<compile_context>
chip_gen: v7x
topology: tpu7x:2x2x1
jax: 0.10.0
libtpu: 0.0.40
codegen_flags: <defaults>
</compile_context>

<pallas_src>
import functools

import jax
import jax.numpy as jnp
from jax.experimental import pallas as pl
from jax.experimental.pallas import tpu as pltpu

EPS = 1e-5


# ------------------------------ Pallas kernel ------------------------------ #

def _bn2d_relu(y, fold, fold_t, gamma_t, beta_t, n_samples, eps):
    """Training-mode BatchNorm2d + ReLU on a (rows, groups*C) activation.

    Per-channel stats pool over all rows AND over the `groups` column groups.
    fold (G*C, C) / fold_t (C, G*C) are 0/1 matrices, so the group fold and the
    tile-back are plain MXU matmuls with M = rows (no lane games).
    One-pass stats: var = E[x^2] - mean^2.
    """
    t = jnp.dot(jnp.dot(y, fold, preferred_element_type=jnp.float32),
                fold_t, preferred_element_type=jnp.float32)
    tt = jnp.dot(jnp.dot(y * y, fold, preferred_element_type=jnp.float32),
                 fold_t, preferred_element_type=jnp.float32)
    mean_t = jnp.sum(t, axis=0, keepdims=True) / n_samples
    var_t = jnp.sum(tt, axis=0, keepdims=True) / n_samples - mean_t * mean_t
    scale_t = gamma_t * jax.lax.rsqrt(var_t + eps)
    shift_t = beta_t - mean_t * scale_t
    return jnp.maximum(y * scale_t + shift_t, 0.0)


def _generator_kernel(
        x_ref,
        w0_ref, b0_ref, g0_ref, bt0_ref,                       # Linear + BN1d
        w1_ref, b1_ref, g1_ref, bt1_ref, f1_ref, f1t_ref,       # block1
        w2_ref, b2_ref, g2_ref, bt2_ref, f2_ref, f2t_ref,       # block2
        w3_ref, b3_ref,                                         # block3
        o_ref,
        act_ref,                                                # VMEM scratch
        *, batch, c1, eps):
    B = batch
    R = 16 * B                       # rows = (i1, j1, b): pixels of the 4x4 map

    # ---- preprocess: Linear + BN1d + ReLU at (B, 16*C1), cols = (i1,j1,c) ----
    h = jnp.dot(x_ref[...], w0_ref[...], preferred_element_type=jnp.float32)
    h = h + b0_ref[...]
    mean0 = jnp.sum(h, axis=0, keepdims=True) / float(B)
    var0 = jnp.sum(h * h, axis=0, keepdims=True) / float(B) - mean0 * mean0
    scale0 = g0_ref[...] * jax.lax.rsqrt(var0 + eps)
    shift0 = bt0_ref[...] - mean0 * scale0
    h = jnp.maximum(h * scale0 + shift0, 0.0)

    # ---- restack (B, 16*C1) -> (16*B, C1) in VMEM: rows ordered (i1, j1, b) --
    # 16 vreg-aligned (B, C1) block copies (C1 = 128, B = 8 -> exact (8,128) tiles).
    for pix in range(16):
        act_ref[pix * B:(pix + 1) * B, :] = h[:, pix * c1:(pix + 1) * c1]
    a1 = act_ref[...]

    # ---- block1: ConvT(4hd->2hd, k2 s2) as per-pixel matmul + BN2d + ReLU ----
    # y1 cols = (kh1, kw1, c2); BN pools over rows and the 4 (kh1,kw1) groups.
    y1 = jnp.dot(a1, w1_ref[...], preferred_element_type=jnp.float32) + b1_ref[...]
    y1 = _bn2d_relu(y1, f1_ref[...], f1t_ref[...], g1_ref[...], bt1_ref[...],
                    float(R * 4), eps)

    # ---- block2: ConvT(2hd->hd) with block-diagonal weight + BN2d + ReLU -----
    # y2 cols = (kh1, kw1, kh2, kw2, c3); BN pools over rows and 16 groups.
    y2 = jnp.dot(y1, w2_ref[...], preferred_element_type=jnp.float32) + b2_ref[...]
    y2 = _bn2d_relu(y2, f2_ref[...], f2t_ref[...], g2_ref[...], bt2_ref[...],
                    float(R * 16), eps)

    # ---- block3: ConvT(hd->3) block-diagonal, columns pre-permuted to --------
    # (c, dh, dw) with dh = 4*kh1+2*kh2+kh3, dw = 4*kw1+2*kw2+kw3; then tanh.
    y3 = jnp.dot(y2, w3_ref[...], preferred_element_type=jnp.float32) + b3_ref[...]
    o_ref[...] = jnp.tanh(y3)


# ------------------------------- parameters -------------------------------- #

def init_params(key, input_dim, hidden_dim, init_var=0.02):
    """Parameters in PyTorch-equivalent layout (Linear weight stored as (in, out))."""
    ks = jax.random.split(key, 14)
    hd = hidden_dim
    C1, C2, C3 = 4 * hd, 2 * hd, hd
    F0 = 4 * 4 * C1
    n = lambda k, shape: init_var * jax.random.normal(k, shape, jnp.float32)
    return {
        # preprocess: Linear(input_dim, 4*4*4*hd) + BN1d   (features = (c, i, j))
        "w0": n(ks[0], (input_dim, F0)), "b0": n(ks[1], (F0,)),
        "g0": 1.0 + n(ks[2], (F0,)), "bt0": n(ks[3], (F0,)),
        # block1: ConvTranspose2d(4hd, 2hd, 2, stride=2) + BN2d
        "w1": n(ks[4], (C1, C2, 2, 2)), "b1": n(ks[5], (C2,)),
        "g1": 1.0 + n(ks[6], (C2,)), "bt1": n(ks[7], (C2,)),
        # block2: ConvTranspose2d(2hd, hd, 2, stride=2) + BN2d
        "w2": n(ks[8], (C2, C3, 2, 2)), "b2": n(ks[9], (C3,)),
        "g2": 1.0 + n(ks[10], (C3,)), "bt2": n(ks[11], (C3,)),
        # block3: ConvTranspose2d(hd, 3, 2, stride=2)
        "w3": n(ks[12], (C3, 3, 2, 2)), "b3": n(ks[13], (3,)),
    }


def prepare_params(p, hidden_dim):
    """One-time repack into kernel-ready (block-diagonal) matmul form."""
    hd = hidden_dim
    C1, C2, C3 = 4 * hd, 2 * hd, hd
    row = lambda v: v.reshape(1, -1)

    # Permute Linear/BN1d features from PyTorch order (c, i, j) to (i, j, c)
    # so the in-kernel restack is 16 contiguous (B, C1) block copies.
    def perm_features(v):
        lead = v.shape[:-1]
        return v.reshape(lead + (C1, 16)).swapaxes(-1, -2).reshape(lead + (16 * C1,))

    def convt_mat(w):   # (Cin, Cout, 2, 2) -> (Cin, 4*Cout), cols = (kh, kw, c)
        cin, cout = w.shape[0], w.shape[1]
        return w.transpose(0, 2, 3, 1).reshape(cin, 4 * cout)

    w1m = convt_mat(p["w1"])                                  # (C1, 4*C2)
    w2m = convt_mat(p["w2"])                                  # (C2, 4*C3)
    w3m = convt_mat(p["w3"])                                  # (C3, 12)

    # Block-diagonal replication so the activation never needs restacking:
    w2bd = jnp.kron(jnp.eye(4, dtype=w2m.dtype), w2m)         # (4*C2, 16*C3)
    w3bd = jnp.kron(jnp.eye(16, dtype=w3m.dtype), w3m)        # (16*C3, 192)
    # Permute w3bd columns (kh1,kw1,kh2,kw2,kh3,kw3,c) -> (c, dh, dw):
    w3bd = (w3bd.reshape(16 * C3, 2, 2, 2, 2, 2, 2, 3)
                 .transpose(0, 7, 1, 3, 5, 2, 4, 6)
                 .reshape(16 * C3, 3 * 8 * 8))

    # 0/1 fold matrices for pooled BN2d stats (group fold + tile-back).
    F1 = jnp.tile(jnp.eye(C2, dtype=jnp.float32), (4, 1))     # (4*C2, C2)
    F2 = jnp.tile(jnp.eye(C3, dtype=jnp.float32), (16, 1))    # (16*C3, C3)

    return {
        "w0": perm_features(p["w0"]), "b0": row(perm_features(p["b0"])),
        "g0": row(perm_features(p["g0"])), "bt0": row(perm_features(p["bt0"])),
        "w1": w1m, "b1": row(jnp.tile(p["b1"], 4)),
        "g1": row(jnp.tile(p["g1"], 4)), "bt1": row(jnp.tile(p["bt1"], 4)),
        "f1": F1, "f1t": F1.T,
        "w2": w2bd, "b2": row(jnp.tile(p["b2"], 16)),
        "g2": row(jnp.tile(p["g2"], 16)), "bt2": row(jnp.tile(p["bt2"], 16)),
        "f2": F2, "f2t": F2.T,
        "w3": w3bd, "b3": row(jnp.repeat(p["b3"], 64)),
    }


# --------------------------------- forward --------------------------------- #

@functools.partial(jax.jit, static_argnames=("hidden_dim",))
def generator_forward(prep, x, *, hidden_dim):
    B = x.shape[0]
    C1 = 4 * hidden_dim

    y3 = pl.pallas_call(
        functools.partial(_generator_kernel, batch=B, c1=C1, eps=EPS),
        out_shape=jax.ShapeDtypeStruct((16 * B, 3 * 8 * 8), jnp.float32),
        scratch_shapes=[pltpu.VMEM((16 * B, C1), jnp.float32)],
        # Grid-less call: every operand is a whole-array VMEM block; all
        # intermediates stay on-chip; only the final (16*B, 192) hits HBM.
    )(x,
      prep["w0"], prep["b0"], prep["g0"], prep["bt0"],
      prep["w1"], prep["b1"], prep["g1"], prep["bt1"], prep["f1"], prep["f1t"],
      prep["w2"], prep["b2"], prep["g2"], prep["bt2"], prep["f2"], prep["f2t"],
      prep["w3"], prep["b3"])

    # y3 rows = (i1, j1, b), cols = (c, dh, dw); NCHW pixel:
    #   h = 8*i1 + dh, w = 8*j1 + dw.  Remaining rearrangement is a cheap 6-D
    # transpose of contiguous 8-element chunks on 16*B*192 floats.
    out = (y3.reshape(4, 4, B, 3, 8, 8)
              .transpose(2, 3, 0, 4, 1, 5)
              .reshape(B, 3 * 32 * 32))
    return out


# --------------------------- pure-JAX reference ---------------------------- #

def _bn_train_ref(y, gamma, beta, axes):
    mean = jnp.mean(y, axis=axes, keepdims=True)
    var = jnp.mean((y - mean) ** 2, axis=axes, keepdims=True)   # biased var
    return (y - mean) * jax.lax.rsqrt(var + EPS) * gamma + beta


def generator_reference(p, x, hidden_dim):
    """Straightforward NCHW reference matching the PyTorch module."""
    B = x.shape[0]
    hd = hidden_dim
    hp = jax.lax.Precision.HIGHEST

    h = jnp.dot(x, p["w0"], precision=hp) + p["b0"]
    h = jnp.maximum(_bn_train_ref(h, p["g0"], p["bt0"], axes=(0,)), 0.0)
    h = h.reshape(B, 4 * hd, 4, 4)

    def convt(x4, w, b):     # ConvTranspose2d(kernel=2, stride=2)
        Bc, _, H, W = x4.shape
        co = w.shape[1]
        y = jnp.einsum("bihw,iokl->bohkwl", x4, w, precision=hp)
        return y.reshape(Bc, co, 2 * H, 2 * W) + b[None, :, None, None]

    h = convt(h, p["w1"], p["b1"])
    h = jnp.maximum(_bn_train_ref(h, p["g1"][None, :, None, None],
                                  p["bt1"][None, :, None, None], (0, 2, 3)), 0.0)
    h = convt(h, p["w2"], p["b2"])
    h = jnp.maximum(_bn_train_ref(h, p["g2"][None, :, None, None],
                                  p["bt2"][None, :, None, None], (0, 2, 3)), 0.0)
    h = convt(h, p["w3"], p["b3"])
    return jnp.tanh(h).reshape(B, 3 * 32 * 32)


# ----------------------------------- main ----------------------------------- #

if __name__ == "__main__":
    INPUT_DIM = 32      # small shapes consistent with the module structure
    HIDDEN_DIM = 32
    BATCH = 8           # multiple of 8 keeps every in-kernel block (8,128) aligned

    key = jax.random.PRNGKey(0)
    pkey, xkey = jax.random.split(key)
    params = init_params(pkey, INPUT_DIM, HIDDEN_DIM)
    prep = prepare_params(params, HIDDEN_DIM)      # one-time weight repack
    x = jax.random.normal(xkey, (BATCH, INPUT_DIM), jnp.float32)

    out = generator_forward(prep, x, hidden_dim=HIDDEN_DIM)
    out = jax.block_until_ready(out)

    assert out.shape == (BATCH, 3 * 32 * 32), out.shape
    assert out.dtype == jnp.float32
    assert bool(jnp.all(jnp.isfinite(out)))
    assert bool(jnp.all(jnp.abs(out) <= 1.0))      # tanh range

    # End-to-end check against a plain-JAX NCHW reference (guards the
    # depth-to-space / block-diagonal / column-permutation bookkeeping).
    ref = jax.block_until_ready(generator_reference(params, x, HIDDEN_DIM))
    max_err = float(jnp.max(jnp.abs(out - ref)))
    assert max_err < 5e-3, f"mismatch vs reference: max |diff| = {max_err}"

    print("KERNEL_OK")
</pallas_src>

<mosaic_0001>
module attributes {stable_mosaic.version = 11 : i64} {
  func.func @_generator_kernel(%arg0: memref<8x32xf32, #tpu.memory_space<vmem>>, %arg1: memref<32x2048xf32, #tpu.memory_space<vmem>>, %arg2: memref<1x2048xf32, #tpu.memory_space<vmem>>, %arg3: memref<1x2048xf32, #tpu.memory_space<vmem>>, %arg4: memref<1x2048xf32, #tpu.memory_space<vmem>>, %arg5: memref<128x256xf32, #tpu.memory_space<vmem>>, %arg6: memref<1x256xf32, #tpu.memory_space<vmem>>, %arg7: memref<1x256xf32, #tpu.memory_space<vmem>>, %arg8: memref<1x256xf32, #tpu.memory_space<vmem>>, %arg9: memref<256x64xf32, #tpu.memory_space<vmem>>, %arg10: memref<64x256xf32, #tpu.memory_space<vmem>>, %arg11: memref<256x512xf32, #tpu.memory_space<vmem>>, %arg12: memref<1x512xf32, #tpu.memory_space<vmem>>, %arg13: memref<1x512xf32, #tpu.memory_space<vmem>>, %arg14: memref<1x512xf32, #tpu.memory_space<vmem>>, %arg15: memref<512x32xf32, #tpu.memory_space<vmem>>, %arg16: memref<32x512xf32, #tpu.memory_space<vmem>>, %arg17: memref<512x192xf32, #tpu.memory_space<vmem>>, %arg18: memref<1x192xf32, #tpu.memory_space<vmem>>, %arg19: memref<128x192xf32, #tpu.memory_space<vmem>>, %arg20: memref<128x128xf32, #tpu.memory_space<vmem>>) attributes {dimension_semantics = [], scalar_prefetch = 0 : i64, scratch_operands = 1 : i64, tpu.core_type = #tpu.core_type<tc>} {
    %c0 = arith.constant 0 : index
    %c0_0 = arith.constant 0 : index
    %0 = vector.load %arg0[%c0, %c0_0] : memref<8x32xf32, #tpu.memory_space<vmem>>, vector<8x32xf32>
    %c0_1 = arith.constant 0 : index
    %c0_2 = arith.constant 0 : index
    %1 = vector.load %arg1[%c0_1, %c0_2] : memref<32x2048xf32, #tpu.memory_space<vmem>>, vector<32x2048xf32>
    %cst = arith.constant dense<0.000000e+00> : vector<8x2048xf32>
    %2 = tpu.matmul %0, %1, %cst {dimension_numbers = #tpu.dot_dimension_numbers<[1], [0], [0], [1], [0, 0, 1, 1], [], []>} : vector<8x32xf32>, vector<32x2048xf32>, vector<8x2048xf32> -> vector<8x2048xf32>
    %c0_3 = arith.constant 0 : index
    %c0_4 = arith.constant 0 : index
    %3 = vector.load %arg2[%c0_3, %c0_4] : memref<1x2048xf32, #tpu.memory_space<vmem>>, vector<1x2048xf32>
    %4 = vector.broadcast %3 : vector<1x2048xf32> to vector<8x2048xf32>
    %5 = arith.addf %2, %4 : vector<8x2048xf32>
    %cst_5 = arith.constant dense<0.000000e+00> : vector<2048xf32>
    %6 = vector.multi_reduction <add>, %5, %cst_5 [0] : vector<8x2048xf32> to vector<2048xf32>
    %7 = vector.shape_cast %6 : vector<2048xf32> to vector<1x2048xf32>
    %cst_6 = arith.constant 8.000000e+00 : f32
    %8 = vector.broadcast %cst_6 : f32 to vector<1x2048xf32>
    %9 = arith.divf %7, %8 : vector<1x2048xf32>
    %10 = arith.mulf %5, %5 : vector<8x2048xf32>
    %cst_7 = arith.constant dense<0.000000e+00> : vector<2048xf32>
    %11 = vector.multi_reduction <add>, %10, %cst_7 [0] : vector<8x2048xf32> to vector<2048xf32>
    %12 = vector.shape_cast %11 : vector<2048xf32> to vector<1x2048xf32>
    %cst_8 = arith.constant 8.000000e+00 : f32
    %13 = vector.broadcast %cst_8 : f32 to vector<1x2048xf32>
    %14 = arith.divf %12, %13 : vector<1x2048xf32>
    %15 = arith.mulf %9, %9 : vector<1x2048xf32>
    %16 = arith.subf %14, %15 : vector<1x2048xf32>
    %c0_9 = arith.constant 0 : index
    %c0_10 = arith.constant 0 : index
    %17 = vector.load %arg3[%c0_9, %c0_10] : memref<1x2048xf32, #tpu.memory_space<vmem>>, vector<1x2048xf32>
    %cst_11 = arith.constant 9.99999974E-6 : f32
    %18 = vector.broadcast %cst_11 : f32 to vector<1x2048xf32>
    %19 = arith.addf %16, %18 : vector<1x2048xf32>
    %20 = math.rsqrt %19 : vector<1x2048xf32>
    %21 = arith.mulf %17, %20 : vector<1x2048xf32>
    %c0_12 = arith.constant 0 : index
    %c0_13 = arith.constant 0 : index
    %22 = vector.load %arg4[%c0_12, %c0_13] : memref<1x2048xf32, #tpu.memory_space<vmem>>, vector<1x2048xf32>
    %23 = arith.mulf %9, %21 : vector<1x2048xf32>
    %24 = arith.subf %22, %23 : vector<1x2048xf32>
    %25 = vector.broadcast %21 : vector<1x2048xf32> to vector<8x2048xf32>
    %26 = arith.mulf %5, %25 : vector<8x2048xf32>
    %27 = vector.broadcast %24 : vector<1x2048xf32> to vector<8x2048xf32>
    %28 = arith.addf %26, %27 : vector<8x2048xf32>
    %cst_14 = arith.constant 0.000000e+00 : f32
    %29 = vector.broadcast %cst_14 : f32 to vector<8x2048xf32>
    %30 = arith.maximumf %28, %29 : vector<8x2048xf32>
    %31 = vector.extract_strided_slice %30 {offsets = [0, 0], sizes = [8, 128], strides = [1, 1]} : vector<8x2048xf32> to vector<8x128xf32>
    %c0_15 = arith.constant 0 : index
    %c0_16 = arith.constant 0 : index
    %32 = vector.load %arg20[%c0_15, %c0_16] : memref<128x128xf32, #tpu.memory_space<vmem>>, vector<8x128xf32>
    tpu.vector_store %arg20[%c0_15, %c0_16], %31 {strides = array<i32>} : memref<128x128xf32, #tpu.memory_space<vmem>>, vector<8x128xf32>,
    %33 = vector.extract_strided_slice %30 {offsets = [0, 128], sizes = [8, 128], strides = [1, 1]} : vector<8x2048xf32> to vector<8x128xf32>
    %c8 = arith.constant 8 : index
    %c0_17 = arith.constant 0 : index
    %34 = vector.load %arg20[%c8, %c0_17] : memref<128x128xf32, #tpu.memory_space<vmem>>, vector<8x128xf32>
    tpu.vector_store %arg20[%c8, %c0_17], %33 {strides = array<i32>} : memref<128x128xf32, #tpu.memory_space<vmem>>, vector<8x128xf32>,
    %35 = vector.extract_strided_slice %30 {offsets = [0, 256], sizes = [8, 128], strides = [1, 1]} : vector<8x2048xf32> to vector<8x128xf32>
    %c16 = arith.constant 16 : index
    %c0_18 = arith.constant 0 : index
    %36 = vector.load %arg20[%c16, %c0_18] : memref<128x128xf32, #tpu.memory_space<vmem>>, vector<8x128xf32>
    tpu.vector_store %arg20[%c16, %c0_18], %35 {strides = array<i32>} : memref<128x128xf32, #tpu.memory_space<vmem>>, vector<8x128xf32>,
    %37 = vector.extract_strided_slice %30 {offsets = [0, 384], sizes = [8, 128], strides = [1, 1]} : vector<8x2048xf32> to vector<8x128xf32>
    %c24 = arith.constant 24 : index
    %c0_19 = arith.constant 0 : index
    %38 = vector.load %arg20[%c24, %c0_19] : memref<128x128xf32, #tpu.memory_space<vmem>>, vector<8x128xf32>
    tpu.vector_store %arg20[%c24, %c0_19], %37 {strides = array<i32>} : memref<128x128xf32, #tpu.memory_space<vmem>>, vector<8x128xf32>,
    %39 = vector.extract_strided_slice %30 {offsets = [0, 512], sizes = [8, 128], strides = [1, 1]} : vector<8x2048xf32> to vector<8x128xf32>
    %c32 = arith.constant 32 : index
    %c0_20 = arith.constant 0 : index
    %40 = vector.load %arg20[%c32, %c0_20] : memref<128x128xf32, #tpu.memory_space<vmem>>, vector<8x128xf32>
    tpu.vector_store %arg20[%c32, %c0_20], %39 {strides = array<i32>} : memref<128x128xf32, #tpu.memory_space<vmem>>, vector<8x128xf32>,
    %41 = vector.extract_strided_slice %30 {offsets = [0, 640], sizes = [8, 128], strides = [1, 1]} : vector<8x2048xf32> to vector<8x128xf32>
    %c40 = arith.constant 40 : index
    %c0_21 = arith.constant 0 : index
    %42 = vector.load %arg20[%c40, %c0_21] : memref<128x128xf32, #tpu.memory_space<vmem>>, vector<8x128xf32>
    tpu.vector_store %arg20[%c40, %c0_21], %41 {strides = array<i32>} : memref<128x128xf32, #tpu.memory_space<vmem>>, vector<8x128xf32>,
    %43 = vector.extract_strided_slice %30 {offsets = [0, 768], sizes = [8, 128], strides = [1, 1]} : vector<8x2048xf32> to vector<8x128xf32>
    %c48 = arith.constant 48 : index
    %c0_22 = arith.constant 0 : index
    %44 = vector.load %arg20[%c48, %c0_22] : memref<128x128xf32, #tpu.memory_space<vmem>>, vector<8x128xf32>
    tpu.vector_store %arg20[%c48, %c0_22], %43 {strides = array<i32>} : memref<128x128xf32, #tpu.memory_space<vmem>>, vector<8x128xf32>,
    %45 = vector.extract_strided_slice %30 {offsets = [0, 896], sizes = [8, 128], strides = [1, 1]} : vector<8x2048xf32> to vector<8x128xf32>
    %c56 = arith.constant 56 : index
    %c0_23 = arith.constant 0 : index
    %46 = vector.load %arg20[%c56, %c0_23] : memref<128x128xf32, #tpu.memory_space<vmem>>, vector<8x128xf32>
    tpu.vector_store %arg20[%c56, %c0_23], %45 {strides = array<i32>} : memref<128x128xf32, #tpu.memory_space<vmem>>, vector<8x128xf32>,
    %47 = vector.extract_strided_slice %30 {offsets = [0, 1024], sizes = [8, 128], strides = [1, 1]} : vector<8x2048xf32> to vector<8x128xf32>
    %c64 = arith.constant 64 : index
    %c0_24 = arith.constant 0 : index
    %48 = vector.load %arg20[%c64, %c0_24] : memref<128x128xf32, #tpu.memory_space<vmem>>, vector<8x128xf32>
    tpu.vector_store %arg20[%c64, %c0_24], %47 {strides = array<i32>} : memref<128x128xf32, #tpu.memory_space<vmem>>, vector<8x128xf32>,
    %49 = vector.extract_strided_slice %30 {offsets = [0, 1152], sizes = [8, 128], strides = [1, 1]} : vector<8x2048xf32> to vector<8x128xf32>
    %c72 = arith.constant 72 : index
    %c0_25 = arith.constant 0 : index
    %50 = vector.load %arg20[%c72, %c0_25] : memref<128x128xf32, #tpu.memory_space<vmem>>, vector<8x128xf32>
    tpu.vector_store %arg20[%c72, %c0_25], %49 {strides = array<i32>} : memref<128x128xf32, #tpu.memory_space<vmem>>, vector<8x128xf32>,
    %51 = vector.extract_strided_slice %30 {offsets = [0, 1280], sizes = [8, 128], strides = [1, 1]} : vector<8x2048xf32> to vector<8x128xf32>
    %c80 = arith.constant 80 : index
    %c0_26 = arith.constant 0 : index
    %52 = vector.load %arg20[%c80, %c0_26] : memref<128x128xf32, #tpu.memory_space<vmem>>, vector<8x128xf32>
    tpu.vector_store %arg20[%c80, %c0_26], %51 {strides = array<i32>} : memref<128x128xf32, #tpu.memory_space<vmem>>, vector<8x128xf32>,
    %53 = vector.extract_strided_slice %30 {offsets = [0, 1408], sizes = [8, 128], strides = [1, 1]} : vector<8x2048xf32> to vector<8x128xf32>
    %c88 = arith.constant 88 : index
    %c0_27 = arith.constant 0 : index
    %54 = vector.load %arg20[%c88, %c0_27] : memref<128x128xf32, #tpu.memory_space<vmem>>, vector<8x128xf32>
    tpu.vector_store %arg20[%c88, %c0_27], %53 {strides = array<i32>} : memref<128x128xf32, #tpu.memory_space<vmem>>, vector<8x128xf32>,
    %55 = vector.extract_strided_slice %30 {offsets = [0, 1536], sizes = [8, 128], strides = [1, 1]} : vector<8x2048xf32> to vector<8x128xf32>
    %c96 = arith.constant 96 : index
    %c0_28 = arith.constant 0 : index
    %56 = vector.load %arg20[%c96, %c0_28] : memref<128x128xf32, #tpu.memory_space<vmem>>, vector<8x128xf32>
    tpu.vector_store %arg20[%c96, %c0_28], %55 {strides = array<i32>} : memref<128x128xf32, #tpu.memory_space<vmem>>, vector<8x128xf32>,
    %57 = vector.extract_strided_slice %30 {offsets = [0, 1664], sizes = [8, 128], strides = [1, 1]} : vector<8x2048xf32> to vector<8x128xf32>
    %c104 = arith.constant 104 : index
    %c0_29 = arith.constant 0 : index
    %58 = vector.load %arg20[%c104, %c0_29] : memref<128x128xf32, #tpu.memory_space<vmem>>, vector<8x128xf32>
    tpu.vector_store %arg20[%c104, %c0_29], %57 {strides = array<i32>} : memref<128x128xf32, #tpu.memory_space<vmem>>, vector<8x128xf32>,
    %59 = vector.extract_strided_slice %30 {offsets = [0, 1792], sizes = [8, 128], strides = [1, 1]} : vector<8x2048xf32> to vector<8x128xf32>
    %c112 = arith.constant 112 : index
    %c0_30 = arith.constant 0 : index
    %60 = vector.load %arg20[%c112, %c0_30] : memref<128x128xf32, #tpu.memory_space<vmem>>, vector<8x128xf32>
    tpu.vector_store %arg20[%c112, %c0_30], %59 {strides = array<i32>} : memref<128x128xf32, #tpu.memory_space<vmem>>, vector<8x128xf32>,
    %61 = vector.extract_strided_slice %30 {offsets = [0, 1920], sizes = [8, 128], strides = [1, 1]} : vector<8x2048xf32> to vector<8x128xf32>
    %c120 = arith.constant 120 : index
    %c0_31 = arith.constant 0 : index
    %62 = vector.load %arg20[%c120, %c0_31] : memref<128x128xf32, #tpu.memory_space<vmem>>, vector<8x128xf32>
    tpu.vector_store %arg20[%c120, %c0_31], %61 {strides = array<i32>} : memref<128x128xf32, #tpu.memory_space<vmem>>, vector<8x128xf32>,
    %c0_32 = arith.constant 0 : index
    %c0_33 = arith.constant 0 : index
    %63 = vector.load %arg20[%c0_32, %c0_33] : memref<128x128xf32, #tpu.memory_space<vmem>>, vector<128x128xf32>
    %c0_34 = arith.constant 0 : index
    %c0_35 = arith.constant 0 : index
    %64 = vector.load %arg5[%c0_34, %c0_35] : memref<128x256xf32, #tpu.memory_space<vmem>>, vector<128x256xf32>
    %cst_36 = arith.constant dense<0.000000e+00> : vector<128x256xf32>
    %65 = tpu.matmul %63, %64, %cst_36 {dimension_numbers = #tpu.dot_dimension_numbers<[1], [0], [0], [1], [0, 0, 1, 1], [], []>} : vector<128x128xf32>, vector<128x256xf32>, vector<128x256xf32> -> vector<128x256xf32>
    %c0_37 = arith.constant 0 : index
    %c0_38 = arith.constant 0 : index
    %66 = vector.load %arg6[%c0_37, %c0_38] : memref<1x256xf32, #tpu.memory_space<vmem>>, vector<1x256xf32>
    %67 = vector.broadcast %66 : vector<1x256xf32> to vector<128x256xf32>
    %68 = arith.addf %65, %67 : vector<128x256xf32>
    %c0_39 = arith.constant 0 : index
    %c0_40 = arith.constant 0 : index
    %69 = vector.load %arg9[%c0_39, %c0_40] : memref<256x64xf32, #tpu.memory_space<vmem>>, vector<256x64xf32>
    %c0_41 = arith.constant 0 : index
    %c0_42 = arith.constant 0 : index
    %70 = vector.load %arg10[%c0_41, %c0_42] : memref<64x256xf32, #tpu.memory_space<vmem>>, vector<64x256xf32>
    %c0_43 = arith.constant 0 : index
    %c0_44 = arith.constant 0 : index
    %71 = vector.load %arg7[%c0_43, %c0_44] : memref<1x256xf32, #tpu.memory_space<vmem>>, vector<1x256xf32>
    %c0_45 = arith.constant 0 : index
    %c0_46 = arith.constant 0 : index
    %72 = vector.load %arg8[%c0_45, %c0_46] : memref<1x256xf32, #tpu.memory_space<vmem>>, vector<1x256xf32>
    %cst_47 = arith.constant dense<0.000000e+00> : vector<128x64xf32>
    %73 = tpu.matmul %68, %69, %cst_47 {dimension_numbers = #tpu.dot_dimension_numbers<[1], [0], [0], [1], [0, 0, 1, 1], [], []>} : vector<128x256xf32>, vector<256x64xf32>, vector<128x64xf32> -> vector<128x64xf32>
    %cst_48 = arith.constant dense<0.000000e+00> : vector<128x256xf32>
    %74 = tpu.matmul %73, %70, %cst_48 {dimension_numbers = #tpu.dot_dimension_numbers<[1], [0], [0], [1], [0, 0, 1, 1], [], []>} : vector<128x64xf32>, vector<64x256xf32>, vector<128x256xf32> -> vector<128x256xf32>
    %75 = arith.mulf %68, %68 : vector<128x256xf32>
    %cst_49 = arith.constant dense<0.000000e+00> : vector<128x64xf32>
    %76 = tpu.matmul %75, %69, %cst_49 {dimension_numbers = #tpu.dot_dimension_numbers<[1], [0], [0], [1], [0, 0, 1, 1], [], []>} : vector<128x256xf32>, vector<256x64xf32>, vector<128x64xf32> -> vector<128x64xf32>
    %cst_50 = arith.constant dense<0.000000e+00> : vector<128x256xf32>
    %77 = tpu.matmul %76, %70, %cst_50 {dimension_numbers = #tpu.dot_dimension_numbers<[1], [0], [0], [1], [0, 0, 1, 1], [], []>} : vector<128x64xf32>, vector<64x256xf32>, vector<128x256xf32> -> vector<128x256xf32>
    %cst_51 = arith.constant dense<0.000000e+00> : vector<256xf32>
    %78 = vector.multi_reduction <add>, %74, %cst_51 [0] : vector<128x256xf32> to vector<256xf32>
    %79 = vector.shape_cast %78 : vector<256xf32> to vector<1x256xf32>
    %cst_52 = arith.constant 5.120000e+02 : f32
    %80 = vector.broadcast %cst_52 : f32 to vector<1x256xf32>
    %81 = arith.divf %79, %80 : vector<1x256xf32>
    %cst_53 = arith.constant dense<0.000000e+00> : vector<256xf32>
    %82 = vector.multi_reduction <add>, %77, %cst_53 [0] : vector<128x256xf32> to vector<256xf32>
    %83 = vector.shape_cast %82 : vector<256xf32> to vector<1x256xf32>
    %cst_54 = arith.constant 5.120000e+02 : f32
    %84 = vector.broadcast %cst_54 : f32 to vector<1x256xf32>
    %85 = arith.divf %83, %84 : vector<1x256xf32>
    %86 = arith.mulf %81, %81 : vector<1x256xf32>
    %87 = arith.subf %85, %86 : vector<1x256xf32>
    %cst_55 = arith.constant 9.99999974E-6 : f32
    %88 = vector.broadcast %cst_55 : f32 to vector<1x256xf32>
    %89 = arith.addf %87, %88 : vector<1x256xf32>
    %90 = math.rsqrt %89 : vector<1x256xf32>
    %91 = arith.mulf %71, %90 : vector<1x256xf32>
    %92 = arith.mulf %81, %91 : vector<1x256xf32>
    %93 = arith.subf %72, %92 : vector<1x256xf32>
    %94 = vector.broadcast %91 : vector<1x256xf32> to vector<128x256xf32>
    %95 = arith.mulf %68, %94 : vector<128x256xf32>
    %96 = vector.broadcast %93 : vector<1x256xf32> to vector<128x256xf32>
    %97 = arith.addf %95, %96 : vector<128x256xf32>
    %cst_56 = arith.constant 0.000000e+00 : f32
    %98 = vector.broadcast %cst_56 : f32 to vector<128x256xf32>
    %99 = arith.maximumf %97, %98 : vector<128x256xf32>
    %c0_57 = arith.constant 0 : index
    %c0_58 = arith.constant 0 : index
    %100 = vector.load %arg11[%c0_57, %c0_58] : memref<256x512xf32, #tpu.memory_space<vmem>>, vector<256x512xf32>
    %cst_59 = arith.constant dense<0.000000e+00> : vector<128x512xf32>
    %101 = tpu.matmul %99, %100, %cst_59 {dimension_numbers = #tpu.dot_dimension_numbers<[1], [0], [0], [1], [0, 0, 1, 1], [], []>} : vector<128x256xf32>, vector<256x512xf32>, vector<128x512xf32> -> vector<128x512xf32>
    %c0_60 = arith.constant 0 : index
    %c0_61 = arith.constant 0 : index
    %102 = vector.load %arg12[%c0_60, %c0_61] : memref<1x512xf32, #tpu.memory_space<vmem>>, vector<1x512xf32>
    %103 = vector.broadcast %102 : vector<1x512xf32> to vector<128x512xf32>
    %104 = arith.addf %101, %103 : vector<128x512xf32>
    %c0_62 = arith.constant 0 : index
    %c0_63 = arith.constant 0 : index
    %105 = vector.load %arg15[%c0_62, %c0_63] : memref<512x32xf32, #tpu.memory_space<vmem>>, vector<512x32xf32>
    %c0_64 = arith.constant 0 : index
    %c0_65 = arith.constant 0 : index
    %106 = vector.load %arg16[%c0_64, %c0_65] : memref<32x512xf32, #tpu.memory_space<vmem>>, vector<32x512xf32>
    %c0_66 = arith.constant 0 : index
    %c0_67 = arith.constant 0 : index
    %107 = vector.load %arg13[%c0_66, %c0_67] : memref<1x512xf32, #tpu.memory_space<vmem>>, vector<1x512xf32>
    %c0_68 = arith.constant 0 : index
    %c0_69 = arith.constant 0 : index
    %108 = vector.load %arg14[%c0_68, %c0_69] : memref<1x512xf32, #tpu.memory_space<vmem>>, vector<1x512xf32>
    %cst_70 = arith.constant dense<0.000000e+00> : vector<128x32xf32>
    %109 = tpu.matmul %104, %105, %cst_70 {dimension_numbers = #tpu.dot_dimension_numbers<[1], [0], [0], [1], [0, 0, 1, 1], [], []>} : vector<128x512xf32>, vector<512x32xf32>, vector<128x32xf32> -> vector<128x32xf32>
    %cst_71 = arith.constant dense<0.000000e+00> : vector<128x512xf32>
    %110 = tpu.matmul %109, %106, %cst_71 {dimension_numbers = #tpu.dot_dimension_numbers<[1], [0], [0], [1], [0, 0, 1, 1], [], []>} : vector<128x32xf32>, vector<32x512xf32>, vector<128x512xf32> -> vector<128x512xf32>
    %111 = arith.mulf %104, %104 : vector<128x512xf32>
    %cst_72 = arith.constant dense<0.000000e+00> : vector<128x32xf32>
    %112 = tpu.matmul %111, %105, %cst_72 {dimension_numbers = #tpu.dot_dimension_numbers<[1], [0], [0], [1], [0, 0, 1, 1], [], []>} : vector<128x512xf32>, vector<512x32xf32>, vector<128x32xf32> -> vector<128x32xf32>
    %cst_73 = arith.constant dense<0.000000e+00> : vector<128x512xf32>
    %113 = tpu.matmul %112, %106, %cst_73 {dimension_numbers = #tpu.dot_dimension_numbers<[1], [0], [0], [1], [0, 0, 1, 1], [], []>} : vector<128x32xf32>, vector<32x512xf32>, vector<128x512xf32> -> vector<128x512xf32>
    %cst_74 = arith.constant dense<0.000000e+00> : vector<512xf32>
    %114 = vector.multi_reduction <add>, %110, %cst_74 [0] : vector<128x512xf32> to vector<512xf32>
    %115 = vector.shape_cast %114 : vector<512xf32> to vector<1x512xf32>
    %cst_75 = arith.constant 2.048000e+03 : f32
    %116 = vector.broadcast %cst_75 : f32 to vector<1x512xf32>
    %117 = arith.divf %115, %116 : vector<1x512xf32>
    %cst_76 = arith.constant dense<0.000000e+00> : vector<512xf32>
    %118 = vector.multi_reduction <add>, %113, %cst_76 [0] : vector<128x512xf32> to vector<512xf32>
    %119 = vector.shape_cast %118 : vector<512xf32> to vector<1x512xf32>
    %cst_77 = arith.constant 2.048000e+03 : f32
    %120 = vector.broadcast %cst_77 : f32 to vector<1x512xf32>
    %121 = arith.divf %119, %120 : vector<1x512xf32>
    %122 = arith.mulf %117, %117 : vector<1x512xf32>
    %123 = arith.subf %121, %122 : vector<1x512xf32>
    %cst_78 = arith.constant 9.99999974E-6 : f32
    %124 = vector.broadcast %cst_78 : f32 to vector<1x512xf32>
    %125 = arith.addf %123, %124 : vector<1x512xf32>
    %126 = math.rsqrt %125 : vector<1x512xf32>
    %127 = arith.mulf %107, %126 : vector<1x512xf32>
    %128 = arith.mulf %117, %127 : vector<1x512xf32>
    %129 = arith.subf %108, %128 : vector<1x512xf32>
    %130 = vector.broadcast %127 : vector<1x512xf32> to vector<128x512xf32>
    %131 = arith.mulf %104, %130 : vector<128x512xf32>
    %132 = vector.broadcast %129 : vector<1x512xf32> to vector<128x512xf32>
    %133 = arith.addf %131, %132 : vector<128x512xf32>
    %cst_79 = arith.constant 0.000000e+00 : f32
    %134 = vector.broadcast %cst_79 : f32 to vector<128x512xf32>
    %135 = arith.maximumf %133, %134 : vector<128x512xf32>
    %c0_80 = arith.constant 0 : index
    %c0_81 = arith.constant 0 : index
    %136 = vector.load %arg17[%c0_80, %c0_81] : memref<512x192xf32, #tpu.memory_space<vmem>>, vector<512x192xf32>
    %cst_82 = arith.constant dense<0.000000e+00> : vector<128x192xf32>
    %137 = tpu.matmul %135, %136, %cst_82 {dimension_numbers = #tpu.dot_dimension_numbers<[1], [0], [0], [1], [0, 0, 1, 1], [], []>} : vector<128x512xf32>, vector<512x192xf32>, vector<128x192xf32> -> vector<128x192xf32>
    %c0_83 = arith.constant 0 : index
    %c0_84 = arith.constant 0 : index
    %138 = vector.load %arg18[%c0_83, %c0_84] : memref<1x192xf32, #tpu.memory_space<vmem>>, vector<1x192xf32>
    %139 = vector.broadcast %138 : vector<1x192xf32> to vector<128x192xf32>
    %140 = arith.addf %137, %139 : vector<128x192xf32>
    %141 = math.tanh %140 : vector<128x192xf32>
    %c0_85 = arith.constant 0 : index
    %c0_86 = arith.constant 0 : index
    %142 = vector.load %arg19[%c0_85, %c0_86] : memref<128x192xf32, #tpu.memory_space<vmem>>, vector<128x192xf32>
    tpu.vector_store %arg19[%c0_85, %c0_86], %141 {strides = array<i32>} : memref<128x192xf32, #tpu.memory_space<vmem>>, vector<128x192xf32>,
    return
  }
}

</mosaic_0001>

<bundles_post_ra>
// kernel: generator_forward.1
= control target key start
LH: loop header
LB: loop body
LE: loop exit
PB: predicated region body
PF: predicated region fallthrough
CT: control target
= control target key end

     0   :  { %s11830_s0 = inlined_call_operand.hbm [shape: f32[8,32], index: 0, kind: input, shape index: {}]   ;;  %s11831_s1 = inlined_call_operand.vmem [shape: f32[32,2048], index: 1, kind: input, shape index: {}]   ;;  %s11832_s2 = inlined_call_operand.hbm [shape: f32[1,2048], index: 2, kind: input, shape index: {}]   ;;  %s11833_s3 = inlined_call_operand.hbm [shape: f32[1,2048], index: 3, kind: input, shape index: {}]   ;;  %s11834_s4 = inlined_call_operand.hbm [shape: f32[1,2048], index: 4, kind: input, shape index: {}]   ;;  %s11835_s5 = inlined_call_operand.hbm [shape: f32[128,256], index: 5, kind: input, shape index: {}]   ;;  %s11836_s6 = inlined_call_operand.hbm [shape: f32[1,256], index: 6, kind: input, shape index: {}]   ;;  %s11837_s7 = inlined_call_operand.hbm [shape: f32[1,256], index: 7, kind: input, shape index: {}]   ;;  %s11838_s8 = inlined_call_operand.hbm [shape: f32[1,256], index: 8, kind: input, shape index: {}]   ;;  %s11839_s9 = inlined_call_operand.vmem [shape: f32[256,64], index: 9, kind: input, shape index: {}]   ;;  %s11840_s10 = inlined_call_operand.hbm [shape: f32[64,256], index: 10, kind: input, shape index: {}]   ;;  %s11841_s11 = inlined_call_operand.vmem [shape: f32[256,512], index: 11, kind: input, shape index: {}]   ;;  %s11842_s12 = inlined_call_operand.hbm [shape: f32[1,512], index: 12, kind: input, shape index: {}]   ;;  %s11843_s13 = inlined_call_operand.hbm [shape: f32[1,512], index: 13, kind: input, shape index: {}]   ;;  %s11844_s14 = inlined_call_operand.hbm [shape: f32[1,512], index: 14, kind: input, shape index: {}]   ;;  %s11845_s15 = inlined_call_operand.vmem [shape: f32[512,32], index: 15, kind: input, shape index: {}]   ;;  %s11846_s16 = inlined_call_operand.hbm [shape: f32[32,512], index: 16, kind: input, shape index: {}]   ;;  %s11847_s17 = inlined_call_operand.vmem [shape: f32[512,192], index: 17, kind: input, shape index: {}]   ;;  %s11848_s18 = inlined_call_operand.hbm [shape: f32[1,192], index: 18, kind: input, shape index: {}]   ;;  %s11849_s19 = inlined_call_operand.vmem [shape: f32[128,192], index: 19, kind: output, shape index: {}]  }
   0x1   :  { %11998 = sst [smem:[#allocation98_spill]] %s11830_s0 }
   0x2   :  { %11999 = sst [smem:[#allocation99_spill]] %s11831_s1 }
   0x3   :  { %12000 = sst [smem:[#allocation100_spill]] %s11832_s2 }
   0x4   :  { %12001 = sst [smem:[#allocation101_spill]] %s11833_s3 }
   0x5   :  { %24 = vsyncpa [#allocation4], 0 }
   0x6   :  { %25 = vsyncpa [#allocation6], 0 }
   0x7   :  { %26 = vsyncpa [#allocation9], 0 }
   0x8   :  { %27 = vsyncpa [#allocation12], 0 }
   0x9   :  { %28 = vsyncpa [#allocation15], 0 }
   0xa   :  { %29 = vsyncpa [#allocation18], 0 }
   0xb   :  { %30 = vsyncpa [#allocation21], 0 }
   0xc   :  { %31 = vsyncpa [#allocation24], 0  ;;  %s7878_s0 = smov [#allocation5]   ;;  %s7879_s20 = smov [#allocation8]  }
   0xd   :  { %s50_s30 = sshll.u32 %s7878_s0, 4  ;;  %s70_s21 = sshll.u32 %s7879_s20, 4  ;;  %s51_s30 = int_to_ptr.vmem [resolvable:$true] %s50_s30  ;;  %s71_s21 = int_to_ptr.vmem [resolvable:$true] %s70_s21 }
   0xe   :  { %s12002_s2 = sld [smem:[#allocation100_spill]] }
  0x14   :  { %s7554_s23 = scalar_lea.hbm %s12002_s2, 256 }
  0x15   :  { %p7555_p0 = scmp.ne.s32.totalorder %s12002_s2, %s7554_s23  ;;  %p7558_p1 = scmp.lt.u32.totalorder %s7554_s23, %s12002_s2 }
  0x17   :  { %p7560_p2 = pnand %p7558_p1, %p7555_p0 }
  0x19   :  { %7563 = shalt.err (!%p7560_p2)
}
  0x1a   :  { %s7564_s27 = scalar_lea.vmem %s51_s30, 256  ;;  %p7569_p4 = scmp.lt.s32.totalorder %s51_s30, %s51_s30 }
  0x1b   :  { %p7565_p3 = scmp.ne.s32.totalorder %s51_s30, %s7564_s27  ;;  %p7570_p5 = scmp.lt.s32.totalorder %s7564_s27, %s7564_s27 }
  0x1d   :  { %p7571_p6 = por %p7570_p5, %p7569_p4 }
  0x1f   :  { %p7572_p7 = pnand %p7571_p6, %p7565_p3 }
  0x21   :  { %7575 = shalt.err (!%p7572_p7)
}
  0x22   :  { %53 = dma.hbm_to_vmem [thread:$0]  %s12002_s2, 256, %s51_s30, [#allocation6]  }
  0x23   :  { %s7576_s1 = scalar_lea.hbm %s11834_s4, 256 }
  0x24   :  { %p7577_p8 = scmp.ne.s32.totalorder %s11834_s4, %s7576_s1  ;;  %p7580_p9 = scmp.lt.u32.totalorder %s7576_s1, %s11834_s4 }
  0x26   :  { %p7582_p10 = pnand %p7580_p9, %p7577_p8 }
  0x28   :  { %7585 = shalt.err (!%p7582_p10)
}
  0x29   :  { %s7586_s3 = scalar_lea.vmem %s71_s21, 256  ;;  %p7591_p12 = scmp.lt.s32.totalorder %s71_s21, %s71_s21 }
  0x2a   :  { %p7587_p11 = scmp.ne.s32.totalorder %s71_s21, %s7586_s3  ;;  %p7592_p13 = scmp.lt.s32.totalorder %s7586_s3, %s7586_s3 }
  0x2c   :  { %p7593_p0 = por %p7592_p13, %p7591_p12 }
  0x2e   :  { %p7594_p1 = pnand %p7593_p0, %p7587_p11 }
  0x30   :  { %7597 = shalt.err (!%p7594_p1)
}
  0x31   :  { %73 = dma.hbm_to_vmem [thread:$0]  %s11834_s4, 256, %s71_s21, [#allocation9]  }
  0x32   :  { %s7880_s26 = smov [#allocation11]   ;;  %s7881_s28 = smov [#allocation14]  }
  0x33   :  { %s92_s27 = sshll.u32 %s7880_s26, 4  ;;  %s112_s29 = sshll.u32 %s7881_s28, 4  ;;  %s93_s27 = int_to_ptr.vmem [resolvable:$true] %s92_s27  ;;  %s113_s29 = int_to_ptr.vmem [resolvable:$true] %s112_s29 }
  0x34   :  { %s7598_s1 = scalar_lea.hbm %s11836_s6, 32 }
  0x35   :  { %p7599_p2 = scmp.ne.s32.totalorder %s11836_s6, %s7598_s1  ;;  %p7602_p3 = scmp.lt.u32.totalorder %s7598_s1, %s11836_s6 }
  0x37   :  { %p7604_p4 = pnand %p7602_p3, %p7599_p2 }
  0x39   :  { %7607 = shalt.err (!%p7604_p4)
}
  0x3a   :  { %s7608_s4 = scalar_lea.vmem %s93_s27, 32  ;;  %p7613_p6 = scmp.lt.s32.totalorder %s93_s27, %s93_s27 }
  0x3b   :  { %p7609_p5 = scmp.ne.s32.totalorder %s93_s27, %s7608_s4  ;;  %p7614_p7 = scmp.lt.s32.totalorder %s7608_s4, %s7608_s4 }
  0x3d   :  { %p7615_p8 = por %p7614_p7, %p7613_p6 }
  0x3f   :  { %p7616_p9 = pnand %p7615_p8, %p7609_p5 }
  0x41   :  { %7619 = shalt.err (!%p7616_p9)
}
  0x42   :  { %95 = dma.hbm_to_vmem [thread:$0]  %s11836_s6, 32, %s93_s27, [#allocation12]  }
  0x43   :  { %s7620_s26 = scalar_lea.hbm %s11838_s8, 32 }
  0x44   :  { %p7621_p10 = scmp.ne.s32.totalorder %s11838_s8, %s7620_s26  ;;  %p7624_p11 = scmp.lt.u32.totalorder %s7620_s26, %s11838_s8 }
  0x46   :  { %p7626_p12 = pnand %p7624_p11, %p7621_p10 }
  0x48   :  { %7629 = shalt.err (!%p7626_p12)
}
  0x49   :  { %s7630_s22 = scalar_lea.vmem %s113_s29, 32  ;;  %p7635_p0 = scmp.lt.s32.totalorder %s113_s29, %s113_s29 }
  0x4a   :  { %p7631_p13 = scmp.ne.s32.totalorder %s113_s29, %s7630_s22  ;;  %p7636_p1 = scmp.lt.s32.totalorder %s7630_s22, %s7630_s22 }
  0x4c   :  { %p7637_p2 = por %p7636_p1, %p7635_p0 }
  0x4e   :  { %p7638_p3 = pnand %p7637_p2, %p7631_p13 }
  0x50   :  { %7641 = shalt.err (!%p7638_p3)
}
  0x51   :  { %115 = dma.hbm_to_vmem [thread:$0]  %s11838_s8, 32, %s113_s29, [#allocation15]  }
  0x52   :  { %s7882_s24 = smov [#allocation17]   ;;  %s7883_s25 = smov [#allocation20]  }
  0x53   :  { %s138_s23 = sshll.u32 %s7882_s24, 4  ;;  %s158_s4 = sshll.u32 %s7883_s25, 4  ;;  %s139_s23 = int_to_ptr.vmem [resolvable:$true] %s138_s23  ;;  %s159_s4 = int_to_ptr.vmem [resolvable:$true] %s158_s4 }
  0x54   :  { %s7642_s30 = scalar_lea.hbm %s11842_s12, 64 }
  0x55   :  { %p7643_p4 = scmp.ne.s32.totalorder %s11842_s12, %s7642_s30  ;;  %p7646_p5 = scmp.lt.u32.totalorder %s7642_s30, %s11842_s12 }
  0x57   :  { %p7648_p6 = pnand %p7646_p5, %p7643_p4 }
  0x59   :  { %7651 = shalt.err (!%p7648_p6)
}
  0x5a   :  { %s7652_s8 = scalar_lea.vmem %s139_s23, 64  ;;  %p7657_p8 = scmp.lt.s32.totalorder %s139_s23, %s139_s23 }
  0x5b   :  { %p7653_p7 = scmp.ne.s32.totalorder %s139_s23, %s7652_s8  ;;  %p7658_p9 = scmp.lt.s32.totalorder %s7652_s8, %s7652_s8 }
  0x5d   :  { %p7659_p10 = por %p7658_p9, %p7657_p8 }
  0x5f   :  { %p7660_p11 = pnand %p7659_p10, %p7653_p7 }
  0x61   :  { %7663 = shalt.err (!%p7660_p11)
}
  0x62   :  { %141 = dma.hbm_to_vmem [thread:$0]  %s11842_s12, 64, %s139_s23, [#allocation18]  }
  0x63   :  { %s7664_s6 = scalar_lea.hbm %s11844_s14, 64 }
  0x64   :  { %p7665_p12 = scmp.ne.s32.totalorder %s11844_s14, %s7664_s6  ;;  %p7668_p13 = scmp.lt.u32.totalorder %s7664_s6, %s11844_s14 }
  0x66   :  { %p7670_p0 = pnand %p7668_p13, %p7665_p12 }
  0x68   :  { %7673 = shalt.err (!%p7670_p0)
}
  0x69   :  { %s7674_s3 = scalar_lea.vmem %s159_s4, 64  ;;  %p7679_p2 = scmp.lt.s32.totalorder %s159_s4, %s159_s4 }
  0x6a   :  { %p7675_p1 = scmp.ne.s32.totalorder %s159_s4, %s7674_s3  ;;  %p7680_p3 = scmp.lt.s32.totalorder %s7674_s3, %s7674_s3 }
  0x6c   :  { %p7681_p4 = por %p7680_p3, %p7679_p2 }
  0x6e   :  { %p7682_p5 = pnand %p7681_p4, %p7675_p1 }
  0x70   :  { %7685 = shalt.err (!%p7682_p5)
}
  0x71   :  { %161 = dma.hbm_to_vmem [thread:$0]  %s11844_s14, 64, %s159_s4, [#allocation21]  }
  0x72   :  { %s7884_s30 = smov [#allocation3]   ;;  %s7885_s26 = smov [#allocation7]  }
  0x73   :  { %s38_s2 = sshll.u32 %s7884_s30, 4  ;;  %s60_s28 = sshll.u32 %s7885_s26, 4  ;;  %s39_s2 = int_to_ptr.vmem [resolvable:$true] %s38_s2  ;;  %s61_s28 = int_to_ptr.vmem [resolvable:$true] %s60_s28 }
  0x74   :  { %s12003_s29 = sld [smem:[#allocation98_spill]] }
  0x7a   :  { %s7686_s20 = scalar_lea.hbm %s12003_s29, 128 }
  0x7b   :  { %p7687_p6 = scmp.ne.s32.totalorder %s12003_s29, %s7686_s20  ;;  %p7690_p7 = scmp.lt.u32.totalorder %s7686_s20, %s12003_s29 }
  0x7d   :  { %p7692_p8 = pnand %p7690_p7, %p7687_p6 }
  0x7f   :  { %7695 = shalt.err (!%p7692_p8)
}
  0x80   :  { %s7696_s14 = scalar_lea.vmem %s39_s2, 128  ;;  %p7701_p10 = scmp.lt.s32.totalorder %s39_s2, %s39_s2 }
  0x81   :  { %p7697_p9 = scmp.ne.s32.totalorder %s39_s2, %s7696_s14  ;;  %p7702_p11 = scmp.lt.s32.totalorder %s7696_s14, %s7696_s14 }
  0x83   :  { %p7703_p12 = por %p7702_p11, %p7701_p10 }
  0x85   :  { %p7704_p13 = pnand %p7703_p12, %p7697_p9 }
  0x87   :  { %7707 = shalt.err (!%p7704_p13)
}
  0x88   :  { %41 = dma.hbm_to_vmem [thread:$0]  %s12003_s29, 128, %s39_s2, [#allocation4]  }
  0x89   :  { %s12004_s3 = sld [smem:[#allocation101_spill]] }
  0x8f   :  { %s7708_s12 = scalar_lea.hbm %s12004_s3, 256 }
  0x90   :  { %p7709_p0 = scmp.ne.s32.totalorder %s12004_s3, %s7708_s12  ;;  %p7712_p1 = scmp.lt.u32.totalorder %s7708_s12, %s12004_s3 }
  0x92   :  { %p7714_p2 = pnand %p7712_p1, %p7709_p0 }
  0x94   :  { %7717 = shalt.err (!%p7714_p2)
}
  0x95   :  { %s7718_s8 = scalar_lea.vmem %s61_s28, 256  ;;  %p7723_p4 = scmp.lt.s32.totalorder %s61_s28, %s61_s28 }
  0x96   :  { %p7719_p3 = scmp.ne.s32.totalorder %s61_s28, %s7718_s8  ;;  %p7724_p5 = scmp.lt.s32.totalorder %s7718_s8, %s7718_s8 }
  0x98   :  { %p7725_p6 = por %p7724_p5, %p7723_p4 }
  0x9a   :  { %p7726_p7 = pnand %p7725_p6, %p7719_p3 }
  0x9c   :  { %7729 = shalt.err (!%p7726_p7)
}
  0x9d   :  { %63 = dma.hbm_to_vmem [thread:$0]  %s12004_s3, 256, %s61_s28, [#allocation6]  }
  0x9e   :  { %s7886_s20 = smov [#allocation10]   ;;  %s7730_s27 = scalar_lea.hbm %s11835_s5, 4096 }
  0x9f   :  { %s79_s1 = sshll.u32 %s7886_s20, 4  ;;  %p7731_p8 = scmp.ne.s32.totalorder %s11835_s5, %s7730_s27  ;;  %s80_s1 = int_to_ptr.vmem [resolvable:$true] %s79_s1 }
  0xa0   :  { %p7734_p9 = scmp.lt.u32.totalorder %s7730_s27, %s11835_s5 }
  0xa2   :  { %p7736_p10 = pnand %p7734_p9, %p7731_p8 }
  0xa4   :  { %7739 = shalt.err (!%p7736_p10)
}
  0xa5   :  { %s7740_s21 = scalar_lea.vmem %s80_s1, 4096  ;;  %p7745_p12 = scmp.lt.s32.totalorder %s80_s1, %s80_s1 }
  0xa6   :  { %p7741_p11 = scmp.ne.s32.totalorder %s80_s1, %s7740_s21  ;;  %p7746_p13 = scmp.lt.s32.totalorder %s7740_s21, %s7740_s21 }
  0xa8   :  { %p7747_p0 = por %p7746_p13, %p7745_p12 }
  0xaa   :  { %p7748_p1 = pnand %p7747_p0, %p7741_p11 }
  0xac   :  { %7751 = shalt.err (!%p7748_p1)
}
  0xad   :  { %s7887_s28 = smov 256   ;;  %s7888_s3 = smov 16  }
  0xae   :  { %85 = dma.hbm_to_vmem [thread:$0]  %s11835_s5, 4096, %s80_s1, [#allocation9], %s7887_s28, %s7887_s28, %s7888_s3  }
  0xaf   :  { %s7889_s30 = smov [#allocation13]   ;;  %s7890_s0 = smov [#allocation16]  }
  0xb0   :  { %s102_s26 = sshll.u32 %s7889_s30, 4  ;;  %s123_s8 = sshll.u32 %s7890_s0, 4  ;;  %s103_s26 = int_to_ptr.vmem [resolvable:$true] %s102_s26  ;;  %s124_s8 = int_to_ptr.vmem [resolvable:$true] %s123_s8 }
  0xb1   :  { %s7752_s20 = scalar_lea.hbm %s11837_s7, 32 }
  0xb2   :  { %p7753_p2 = scmp.ne.s32.totalorder %s11837_s7, %s7752_s20  ;;  %p7756_p3 = scmp.lt.u32.totalorder %s7752_s20, %s11837_s7 }
  0xb4   :  { %p7758_p4 = pnand %p7756_p3, %p7753_p2 }
  0xb6   :  { %7761 = shalt.err (!%p7758_p4)
}
  0xb7   :  { %s7762_s5 = scalar_lea.vmem %s103_s26, 32  ;;  %p7767_p6 = scmp.lt.s32.totalorder %s103_s26, %s103_s26 }
  0xb8   :  { %p7763_p5 = scmp.ne.s32.totalorder %s103_s26, %s7762_s5  ;;  %p7768_p7 = scmp.lt.s32.totalorder %s7762_s5, %s7762_s5 }
  0xba   :  { %p7769_p8 = por %p7768_p7, %p7767_p6 }
  0xbc   :  { %p7770_p9 = pnand %p7769_p8, %p7763_p5 }
  0xbe   :  { %7773 = shalt.err (!%p7770_p9)
}
  0xbf   :  { %105 = dma.hbm_to_vmem [thread:$0]  %s11837_s7, 32, %s103_s26, [#allocation12]  }
  0xc0   :  { %s7774_s21 = scalar_lea.hbm %s11840_s10, 2048 }
  0xc1   :  { %p7775_p10 = scmp.ne.s32.totalorder %s11840_s10, %s7774_s21  ;;  %p7778_p11 = scmp.lt.u32.totalorder %s7774_s21, %s11840_s10 }
  0xc3   :  { %p7780_p12 = pnand %p7778_p11, %p7775_p10 }
  0xc5   :  { %7783 = shalt.err (!%p7780_p12)
}
  0xc6   :  { %s7784_s2 = scalar_lea.vmem %s124_s8, 2048  ;;  %p7789_p0 = scmp.lt.s32.totalorder %s124_s8, %s124_s8 }
  0xc7   :  { %p7785_p13 = scmp.ne.s32.totalorder %s124_s8, %s7784_s2  ;;  %p7790_p1 = scmp.lt.s32.totalorder %s7784_s2, %s7784_s2 }
  0xc9   :  { %p7791_p2 = por %p7790_p1, %p7789_p0 }
  0xcb   :  { %p7792_p3 = pnand %p7791_p2, %p7785_p13 }
  0xcd   :  { %7795 = shalt.err (!%p7792_p3)
}
  0xce   :  { %129 = dma.hbm_to_vmem [thread:$0]  %s11840_s10, 2048, %s124_s8, [#allocation15], %s7887_s28, %s7887_s28, %s7888_s3  }
  0xcf   :  { %s7891_s29 = smov [#allocation19]   ;;  %s7892_s22 = smov [#allocation22]  }
  0xd0   :  { %s148_s20 = sshll.u32 %s7891_s29, 4  ;;  %s169_s6 = sshll.u32 %s7892_s22, 4  ;;  %s149_s20 = int_to_ptr.vmem [resolvable:$true] %s148_s20  ;;  %s170_s6 = int_to_ptr.vmem [resolvable:$true] %s169_s6 }
  0xd1   :  { %s7796_s5 = scalar_lea.hbm %s11843_s13, 64 }
  0xd2   :  { %p7797_p4 = scmp.ne.s32.totalorder %s11843_s13, %s7796_s5  ;;  %p7800_p5 = scmp.lt.u32.totalorder %s7796_s5, %s11843_s13 }
  0xd4   :  { %p7802_p6 = pnand %p7800_p5, %p7797_p4 }
  0xd6   :  { %7805 = shalt.err (!%p7802_p6)
}
  0xd7   :  { %s7806_s10 = scalar_lea.vmem %s149_s20, 64  ;;  %p7811_p8 = scmp.lt.s32.totalorder %s149_s20, %s149_s20 }
  0xd8   :  { %p7807_p7 = scmp.ne.s32.totalorder %s149_s20, %s7806_s10  ;;  %p7812_p9 = scmp.lt.s32.totalorder %s7806_s10, %s7806_s10 }
  0xda   :  { %p7813_p10 = por %p7812_p9, %p7811_p8 }
  0xdc   :  { %p7814_p11 = pnand %p7813_p10, %p7807_p7 }
  0xde   :  { %7817 = shalt.err (!%p7814_p11)
}
  0xdf   :  { %151 = dma.hbm_to_vmem [thread:$0]  %s11843_s13, 64, %s149_s20, [#allocation18]  }
  0xe0   :  { %s7818_s12 = scalar_lea.hbm %s11846_s16, 2048 }
  0xe1   :  { %p7819_p12 = scmp.ne.s32.totalorder %s11846_s16, %s7818_s12  ;;  %p7822_p13 = scmp.lt.u32.totalorder %s7818_s12, %s11846_s16 }
  0xe3   :  { %p7824_p0 = pnand %p7822_p13, %p7819_p12 }
  0xe5   :  { %7827 = shalt.err (!%p7824_p0)
}
  0xe6   :  { %s7828_s7 = scalar_lea.vmem %s170_s6, 2048  ;;  %p7833_p2 = scmp.lt.s32.totalorder %s170_s6, %s170_s6 }
  0xe7   :  { %p7829_p1 = scmp.ne.s32.totalorder %s170_s6, %s7828_s7  ;;  %p7834_p3 = scmp.lt.s32.totalorder %s7828_s7, %s7828_s7 }
  0xe9   :  { %p7835_p4 = por %p7834_p3, %p7833_p2 }
  0xeb   :  { %p7836_p5 = pnand %p7835_p4, %p7829_p1 }
  0xed   :  { %7839 = shalt.err (!%p7836_p5)
}
  0xee   :  { %s7893_s13 = smov 512   ;;  %s7894_s26 = smov 32  }
  0xef   :  { %175 = dma.hbm_to_vmem [thread:$0]  %s11846_s16, 2048, %s170_s6, [#allocation21], %s7893_s13, %s7893_s13, %s7894_s26  }
  0xf0   :  { %s7895_s22 = smov [#allocation23]   ;;  %s7840_s1 = scalar_lea.hbm %s11848_s18, 32 }
  0xf1   :  { %s184_s27 = sshll.u32 %s7895_s22, 4  ;;  %p7841_p6 = scmp.ne.s32.totalorder %s11848_s18, %s7840_s1  ;;  %s185_s27 = int_to_ptr.vmem [resolvable:$true] %s184_s27 }
  0xf2   :  { %p7844_p7 = scmp.lt.u32.totalorder %s7840_s1, %s11848_s18 }
  0xf4   :  { %p7846_p8 = pnand %p7844_p7, %p7841_p6 }
  0xf6   :  { %7849 = shalt.err (!%p7846_p8)
}
  0xf7   :  { %s7850_s28 = scalar_lea.vmem %s185_s27, 32  ;;  %p7855_p10 = scmp.lt.s32.totalorder %s185_s27, %s185_s27 }
  0xf8   :  { %p7851_p9 = scmp.ne.s32.totalorder %s185_s27, %s7850_s28  ;;  %p7856_p11 = scmp.lt.s32.totalorder %s7850_s28, %s7850_s28 }
  0xfa   :  { %p7857_p12 = por %p7856_p11, %p7855_p10 }
  0xfc   :  { %p7858_p13 = pnand %p7857_p12, %p7851_p9 }
  0xfe   :  { %7861 = shalt.err (!%p7858_p13)
}
  0xff   :  { %187 = dma.hbm_to_vmem [thread:$0]  %s11848_s18, 32, %s185_s27, [#allocation24]  }
 0x100   :  { %7862 = dma.done.wait [#allocation4], 128  }
 0x101   :  { %7863 = vsyncadd [#allocation4], 4294967168 }
 0x102   :  { %7864 = dma.done.wait [#allocation6], 512  }
 0x103   :  { %7865 = vsyncadd [#allocation6], 4294966784 }
 0x104   :  { %7866 = dma.done.wait [#allocation9], 4352  }
 0x105   :  { %7867 = vsyncadd [#allocation9], 4294962944 }
 0x106   :  { %7868 = dma.done.wait [#allocation12], 64  }
 0x107   :  { %7869 = vsyncadd [#allocation12], 4294967232 }
 0x108   :  { %7870 = dma.done.wait [#allocation15], 2080  }
 0x109   :  { %7871 = vsyncadd [#allocation15], 4294965216 }
 0x10a   :  { %7872 = dma.done.wait [#allocation18], 128  }
 0x10b   :  { %7873 = vsyncadd [#allocation18], 4294967168 }
 0x10c   :  { %7874 = dma.done.wait [#allocation21], 2112  }
 0x10d   :  { %7875 = vsyncadd [#allocation21], 4294965184 }
 0x10e   :  { %7876 = dma.done.wait [#allocation24], 32  }
 0x10f   :  { %7877 = vsyncadd [#allocation24], 4294967264  ;;  %v11854_v0 = vmov 0.0   ;;  %s12005_s8 = sld [smem:[#allocation99_spill]]  ;;  %v8225_v26 = vld [vmem:[#allocation3] sm:$0xff]  ;;  %vm379_vm0 = vcmask 261120  }
 0x110   :  { %447 = vmatprep.mubr.f32.mxu0 %v11854_v0  ;;  %518 = vmatprep.mubr.f32.mxu1 %v11854_v0  ;;  %vm2156_vm1 = vcmask 523264  }
 0x115   :  { %v232_v1 = vld [vmem:[%s12005_s8 + $0x8] sm:$0xff]  ;;  %v234_v3 = vld [vmem:[%s12005_s8 + $0x18] sm:$0xff]  ;;  %v231_v6 = vld [vmem:[%s12005_s8] sm:$0xff] }
 0x116   :  { %v248_v2 = vld [vmem:[%s12005_s8 + $0x88] sm:$0xff]  ;;  %v250_v5 = vld [vmem:[%s12005_s8 + $0x98] sm:$0xff]  ;;  %v247_v7 = vld [vmem:[%s12005_s8 + $0x80] sm:$0xff] }
 0x117   :  { %v6558_v4 = vpack.c.bf16 %v248_v2, %v232_v1  ;;  %v6566_v8 = vpack.c.bf16 %v250_v5, %v234_v3  ;;  %v6560_v9 = vpack.c.bf16 %v247_v7, %v231_v6  ;;  %v233_v10 = vld [vmem:[%s12005_s8 + $0x10] sm:$0xff]  ;;  %v264_v12 = vld [vmem:[%s12005_s8 + $0x108] sm:$0xff]  ;;  %v266_v15 = vld [vmem:[%s12005_s8 + $0x118] sm:$0xff] }
 0x118   :  { %v249_v11 = vld [vmem:[%s12005_s8 + $0x90] sm:$0xff]  ;;  %v280_v14 = vld [vmem:[%s12005_s8 + $0x188] sm:$0xff]  ;;  %v282_v16 = vld [vmem:[%s12005_s8 + $0x198] sm:$0xff] }
 0x119   :  { %6559 = vmatprep.subr.bf16.mxu0 %v6558_v4  ;;  %v6568_v13 = vpack.c.bf16 %v249_v11, %v233_v10  ;;  %6567 = vmatprep.subr.bf16.mxu1 %v6566_v8  ;;  %v6562_v17 = vpack.c.bf16 %v280_v14, %v264_v12  ;;  %v6570_v18 = vpack.c.bf16 %v282_v16, %v266_v15  ;;  %v263_v19 = vld [vmem:[%s12005_s8 + $0x100] sm:$0xff]  ;;  %v265_v21 = vld [vmem:[%s12005_s8 + $0x110] sm:$0xff]  ;;  %v236_v24 = vld [vmem:[%s12005_s8 + $0x28] sm:$0xff] }
 0x11a   :  { %6561 = vmatpush1.bf16.msra.mxu0 %v6560_v9  ;;  %v279_v20 = vld [vmem:[%s12005_s8 + $0x180] sm:$0xff]  ;;  %v281_v23 = vld [vmem:[%s12005_s8 + $0x190] sm:$0xff]  ;;  %v252_v27 = vld [vmem:[%s12005_s8 + $0xa8] sm:$0xff] }
 0x11b   :  { %6569 = vmatpush1.bf16.msra.mxu1 %v6568_v13  ;;  %v6564_v22 = vpack.c.bf16 %v279_v20, %v263_v19  ;;  %6563 = vmatprep.subr.bf16.mxu0 %v6562_v17  ;;  %v6572_v25 = vpack.c.bf16 %v281_v23, %v265_v21  ;;  %v238_v28 = vld [vmem:[%s12005_s8 + $0x38] sm:$0xff]  ;;  %v6574_v30 = vpack.c.bf16 %v252_v27, %v236_v24  ;;  %v235_v32 = vld [vmem:[%s12005_s8 + $0x20] sm:$0xff]  ;;  %v237_v34 = vld [vmem:[%s12005_s8 + $0x30] sm:$0xff] }
 0x11c   :  { %6571 = vmatprep.subr.bf16.mxu1 %v6570_v18  ;;  %v254_v29 = vld [vmem:[%s12005_s8 + $0xb8] sm:$0xff]  ;;  %v251_v33 = vld [vmem:[%s12005_s8 + $0xa0] sm:$0xff]  ;;  %v253_v36 = vld [vmem:[%s12005_s8 + $0xb0] sm:$0xff] }
 0x11d   :  { %v6582_v31 = vpack.c.bf16 %v254_v29, %v238_v28  ;;  %v6576_v35 = vpack.c.bf16 %v251_v33, %v235_v32  ;;  %v268_v37 = vld [vmem:[%s12005_s8 + $0x128] sm:$0xff]  ;;  %v6584_v39 = vpack.c.bf16 %v253_v36, %v237_v34  ;;  %v270_v41 = vld [vmem:[%s12005_s8 + $0x138] sm:$0xff]  ;;  %v267_v43 = vld [vmem:[%s12005_s8 + $0x120] sm:$0xff] }
 0x11e   :  { %6565 = vmatpush1.bf16.msra.mxu0 %v6564_v22  ;;  %v284_v38 = vld [vmem:[%s12005_s8 + $0x1a8] sm:$0xff]  ;;  %v286_v42 = vld [vmem:[%s12005_s8 + $0x1b8] sm:$0xff]  ;;  %v283_v45 = vld [vmem:[%s12005_s8 + $0x1a0] sm:$0xff] }
 0x11f   :  { %6573 = vmatpush1.bf16.msra.mxu1 %v6572_v25  ;;  %6575 = vmatprep.subr.bf16.mxu0 %v6574_v30  ;;  %v6578_v40 = vpack.c.bf16 %v284_v38, %v268_v37  ;;  %v6586_v44 = vpack.c.bf16 %v286_v42, %v270_v41  ;;  %v269_v46 = vld [vmem:[%s12005_s8 + $0x130] sm:$0xff]  ;;  %v240_v48 = vld [vmem:[%s12005_s8 + $0x48] sm:$0xff]  ;;  %v242_v50 = vld [vmem:[%s12005_s8 + $0x58] sm:$0xff]  ;;  %v6580_v51 = vpack.c.bf16 %v283_v45, %v267_v43 }
 0x120   :  { %6583 = vmatprep.subr.bf16.mxu1 %v6582_v31  ;;  %v285_v47 = vld [vmem:[%s12005_s8 + $0x1b0] sm:$0xff]  ;;  %v256_v49 = vld [vmem:[%s12005_s8 + $0xc8] sm:$0xff]  ;;  %v258_v52 = vld [vmem:[%s12005_s8 + $0xd8] sm:$0xff] }
 0x121   :  { %5974 = vmatmul.mubr.msk.f32.vlgmr.msra.gmra.mrb[0].mxu0 %vm379_vm0, %v8225_v26  ;;  %v6588_v53 = vpack.c.bf16 %v285_v47, %v269_v46  ;;  %v6590_v54 = vpack.c.bf16 %v256_v49, %v240_v48  ;;  %v239_v55 = vld [vmem:[%s12005_s8 + $0x40] sm:$0xff]  ;;  %v241_v57 = vld [vmem:[%s12005_s8 + $0x50] sm:$0xff]  ;;  %v6598_v58 = vpack.c.bf16 %v258_v52, %v242_v50  ;;  %v272_v60 = vld [vmem:[%s12005_s8 + $0x148] sm:$0xff] }
 0x122   :  { %5975 = vmatmul.mubr.msk.f32.vlgmr.msra.gmra.mrb[0].mxu1 %vm379_vm0, %v8225_v26  ;;  %6577 = vmatpush1.bf16.msra.mxu0 %v6576_v35  ;;  %v255_v56 = vld [vmem:[%s12005_s8 + $0xc0] sm:$0xff]  ;;  %v257_v59 = vld [vmem:[%s12005_s8 + $0xd0] sm:$0xff]  ;;  %v288_v61 = vld [vmem:[%s12005_s8 + $0x1c8] sm:$0xff] }
 0x123   :  { %6585 = vmatpush1.bf16.msra.mxu1 %v6584_v39  ;;  %6579 = vmatprep.subr.bf16.mxu0 %v6578_v40  ;;  %v274_v62 = vld [vmem:[%s12005_s8 + $0x158] sm:$0xff]  ;;  %v6592_v1 = vpack.c.bf16 %v255_v56, %v239_v55  ;;  %v6600_v2 = vpack.c.bf16 %v257_v59, %v241_v57  ;;  %v6594_v3 = vpack.c.bf16 %v288_v61, %v272_v60  ;;  %v271_v4 = vld [vmem:[%s12005_s8 + $0x140] sm:$0xff]  ;;  %v273_v6 = vld [vmem:[%s12005_s8 + $0x150] sm:$0xff] }
 0x124   :  { %6587 = vmatprep.subr.bf16.mxu1 %v6586_v44  ;;  %589 = vmatprep.mubr.f32.mxu0 %v11854_v0  ;;  %v290_v63 = vld [vmem:[%s12005_s8 + $0x1d8] sm:$0xff]  ;;  %v287_v5 = vld [vmem:[%s12005_s8 + $0x1c0] sm:$0xff]  ;;  %v289_v8 = vld [vmem:[%s12005_s8 + $0x1d0] sm:$0xff] }
 0x125   :  { %660 = vmatprep.mubr.f32.mxu1 %v11854_v0  ;;  %v6602_v7 = vpack.c.bf16 %v290_v63, %v274_v62  ;;  %v244_v9 = vld [vmem:[%s12005_s8 + $0x68] sm:$0xff]  ;;  %v246_v11 = vld [vmem:[%s12005_s8 + $0x78] sm:$0xff]  ;;  %v6596_v13 = vpack.c.bf16 %v287_v5, %v271_v4  ;;  %v6604_v14 = vpack.c.bf16 %v289_v8, %v273_v6  ;;  %v243_v16 = vld [vmem:[%s12005_s8 + $0x60] sm:$0xff]  ;;  %v299_v4 = vlaneseq }
 0x126   :  { %6581 = vmatpush1.bf16.msra.mxu0 %v6580_v51  ;;  %v260_v10 = vld [vmem:[%s12005_s8 + $0xe8] sm:$0xff]  ;;  %v262_v12 = vld [vmem:[%s12005_s8 + $0xf8] sm:$0xff]  ;;  %v259_v17 = vld [vmem:[%s12005_s8 + $0xe0] sm:$0xff] }
 0x127   :  { %6589 = vmatpush1.bf16.msra.mxu1 %v6588_v53  ;;  %6591 = vmatprep.subr.bf16.mxu0 %v6590_v54  ;;  %v6606_v15 = vpack.c.bf16 %v260_v10, %v244_v9  ;;  %v245_v18 = vld [vmem:[%s12005_s8 + $0x70] sm:$0xff]  ;;  %v6614_v19 = vpack.c.bf16 %v262_v12, %v246_v11  ;;  %v276_v21 = vld [vmem:[%s12005_s8 + $0x168] sm:$0xff]  ;;  %v278_v23 = vld [vmem:[%s12005_s8 + $0x178] sm:$0xff]  ;;  %v6608_v25 = vpack.c.bf16 %v259_v17, %v243_v16  ;;  %v8391_v16 = vshrl.u32 %v299_v4, 7 }
 0x128   :  { %6599 = vmatprep.subr.bf16.mxu1 %v6598_v58  ;;  %v261_v20 = vld [vmem:[%s12005_s8 + $0xf0] sm:$0xff]  ;;  %v292_v22 = vld [vmem:[%s12005_s8 + $0x1e8] sm:$0xff]  ;;  %v294_v24 = vld [vmem:[%s12005_s8 + $0x1f8] sm:$0xff] }
 0x129   :  { %5976 = vmatmul.mubr.msk.f32.vlgmr.msra.gmra.mrb[2].mxu0 %vm379_vm0, %v8225_v26  ;;  %v6616_v27 = vpack.c.bf16 %v261_v20, %v245_v18  ;;  %v6610_v28 = vpack.c.bf16 %v292_v22, %v276_v21  ;;  %v275_v29 = vld [vmem:[%s12005_s8 + $0x160] sm:$0xff]  ;;  %v6618_v31 = vpack.c.bf16 %v294_v24, %v278_v23  ;;  %v277_v32 = vld [vmem:[%s12005_s8 + $0x170] sm:$0xff]  ;;  %v1756_v39 = vld [vmem:[#allocation10] sm:$0xff]  ;;  %v8394_v22 = vsub.s32 0, %v8391_v16 }
 0x12a   :  { %5977 = vmatmul.mubr.msk.f32.vlgmr.msra.gmra.mrb[2].mxu1 %vm379_vm0, %v8225_v26  ;;  %6593 = vmatpush1.bf16.msra.mxu0 %v6592_v1  ;;  %v291_v30 = vld [vmem:[%s12005_s8 + $0x1e0] sm:$0xff]  ;;  %v293_v33 = vld [vmem:[%s12005_s8 + $0x1f0] sm:$0xff]  ;;  %v1758_v40 = vld [vmem:[#allocation10 + $0x10] sm:$0xff]  ;;  %v8399_v24 = vsub.s32 2, %v8391_v16 }
 0x12b   :  { %6601 = vmatpush1.bf16.msra.mxu1 %v6600_v2  ;;  %6595 = vmatprep.subr.bf16.mxu0 %v6594_v3  ;;  %v6612_v34 = vpack.c.bf16 %v291_v30, %v275_v29  ;;  %v6620_v35 = vpack.c.bf16 %v293_v33, %v277_v32  ;;  %v1757_v36 = vld [vmem:[#allocation10 + $0x8] sm:$0xff]  ;;  %v1759_v37 = vld [vmem:[#allocation10 + $0x18] sm:$0xff]  ;;  %v6624_v41 = vpack.c.bf16 %v1758_v40, %v1756_v39  ;;  %v1760_v45 = vld [vmem:[#allocation10 + $0x20] sm:$0xff]  ;;  %v8410_v29 = vsub.s32 4, %v8391_v16 }
 0x12c   :  { %6603 = vmatprep.subr.bf16.mxu1 %v6602_v7  ;;  %731 = vmatprep.mubr.f32.mxu0 %v11854_v0  ;;  %v6622_v38 = vpack.c.bf16 %v1759_v37, %v1757_v36  ;;  %v1761_v42 = vld [vmem:[#allocation10 + $0x28] sm:$0xff]  ;;  %v1763_v43 = vld [vmem:[#allocation10 + $0x38] sm:$0xff]  ;;  %v1762_v46 = vld [vmem:[#allocation10 + $0x30] sm:$0xff]  ;;  %12006 = vst [vmem:[#allocation33_spill] sm:$0xff] %v8394_v22  ;;  %v8413_v30 = vsub.s32 6, %v8391_v16  ;;  %v8425_v36 = vsub.s32 7, %v8391_v16 }
 0x12d   :  { %802 = vmatprep.mubr.f32.mxu1 %v11854_v0  ;;  %v6626_v44 = vpack.c.bf16 %v1763_v43, %v1761_v42  ;;  %v6628_v47 = vpack.c.bf16 %v1762_v46, %v1760_v45  ;;  %v1765_v48 = vld [vmem:[#allocation10 + $0x48] sm:$0xff]  ;;  %v1764_v50 = vld [vmem:[#allocation10 + $0x40] sm:$0xff]  ;;  %v1766_v51 = vld [vmem:[#allocation10 + $0x50] sm:$0xff]  ;;  %12007 = vst [vmem:[#allocation34_spill] sm:$0xff] %v8399_v24  ;;  %v7897_v32 = vmov 1966171168  }
 0x12e   :  { %6597 = vmatpush1.bf16.msra.mxu0 %v6596_v13  ;;  %v6632_v52 = vpack.c.bf16 %v1766_v51, %v1764_v50  ;;  %v1769_v53 = vld [vmem:[#allocation10 + $0x68] sm:$0xff]  ;;  %v1771_v54 = vld [vmem:[#allocation10 + $0x78] sm:$0xff]  ;;  %v1768_v56 = vld [vmem:[#allocation10 + $0x60] sm:$0xff]  ;;  %v8418_v33 = vunpack.c.l.s4 %v7897_v32 }
 0x12f   :  { %6605 = vmatpush1.bf16.msra.mxu1 %v6604_v14  ;;  %6607 = vmatprep.subr.bf16.mxu0 %v6606_v15  ;;  %v6634_v55 = vpack.c.bf16 %v1771_v54, %v1769_v53  ;;  %v1770_v57 = vld [vmem:[#allocation10 + $0x70] sm:$0xff]  ;;  %v1773_v59 = vld [vmem:[#allocation10 + $0x88] sm:$0xff]  ;;  %v1775_v60 = vld [vmem:[#allocation10 + $0x98] sm:$0xff] }
 0x130   :  { %6615 = vmatprep.subr.bf16.mxu1 %v6614_v19  ;;  %v6636_v58 = vpack.c.bf16 %v1770_v57, %v1768_v56  ;;  %v6638_v61 = vpack.c.bf16 %v1775_v60, %v1773_v59  ;;  %v1772_v62 = vld [vmem:[#allocation10 + $0x80] sm:$0xff]  ;;  %v1774_v63 = vld [vmem:[#allocation10 + $0x90] sm:$0xff]  ;;  %v1777_v2 = vld [vmem:[#allocation10 + $0xa8] sm:$0xff]  ;;  %v1280_v46 = vunpack.c.0.s8 %v8418_v33 }
 0x131   :  { %5978 = vmatmul.mubr.msk.f32.vlgmr.msra.gmra.mrb[4].mxu0 %vm379_vm0, %v8225_v26  ;;  %v6640_v1 = vpack.c.bf16 %v1774_v63, %v1772_v62  ;;  %v1779_v3 = vld [vmem:[#allocation10 + $0xb8] sm:$0xff]  ;;  %v1776_v6 = vld [vmem:[#allocation10 + $0xa0] sm:$0xff]  ;;  %v1778_v7 = vld [vmem:[#allocation10 + $0xb0] sm:$0xff] }
 0x132   :  { %5979 = vmatmul.mubr.msk.f32.vlgmr.msra.gmra.mrb[4].mxu1 %vm379_vm0, %v8225_v26  ;;  %6609 = vmatpush1.bf16.msra.mxu0 %v6608_v25  ;;  %v6642_v5 = vpack.c.bf16 %v1779_v3, %v1777_v2  ;;  %v6644_v8 = vpack.c.bf16 %v1778_v7, %v1776_v6  ;;  %v1781_v9 = vld [vmem:[#allocation10 + $0xc8] sm:$0xff]  ;;  %v1783_v10 = vld [vmem:[#allocation10 + $0xd8] sm:$0xff]  ;;  %v1780_v11 = vld [vmem:[#allocation10 + $0xc0] sm:$0xff]  ;;  %v8402_v25 = vsub.s32 1, %v8391_v16 }
 0x133   :  { %6617 = vmatpush1.bf16.msra.mxu1 %v6616_v27  ;;  %6611 = vmatprep.subr.bf16.mxu0 %v6610_v28  ;;  %v6646_v12 = vpack.c.bf16 %v1783_v10, %v1781_v9  ;;  %v1782_v13 = vld [vmem:[#allocation10 + $0xd0] sm:$0xff]  ;;  %v1785_v14 = vld [vmem:[#allocation10 + $0xe8] sm:$0xff]  ;;  %v1787_v15 = vld [vmem:[#allocation10 + $0xf8] sm:$0xff]  ;;  %v8405_v27 = vsub.s32 3, %v8391_v16 }
 0x134   :  { %6619 = vmatprep.subr.bf16.mxu1 %v6618_v31  ;;  %873 = vmatprep.mubr.f32.mxu0 %v11854_v0  ;;  %v6648_v17 = vpack.c.bf16 %v1782_v13, %v1780_v11  ;;  %v6650_v18 = vpack.c.bf16 %v1787_v15, %v1785_v14  ;;  %v1784_v19 = vld [vmem:[#allocation10 + $0xe0] sm:$0xff]  ;;  %v1786_v20 = vld [vmem:[#allocation10 + $0xf0] sm:$0xff]  ;;  %12008 = vst [vmem:[#allocation35_spill] sm:$0xff] %v8402_v25  ;;  %v8416_v31 = vsub.s32 5, %v8391_v16  ;;  %v8429_v39 = vld [vmem:[#allocation5 + $0x8] sm:$0xff] }
 0x135   :  { %944 = vmatprep.mubr.f32.mxu1 %v11854_v0  ;;  %v6652_v21 = vpack.c.bf16 %v1786_v20, %v1784_v19  ;;  %v8396_v23 = vld [vmem:[#allocation5] sm:$0xff]  ;;  %12009 = vst [vmem:[#allocation36_spill] sm:$0xff] %v8405_v27  ;;  %v334_v53 = vrot.slane %v8429_v39, %v8394_v22 }
 0x136   :  { %6613 = vmatpush1.bf16.msra.mxu0 %v6612_v34  ;;  %v302_v28 = vrot.slane %v8396_v23, %v8394_v22  ;;  %v310_v34 = vrot.slane %v8396_v23, %v8399_v24  ;;  %v314_v37 = vrot.slane %v8396_v23, %v8405_v27  ;;  %v318_v43 = vrot.slane %v8396_v23, %v8410_v29 }
 0x137   :  { %6621 = vmatpush1.bf16.msra.mxu1 %v6620_v35  ;;  %6623 = vmatprep.subr.bf16.mxu0 %v6622_v38  ;;  %v306_v35 = vrot.slane %v8396_v23, %v8402_v25  ;;  %v322_v45 = vrot.slane %v8396_v23, %v8416_v31 }
 0x139   :  { %5980 = vmatmul.mubr.msk.f32.vlgmr.msra.gmra.mrb[6].mxu0 %vm379_vm0, %v8225_v26 }
 0x13a   :  { %5981 = vmatmul.mubr.msk.f32.vlgmr.msra.gmra.mrb[6].mxu1 %vm379_vm0, %v8225_v26  ;;  %1864 = vmatprep.mubr.f32.mxu0 %v11854_v0  ;;  %v1767_v26 = vld [vmem:[#allocation10 + $0x58] sm:$0xff] }
 0x13b   :  { %6625 = vmatpush1.bf16.msra.mxu0 %v6624_v41  ;;  %v6630_v49 = vpack.c.bf16 %v1767_v26, %v1765_v48 }
 0x13c   :  { %6627 = vmatprep.subr.bf16.mxu0 %v6626_v44  ;;  %v326_v44 = vrot.slane %v8396_v23, %v8413_v30 }
 0x13f   :  { %6629 = vmatpush1.bf16.msra.mxu0 %v6628_v47 }
 0x140   :  { %6631 = vmatprep.subr.bf16.mxu0 %v6630_v49  ;;  %v330_v49 = vrot.slane %v8396_v23, %v8425_v36 }
 0x143   :  { %6633 = vmatpush1.bf16.msra.mxu0 %v6632_v52 }
 0x144   :  { %6635 = vmatprep.subr.bf16.mxu0 %v6634_v55 }
 0x147   :  { %6637 = vmatpush1.bf16.msra.mxu0 %v6636_v58 }
 0x148   :  { %6639 = vmatprep.subr.bf16.mxu0 %v6638_v61 }
 0x14b   :  { %6641 = vmatpush1.bf16.msra.mxu0 %v6640_v1 }
 0x14c   :  { %6643 = vmatprep.subr.bf16.mxu0 %v6642_v5 }
 0x14f   :  { %6645 = vmatpush1.bf16.msra.mxu0 %v6644_v8 }
 0x150   :  { %6647 = vmatprep.subr.bf16.mxu0 %v6646_v12 }
 0x153   :  { %6649 = vmatpush1.bf16.msra.mxu0 %v6648_v17 }
 0x154   :  { %6651 = vmatprep.subr.bf16.mxu0 %v6650_v18 }
 0x157   :  { %6653 = vmatpush1.bf16.msra.mxu0 %v6652_v21 }
 0x1f4   :  { %v449_v38 = vpop.f32.mrb[0].mxu0 }
 0x1f5   :  { %v8431_v40 = vadd.f32 %v449_v38, %v302_v28  ;;  %v520_v41 = vpop.f32.mrb[0].mxu1  ;;  %v451_v42 = vpop.f32.mrb[1].mxu0 }
 0x1f6   :  { %v8440_v47 = vadd.f32 %v520_v41, %v310_v34  ;;  %v8442_v48 = vadd.f32 %v451_v42, %v306_v35  ;;  %v522_v26 = vpop.f32.mrb[1].mxu1 }
 0x1f7   :  { %v951_v50 = vrot.slane %v8431_v40, 4  ;;  %v1064_v51 = vmul.f32 %v8431_v40, %v8431_v40  ;;  %v8449_v52 = vadd.f32 %v522_v26, %v314_v37 }
 0x1f8   :  { %v963_v54 = vrot.slane %v8440_v47, 4  ;;  %v1066_v55 = vmul.f32 %v8440_v47, %v8440_v47  ;;  %v957_v56 = vrot.slane %v8442_v48, 4  ;;  %v1065_v57 = vmul.f32 %v8442_v48, %v8442_v48 }
 0x1f9   :  { %v952_v58 = vadd.f32 %v951_v50, %v8431_v40  ;;  %v1080_v59 = vrot.slane %v1064_v51, 4  ;;  %v969_v60 = vrot.slane %v8449_v52, 4  ;;  %v1067_v61 = vmul.f32 %v8449_v52, %v8449_v52 }
 0x1fa   :  { %v964_v62 = vadd.f32 %v963_v54, %v8440_v47  ;;  %v1092_v63 = vrot.slane %v1066_v55, 4  ;;  %v958_v1 = vadd.f32 %v957_v56, %v8442_v48  ;;  %v1086_v2 = vrot.slane %v1065_v57, 4 }
 0x1fb   :  { %v953_v3 = vrot.slane %v952_v58, 2  ;;  %v1081_v4 = vadd.f32 %v1080_v59, %v1064_v51  ;;  %v970_v5 = vadd.f32 %v969_v60, %v8449_v52  ;;  %v1098_v6 = vrot.slane %v1067_v61, 4 }
 0x1fc   :  { %v965_v7 = vrot.slane %v964_v62, 2  ;;  %v1093_v8 = vadd.f32 %v1092_v63, %v1066_v55  ;;  %v959_v9 = vrot.slane %v958_v1, 2  ;;  %v1087_v10 = vadd.f32 %v1086_v2, %v1065_v57  ;;  %v591_v11 = vpop.f32.mrb[2].mxu0 }
 0x1fd   :  { %v954_v12 = vadd.f32 %v953_v3, %v952_v58  ;;  %v1082_v13 = vrot.slane %v1081_v4, 2  ;;  %v971_v14 = vrot.slane %v970_v5, 2  ;;  %v1099_v15 = vadd.f32 %v1098_v6, %v1067_v61  ;;  %v662_v17 = vpop.f32.mrb[2].mxu1  ;;  %v593_v18 = vpop.f32.mrb[3].mxu0 }
 0x1fe   :  { %v966_v19 = vadd.f32 %v965_v7, %v964_v62  ;;  %v1094_v20 = vrot.slane %v1093_v8, 2  ;;  %v960_v21 = vadd.f32 %v959_v9, %v958_v1  ;;  %v1088_v28 = vrot.slane %v1087_v10, 2  ;;  %v8466_v32 = vpop.f32.mrb[3].mxu1 }
 0x1ff   :  { %v955_v34 = vrot.slane %v954_v12, 1  ;;  %v1083_v35 = vadd.f32 %v1082_v13, %v1081_v4  ;;  %v972_v37 = vadd.f32 %v971_v14, %v970_v5  ;;  %v1100_v38 = vrot.slane %v1099_v15, 2 }
 0x200   :  { %v967_v41 = vrot.slane %v966_v19, 1  ;;  %v1095_v42 = vadd.f32 %v1094_v20, %v1093_v8  ;;  %v961_v26 = vrot.slane %v960_v21, 1  ;;  %v1089_v50 = vadd.f32 %v1088_v28, %v1087_v10 }
 0x201   :  { %v956_v51 = vadd.f32 %v955_v34, %v954_v12  ;;  %v1084_v54 = vrot.slane %v1083_v35, 1  ;;  %v973_v55 = vrot.slane %v972_v37, 1  ;;  %v1101_v56 = vadd.f32 %v1100_v38, %v1099_v15 }
 0x202   :  { %v968_v57 = vadd.f32 %v967_v41, %v966_v19  ;;  %v1096_v58 = vrot.slane %v1095_v42, 1  ;;  %v962_v59 = vadd.f32 %v961_v26, %v960_v21  ;;  %v1090_v60 = vrot.slane %v1089_v50, 1 }
 0x203   :  { %v8468_v61 = vmul.f32 0.125, %v956_v51  ;;  %v1085_v62 = vadd.f32 %v1084_v54, %v1083_v35  ;;  %v974_v63 = vadd.f32 %v973_v55, %v972_v37  ;;  %v1102_v1 = vrot.slane %v1101_v56, 1 }
 0x204   :  { %v8470_v2 = vmul.f32 0.125, %v968_v57  ;;  %v1097_v3 = vadd.f32 %v1096_v58, %v1095_v42  ;;  %v8472_v4 = vmul.f32 0.125, %v962_v59  ;;  %v1091_v5 = vadd.f32 %v1090_v60, %v1089_v50  ;;  %v733_v6 = vpop.f32.mrb[4].mxu0 }
 0x205   :  { %v1176_v7 = vmul.f32 0.125, %v1085_v62  ;;  %v1192_v8 = vmul.f32 %v8468_v61, %v8468_v61  ;;  %v8476_v9 = vmul.f32 0.125, %v974_v63  ;;  %v1103_v10 = vadd.f32 %v1102_v1, %v1101_v56  ;;  %v8478_v12 = vpop.f32.mrb[4].mxu1  ;;  %v8480_v13 = vpop.f32.mrb[5].mxu0 }
 0x206   :  { %v1178_v14 = vmul.f32 0.125, %v1097_v3  ;;  %v1194_v15 = vmul.f32 %v8470_v2, %v8470_v2  ;;  %v1177_v19 = vmul.f32 0.125, %v1091_v5  ;;  %v1193_v20 = vmul.f32 %v8472_v4, %v8472_v4  ;;  %v8486_v21 = vpop.f32.mrb[5].mxu1 }
 0x207   :  { %v1208_v28 = vsub.f32 %v1176_v7, %v1192_v8  ;;  %v1179_v34 = vmul.f32 0.125, %v1103_v10  ;;  %v1195_v35 = vmul.f32 %v8476_v9, %v8476_v9  ;;  %v8493_v37 = vadd.f32 %v591_v11, %v318_v43 }
 0x208   :  { %v1210_v38 = vsub.f32 %v1178_v14, %v1194_v15  ;;  %v1209_v41 = vsub.f32 %v1177_v19, %v1193_v20  ;;  %v8498_v42 = vadd.f32 %v662_v17, %v326_v44  ;;  %v8503_v26 = vadd.f32 %v593_v18, %v322_v45 }
 0x209   :  { %v1226_v50 = vadd.f32 1e-05, %v1208_v28  ;;  %v1211_v51 = vsub.f32 %v1179_v34, %v1195_v35  ;;  %v975_v54 = vrot.slane %v8493_v37, 4  ;;  %v1068_v43 = vmul.f32 %v8493_v37, %v8493_v37 }
 0x20a   :  { %v1228_v11 = vadd.f32 1e-05, %v1210_v38  ;;  %v1227_v55 = vadd.f32 1e-05, %v1209_v41  ;;  %v987_v56 = vrot.slane %v8498_v42, 4  ;;  %v1070_v44 = vmul.f32 %v8498_v42, %v8498_v42 }
 0x20b   :  { %7446 = vrsqrt.f32 %v1226_v50  ;;  %v1229_v17 = vadd.f32 1e-05, %v1211_v51  ;;  %v976_v57 = vadd.f32 %v975_v54, %v8493_v37  ;;  %v1104_v45 = vrot.slane %v1068_v43, 4 }
 0x20c   :  { %7448 = vrsqrt.f32 %v1228_v11  ;;  %v988_v18 = vadd.f32 %v987_v56, %v8498_v42  ;;  %v1116_v58 = vrot.slane %v1070_v44, 4  ;;  %v981_v59 = vrot.slane %v8503_v26, 4  ;;  %v8514_v60 = vpop.f32.mrb[6].mxu0 }
 0x20d   :  { %7450 = vrsqrt.f32 %v1227_v55  ;;  %v977_v62 = vrot.slane %v976_v57, 2  ;;  %v1105_v63 = vadd.f32 %v1104_v45, %v1068_v43  ;;  %v1069_v1 = vmul.f32 %v8503_v26, %v8503_v26  ;;  %v8518_v3 = vpop.f32.mrb[6].mxu1  ;;  %v8520_v5 = vpop.f32.mrb[7].mxu0 }
 0x20e   :  { %7452 = vrsqrt.f32 %v1229_v17  ;;  %v989_v7 = vrot.slane %v988_v18, 2  ;;  %v1117_v8 = vadd.f32 %v1116_v58, %v1070_v44  ;;  %v982_v10 = vadd.f32 %v981_v59, %v8503_v26  ;;  %v8523_v14 = vpop.f32.mrb[7].mxu1 }
 0x20f   :  { %v978_v15 = vadd.f32 %v977_v62, %v976_v57  ;;  %v1106_v19 = vrot.slane %v1105_v63, 2  ;;  %v1110_v20 = vrot.slane %v1069_v1, 4  ;;  %v8529_v28 = vadd.f32 %v8466_v32, %v330_v49 }
 0x210   :  { %v990_v34 = vadd.f32 %v989_v7, %v988_v18  ;;  %v1118_v35 = vrot.slane %v1117_v8, 2  ;;  %v983_v38 = vrot.slane %v982_v10, 2  ;;  %v8534_v41 = vadd.f32 %v733_v6, %v334_v53 }
 0x211   :  { %v979_v50 = vrot.slane %v978_v15, 1  ;;  %v1107_v51 = vadd.f32 %v1106_v19, %v1105_v63  ;;  %v1111_v54 = vadd.f32 %v1110_v20, %v1069_v1  ;;  %v993_v43 = vrot.slane %v8529_v28, 4 }
 0x212   :  { %12010 = vst [vmem:[#allocation37_spill] sm:$0xff] %v8534_v41  ;;  %v991_v11 = vrot.slane %v990_v34, 1  ;;  %v1119_v55 = vadd.f32 %v1118_v35, %v1117_v8  ;;  %v984_v56 = vadd.f32 %v983_v38, %v982_v10  ;;  %v1071_v23 = vmul.f32 %v8529_v28, %v8529_v28 }
 0x213   :  { %v980_v49 = vadd.f32 %v979_v50, %v978_v15  ;;  %v1108_v32 = vrot.slane %v1107_v51, 1  ;;  %v1112_v44 = vrot.slane %v1111_v54, 2  ;;  %v994_v17 = vadd.f32 %v993_v43, %v8529_v28 }
 0x214   :  { %v992_v57 = vadd.f32 %v991_v11, %v990_v34  ;;  %v1120_v45 = vrot.slane %v1119_v55, 1  ;;  %v985_v53 = vrot.slane %v984_v56, 1  ;;  %v1122_v6 = vrot.slane %v1071_v23, 4 }
 0x215   :  { %v7447_v18 = vpop.eup %7446  ;;  %v8540_v58 = vmul.f32 0.125, %v980_v49  ;;  %v1109_v59 = vadd.f32 %v1108_v32, %v1107_v51  ;;  %v1113_v62 = vadd.f32 %v1112_v44, %v1111_v54  ;;  %v995_v63 = vrot.slane %v994_v17, 2 }
 0x216   :  { %v7449_v1 = vpop.eup %7448  ;;  %v8542_v7 = vmul.f32 0.125, %v992_v57  ;;  %v1121_v8 = vadd.f32 %v1120_v45, %v1119_v55  ;;  %v986_v10 = vadd.f32 %v985_v53, %v984_v56  ;;  %v1123_v15 = vadd.f32 %v1122_v6, %v1071_v23 }
 0x217   :  { %v7451_v19 = vpop.eup %7450  ;;  %v1180_v20 = vmul.f32 0.125, %v1109_v59  ;;  %v1196_v34 = vmul.f32 %v8540_v58, %v8540_v58  ;;  %v1114_v35 = vrot.slane %v1113_v62, 1  ;;  %v996_v38 = vadd.f32 %v995_v63, %v994_v17 }
 0x218   :  { %v7453_v50 = vpop.eup %7452  ;;  %v1274_v43 = vcombine.low %v7447_v18, %v7451_v19  ;;  %v1182_v11 = vmul.f32 0.125, %v1121_v8  ;;  %v1198_v51 = vmul.f32 %v8542_v7, %v8542_v7  ;;  %v8548_v54 = vmul.f32 0.125, %v986_v10 }
 0x219   :  { %v8553_v55 = vsub.s32 %v1280_v46, %v8391_v16  ;;  %v1212_v56 = vsub.f32 %v1180_v20, %v1196_v34  ;;  %v1115_v23 = vadd.f32 %v1114_v35, %v1113_v62  ;;  %v997_v49 = vrot.slane %v996_v38, 1 }
 0x21a   :  { %v1197_v32 = vmul.f32 %v8548_v54, %v8548_v54  ;;  %v1124_v44 = vrot.slane %v1123_v15, 2  ;;  %v342_v17 = vrot.slane %v8429_v39, %v8399_v24  ;;  %v338_v57 = vrot.slane %v8429_v39, %v8402_v25 }
 0x21b   :  { %12011 = vst [vmem:[#allocation38_spill] sm:$0xff] %v8553_v55  ;;  %v1230_v45 = vadd.f32 1e-05, %v1212_v56  ;;  %v1214_v53 = vsub.f32 %v1182_v11, %v1198_v51  ;;  %v1181_v6 = vmul.f32 0.125, %v1115_v23  ;;  %v998_v18 = vadd.f32 %v997_v49, %v996_v38 }
 0x21c   :  { %v1125_v33 = vadd.f32 %v1124_v44, %v1123_v15  ;;  %v999_v16 = vrot.slane %v8534_v41, 4  ;;  %v1072_v46 = vmul.f32 %v8534_v41, %v8534_v41  ;;  %v346_v59 = vrot.slane %v8429_v39, %v8405_v27 }
 0x21d   :  { %v1275_v62 = vcombine.low %v7449_v1, %v7453_v50  ;;  %v1213_v63 = vsub.f32 %v1181_v6, %v1197_v32  ;;  %v8566_v8 = vmul.f32 0.125, %v998_v18  ;;  %v350_v10 = vrot.slane %v8429_v39, %v8410_v29 }
 0x21e   :  { %v8571_v19 = vrot.slane %v1274_v43, %v8553_v55  ;;  %v1126_v20 = vrot.slane %v1125_v33, 1  ;;  %v1000_v15 = vadd.f32 %v999_v16, %v8534_v41  ;;  %v1128_v34 = vrot.slane %v1072_v46, 4 }
 0x21f   :  { %7454 = vrsqrt.f32 %v1230_v45  ;;  %v1232_v35 = vadd.f32 1e-05, %v1214_v53  ;;  %v1231_v38 = vadd.f32 1e-05, %v1213_v63  ;;  %v8575_v11 = vadd.f32 %v8478_v12, %v342_v17 }
 0x220   :  { %v1127_v1 = vadd.f32 %v1126_v20, %v1125_v33  ;;  %v1199_v50 = vmul.f32 %v8566_v8, %v8566_v8  ;;  %v1129_v51 = vadd.f32 %v1128_v34, %v1072_v46  ;;  %v8580_v56 = vadd.f32 %v8480_v13, %v338_v57 }
 0x221   :  { %12012 = vst [vmem:[#allocation39_spill] sm:$0xff] %v8575_v11  ;;  %7456 = vrsqrt.f32 %v1231_v38  ;;  %v1011_v43 = vrot.slane %v8575_v11, 4  ;;  %v1074_v23 = vmul.f32 %v8575_v11, %v8575_v11  ;;  %v8586_v49 = vadd.f32 %v8486_v21, %v346_v59 }
 0x222   :  { %12013 = vst [vmem:[#allocation40_spill] sm:$0xff] %v8580_v56  ;;  %v1183_v32 = vmul.f32 0.125, %v1127_v1  ;;  %v1001_v12 = vrot.slane %v1000_v15, 2  ;;  %v1130_v44 = vrot.slane %v1129_v51, 2  ;;  %v1005_v17 = vrot.slane %v8580_v56, 4 }
 0x223   :  { %12014 = vst [vmem:[#allocation41_spill] sm:$0xff] %v8586_v49  ;;  %v1012_v45 = vadd.f32 %v1011_v43, %v8575_v11  ;;  %v1140_v53 = vrot.slane %v1074_v23, 4  ;;  %v1073_v13 = vmul.f32 %v8580_v56, %v8580_v56  ;;  %v1017_v57 = vrot.slane %v8586_v49, 4 }
 0x224   :  { %v1291_v6 = vrot.slane %v1275_v62, %v8553_v55  ;;  %v1215_v18 = vsub.f32 %v1183_v32, %v1199_v50  ;;  %v1131_v33 = vadd.f32 %v1130_v44, %v1129_v51  ;;  %v1006_v21 = vadd.f32 %v1005_v17, %v8580_v56 }
 0x225   :  { %v1013_v16 = vrot.slane %v1012_v45, 2  ;;  %v1141_v46 = vadd.f32 %v1140_v53, %v1074_v23  ;;  %v1134_v59 = vrot.slane %v1073_v13, 4  ;;  %v1018_v63 = vadd.f32 %v1017_v57, %v8586_v49 }
 0x226   :  { %7458 = vrsqrt.f32 %v1232_v35  ;;  %v1233_v20 = vadd.f32 1e-05, %v1215_v18  ;;  %v1002_v34 = vadd.f32 %v1001_v12, %v1000_v15  ;;  %v1007_v38 = vrot.slane %v1006_v21, 2 }
 0x227   :  { %v1014_v1 = vadd.f32 %v1013_v16, %v1012_v45  ;;  %v1142_v43 = vrot.slane %v1141_v46, 2  ;;  %v1135_v0 = vadd.f32 %v1134_v59, %v1073_v13  ;;  %v1019_v11 = vrot.slane %v1018_v63, 2 }
 0x228   :  { %7460 = vrsqrt.f32 %v1233_v20  ;;  %v1132_v41 = vrot.slane %v1131_v33, 1  ;;  %v1008_v62 = vadd.f32 %v1007_v38, %v1006_v21  ;;  %v1075_v50 = vmul.f32 %v8586_v49, %v8586_v49 }
 0x229   :  { %v7455_v51 = vpop.eup %7454  ;;  %v1015_v32 = vrot.slane %v1014_v1, 1  ;;  %v1143_v23 = vadd.f32 %v1142_v43, %v1141_v46  ;;  %v1136_v44 = vrot.slane %v1135_v0, 2  ;;  %v1020_v17 = vadd.f32 %v1019_v11, %v1018_v63 }
 0x22a   :  { %v1146_v53 = vrot.slane %v1075_v50, 4  ;;  %v8599_v35 = vadd.f32 %v8514_v60, %v350_v10  ;;  %v1306_v12 = vcombine.low %v8571_v19, %v1291_v6  ;;  %v1003_v45 = vrot.slane %v1002_v34, 1 }
 0x22b   :  { %v7457_v15 = vpop.eup %7456  ;;  %v1009_v13 = vrot.slane %v1008_v62, 1  ;;  %v1133_v57 = vadd.f32 %v1132_v41, %v1131_v33  ;;  %v358_v16 = vrot.slane %v8429_v39, %v8413_v30  ;;  %v1016_v59 = vadd.f32 %v1015_v32, %v1014_v1 }
 0x22c   :  { %12015 = vst [vmem:[#allocation42_spill] sm:$0xff] %v8599_v35  ;;  %v1147_v18 = vadd.f32 %v1146_v53, %v1075_v50  ;;  %v1023_v21 = vrot.slane %v8599_v35, 4  ;;  %v1144_v46 = vrot.slane %v1143_v23, 1  ;;  %v1137_v20 = vadd.f32 %v1136_v44, %v1135_v0 }
 0x22d   :  { %v354_v11 = vrot.slane %v8429_v39, %v8416_v31  ;;  %v1276_v60 = vcombine.low %v7455_v51, %v7457_v15  ;;  %v1021_v10 = vrot.slane %v1020_v17, 1  ;;  %v1314_v6 = vrot.slane %v1306_v12, %v8553_v55 }
 0x22e   :  { %v1148_v63 = vrot.slane %v1147_v18, 2  ;;  %v1024_v19 = vadd.f32 %v1023_v21, %v8599_v35  ;;  %v8609_v41 = vadd.f32 %v1003_v45, %v1002_v34  ;;  %v1010_v33 = vadd.f32 %v1009_v13, %v1008_v62 }
 0x22f   :  { %v362_v38 = vrot.slane %v8429_v39, %v8425_v36  ;;  %v8613_v1 = vmul.f32 0.125, %v1133_v57  ;;  %v1076_v51 = vmul.f32 %v8599_v35, %v8599_v35  ;;  %v8617_v32 = vmul.f32 0.125, %v1016_v59 }
 0x230   :  { %v7459_v43 = vpop.eup %7458  ;;  %v1149_v0 = vadd.f32 %v1148_v63, %v1147_v18  ;;  %v1025_v50 = vrot.slane %v1024_v19, 2  ;;  %v1145_v44 = vadd.f32 %v1144_v46, %v1143_v23  ;;  %v1138_v53 = vrot.slane %v1137_v20, 1 }
 0x231   :  { %v8620_v15 = vadd.f32 %v8518_v3, %v358_v16  ;;  %v1298_v62 = vrot.slane %v1276_v60, %v8553_v55  ;;  %v1022_v12 = vadd.f32 %v1021_v10, %v1020_v17  ;;  %v1152_v45 = vrot.slane %v1076_v51, 4 }
 0x232   :  { %v7461_v34 = vpop.eup %7460  ;;  %v1026_v39 = vadd.f32 %v1025_v50, %v1024_v19  ;;  %v8623_v57 = vmul.f32 0.125, %v1010_v33  ;;  %v8627_v21 = vadd.f32 %v8520_v5, %v354_v11  ;;  %v1150_v59 = vrot.slane %v1149_v0, 1 }
 0x233   :  { %12016 = vst [vmem:[#allocation43_spill] sm:$0xff] %v8620_v15  ;;  %v1277_v13 = vcombine.low %v7459_v43, %v7461_v34  ;;  %v1035_v18 = vrot.slane %v8620_v15, 4  ;;  %v1153_v46 = vadd.f32 %v1152_v45, %v1076_v51  ;;  %v1078_v3 = vmul.f32 %v8620_v15, %v8620_v15 }
 0x234   :  { %12017 = vst [vmem:[#allocation44_spill] sm:$0xff] %v8627_v21  ;;  %v1027_v23 = vrot.slane %v1026_v39, 1  ;;  %v8632_v60 = vmul.f32 0.125, %v1145_v44  ;;  %v8636_v17 = vmul.f32 %v8617_v32, %v8617_v32  ;;  %v8639_v63 = vmul.f32 0.125, %v1022_v12 }
 0x235   :  { %v1305_v16 = vrot.slane %v1277_v13, %v8553_v55  ;;  %v1036_v10 = vadd.f32 %v1035_v18, %v8620_v15  ;;  %v1154_v11 = vrot.slane %v1153_v46, 2  ;;  %v1164_v19 = vrot.slane %v1078_v3, 4 }
 0x236   :  { %12018 = vst [vmem:[#allocation45_spill] sm:$0xff] %v8639_v63  ;;  %v1028_v5 = vadd.f32 %v1027_v23, %v1026_v39  ;;  %v1139_v43 = vadd.f32 %v1138_v53, %v1137_v20  ;;  %v1029_v51 = vrot.slane %v8627_v21, 4  ;;  %v1151_v34 = vadd.f32 %v1150_v59, %v1149_v0  ;;  %v1224_v39 = vld [vmem:[#allocation7] sm:$0xff] }
 0x237   :  { %v1307_v33 = vcombine.low %v1298_v62, %v1305_v16  ;;  %v1037_v50 = vrot.slane %v1036_v10, 2  ;;  %v1155_v44 = vadd.f32 %v1154_v11, %v1153_v46  ;;  %v1165_v13 = vadd.f32 %v1164_v19, %v1078_v3 }
 0x238   :  { %v8642_v45 = vmul.f32 0.125, %v1028_v5  ;;  %v1030_v18 = vadd.f32 %v1029_v51, %v8627_v21  ;;  %v1077_v12 = vmul.f32 %v8627_v21, %v8627_v21  ;;  %v8650_v20 = vmul.f32 %v8623_v57, %v8623_v57 }
 0x239   :  { %v1321_v35 = vrot.slane %v1307_v33, %v8553_v55  ;;  %v1038_v49 = vadd.f32 %v1037_v50, %v1036_v10  ;;  %v1203_v0 = vmul.f32 %v8639_v63, %v8639_v63  ;;  %v1156_v53 = vrot.slane %v1155_v44, 1 }
 0x23a   :  { %12019 = vst [vmem:[#allocation46_spill] sm:$0xff] %v8642_v45  ;;  %v1166_v62 = vrot.slane %v1165_v13, 2  ;;  %v1031_v46 = vrot.slane %v1030_v18, 2  ;;  %v1158_v3 = vrot.slane %v1077_v12, 4  ;;  %v1187_v16 = vmul.f32 0.125, %v1151_v34 }
 0x23b   :  { %v1322_v59 = vcombine.low %v1314_v6, %v1321_v35  ;;  %v1039_v23 = vrot.slane %v1038_v49, 1  ;;  %v1157_v10 = vadd.f32 %v1156_v53, %v1155_v44  ;;  %v8655_v11 = vadd.f32 %v8523_v14, %v362_v38 }
 0x23c   :  { %v1167_v5 = vadd.f32 %v1166_v62, %v1165_v13  ;;  %v1204_v33 = vmul.f32 %v8642_v45, %v8642_v45  ;;  %v1032_v51 = vadd.f32 %v1031_v46, %v1030_v18  ;;  %v1159_v56 = vadd.f32 %v1158_v3, %v1077_v12 }
 0x23d   :  { %v1374_v19 = vmul.f32 %v1322_v59, %v1224_v39  ;;  %v1040_v50 = vadd.f32 %v1039_v23, %v1038_v49  ;;  %v1188_v15 = vmul.f32 0.125, %v1157_v10  ;;  %v1041_v35 = vrot.slane %v8655_v11, 4 }
 0x23e   :  { %v1168_v21 = vrot.slane %v1167_v5, 1  ;;  %v1033_v13 = vrot.slane %v1032_v51, 1  ;;  %v1079_v18 = vmul.f32 %v8655_v11, %v8655_v11  ;;  %v1218_v59 = vsub.f32 %v8632_v60, %v8636_v17 }
 0x23f   :  { %v8661_v6 = vrot.slane %v1374_v19, %v8410_v29  ;;  %v8664_v34 = vrot.slane %v1374_v19, %v8416_v31  ;;  %v8667_v14 = vrot.slane %v1374_v19, %v8413_v30  ;;  %v8670_v38 = vrot.slane %v1374_v19, %v8425_v36 }
 0x240   :  { %v8672_v44 = vmul.f32 0.125, %v1040_v50  ;;  %v1169_v49 = vadd.f32 %v1168_v21, %v1167_v5  ;;  %v1219_v21 = vsub.f32 %v1187_v16, %v1203_v0  ;;  %v1220_v23 = vsub.f32 %v1188_v15, %v1204_v33 }
 0x241   :  { %v1464_v12 = vmul.f32 %v8661_v6, %v8540_v58  ;;  %v1465_v39 = vmul.f32 %v8664_v34, %v8548_v54  ;;  %v1466_v53 = vmul.f32 %v8667_v14, %v8542_v7  ;;  %v1467_v62 = vmul.f32 %v8670_v38, %v8566_v8 }
 0x242   :  { %v1034_v46 = vadd.f32 %v1033_v13, %v1032_v51  ;;  %v1160_v5 = vrot.slane %v1159_v56, 2  ;;  %v1042_v58 = vadd.f32 %v1041_v35, %v8655_v11  ;;  %v1190_v50 = vmul.f32 0.125, %v1169_v49 }
 0x243   :  { %v1494_v3 = vcombine.low %v1464_v12, %v1465_v39  ;;  %v1495_v10 = vcombine.low %v1466_v53, %v1467_v62  ;;  %v1206_v54 = vmul.f32 %v8672_v44, %v8672_v44  ;;  %v1170_v7 = vrot.slane %v1079_v18, 4 }
 0x244   :  { %v8689_v45 = vmul.f32 0.125, %v1034_v46  ;;  %v1161_v60 = vadd.f32 %v1160_v5, %v1159_v56  ;;  %v1043_v17 = vrot.slane %v1042_v58, 2  ;;  %v1236_v15 = vadd.f32 1e-05, %v1218_v59 }
 0x245   :  { %v1516_v8 = vrot.slane %v1494_v3, %v8553_v55  ;;  %v1523_v63 = vrot.slane %v1495_v10, %v8553_v55  ;;  %v1185_v0 = vmul.f32 0.125, %v1139_v43  ;;  %v1171_v16 = vadd.f32 %v1170_v7, %v1079_v18 }
 0x246   :  { %v1383_v33 = vrot.slane %v1374_v19, %v8394_v22  ;;  %v1237_v35 = vadd.f32 1e-05, %v1219_v21  ;;  %v1162_v49 = vrot.slane %v1161_v60, 1  ;;  %v1044_v13 = vadd.f32 %v1043_v17, %v1042_v58  ;;  %v1977_v17 = vld [vmem:[%s11839_s9 + $0x80] sm:$0xff] }
 0x247   :  { %v1525_v51 = vcombine.low %v1516_v8, %v1523_v63  ;;  %v1238_v12 = vadd.f32 1e-05, %v1220_v23  ;;  %v1172_v39 = vrot.slane %v1171_v16, 2  ;;  %v1387_v53 = vrot.slane %v1374_v19, %v8402_v25 }
 0x248   :  { %v8696_v62 = vrot.slane %v1374_v19, %v8399_v24  ;;  %v1222_v46 = vsub.f32 %v1190_v50, %v1206_v54  ;;  %v1163_v3 = vadd.f32 %v1162_v49, %v1161_v60  ;;  %v1205_v56 = vmul.f32 %v8689_v45, %v8689_v45  ;;  %v1961_v49 = vld [vmem:[%s11839_s9] sm:$0xff] }
 0x249   :  { %v1045_v43 = vrot.slane %v1044_v13, 1  ;;  %v1173_v18 = vadd.f32 %v1172_v39, %v1171_v16  ;;  %v8701_v59 = vrot.slane %v1374_v19, %v8405_v27  ;;  %v1460_v63 = vmul.f32 %v1383_v33, %v8468_v61 }
 0x24a   :  { %v1461_v21 = vmul.f32 %v1387_v53, %v8472_v4  ;;  %v1189_v23 = vmul.f32 0.125, %v1163_v3  ;;  %v1462_v5 = vmul.f32 %v8696_v62, %v8470_v2  ;;  %v8708_v58 = vmul.f32 %v1383_v33, %v8431_v40 }
 0x24b   :  { %v1046_v10 = vadd.f32 %v1045_v43, %v1044_v13  ;;  %v1174_v50 = vrot.slane %v1173_v18, 1  ;;  %v1463_v54 = vmul.f32 %v8701_v59, %v8476_v9  ;;  %v8713_v19 = vmul.f32 %v1387_v53, %v8442_v48  ;;  %v1978_v48 = vld [vmem:[%s11839_s9 + $0x88] sm:$0xff] }
 0x24c   :  { %v1492_v7 = vcombine.low %v1460_v63, %v1461_v21  ;;  %7462 = vrsqrt.f32 %v1236_v15  ;;  %v1217_v61 = vsub.f32 %v1185_v0, %v8650_v20  ;;  %v1221_v4 = vsub.f32 %v1189_v23, %v1205_v56  ;;  %v1962_v13 = vld [vmem:[%s11839_s9 + $0x8] sm:$0xff] }
 0x24d   :  { %v8716_v8 = vmul.f32 0.125, %v1046_v10  ;;  %7464 = vrsqrt.f32 %v1237_v35  ;;  %v1175_v60 = vadd.f32 %v1174_v50, %v1173_v18  ;;  %v1493_v2 = vcombine.low %v1462_v5, %v1463_v54  ;;  %v1376_v18 = vld [vmem:[#allocation8] sm:$0xff]  ;;  %v1964_v10 = vld [vmem:[%s11839_s9 + $0x18] sm:$0xff]  ;;  %v1981_v5 = vld [vmem:[%s11839_s9 + $0xa0] sm:$0xff] }
 0x24e   :  { %v1502_v40 = vrot.slane %v1492_v7, %v8553_v55  ;;  %7466 = vrsqrt.f32 %v1238_v12  ;;  %v1240_v9 = vadd.f32 1e-05, %v1222_v46  ;;  %v1239_v15 = vadd.f32 1e-05, %v1221_v4  ;;  %v1965_v50 = vld [vmem:[%s11839_s9 + $0x20] sm:$0xff]  ;;  %v1983_v4 = vld [vmem:[%s11839_s9 + $0xb0] sm:$0xff] }
 0x24f   :  { %v1207_v20 = vmul.f32 %v8716_v8, %v8716_v8  ;;  %v1191_v0 = vmul.f32 0.125, %v1175_v60  ;;  %v1509_v16 = vrot.slane %v1493_v2, %v8553_v55  ;;  %v8730_v33 = vmul.f32 %v8670_v38, %v8529_v28  ;;  %v1979_v28 = vld [vmem:[%s11839_s9 + $0x90] sm:$0xff]  ;;  %v1984_v60 = vld [vmem:[%s11839_s9 + $0xb8] sm:$0xff] }
 0x250   :  { %v8733_v35 = vmul.f32 0.125, %v8609_v41  ;;  %v1235_v12 = vadd.f32 1e-05, %v1217_v61  ;;  %7468 = vrsqrt.f32 %v1239_v15  ;;  %v8741_v39 = vpack.c.bf16 %v1978_v48, %v1977_v17  ;;  %v1980_v41 = vld [vmem:[%s11839_s9 + $0x98] sm:$0xff]  ;;  %v1966_v61 = vld [vmem:[%s11839_s9 + $0x28] sm:$0xff] }
 0x251   :  { %v1539_v38 = vrot.slane %v1525_v51, %v8553_v55  ;;  %v1223_v53 = vsub.f32 %v1191_v0, %v1207_v20  ;;  %v1524_v46 = vcombine.low %v1502_v40, %v1509_v16  ;;  %7470 = vrsqrt.f32 %v1240_v9  ;;  %v1963_v51 = vld [vmem:[%s11839_s9 + $0x10] sm:$0xff] }
 0x252   :  { %v1200_v3 = vmul.f32 %v8733_v35, %v8733_v35  ;;  %6655 = vmatprep.subr.bf16.mxu0 %v8741_v39  ;;  %v8753_v56 = vpack.c.bf16 %v1962_v13, %v1961_v49  ;;  %v8757_v23 = vpack.c.bf16 %v1980_v41, %v1979_v28  ;;  %7166 = vmatprep.subr.bf16.mxu1 %v8741_v39  ;;  %7472 = vrsqrt.f32 %v1235_v12 }
 0x253   :  { %v1241_v43 = vadd.f32 1e-05, %v1223_v53  ;;  %v1532_v63 = vrot.slane %v1524_v46, %v8553_v55  ;;  %v1596_v40 = vmul.f32 %v8696_v62, %v8440_v47  ;;  %v1597_v17 = vmul.f32 %v8701_v59, %v8449_v52 }
 0x254   :  { %v1216_v21 = vsub.f32 %v8613_v1, %v1200_v3  ;;  %v1982_v1 = vld [vmem:[%s11839_s9 + $0xa8] sm:$0xff]  ;;  %7174 = vmatpush3.bf16.msra.mxu1 %v8753_v56  ;;  %v8790_v48 = vpack.c.bf16 %v1964_v10, %v1963_v51  ;;  %v1598_v20 = vmul.f32 %v8661_v6, %v8493_v37  ;;  %v1599_v49 = vmul.f32 %v8664_v34, %v8503_v26  ;;  %v1985_v51 = vld [vmem:[%s11839_s9 + $0xc0] sm:$0xff] }
 0x255   :  { %7474 = vrsqrt.f32 %v1241_v43  ;;  %v1540_v54 = vcombine.low %v1532_v63, %v1539_v38  ;;  %7167 = vmatprep.subr.bf16.mxu1 %v8757_v23  ;;  %v8794_v0 = vpack.c.bf16 %v1982_v1, %v1981_v5  ;;  %v1600_v47 = vmul.f32 %v8667_v14, %v8498_v42  ;;  %v1986_v10 = vld [vmem:[%s11839_s9 + $0xc8] sm:$0xff] }
 0x256   :  { %v1234_v7 = vadd.f32 1e-05, %v1216_v21  ;;  %v7463_v2 = vpop.eup %7462  ;;  %v8800_v62 = vpack.c.bf16 %v1966_v61, %v1965_v50  ;;  %v8802_v52 = vpack.c.bf16 %v1984_v60, %v1983_v4  ;;  %v1967_v21 = vld [vmem:[%s11839_s9 + $0x30] sm:$0xff]  ;;  %v12020_v60 = vmov 0.0  }
 0x257   :  { %v7465_v9 = vpop.eup %7464  ;;  %v1592_v15 = vsub.f32 %v1376_v18, %v1540_v54 }
 0x258   :  { %7476 = vrsqrt.f32 %v1234_v7  ;;  %v7467_v16 = vpop.eup %7466  ;;  %7175 = vmatpush3.bf16.msra.mxu1 %v8790_v48  ;;  %v1324_v1 = vcombine.low %v7463_v2, %v7465_v9  ;;  %v1969_v2 = vld [vmem:[%s11839_s9 + $0x40] sm:$0xff] }
 0x259   :  { %v1615_v59 = vrot.slane %v1592_v15, %v8394_v22  ;;  %v1619_v37 = vrot.slane %v1592_v15, %v8402_v25  ;;  %v1623_v6 = vrot.slane %v1592_v15, %v8399_v24  ;;  %v1627_v13 = vrot.slane %v1592_v15, %v8405_v27  ;;  %7168 = vmatprep.subr.bf16.mxu1 %v8794_v0 }
 0x25a   :  { %v7469_v26 = vpop.eup %7468  ;;  %v1631_v34 = vrot.slane %v1592_v15, %v8410_v29  ;;  %v1635_v42 = vrot.slane %v1592_v15, %v8416_v31  ;;  %v1639_v14 = vrot.slane %v1592_v15, %v8413_v30  ;;  %v1643_v12 = vrot.slane %v1592_v15, %v8425_v36  ;;  %v1987_v15 = vld [vmem:[%s11839_s9 + $0xd0] sm:$0xff] }
 0x25b   :  { %v1325_v28 = vcombine.low %v7467_v16, %v7469_v26  ;;  %v1692_v41 = vadd.f32 %v1615_v59, %v8708_v58  ;;  %v1693_v38 = vadd.f32 %v1619_v37, %v8713_v19  ;;  %v1694_v53 = vadd.f32 %v1623_v6, %v1596_v40  ;;  %v7471_v46 = vpop.eup %7470  ;;  %v1968_v58 = vld [vmem:[%s11839_s9 + $0x38] sm:$0xff]  ;;  %v1971_v26 = vld [vmem:[%s11839_s9 + $0x50] sm:$0xff] }
 0x25c   :  { %v8816_v3 = vadd.f32 %v1627_v13, %v1597_v17  ;;  %v8818_v43 = vadd.f32 %v1631_v34, %v1598_v20  ;;  %v8820_v18 = vadd.f32 %v1635_v42, %v1599_v49  ;;  %v8822_v63 = vadd.f32 %v1639_v14, %v1600_v47  ;;  %7176 = vmatpush3.bf16.msra.mxu1 %v8800_v62  ;;  %v7473_v5 = vpop.eup %7472  ;;  %v1988_v20 = vld [vmem:[%s11839_s9 + $0xd8] sm:$0xff]  ;;  %v1989_v14 = vld [vmem:[%s11839_s9 + $0xe0] sm:$0xff] }
 0x25d   :  { %v1708_v19 = vmax.f32 %v1692_v41, 0.0  ;;  %7169 = vmatprep.subr.bf16.mxu1 %v8802_v52  ;;  %v8839_v54 = vadd.f32 %v1643_v12, %v8730_v33  ;;  %v8841_v7 = vpack.c.bf16 %v1968_v58, %v1967_v21  ;;  %v1347_v61 = vrot.slane %v1325_v28, %v8553_v55  ;;  %v1970_v33 = vld [vmem:[%s11839_s9 + $0x48] sm:$0xff]  ;;  %v1972_v34 = vld [vmem:[%s11839_s9 + $0x58] sm:$0xff]  ;;  %v1973_v21 = vld [vmem:[%s11839_s9 + $0x60] sm:$0xff] }
 0x25e   :  { %v8846_v40 = vpack.c.bf16 %v1986_v10, %v1985_v51  ;;  %v1709_v9 = vmax.f32 %v1693_v38, 0.0  ;;  %v1340_v16 = vrot.slane %v1324_v1, %v8553_v55  ;;  %v8865_v59 = vpack.c.bf16 %v1970_v33, %v1969_v2  ;;  %v1990_v12 = vld [vmem:[%s11839_s9 + $0xe8] sm:$0xff]  ;;  %v1225_v51 = vld [vmem:[#allocation7 + $0x8] sm:$0xff]  ;;  %v1991_v10 = vld [vmem:[%s11839_s9 + $0xf0] sm:$0xff] }
 0x25f   :  { %v7475_v50 = vpop.eup %7474  ;;  %1865 = vmatmul.mubr.f32.vlgmr.msra.gmra.mrb[8].mxu0 %v1708_v19  ;;  %v8870_v13 = vpack.c.bf16 %v1988_v20, %v1987_v15  ;;  %v1710_v42 = vmax.f32 %v1694_v53, 0.0  ;;  %v8888_v38 = vpack.c.bf16 %v1972_v34, %v1971_v26  ;;  %v1974_v58 = vld [vmem:[%s11839_s9 + $0x68] sm:$0xff]  ;;  %v1711_v19 = vmax.f32 %v8816_v3, 0.0  ;;  %v12022_v34 = vld [vmem:[#allocation46_spill] sm:$0xff] }
 0x260   :  { %v1326_v4 = vcombine.low %v7471_v46, %v7475_v50  ;;  %1870 = vmatprep.mubr.f32.mxu0 %v12020_v60  ;;  %6657 = vmatpush3.bf16.msra.mxu0 %v8753_v56  ;;  %v8893_v46 = vpack.c.bf16 %v1990_v12, %v1989_v14  ;;  %v8911_v50 = vpack.c.bf16 %v1974_v58, %v1973_v21  ;;  %v1713_v2 = vmax.f32 %v8820_v18, 0.0  ;;  %v12024_v58 = vld [vmem:[#allocation40_spill] sm:$0xff] }
 0x261   :  { %6659 = vmatprep.subr.bf16.mxu0 %v8757_v23  ;;  %7177 = vmatpush3.bf16.msra.mxu1 %v8841_v7 }
 0x262   :  { %v7477_v17 = vpop.eup %7476  ;;  %v1354_v49 = vrot.slane %v1326_v4, %v8553_v55  ;;  %7170 = vmatprep.subr.bf16.mxu1 %v8846_v40  ;;  %v1712_v4 = vmax.f32 %v8818_v43, 0.0 }
 0x263   :  { %v1323_v47 = vcombine.low %v7477_v17, %v7473_v5  ;;  %1871 = vmatmul.mubr.f32.gmra.mrb[10].mxu0 %v1709_v9  ;;  %v1992_v5 = vld [vmem:[%s11839_s9 + $0xf8] sm:$0xff] }
 0x264   :  { %v1356_v37 = vcombine.low %v1347_v61, %v1354_v49  ;;  %1876 = vmatprep.mubr.f32.mxu0 %v12020_v60  ;;  %6661 = vmatpush3.bf16.msra.mxu0 %v8790_v48  ;;  %v8915_v61 = vpack.c.bf16 %v1992_v5, %v1991_v10  ;;  %v12025_v10 = vld [vmem:[#allocation44_spill] sm:$0xff] }
 0x265   :  { %v1333_v6 = vrot.slane %v1323_v47, %v8553_v55  ;;  %6663 = vmatprep.subr.bf16.mxu0 %v8794_v0  ;;  %7178 = vmatpush3.bf16.msra.mxu1 %v8865_v59 }
 0x266   :  { %v1370_v28 = vrot.slane %v1356_v37, %v8553_v55  ;;  %7171 = vmatprep.subr.bf16.mxu1 %v8870_v13 }
 0x267   :  { %v1355_v41 = vcombine.low %v1333_v6, %v1340_v16  ;;  %1877 = vmatmul.mubr.f32.gmra.mrb[12].mxu0 %v1710_v42  ;;  %v12021_v6 = vld [vmem:[#allocation45_spill] sm:$0xff] }
 0x268   :  { %1882 = vmatprep.mubr.f32.mxu0 %v12020_v60  ;;  %6665 = vmatpush3.bf16.msra.mxu0 %v8800_v62 }
 0x269   :  { %v1363_v53 = vrot.slane %v1355_v41, %v8553_v55  ;;  %6667 = vmatprep.subr.bf16.mxu0 %v8802_v52  ;;  %7179 = vmatpush3.bf16.msra.mxu1 %v8888_v38 }
 0x26a   :  { %7172 = vmatprep.subr.bf16.mxu1 %v8893_v46 }
 0x26b   :  { %v1371_v1 = vcombine.low %v1363_v53, %v1370_v28  ;;  %1883 = vmatmul.mubr.f32.gmra.mrb[14].mxu0 %v1711_v19  ;;  %v12023_v53 = vld [vmem:[#allocation37_spill] sm:$0xff] }
 0x26c   :  { %1888 = vmatprep.mubr.f32.mxu0 %v12020_v60  ;;  %6669 = vmatpush3.bf16.msra.mxu0 %v8841_v7 }
 0x26d   :  { %v1375_v3 = vmul.f32 %v1371_v1, %v1225_v51  ;;  %6671 = vmatprep.subr.bf16.mxu0 %v8846_v40  ;;  %7180 = vmatpush3.bf16.msra.mxu1 %v8911_v50 }
 0x26e   :  { %7173 = vmatprep.subr.bf16.mxu1 %v8915_v61 }
 0x26f   :  { %v1415_v33 = vrot.slane %v1375_v3, %v8394_v22  ;;  %v1419_v17 = vrot.slane %v1375_v3, %v8402_v25  ;;  %v1423_v9 = vrot.slane %v1375_v3, %v8399_v24  ;;  %v1427_v15 = vrot.slane %v1375_v3, %v8405_v27  ;;  %1889 = vmatmul.mubr.f32.gmra.mrb[16].mxu0 %v1712_v4 }
 0x270   :  { %v1431_v20 = vrot.slane %v1375_v3, %v8410_v29  ;;  %v1435_v43 = vrot.slane %v1375_v3, %v8416_v31  ;;  %v1439_v18 = vrot.slane %v1375_v3, %v8413_v30  ;;  %v1443_v16 = vrot.slane %v1375_v3, %v8425_v36  ;;  %1894 = vmatprep.mubr.f32.mxu0 %v12020_v60 }
 0x271   :  { %v1468_v49 = vmul.f32 %v1415_v33, %v8733_v35  ;;  %v1469_v47 = vmul.f32 %v1419_v17, %v8623_v57  ;;  %v1470_v37 = vmul.f32 %v1423_v9, %v8617_v32  ;;  %v1471_v26 = vmul.f32 %v1427_v15, %v12021_v6  ;;  %6673 = vmatpush3.bf16.msra.mxu0 %v8865_v59  ;;  %v1975_v35 = vld [vmem:[%s11839_s9 + $0x70] sm:$0xff]  ;;  %v1976_v32 = vld [vmem:[%s11839_s9 + $0x78] sm:$0xff] }
 0x272   :  { %v1472_v42 = vmul.f32 %v1431_v20, %v12022_v34  ;;  %v1473_v14 = vmul.f32 %v1435_v43, %v8689_v45  ;;  %v1474_v12 = vmul.f32 %v1439_v18, %v8672_v44  ;;  %v1475_v28 = vmul.f32 %v1443_v16, %v8716_v8  ;;  %6675 = vmatprep.subr.bf16.mxu0 %v8870_v13 }
 0x273   :  { %v1541_v57 = vcombine.low %v1468_v49, %v1469_v47  ;;  %v1542_v41 = vcombine.low %v1470_v37, %v1471_v26  ;;  %v1602_v21 = vmul.f32 %v1415_v33, %v12023_v53  ;;  %v1603_v45 = vmul.f32 %v1419_v17, %v12024_v58  ;;  %1895 = vmatmul.mubr.f32.gmra.mrb[18].mxu0 %v1713_v2  ;;  %v12027_v26 = vld [vmem:[#allocation41_spill] sm:$0xff] }
 0x274   :  { %v1543_v44 = vcombine.low %v1472_v42, %v1473_v14  ;;  %v1544_v8 = vcombine.low %v1474_v12, %v1475_v28  ;;  %1900 = vmatprep.mubr.f32.mxu0 %v12020_v60  ;;  %v1607_v5 = vmul.f32 %v1435_v43, %v12025_v10  ;;  %v8953_v1 = vpack.c.bf16 %v1976_v32, %v1975_v35  ;;  %v12028_v42 = vld [vmem:[#allocation42_spill] sm:$0xff]  ;;  %v12029_v14 = vld [vmem:[#allocation43_spill] sm:$0xff] }
 0x275   :  { %v1551_v19 = vrot.slane %v1541_v57, %v8553_v55  ;;  %v1558_v51 = vrot.slane %v1542_v41, %v8553_v55  ;;  %v1714_v3 = vmax.f32 %v8822_v63, 0.0  ;;  %v1609_v2 = vmul.f32 %v1443_v16, %v8655_v11  ;;  %6677 = vmatpush3.bf16.msra.mxu0 %v8888_v38  ;;  %v1377_v11 = vld [vmem:[#allocation8 + $0x8] sm:$0xff] }
 0x276   :  { %v1565_v4 = vrot.slane %v1543_v44, %v8553_v55  ;;  %v1572_v33 = vrot.slane %v1544_v8, %v8553_v55  ;;  %6679 = vmatprep.subr.bf16.mxu0 %v8893_v46  ;;  %7181 = vmatpush3.bf16.msra.mxu1 %v8953_v1  ;;  %v1715_v43 = vmax.f32 %v8839_v54, 0.0  ;;  %v1605_v34 = vmul.f32 %v1427_v15, %v12027_v26  ;;  %v1993_v26 = vld [vmem:[#allocation16] sm:$0xff] }
 0x277   :  { %v1573_v17 = vcombine.low %v1551_v19, %v1558_v51  ;;  %1901 = vmatmul.mubr.f32.gmra.mrb[20].mxu0 %v1714_v3  ;;  %6703 = vmatprep.subr.bf16.mxu1 %v8741_v39  ;;  %v12026_v39 = vld [vmem:[#allocation39_spill] sm:$0xff]  ;;  %v1606_v54 = vmul.f32 %v1431_v20, %v12028_v42  ;;  %v1608_v12 = vmul.f32 %v1439_v18, %v12029_v14  ;;  %v1998_v14 = vld [vmem:[#allocation16 + $0x28] sm:$0xff] }
 0x278   :  { %v1574_v49 = vcombine.low %v1565_v4, %v1572_v33  ;;  %1906 = vmatprep.mubr.f32.mxu0 %v12020_v60  ;;  %v1604_v6 = vmul.f32 %v1423_v9, %v12026_v39  ;;  %v1994_v39 = vld [vmem:[#allocation16 + $0x8] sm:$0xff] }
 0x279   :  { %v1581_v63 = vrot.slane %v1573_v17, %v8553_v55  ;;  %6681 = vmatpush3.bf16.msra.mxu0 %v8911_v50 }
 0x27a   :  { %v1588_v47 = vrot.slane %v1574_v49, %v8553_v55  ;;  %6683 = vmatprep.subr.bf16.mxu0 %v8915_v61 }
 0x27b   :  { %1907 = vmatmul.mubr.f32.gmra.mrb[22].mxu0 %v1715_v43 }
 0x27c   :  { %v1589_v16 = vcombine.low %v1581_v63, %v1588_v47  ;;  %1912 = vmatprep.mubr.f32.mxu0 %v12020_v60 }
 0x27d   :  { %6685 = vmatpush3.bf16.msra.mxu0 %v8953_v1 }
 0x27e   :  { %v1593_v37 = vsub.f32 %v1377_v11, %v1589_v16 }
 0x280   :  { %v1647_v28 = vrot.slane %v1593_v37, %v8394_v22  ;;  %v1651_v35 = vrot.slane %v1593_v37, %v8402_v25  ;;  %v1655_v32 = vrot.slane %v1593_v37, %v8399_v24  ;;  %v1659_v57 = vrot.slane %v1593_v37, %v8405_v27 }
 0x281   :  { %v1663_v41 = vrot.slane %v1593_v37, %v8410_v29  ;;  %v1667_v53 = vrot.slane %v1593_v37, %v8416_v31  ;;  %v1671_v9 = vrot.slane %v1593_v37, %v8413_v30  ;;  %v1675_v15 = vrot.slane %v1593_v37, %v8425_v36 }
 0x282   :  { %v1700_v58 = vadd.f32 %v1647_v28, %v1602_v21  ;;  %v1701_v20 = vadd.f32 %v1651_v35, %v1603_v45  ;;  %v1702_v44 = vadd.f32 %v1655_v32, %v1604_v6  ;;  %v1703_v18 = vadd.f32 %v1659_v57, %v1605_v34  ;;  %v1996_v6 = vld [vmem:[#allocation16 + $0x18] sm:$0xff]  ;;  %v1997_v57 = vld [vmem:[#allocation16 + $0x20] sm:$0xff] }
 0x283   :  { %v1704_v8 = vadd.f32 %v1663_v41, %v1606_v54  ;;  %v1705_v19 = vadd.f32 %v1667_v53, %v1607_v5  ;;  %v1706_v51 = vadd.f32 %v1671_v9, %v1608_v12  ;;  %v1707_v10 = vadd.f32 %v1675_v15, %v1609_v2  ;;  %v1788_v5 = vld [vmem:[#allocation11] sm:$0x3]  ;;  %v1995_v54 = vld [vmem:[#allocation16 + $0x10] sm:$0xff]  ;;  %v2002_v53 = vld [vmem:[#allocation16 + $0x48] sm:$0xff] }
 0x284   :  { %v1716_v3 = vmax.f32 %v1700_v58, 0.0  ;;  %v1717_v4 = vmax.f32 %v1701_v20, 0.0  ;;  %v1718_v29 = vmax.f32 %v1702_v44, 0.0  ;;  %v1719_v30 = vmax.f32 %v1703_v18, 0.0  ;;  %v2000_v12 = vld [vmem:[#allocation16 + $0x38] sm:$0xff]  ;;  %v1999_v41 = vld [vmem:[#allocation16 + $0x30] sm:$0xff] }
 0x285   :  { %v1720_v31 = vmax.f32 %v1704_v8, 0.0  ;;  %v1721_v36 = vmax.f32 %v1705_v19, 0.0  ;;  %v1722_v21 = vmax.f32 %v1706_v51, 0.0  ;;  %v1723_v45 = vmax.f32 %v1707_v10, 0.0  ;;  %v2004_v15 = vld [vmem:[#allocation16 + $0x58] sm:$0xff]  ;;  %v2001_v8 = vld [vmem:[#allocation16 + $0x40] sm:$0xff] }
 0x286   :  { %1913 = vmatmul.mubr.f32.gmra.mrb[24].mxu0 %v1716_v3  ;;  %v8991_v33 = vrot.slane %v1788_v5, %v8402_v25  ;;  %v8994_v2 = vrot.slane %v1788_v5, %v8394_v22  ;;  %v6686_v42 = vpack.c.bf16 %v1996_v6, %v1994_v39  ;;  %v9012_v35 = vpack.c.bf16 %v1995_v54, %v1993_v26  ;;  %v2003_v19 = vld [vmem:[#allocation16 + $0x50] sm:$0xff]  ;;  %v2006_v10 = vld [vmem:[#allocation16 + $0x68] sm:$0xff]  ;;  %v2008_v3 = vld [vmem:[#allocation16 + $0x78] sm:$0xff] }
 0x287   :  { %1918 = vmatprep.mubr.f32.mxu0 %v12020_v60  ;;  %v9014_v32 = vpack.c.bf16 %v2000_v12, %v1998_v14  ;;  %v9023_v20 = vpack.c.bf16 %v1999_v41, %v1997_v57  ;;  %v9027_v18 = vpack.c.bf16 %v2004_v15, %v2002_v53 }
 0x288   :  { %6687 = vmatprep.subr.bf16.mxu0 %v6686_v42 }
 0x28a   :  { %1919 = vmatmul.mubr.f32.gmra.mrb[26].mxu0 %v1717_v4 }
 0x28b   :  { %1924 = vmatprep.mubr.f32.mxu0 %v12020_v60 }
 0x28e   :  { %1925 = vmatmul.mubr.f32.gmra.mrb[28].mxu0 %v1718_v29 }
 0x28f   :  { %1930 = vmatprep.mubr.f32.mxu0 %v12020_v60 }
 0x292   :  { %1931 = vmatmul.mubr.f32.gmra.mrb[30].mxu0 %v1719_v30  ;;  %v9037_v30 = vpack.c.bf16 %v2003_v19, %v2001_v8 }
 0x293   :  { %1936 = vmatprep.mubr.f32.mxu0 %v12020_v60 }
 0x296   :  { %1937 = vmatmul.mubr.f32.gmra.mrb[32].mxu0 %v1720_v31 }
 0x297   :  { %1942 = vmatprep.mubr.f32.mxu0 %v12020_v60 }
 0x29a   :  { %1943 = vmatmul.mubr.f32.gmra.mrb[34].mxu0 %v1721_v36  ;;  %v9041_v36 = vpack.c.bf16 %v2008_v3, %v2006_v10 }
 0x29b   :  { %1948 = vmatprep.mubr.f32.mxu0 %v12020_v60 }
 0x29e   :  { %1949 = vmatmul.mubr.f32.gmra.mrb[36].mxu0 %v1722_v21  ;;  %v2005_v21 = vld [vmem:[#allocation16 + $0x60] sm:$0xff] }
 0x29f   :  { %1954 = vmatprep.mubr.f32.mxu0 %v12020_v60 }
 0x2a2   :  { %1955 = vmatmul.mubr.f32.gmra.mrb[38].mxu0 %v1723_v45  ;;  %v2007_v45 = vld [vmem:[#allocation16 + $0x70] sm:$0xff] }
 0x332   :  { %v1866_v17 = vpop.f32.mrb[8].mxu0 }
 0x333   :  { %v1868_v49 = vpop.f32.mrb[9].mxu0  ;;  %v9000_v43 = vadd.f32 %v1866_v17, %v8994_v2 }
 0x334   :  { %v8997_v63 = vadd.f32 %v1868_v49, %v8991_v33 }
 0x336   :  { %v1872_v47 = vpop.f32.mrb[10].mxu0  ;;  %2075 = vmatprep.mubr.f32.mxu0 %v8997_v63 }
 0x337   :  { %v1874_v11 = vpop.f32.mrb[11].mxu0  ;;  %2076 = vmatmul.mubr.f32.vlgmr.msra.gmra.mrb[40].mxu0 %v9000_v43  ;;  %v9008_v37 = vadd.f32 %v1872_v47, %v8994_v2  ;;  %v9051_v47 = vpack.c.bf16 %v2007_v45, %v2005_v21 }
 0x338   :  { %v9005_v16 = vadd.f32 %v1874_v11, %v8991_v33  ;;  %6689 = vmatpush1.bf16.msra.mxu0 %v9012_v35 }
 0x339   :  { %6691 = vmatprep.subr.bf16.mxu0 %v9014_v32 }
 0x33a   :  { %v1878_v34 = vpop.f32.mrb[12].mxu0  ;;  %2080 = vmatprep.mubr.f32.mxu0 %v9005_v16 }
 0x33b   :  { %v1880_v28 = vpop.f32.mrb[13].mxu0  ;;  %2081 = vmatmul.mubr.f32.gmra.mrb[42].mxu0 %v9008_v37  ;;  %v9020_v58 = vadd.f32 %v1878_v34, %v8994_v2 }
 0x33c   :  { %v9017_v9 = vadd.f32 %v1880_v28, %v8991_v33  ;;  %6693 = vmatpush1.bf16.msra.mxu0 %v9023_v20 }
 0x33d   :  { %6695 = vmatprep.subr.bf16.mxu0 %v9027_v18 }
 0x33e   :  { %v1884_v44 = vpop.f32.mrb[14].mxu0  ;;  %2085 = vmatprep.mubr.f32.mxu0 %v9017_v9 }
 0x33f   :  { %v1886_v51 = vpop.f32.mrb[15].mxu0  ;;  %2086 = vmatmul.mubr.f32.gmra.mrb[44].mxu0 %v9020_v58  ;;  %v9034_v29 = vadd.f32 %v1884_v44, %v8994_v2 }
 0x340   :  { %v9031_v4 = vadd.f32 %v1886_v51, %v8991_v33  ;;  %6697 = vmatpush1.bf16.msra.mxu0 %v9037_v30 }
 0x341   :  { %6699 = vmatprep.subr.bf16.mxu0 %v9041_v36 }
 0x342   :  { %v1890_v31 = vpop.f32.mrb[16].mxu0  ;;  %2090 = vmatprep.mubr.f32.mxu0 %v9031_v4 }
 0x343   :  { %v1892_v5 = vpop.f32.mrb[17].mxu0  ;;  %2091 = vmatmul.mubr.f32.gmra.mrb[46].mxu0 %v9034_v29  ;;  %v9048_v49 = vadd.f32 %v1890_v31, %v8994_v2 }
 0x344   :  { %v9045_v17 = vadd.f32 %v1892_v5, %v8991_v33  ;;  %6701 = vmatpush1.bf16.msra.mxu0 %v9051_v47 }
 0x345   :  { %6735 = vmatprep.subr.bf16.mxu0 %v6686_v42 }
 0x346   :  { %v1896_v11 = vpop.f32.mrb[18].mxu0  ;;  %2095 = vmatprep.mubr.f32.mxu0 %v9045_v17 }
 0x347   :  { %v1898_v39 = vpop.f32.mrb[19].mxu0  ;;  %2096 = vmatmul.mubr.f32.gmra.mrb[48].mxu0 %v9048_v49  ;;  %v9060_v26 = vadd.f32 %v1896_v11, %v8994_v2 }
 0x348   :  { %v9057_v6 = vadd.f32 %v1898_v39, %v8991_v33 }
 0x34a   :  { %v1902_v34 = vpop.f32.mrb[20].mxu0  ;;  %2100 = vmatprep.mubr.f32.mxu0 %v9057_v6 }
 0x34b   :  { %v1904_v54 = vpop.f32.mrb[21].mxu0  ;;  %2101 = vmatmul.mubr.f32.gmra.mrb[50].mxu0 %v9060_v26  ;;  %v9069_v12 = vadd.f32 %v1902_v34, %v8994_v2 }
 0x34c   :  { %v9066_v14 = vadd.f32 %v1904_v54, %v8991_v33 }
 0x34e   :  { %v1908_v28 = vpop.f32.mrb[22].mxu0  ;;  %2105 = vmatprep.mubr.f32.mxu0 %v9066_v14 }
 0x34f   :  { %v1910_v57 = vpop.f32.mrb[23].mxu0  ;;  %2106 = vmatmul.mubr.f32.gmra.mrb[52].mxu0 %v9069_v12  ;;  %v9077_v42 = vadd.f32 %v1908_v28, %v8994_v2 }
 0x350   :  { %v9074_v41 = vadd.f32 %v1910_v57, %v8991_v33 }
 0x352   :  { %2110 = vmatprep.mubr.f32.mxu0 %v9074_v41 }
 0x353   :  { %2111 = vmatmul.mubr.f32.gmra.mrb[54].mxu0 %v9077_v42 }
 0x354   :  { %2269 = vmatprep.mubr.f32.mxu0 %v12020_v60 }
 0x359   :  { %v1914_v53 = vpop.f32.mrb[24].mxu0 }
 0x35a   :  { %v1916_v15 = vpop.f32.mrb[25].mxu0  ;;  %v9086_v8 = vadd.f32 %v1914_v53, %v8994_v2 }
 0x35b   :  { %v9083_v44 = vadd.f32 %v1916_v15, %v8991_v33 }
 0x35d   :  { %v1920_v19 = vpop.f32.mrb[26].mxu0  ;;  %2115 = vmatprep.mubr.f32.mxu1 %v9083_v44 }
 0x35e   :  { %v1922_v51 = vpop.f32.mrb[27].mxu0  ;;  %2116 = vmatmul.mubr.f32.vlgmr.msra.gmra.mrb[8].mxu1 %v9086_v8  ;;  %v9095_v3 = vadd.f32 %v1920_v19, %v8994_v2 }
 0x35f   :  { %v9091_v10 = vadd.f32 %v1922_v51, %v8991_v33  ;;  %6705 = vmatpush3.bf16.msra.mxu1 %v8753_v56 }
 0x360   :  { %6707 = vmatprep.subr.bf16.mxu1 %v8757_v23 }
 0x361   :  { %v1926_v31 = vpop.f32.mrb[28].mxu0  ;;  %2120 = vmatprep.mubr.f32.mxu1 %v9091_v10 }
 0x362   :  { %v1928_v21 = vpop.f32.mrb[29].mxu0  ;;  %2121 = vmatmul.mubr.f32.gmra.mrb[10].mxu1 %v9095_v3  ;;  %v9105_v5 = vadd.f32 %v1926_v31, %v8994_v2  ;;  %v2372_v31 = vmul.f32 %v9034_v29, %v9034_v29 }
 0x363   :  { %v9101_v45 = vadd.f32 %v1928_v21, %v8991_v33  ;;  %6709 = vmatpush3.bf16.msra.mxu1 %v8790_v48  ;;  %v2375_v21 = vmul.f32 %v9045_v17, %v9045_v17 }
 0x364   :  { %6711 = vmatprep.subr.bf16.mxu1 %v8794_v0 }
 0x365   :  { %v1932_v56 = vpop.f32.mrb[30].mxu0  ;;  %2125 = vmatprep.mubr.f32.mxu1 %v9101_v45 }
 0x366   :  { %v1934_v23 = vpop.f32.mrb[31].mxu0  ;;  %2126 = vmatmul.mubr.f32.gmra.mrb[12].mxu1 %v9105_v5  ;;  %v9115_v39 = vadd.f32 %v1932_v56, %v8994_v2  ;;  %v2374_v56 = vmul.f32 %v9048_v49, %v9048_v49 }
 0x367   :  { %v9111_v11 = vadd.f32 %v1934_v23, %v8991_v33  ;;  %6713 = vmatpush3.bf16.msra.mxu1 %v8800_v62  ;;  %v2377_v23 = vmul.f32 %v9057_v6, %v9057_v6 }
 0x368   :  { %6715 = vmatprep.subr.bf16.mxu1 %v8802_v52 }
 0x369   :  { %v1938_v48 = vpop.f32.mrb[32].mxu0  ;;  %2130 = vmatprep.mubr.f32.mxu1 %v9111_v11 }
 0x36a   :  { %v1940_v0 = vpop.f32.mrb[33].mxu0  ;;  %2131 = vmatmul.mubr.f32.gmra.mrb[14].mxu1 %v9115_v39  ;;  %v9125_v54 = vadd.f32 %v1938_v48, %v8994_v2  ;;  %v2376_v48 = vmul.f32 %v9060_v26, %v9060_v26 }
 0x36b   :  { %v9121_v34 = vadd.f32 %v1940_v0, %v8991_v33  ;;  %6717 = vmatpush3.bf16.msra.mxu1 %v8841_v7  ;;  %v2379_v0 = vmul.f32 %v9066_v14, %v9066_v14 }
 0x36c   :  { %6719 = vmatprep.subr.bf16.mxu1 %v8846_v40 }
 0x36d   :  { %v1944_v62 = vpop.f32.mrb[34].mxu0  ;;  %2135 = vmatprep.mubr.f32.mxu1 %v9121_v34 }
 0x36e   :  { %v1946_v52 = vpop.f32.mrb[35].mxu0  ;;  %2136 = vmatmul.mubr.f32.gmra.mrb[16].mxu1 %v9125_v54  ;;  %v9135_v57 = vadd.f32 %v1944_v62, %v8994_v2  ;;  %v2378_v62 = vmul.f32 %v9069_v12, %v9069_v12 }
 0x36f   :  { %v9131_v28 = vadd.f32 %v1946_v52, %v8991_v33  ;;  %6721 = vmatpush3.bf16.msra.mxu1 %v8865_v59  ;;  %v2381_v52 = vmul.f32 %v9074_v41, %v9074_v41 }
 0x370   :  { %6723 = vmatprep.subr.bf16.mxu1 %v8870_v13 }
 0x371   :  { %v1950_v7 = vpop.f32.mrb[36].mxu0  ;;  %2140 = vmatprep.mubr.f32.mxu1 %v9131_v28 }
 0x372   :  { %v1952_v40 = vpop.f32.mrb[37].mxu0  ;;  %2141 = vmatmul.mubr.f32.gmra.mrb[18].mxu1 %v9135_v57  ;;  %v9145_v15 = vadd.f32 %v1950_v7, %v8994_v2  ;;  %v2380_v7 = vmul.f32 %v9077_v42, %v9077_v42 }
 0x373   :  { %v9141_v53 = vadd.f32 %v1952_v40, %v8991_v33  ;;  %6725 = vmatpush3.bf16.msra.mxu1 %v8888_v38  ;;  %v2367_v38 = vmul.f32 %v8997_v63, %v8997_v63  ;;  %v2383_v40 = vmul.f32 %v9083_v44, %v9083_v44 }
 0x374   :  { %12031 = vst [vmem:[#allocation46_spill] sm:$0xff] %v9145_v15  ;;  %6727 = vmatprep.subr.bf16.mxu1 %v8893_v46  ;;  %v2366_v46 = vmul.f32 %v9000_v43, %v9000_v43 }
 0x375   :  { %12030 = vst [vmem:[#allocation45_spill] sm:$0xff] %v9141_v53  ;;  %v1956_v59 = vpop.f32.mrb[38].mxu0  ;;  %2145 = vmatprep.mubr.f32.mxu1 %v9141_v53 }
 0x376   :  { %v1958_v13 = vpop.f32.mrb[39].mxu0  ;;  %2146 = vmatmul.mubr.f32.gmra.mrb[20].mxu1 %v9145_v15  ;;  %v9155_v51 = vadd.f32 %v1956_v59, %v8994_v2  ;;  %v2373_v2 = vmul.f32 %v9031_v4, %v9031_v4  ;;  %v2382_v59 = vmul.f32 %v9086_v8, %v9086_v8 }
 0x377   :  { %v9151_v19 = vadd.f32 %v1958_v13, %v8991_v33  ;;  %6729 = vmatpush3.bf16.msra.mxu1 %v8911_v50  ;;  %v2369_v50 = vmul.f32 %v9005_v16, %v9005_v16  ;;  %v2371_v33 = vmul.f32 %v9017_v9, %v9017_v9  ;;  %v2385_v13 = vmul.f32 %v9091_v10, %v9091_v10 }
 0x378   :  { %12033 = vst [vmem:[#allocation40_spill] sm:$0xff] %v9155_v51  ;;  %6731 = vmatprep.subr.bf16.mxu1 %v8915_v61  ;;  %v2368_v61 = vmul.f32 %v9008_v37, %v9008_v37 }
 0x379   :  { %12032 = vst [vmem:[#allocation37_spill] sm:$0xff] %v9151_v19  ;;  %2150 = vmatprep.mubr.f32.mxu1 %v9151_v19 }
 0x37a   :  { %2151 = vmatmul.mubr.f32.gmra.mrb[22].mxu1 %v9155_v51 }
 0x37b   :  { %6733 = vmatpush3.bf16.msra.mxu1 %v8953_v1  ;;  %2462 = vmatprep.mubr.f32.mxu1 %v2367_v38  ;;  %v2370_v1 = vmul.f32 %v9020_v58, %v9020_v58  ;;  %v2384_v38 = vmul.f32 %v9095_v3, %v9095_v3 }
 0x37e   :  { %2463 = vmatmul.mubr.f32.vlgmr.msra.gmra.mrb[24].mxu1 %v2366_v46  ;;  %v2387_v46 = vmul.f32 %v9101_v45, %v9101_v45 }
 0x37f   :  { %2467 = vmatprep.mubr.f32.mxu1 %v2369_v50  ;;  %v2386_v50 = vmul.f32 %v9105_v5, %v9105_v5 }
 0x382   :  { %2468 = vmatmul.mubr.f32.gmra.mrb[26].mxu1 %v2368_v61  ;;  %v2389_v61 = vmul.f32 %v9111_v11, %v9111_v11 }
 0x383   :  { %2472 = vmatprep.mubr.f32.mxu1 %v2371_v33  ;;  %v2388_v33 = vmul.f32 %v9115_v39, %v9115_v39 }
 0x386   :  { %2473 = vmatmul.mubr.f32.gmra.mrb[28].mxu1 %v2370_v1  ;;  %v2391_v1 = vmul.f32 %v9121_v34, %v9121_v34 }
 0x387   :  { %2477 = vmatprep.mubr.f32.mxu1 %v2373_v2  ;;  %v2390_v2 = vmul.f32 %v9125_v54, %v9125_v54 }
 0x38a   :  { %2478 = vmatmul.mubr.f32.gmra.mrb[30].mxu1 %v2372_v31  ;;  %v2393_v31 = vmul.f32 %v9131_v28, %v9131_v28 }
 0x38b   :  { %2482 = vmatprep.mubr.f32.mxu1 %v2375_v21  ;;  %v2392_v21 = vmul.f32 %v9135_v57, %v9135_v57 }
 0x38e   :  { %2483 = vmatmul.mubr.f32.gmra.mrb[32].mxu1 %v2374_v56  ;;  %v2395_v56 = vmul.f32 %v9141_v53, %v9141_v53 }
 0x38f   :  { %2487 = vmatprep.mubr.f32.mxu1 %v2377_v23  ;;  %v2394_v23 = vmul.f32 %v9145_v15, %v9145_v15 }
 0x392   :  { %2488 = vmatmul.mubr.f32.gmra.mrb[34].mxu1 %v2376_v48  ;;  %v2397_v48 = vmul.f32 %v9151_v19, %v9151_v19 }
 0x393   :  { %2492 = vmatprep.mubr.f32.mxu1 %v2379_v0  ;;  %v2396_v0 = vmul.f32 %v9155_v51, %v9155_v51  ;;  %v3534_v51 = vld [vmem:[%s11845_s15 + $0x1b8] sm:$0xff] }
 0x396   :  { %2493 = vmatmul.mubr.f32.gmra.mrb[36].mxu1 %v2378_v62 }
 0x397   :  { %2497 = vmatprep.mubr.f32.mxu1 %v2381_v52 }
 0x39a   :  { %2498 = vmatmul.mubr.f32.gmra.mrb[38].mxu1 %v2380_v7 }
 0x39b   :  { %2502 = vmatprep.mubr.f32.mxu1 %v2383_v40 }
 0x39e   :  { %2503 = vmatmul.mubr.f32.gmra.mrb[40].mxu1 %v2382_v59 }
 0x39f   :  { %2507 = vmatprep.mubr.f32.mxu1 %v2385_v13 }
 0x3a2   :  { %2508 = vmatmul.mubr.f32.gmra.mrb[42].mxu1 %v2384_v38 }
 0x3a3   :  { %2512 = vmatprep.mubr.f32.mxu1 %v2387_v46 }
 0x3a6   :  { %2513 = vmatmul.mubr.f32.gmra.mrb[44].mxu1 %v2386_v50 }
 0x3a7   :  { %2517 = vmatprep.mubr.f32.mxu1 %v2389_v61 }
 0x3aa   :  { %2518 = vmatmul.mubr.f32.gmra.mrb[46].mxu1 %v2388_v33 }
 0x3ab   :  { %2522 = vmatprep.mubr.f32.mxu1 %v2391_v1 }
 0x3ae   :  { %2523 = vmatmul.mubr.f32.gmra.mrb[48].mxu1 %v2390_v2 }
 0x3af   :  { %2527 = vmatprep.mubr.f32.mxu1 %v2393_v31 }
 0x3b2   :  { %2528 = vmatmul.mubr.f32.gmra.mrb[50].mxu1 %v2392_v21 }
 0x3b3   :  { %2532 = vmatprep.mubr.f32.mxu1 %v2395_v56 }
 0x3b6   :  { %2533 = vmatmul.mubr.f32.gmra.mrb[52].mxu1 %v2394_v23 }
 0x3b7   :  { %2537 = vmatprep.mubr.f32.mxu1 %v2397_v48 }
 0x3ba   :  { %2538 = vmatmul.mubr.f32.gmra.mrb[54].mxu1 %v2396_v0 }
 0x40a   :  { %v6110_v62 = vpop.f32.mrb[40].mxu0 }
 0x40b   :  { %v6111_v52 = vpop.f32.mrb[41].mxu0 }
 0x40c   :  { %v6112_v7 = vadd.f32 %v6111_v52, %v6110_v62 }
 0x40e   :  { %v6113_v40 = vpop.f32.mrb[42].mxu0  ;;  %5982 = vmatmul.mubr.msk.f32.vlgmr.msra.gmra.mrb[56].mxu0 %vm2156_vm1, %v6112_v7 }
 0x40f   :  { %6737 = vmatpush1.bf16.msra.mxu0 %v9012_v35  ;;  %v6114_v59 = vpop.f32.mrb[43].mxu0  ;;  %2275 = vmatprep.mubr.f32.mxu0 %v12020_v60 }
 0x410   :  { %v6115_v13 = vadd.f32 %v6114_v59, %v6113_v40  ;;  %6739 = vmatprep.subr.bf16.mxu0 %v9014_v32 }
 0x412   :  { %v6116_v38 = vpop.f32.mrb[44].mxu0 }
 0x413   :  { %v6117_v46 = vpop.f32.mrb[45].mxu0  ;;  %6741 = vmatpush1.bf16.msra.mxu0 %v9023_v20 }
 0x414   :  { %v6118_v50 = vadd.f32 %v6117_v46, %v6116_v38  ;;  %6743 = vmatprep.subr.bf16.mxu0 %v9027_v18 }
 0x416   :  { %v6119_v61 = vpop.f32.mrb[46].mxu0  ;;  %5983 = vmatmul.mubr.msk.f32.gmra.mrb[56].mxu0 %vm2156_vm1, %v6115_v13 }
 0x417   :  { %v6120_v33 = vpop.f32.mrb[47].mxu0  ;;  %2281 = vmatprep.mubr.f32.mxu0 %v12020_v60  ;;  %6745 = vmatpush1.bf16.msra.mxu0 %v9037_v30 }
 0x418   :  { %v6121_v35 = vadd.f32 %v6120_v33, %v6119_v61  ;;  %6747 = vmatprep.subr.bf16.mxu0 %v9041_v36 }
 0x41a   :  { %v6122_v1 = vpop.f32.mrb[48].mxu0 }
 0x41b   :  { %v6123_v32 = vpop.f32.mrb[49].mxu0  ;;  %6749 = vmatpush1.bf16.msra.mxu0 %v9051_v47 }
 0x41c   :  { %v6124_v2 = vadd.f32 %v6123_v32, %v6122_v1 }
 0x41e   :  { %v6125_v20 = vpop.f32.mrb[50].mxu0  ;;  %5984 = vmatmul.mubr.msk.f32.gmra.mrb[56].mxu0 %vm2156_vm1, %v6118_v50 }
 0x41f   :  { %v6126_v18 = vpop.f32.mrb[51].mxu0  ;;  %2287 = vmatprep.mubr.f32.mxu0 %v12020_v60 }
 0x420   :  { %v6127_v31 = vadd.f32 %v6126_v18, %v6125_v20 }
 0x422   :  { %v6128_v21 = vpop.f32.mrb[52].mxu0 }
 0x423   :  { %v6129_v56 = vpop.f32.mrb[53].mxu0 }
 0x424   :  { %v6130_v23 = vadd.f32 %v6129_v56, %v6128_v21 }
 0x426   :  { %v6131_v48 = vpop.f32.mrb[54].mxu0  ;;  %5985 = vmatmul.mubr.msk.f32.gmra.mrb[56].mxu0 %vm2156_vm1, %v6121_v35 }
 0x427   :  { %v6132_v30 = vpop.f32.mrb[55].mxu0  ;;  %2293 = vmatprep.mubr.f32.mxu0 %v12020_v60 }
 0x428   :  { %v6133_v36 = vadd.f32 %v6132_v30, %v6131_v48 }
 0x42e   :  { %5986 = vmatmul.mubr.msk.f32.gmra.mrb[56].mxu0 %vm2156_vm1, %v6124_v2 }
 0x42f   :  { %2299 = vmatprep.mubr.f32.mxu0 %v12020_v60 }
 0x431   :  { %v6134_v47 = vpop.f32.mrb[8].mxu1 }
 0x432   :  { %v6135_v0 = vpop.f32.mrb[9].mxu1 }
 0x433   :  { %v6136_v62 = vadd.f32 %v6135_v0, %v6134_v47 }
 0x435   :  { %v6137_v52 = vpop.f32.mrb[10].mxu1 }
 0x436   :  { %v6138_v7 = vpop.f32.mrb[11].mxu1  ;;  %5987 = vmatmul.mubr.msk.f32.gmra.mrb[56].mxu0 %vm2156_vm1, %v6127_v31 }
 0x437   :  { %v6139_v40 = vadd.f32 %v6138_v7, %v6137_v52  ;;  %2305 = vmatprep.mubr.f32.mxu0 %v12020_v60 }
 0x439   :  { %v6140_v59 = vpop.f32.mrb[12].mxu1 }
 0x43a   :  { %v6141_v13 = vpop.f32.mrb[13].mxu1 }
 0x43b   :  { %v6142_v38 = vadd.f32 %v6141_v13, %v6140_v59 }
 0x43d   :  { %v6143_v46 = vpop.f32.mrb[14].mxu1 }
 0x43e   :  { %v6144_v50 = vpop.f32.mrb[15].mxu1  ;;  %5988 = vmatmul.mubr.msk.f32.gmra.mrb[56].mxu0 %vm2156_vm1, %v6130_v23 }
 0x43f   :  { %v6145_v61 = vadd.f32 %v6144_v50, %v6143_v46  ;;  %2311 = vmatprep.mubr.f32.mxu0 %v12020_v60 }
 0x441   :  { %v6146_v33 = vpop.f32.mrb[16].mxu1 }
 0x442   :  { %v6147_v35 = vpop.f32.mrb[17].mxu1 }
 0x443   :  { %v6148_v1 = vadd.f32 %v6147_v35, %v6146_v33 }
 0x445   :  { %v6149_v32 = vpop.f32.mrb[18].mxu1 }
 0x446   :  { %v6150_v2 = vpop.f32.mrb[19].mxu1  ;;  %5989 = vmatmul.mubr.msk.f32.gmra.mrb[56].mxu0 %vm2156_vm1, %v6133_v36 }
 0x447   :  { %v6151_v20 = vadd.f32 %v6150_v2, %v6149_v32  ;;  %2317 = vmatprep.mubr.f32.mxu0 %v12020_v60 }
 0x449   :  { %v6152_v18 = vpop.f32.mrb[20].mxu1 }
 0x44a   :  { %v6153_v31 = vpop.f32.mrb[21].mxu1 }
 0x44b   :  { %v6154_v21 = vadd.f32 %v6153_v31, %v6152_v18 }
 0x44d   :  { %v6155_v56 = vpop.f32.mrb[22].mxu1 }
 0x44e   :  { %v6156_v48 = vpop.f32.mrb[23].mxu1  ;;  %5990 = vmatmul.mubr.msk.f32.gmra.mrb[56].mxu0 %vm2156_vm1, %v6136_v62 }
 0x44f   :  { %v6157_v30 = vadd.f32 %v6156_v48, %v6155_v56  ;;  %2323 = vmatprep.mubr.f32.mxu0 %v12020_v60 }
 0x451   :  { %v6190_v23 = vpop.f32.mrb[24].mxu1 }
 0x452   :  { %v6191_v47 = vpop.f32.mrb[25].mxu1 }
 0x453   :  { %v6192_v0 = vadd.f32 %v6191_v47, %v6190_v23 }
 0x455   :  { %v6193_v52 = vpop.f32.mrb[26].mxu1 }
 0x456   :  { %v6194_v7 = vpop.f32.mrb[27].mxu1  ;;  %5991 = vmatmul.mubr.msk.f32.gmra.mrb[56].mxu0 %vm2156_vm1, %v6139_v40 }
 0x457   :  { %v6195_v59 = vadd.f32 %v6194_v7, %v6193_v52  ;;  %2329 = vmatprep.mubr.f32.mxu0 %v12020_v60 }
 0x459   :  { %v6196_v36 = vpop.f32.mrb[28].mxu1 }
 0x45a   :  { %v6197_v13 = vpop.f32.mrb[29].mxu1 }
 0x45b   :  { %v6198_v46 = vadd.f32 %v6197_v13, %v6196_v36 }
 0x45d   :  { %v6199_v50 = vpop.f32.mrb[30].mxu1 }
 0x45e   :  { %v6200_v33 = vpop.f32.mrb[31].mxu1  ;;  %5992 = vmatmul.mubr.msk.f32.gmra.mrb[56].mxu0 %vm2156_vm1, %v6142_v38 }
 0x45f   :  { %v6201_v35 = vadd.f32 %v6200_v33, %v6199_v50  ;;  %2335 = vmatprep.mubr.f32.mxu0 %v12020_v60 }
 0x461   :  { %v6202_v62 = vpop.f32.mrb[32].mxu1 }
 0x462   :  { %v6203_v32 = vpop.f32.mrb[33].mxu1 }
 0x463   :  { %v6204_v2 = vadd.f32 %v6203_v32, %v6202_v62 }
 0x465   :  { %v6205_v18 = vpop.f32.mrb[34].mxu1 }
 0x466   :  { %v6206_v31 = vpop.f32.mrb[35].mxu1  ;;  %5993 = vmatmul.mubr.msk.f32.gmra.mrb[56].mxu0 %vm2156_vm1, %v6145_v61 }
 0x467   :  { %v6207_v56 = vadd.f32 %v6206_v31, %v6205_v18  ;;  %2341 = vmatprep.mubr.f32.mxu0 %v12020_v60 }
 0x469   :  { %v6208_v40 = vpop.f32.mrb[36].mxu1 }
 0x46a   :  { %v6209_v48 = vpop.f32.mrb[37].mxu1 }
 0x46b   :  { %v6210_v23 = vadd.f32 %v6209_v48, %v6208_v40 }
 0x46d   :  { %v6211_v47 = vpop.f32.mrb[38].mxu1 }
 0x46e   :  { %v6212_v52 = vpop.f32.mrb[39].mxu1  ;;  %5994 = vmatmul.mubr.msk.f32.gmra.mrb[56].mxu0 %vm2156_vm1, %v6148_v1 }
 0x46f   :  { %v6213_v7 = vadd.f32 %v6212_v52, %v6211_v47  ;;  %2347 = vmatprep.mubr.f32.mxu0 %v12020_v60 }
 0x471   :  { %v6214_v38 = vpop.f32.mrb[40].mxu1 }
 0x472   :  { %v6215_v36 = vpop.f32.mrb[41].mxu1 }
 0x473   :  { %v6216_v13 = vadd.f32 %v6215_v36, %v6214_v38 }
 0x475   :  { %v6217_v50 = vpop.f32.mrb[42].mxu1 }
 0x476   :  { %v6218_v33 = vpop.f32.mrb[43].mxu1  ;;  %5995 = vmatmul.mubr.msk.f32.gmra.mrb[56].mxu0 %vm2156_vm1, %v6151_v20 }
 0x477   :  { %v6219_v62 = vadd.f32 %v6218_v33, %v6217_v50  ;;  %2353 = vmatprep.mubr.f32.mxu0 %v12020_v60 }
 0x479   :  { %v6220_v61 = vpop.f32.mrb[44].mxu1 }
 0x47a   :  { %v6221_v32 = vpop.f32.mrb[45].mxu1 }
 0x47b   :  { %v6222_v18 = vadd.f32 %v6221_v32, %v6220_v61 }
 0x47d   :  { %v6223_v31 = vpop.f32.mrb[46].mxu1 }
 0x47e   :  { %v6224_v40 = vpop.f32.mrb[47].mxu1  ;;  %5996 = vmatmul.mubr.msk.f32.gmra.mrb[56].mxu0 %vm2156_vm1, %v6154_v21 }
 0x47f   :  { %v6225_v48 = vadd.f32 %v6224_v40, %v6223_v31  ;;  %2359 = vmatprep.mubr.f32.mxu0 %v12020_v60  ;;  %v3030_v40 = vld [vmem:[%s11841_s11 + $0xb8] sm:$0xff] }
 0x481   :  { %v6226_v1 = vpop.f32.mrb[48].mxu1 }
 0x482   :  { %v6227_v47 = vpop.f32.mrb[49].mxu1 }
 0x483   :  { %v6228_v52 = vadd.f32 %v6227_v47, %v6226_v1  ;;  %v3025_v47 = vld [vmem:[%s11841_s11 + $0x90] sm:$0xff] }
 0x485   :  { %v6229_v38 = vpop.f32.mrb[50].mxu1 }
 0x486   :  { %v6230_v36 = vpop.f32.mrb[51].mxu1  ;;  %5997 = vmatmul.mubr.msk.f32.gmra.mrb[56].mxu0 %vm2156_vm1, %v6157_v30  ;;  %v3010_v30 = vld [vmem:[%s11841_s11 + $0x18] sm:$0xff] }
 0x487   :  { %v6231_v50 = vadd.f32 %v6230_v36, %v6229_v38  ;;  %2655 = vmatprep.mubr.f32.mxu0 %v12020_v60  ;;  %v3034_v38 = vld [vmem:[%s11841_s11 + $0xd8] sm:$0xff] }
 0x488   :  { %v3038_v36 = vld [vmem:[%s11841_s11 + $0xf8] sm:$0xff] }
 0x489   :  { %v6232_v20 = vpop.f32.mrb[52].mxu1 }
 0x48a   :  { %v6233_v33 = vpop.f32.mrb[53].mxu1  ;;  %5998 = vmatmul.mubr.msk.f32.vlgmr.msra.gmra.mrb[58].mxu0 %vm2156_vm1, %v6192_v0  ;;  %v3014_v0 = vld [vmem:[%s11841_s11 + $0x38] sm:$0xff] }
 0x48b   :  { %v9264_v61 = vadd.f32 %v6233_v33, %v6232_v20  ;;  %2661 = vmatprep.mubr.f32.mxu0 %v12020_v60  ;;  %v6826_v33 = vpack.c.bf16 %v3038_v36, %v3034_v38  ;;  %v3019_v38 = vld [vmem:[%s11841_s11 + $0x60] sm:$0xff] }
 0x48d   :  { %v6235_v21 = vpop.f32.mrb[54].mxu1 }
 0x48e   :  { %v6236_v32 = vpop.f32.mrb[55].mxu1 }
 0x48f   :  { %v9268_v31 = vadd.f32 %v6236_v32, %v6235_v21  ;;  %v3033_v21 = vld [vmem:[%s11841_s11 + $0xd0] sm:$0xff] }
 0x490   :  { %v3037_v32 = vld [vmem:[%s11841_s11 + $0xf0] sm:$0xff] }
 0x492   :  { %5999 = vmatmul.mubr.msk.f32.gmra.mrb[58].mxu0 %vm2156_vm1, %v6195_v59  ;;  %v3009_v59 = vld [vmem:[%s11841_s11 + $0x10] sm:$0xff] }
 0x493   :  { %2667 = vmatprep.mubr.f32.mxu0 %v12020_v60 }
 0x49a   :  { %6000 = vmatmul.mubr.msk.f32.gmra.mrb[58].mxu0 %vm2156_vm1, %v6198_v46  ;;  %v6814_v46 = vpack.c.bf16 %v3014_v0, %v3010_v30  ;;  %v3042_v30 = vld [vmem:[%s11841_s11 + $0x118] sm:$0xff]  ;;  %v3008_v0 = vld [vmem:[%s11841_s11 + $0x8] sm:$0xff] }
 0x49b   :  { %2673 = vmatprep.mubr.f32.mxu0 %v12020_v60 }
 0x49c   :  { %6815 = vmatprep.subr.bf16.mxu0 %v6814_v46  ;;  %v3007_v46 = vld [vmem:[%s11841_s11] sm:$0xff] }
 0x4a2   :  { %6001 = vmatmul.mubr.msk.f32.gmra.mrb[58].mxu0 %vm2156_vm1, %v6201_v35  ;;  %v3013_v35 = vld [vmem:[%s11841_s11 + $0x30] sm:$0xff] }
 0x4a3   :  { %2679 = vmatprep.mubr.f32.mxu0 %v12020_v60 }
 0x4aa   :  { %6002 = vmatmul.mubr.msk.f32.gmra.mrb[58].mxu0 %vm2156_vm1, %v6204_v2  ;;  %v3018_v2 = vld [vmem:[%s11841_s11 + $0x58] sm:$0xff] }
 0x4ab   :  { %2685 = vmatprep.mubr.f32.mxu0 %v12020_v60 }
 0x4b2   :  { %6003 = vmatmul.mubr.msk.f32.gmra.mrb[58].mxu0 %vm2156_vm1, %v6207_v56  ;;  %v3022_v56 = vld [vmem:[%s11841_s11 + $0x78] sm:$0xff] }
 0x4b3   :  { %2691 = vmatprep.mubr.f32.mxu0 %v12020_v60 }
 0x4ba   :  { %6004 = vmatmul.mubr.msk.f32.gmra.mrb[58].mxu0 %vm2156_vm1, %v6210_v23  ;;  %v6816_v23 = vpack.c.bf16 %v3013_v35, %v3009_v59  ;;  %v3012_v59 = vld [vmem:[%s11841_s11 + $0x28] sm:$0xff]  ;;  %v3011_v35 = vld [vmem:[%s11841_s11 + $0x20] sm:$0xff] }
 0x4bb   :  { %2697 = vmatprep.mubr.f32.mxu0 %v12020_v60 }
 0x4bc   :  { %6817 = vmatpush1.bf16.msra.mxu0 %v6816_v23  ;;  %v3045_v23 = vld [vmem:[%s11841_s11 + $0x130] sm:$0xff] }
 0x4c2   :  { %6005 = vmatmul.mubr.msk.f32.gmra.mrb[58].mxu0 %vm2156_vm1, %v6213_v7  ;;  %v6818_v7 = vpack.c.bf16 %v3022_v56, %v3018_v2  ;;  %v6828_v2 = vpack.c.bf16 %v3037_v32, %v3033_v21  ;;  %v3041_v56 = vld [vmem:[%s11841_s11 + $0x110] sm:$0xff] }
 0x4c3   :  { %2703 = vmatprep.mubr.f32.mxu0 %v12020_v60  ;;  %v3049_v21 = vld [vmem:[%s11841_s11 + $0x150] sm:$0xff] }
 0x4c4   :  { %6819 = vmatprep.subr.bf16.mxu0 %v6818_v7  ;;  %v6750_v7 = vpack.c.bf16 %v3012_v59, %v3008_v0  ;;  %v3053_v32 = vld [vmem:[%s11841_s11 + $0x170] sm:$0xff] }
 0x4c5   :  { %v3057_v59 = vld [vmem:[%s11841_s11 + $0x190] sm:$0xff] }
 0x4c6   :  { %6751 = vmatprep.subr.bf16.mxu1 %v6750_v7  ;;  %v3065_v7 = vld [vmem:[%s11841_s11 + $0x1d0] sm:$0xff] }
 0x4ca   :  { %6006 = vmatmul.mubr.msk.f32.gmra.mrb[58].mxu0 %vm2156_vm1, %v6216_v13  ;;  %v3017_v13 = vld [vmem:[%s11841_s11 + $0x50] sm:$0xff] }
 0x4cb   :  { %2709 = vmatprep.mubr.f32.mxu0 %v12020_v60 }
 0x4d2   :  { %6007 = vmatmul.mubr.msk.f32.gmra.mrb[58].mxu0 %vm2156_vm1, %v6219_v62  ;;  %v3021_v62 = vld [vmem:[%s11841_s11 + $0x70] sm:$0xff] }
 0x4d3   :  { %2715 = vmatprep.mubr.f32.mxu0 %v12020_v60 }
 0x4da   :  { %6008 = vmatmul.mubr.msk.f32.gmra.mrb[58].mxu0 %vm2156_vm1, %v6222_v18  ;;  %v3026_v18 = vld [vmem:[%s11841_s11 + $0x98] sm:$0xff] }
 0x4db   :  { %2721 = vmatprep.mubr.f32.mxu0 %v12020_v60  ;;  %v6822_v1 = vpack.c.bf16 %v3030_v40, %v3026_v18  ;;  %v3050_v18 = vld [vmem:[%s11841_s11 + $0x158] sm:$0xff]  ;;  %v3016_v40 = vld [vmem:[%s11841_s11 + $0x48] sm:$0xff] }
 0x4e2   :  { %6009 = vmatmul.mubr.msk.f32.gmra.mrb[58].mxu0 %vm2156_vm1, %v6225_v48  ;;  %v6820_v48 = vpack.c.bf16 %v3021_v62, %v3017_v13  ;;  %v6752_v13 = vpack.c.bf16 %v3011_v35, %v3007_v46  ;;  %v3061_v46 = vld [vmem:[%s11841_s11 + $0x1b0] sm:$0xff]  ;;  %v3066_v35 = vld [vmem:[%s11841_s11 + $0x1d8] sm:$0xff] }
 0x4e3   :  { %2727 = vmatprep.mubr.f32.mxu0 %v12020_v60 }
 0x4e4   :  { %6821 = vmatpush1.bf16.msra.mxu0 %v6820_v48  ;;  %v3020_v48 = vld [vmem:[%s11841_s11 + $0x68] sm:$0xff]  ;;  %6753 = vmatpush1.bf16.msra.mxu1 %v6752_v13  ;;  %v3069_v13 = vld [vmem:[%s11841_s11 + $0x1f0] sm:$0xff] }
 0x4e5   :  { %6823 = vmatprep.subr.bf16.mxu0 %v6822_v1  ;;  %v3054_v1 = vld [vmem:[%s11841_s11 + $0x178] sm:$0xff] }
 0x4ea   :  { %6010 = vmatmul.mubr.msk.f32.gmra.mrb[58].mxu0 %vm2156_vm1, %v6228_v52  ;;  %v3029_v52 = vld [vmem:[%s11841_s11 + $0xb0] sm:$0xff] }
 0x4eb   :  { %2733 = vmatprep.mubr.f32.mxu0 %v12020_v60  ;;  %v6824_v20 = vpack.c.bf16 %v3029_v52, %v3025_v47  ;;  %v6754_v47 = vpack.c.bf16 %v3020_v48, %v3016_v40  ;;  %v3015_v52 = vld [vmem:[%s11841_s11 + $0x40] sm:$0xff]  ;;  %v3073_v48 = vld [vmem:[%s11841_s11 + $0x210] sm:$0xff] }
 0x4ec   :  { %v6756_v36 = vpack.c.bf16 %v3019_v38, %v3015_v52 }
 0x4ed   :  { %6825 = vmatpush1.bf16.msra.mxu0 %v6824_v20  ;;  %v6832_v20 = vpack.c.bf16 %v3045_v23, %v3041_v56  ;;  %6755 = vmatprep.subr.bf16.mxu1 %v6754_v47  ;;  %v6840_v56 = vpack.c.bf16 %v3061_v46, %v3057_v59  ;;  %v3031_v59 = vld [vmem:[%s11841_s11 + $0xc0] sm:$0xff] }
 0x4ee   :  { %6827 = vmatprep.subr.bf16.mxu0 %v6826_v33  ;;  %v6834_v33 = vpack.c.bf16 %v3054_v1, %v3050_v18  ;;  %6757 = vmatpush1.bf16.msra.mxu1 %v6756_v36  ;;  %v3078_v18 = vld [vmem:[%s11841_s11 + $0x238] sm:$0xff]  ;;  %v3077_v1 = vld [vmem:[%s11841_s11 + $0x230] sm:$0xff]  ;;  %v3024_v36 = vld [vmem:[%s11841_s11 + $0x88] sm:$0xff] }
 0x4ef   :  { %v6848_v47 = vpack.c.bf16 %v3077_v1, %v3073_v48  ;;  %v3035_v46 = vld [vmem:[%s11841_s11 + $0xe0] sm:$0xff] }
 0x4f0   :  { %v3047_v48 = vld [vmem:[%s11841_s11 + $0x140] sm:$0xff] }
 0x4f1   :  { %6829 = vmatpush1.bf16.msra.mxu0 %v6828_v2  ;;  %v3070_v2 = vld [vmem:[%s11841_s11 + $0x1f8] sm:$0xff]  ;;  %v3051_v1 = vld [vmem:[%s11841_s11 + $0x160] sm:$0xff] }
 0x4f2   :  { %6011 = vmatmul.mubr.msk.f32.gmra.mrb[58].mxu0 %vm2156_vm1, %v6231_v50  ;;  %v3046_v50 = vld [vmem:[%s11841_s11 + $0x138] sm:$0xff]  ;;  %v6842_v23 = vpack.c.bf16 %v3070_v2, %v3066_v35  ;;  %v6764_v35 = vpack.c.bf16 %v3035_v46, %v3031_v59  ;;  %v3040_v2 = vld [vmem:[%s11841_s11 + $0x108] sm:$0xff]  ;;  %v3089_v59 = vld [vmem:[%s11841_s11 + $0x290] sm:$0xff] }
 0x4f3   :  { %2739 = vmatprep.mubr.f32.mxu0 %v12020_v60  ;;  %v6830_v62 = vpack.c.bf16 %v3046_v50, %v3042_v30  ;;  %v3058_v30 = vld [vmem:[%s11841_s11 + $0x198] sm:$0xff]  ;;  %v6836_v50 = vpack.c.bf16 %v3053_v32, %v3049_v21  ;;  %v3023_v21 = vld [vmem:[%s11841_s11 + $0x80] sm:$0xff]  ;;  %v3093_v46 = vld [vmem:[%s11841_s11 + $0x2b0] sm:$0xff] }
 0x4f4   :  { %v3027_v32 = vld [vmem:[%s11841_s11 + $0xa0] sm:$0xff] }
 0x4f5   :  { %6831 = vmatprep.subr.bf16.mxu0 %v6830_v62  ;;  %v3074_v62 = vld [vmem:[%s11841_s11 + $0x218] sm:$0xff] }
 0x4f6   :  { %6833 = vmatpush1.bf16.msra.mxu0 %v6832_v20  ;;  %v6846_v40 = vpack.c.bf16 %v3078_v18, %v3074_v62  ;;  %v3028_v20 = vld [vmem:[%s11841_s11 + $0xa8] sm:$0xff] }
 0x4f7   :  { %6835 = vmatprep.subr.bf16.mxu0 %v6834_v33  ;;  %v6758_v33 = vpack.c.bf16 %v3028_v20, %v3024_v36  ;;  %v3048_v18 = vld [vmem:[%s11841_s11 + $0x148] sm:$0xff]  ;;  %v3082_v36 = vld [vmem:[%s11841_s11 + $0x258] sm:$0xff] }
 0x4f8   :  { %v3086_v20 = vld [vmem:[%s11841_s11 + $0x278] sm:$0xff] }
 0x4f9   :  { %6759 = vmatprep.subr.bf16.mxu1 %v6758_v33  ;;  %v3081_v33 = vld [vmem:[%s11841_s11 + $0x250] sm:$0xff] }
 0x4fa   :  { %6012 = vmatmul.mubr.msk.f32.gmra.mrb[58].mxu0 %vm2156_vm1, %v9264_v61  ;;  %v3062_v61 = vld [vmem:[%s11841_s11 + $0x1b8] sm:$0xff] }
 0x4fb   :  { %2745 = vmatprep.mubr.f32.mxu0 %v12020_v60  ;;  %v6838_v0 = vpack.c.bf16 %v3062_v61, %v3058_v30  ;;  %6837 = vmatpush1.bf16.msra.mxu0 %v6836_v50  ;;  %v6760_v30 = vpack.c.bf16 %v3027_v32, %v3023_v21  ;;  %v3032_v61 = vld [vmem:[%s11841_s11 + $0xc8] sm:$0xff]  ;;  %v6850_v21 = vpack.c.bf16 %v3086_v20, %v3082_v36  ;;  %v3085_v32 = vld [vmem:[%s11841_s11 + $0x270] sm:$0xff] }
 0x4fc   :  { %v3036_v50 = vld [vmem:[%s11841_s11 + $0xe8] sm:$0xff] }
 0x4fd   :  { %6839 = vmatprep.subr.bf16.mxu0 %v6838_v0  ;;  %6761 = vmatpush1.bf16.msra.mxu1 %v6760_v30  ;;  %v6762_v0 = vpack.c.bf16 %v3036_v50, %v3032_v61  ;;  %v3090_v30 = vld [vmem:[%s11841_s11 + $0x298] sm:$0xff]  ;;  %v6852_v50 = vpack.c.bf16 %v3085_v32, %v3081_v33  ;;  %v3068_v36 = vld [vmem:[%s11841_s11 + $0x1e8] sm:$0xff]  ;;  %v3063_v33 = vld [vmem:[%s11841_s11 + $0x1c0] sm:$0xff] }
 0x4fe   :  { %v3094_v61 = vld [vmem:[%s11841_s11 + $0x2b8] sm:$0xff]  ;;  %v3072_v32 = vld [vmem:[%s11841_s11 + $0x208] sm:$0xff] }
 0x4ff   :  { %6841 = vmatpush1.bf16.msra.mxu0 %v6840_v56  ;;  %6763 = vmatprep.subr.bf16.mxu1 %v6762_v0  ;;  %v3044_v56 = vld [vmem:[%s11841_s11 + $0x128] sm:$0xff]  ;;  %v6854_v0 = vpack.c.bf16 %v3094_v61, %v3090_v30 }
 0x500   :  { %6843 = vmatprep.subr.bf16.mxu0 %v6842_v23  ;;  %v6766_v23 = vpack.c.bf16 %v3044_v56, %v3040_v2  ;;  %v3060_v2 = vld [vmem:[%s11841_s11 + $0x1a8] sm:$0xff]  ;;  %v3055_v56 = vld [vmem:[%s11841_s11 + $0x180] sm:$0xff] }
 0x501   :  { %6765 = vmatpush1.bf16.msra.mxu1 %v6764_v35  ;;  %v3056_v35 = vld [vmem:[%s11841_s11 + $0x188] sm:$0xff] }
 0x502   :  { %6013 = vmatmul.mubr.msk.f32.gmra.mrb[58].mxu0 %vm2156_vm1, %v9268_v31  ;;  %v6844_v31 = vpack.c.bf16 %v3069_v13, %v3065_v7  ;;  %v3039_v7 = vld [vmem:[%s11841_s11 + $0x100] sm:$0xff]  ;;  %6767 = vmatprep.subr.bf16.mxu1 %v6766_v23  ;;  %v3076_v61 = vld [vmem:[%s11841_s11 + $0x228] sm:$0xff] }
 0x503   :  { %v3043_v13 = vld [vmem:[%s11841_s11 + $0x120] sm:$0xff] }
 0x504   :  { %6845 = vmatpush1.bf16.msra.mxu0 %v6844_v31  ;;  %v6768_v62 = vpack.c.bf16 %v3043_v13, %v3039_v7  ;;  %v3052_v31 = vld [vmem:[%s11841_s11 + $0x168] sm:$0xff]  ;;  %v3059_v23 = vld [vmem:[%s11841_s11 + $0x1a0] sm:$0xff]  ;;  %v6856_v7 = vpack.c.bf16 %v3093_v46, %v3089_v59  ;;  %v6774_v13 = vpack.c.bf16 %v3060_v2, %v3056_v35  ;;  %v6782_v46 = vpack.c.bf16 %v3076_v61, %v3072_v32  ;;  %v3106_v35 = vld [vmem:[%s11841_s11 + $0x318] sm:$0xff] }
 0x505   :  { %6847 = vmatprep.subr.bf16.mxu0 %v6846_v40  ;;  %v6770_v40 = vpack.c.bf16 %v3052_v31, %v3048_v18  ;;  %v3098_v18 = vld [vmem:[%s11841_s11 + $0x2d8] sm:$0xff]  ;;  %v3113_v32 = vld [vmem:[%s11841_s11 + $0x350] sm:$0xff] }
 0x506   :  { %6769 = vmatpush1.bf16.msra.mxu1 %v6768_v62  ;;  %v6776_v62 = vpack.c.bf16 %v3059_v23, %v3055_v56  ;;  %v3102_v31 = vld [vmem:[%s11841_s11 + $0x2f8] sm:$0xff]  ;;  %v3105_v56 = vld [vmem:[%s11841_s11 + $0x310] sm:$0xff] }
 0x507   :  { %6771 = vmatprep.subr.bf16.mxu1 %v6770_v40  ;;  %v3097_v40 = vld [vmem:[%s11841_s11 + $0x2d0] sm:$0xff]  ;;  %v3110_v2 = vld [vmem:[%s11841_s11 + $0x338] sm:$0xff] }
 0x508   :  { %6849 = vmatpush1.bf16.msra.mxu0 %v6848_v47  ;;  %v6772_v47 = vpack.c.bf16 %v3051_v1, %v3047_v48  ;;  %v6858_v48 = vpack.c.bf16 %v3102_v31, %v3098_v18  ;;  %v3101_v1 = vld [vmem:[%s11841_s11 + $0x2f0] sm:$0xff]  ;;  %v6862_v23 = vpack.c.bf16 %v3110_v2, %v3106_v35  ;;  %v3079_v31 = vld [vmem:[%s11841_s11 + $0x240] sm:$0xff]  ;;  %v3096_v35 = vld [vmem:[%s11841_s11 + $0x2c8] sm:$0xff] }
 0x509   :  { %6851 = vmatprep.subr.bf16.mxu0 %v6850_v21  ;;  %v3067_v21 = vld [vmem:[%s11841_s11 + $0x1e0] sm:$0xff]  ;;  %v6860_v59 = vpack.c.bf16 %v3101_v1, %v3097_v40  ;;  %v3122_v2 = vld [vmem:[%s11841_s11 + $0x398] sm:$0xff] }
 0x50a   :  { %6773 = vmatpush1.bf16.msra.mxu1 %v6772_v47  ;;  %v3064_v47 = vld [vmem:[%s11841_s11 + $0x1c8] sm:$0xff]  ;;  %v6780_v30 = vpack.c.bf16 %v3067_v21, %v3063_v33  ;;  %v3083_v40 = vld [vmem:[%s11841_s11 + $0x260] sm:$0xff] }
 0x50b   :  { %6775 = vmatprep.subr.bf16.mxu1 %v6774_v13  ;;  %v6778_v20 = vpack.c.bf16 %v3068_v36, %v3064_v47  ;;  %v3080_v13 = vld [vmem:[%s11841_s11 + $0x248] sm:$0xff]  ;;  %v3114_v36 = vld [vmem:[%s11841_s11 + $0x358] sm:$0xff]  ;;  %v6788_v61 = vpack.c.bf16 %v3083_v40, %v3079_v31  ;;  %v3095_v31 = vld [vmem:[%s11841_s11 + $0x2c0] sm:$0xff] }
 0x50c   :  { %6853 = vmatpush1.bf16.msra.mxu0 %v6852_v50  ;;  %v3071_v50 = vld [vmem:[%s11841_s11 + $0x200] sm:$0xff]  ;;  %v3088_v47 = vld [vmem:[%s11841_s11 + $0x288] sm:$0xff] }
 0x50d   :  { %6855 = vmatprep.subr.bf16.mxu0 %v6854_v0  ;;  %v3075_v0 = vld [vmem:[%s11841_s11 + $0x220] sm:$0xff]  ;;  %v3092_v33 = vld [vmem:[%s11841_s11 + $0x2a8] sm:$0xff] }
 0x50e   :  { %6777 = vmatpush1.bf16.msra.mxu1 %v6776_v62  ;;  %v3084_v62 = vld [vmem:[%s11841_s11 + $0x268] sm:$0xff]  ;;  %v6784_v18 = vpack.c.bf16 %v3075_v0, %v3071_v50  ;;  %v3087_v50 = vld [vmem:[%s11841_s11 + $0x280] sm:$0xff] }
 0x50f   :  { %6779 = vmatprep.subr.bf16.mxu1 %v6778_v20  ;;  %v6786_v1 = vpack.c.bf16 %v3084_v62, %v3080_v13  ;;  %v3118_v20 = vld [vmem:[%s11841_s11 + $0x378] sm:$0xff]  ;;  %v3091_v0 = vld [vmem:[%s11841_s11 + $0x2a0] sm:$0xff]  ;;  %v3121_v13 = vld [vmem:[%s11841_s11 + $0x390] sm:$0xff] }
 0x510   :  { %6857 = vmatpush1.bf16.msra.mxu0 %v6856_v7  ;;  %v3109_v7 = vld [vmem:[%s11841_s11 + $0x330] sm:$0xff]  ;;  %v6866_v21 = vpack.c.bf16 %v3118_v20, %v3114_v36  ;;  %v3099_v40 = vld [vmem:[%s11841_s11 + $0x2e0] sm:$0xff]  ;;  %v3130_v36 = vld [vmem:[%s11841_s11 + $0x3d8] sm:$0xff] }
 0x511   :  { %6859 = vmatprep.subr.bf16.mxu0 %v6858_v48  ;;  %v6864_v48 = vpack.c.bf16 %v3109_v7, %v3105_v56  ;;  %v3126_v56 = vld [vmem:[%s11841_s11 + $0x3b8] sm:$0xff]  ;;  %v3125_v62 = vld [vmem:[%s11841_s11 + $0x3b0] sm:$0xff] }
 0x512   :  { %6781 = vmatpush1.bf16.msra.mxu1 %v6780_v30  ;;  %v3117_v30 = vld [vmem:[%s11841_s11 + $0x370] sm:$0xff]  ;;  %v6870_v7 = vpack.c.bf16 %v3126_v56, %v3122_v2  ;;  %v3134_v20 = vld [vmem:[%s11841_s11 + $0x3f8] sm:$0xff]  ;;  %v3116_v2 = vld [vmem:[%s11841_s11 + $0x368] sm:$0xff] }
 0x513   :  { %6783 = vmatprep.subr.bf16.mxu1 %v6782_v46  ;;  %v6868_v46 = vpack.c.bf16 %v3117_v30, %v3113_v32  ;;  %v3129_v32 = vld [vmem:[%s11841_s11 + $0x3d0] sm:$0xff] }
 0x514   :  { %6861 = vmatpush1.bf16.msra.mxu0 %v6860_v59  ;;  %v6790_v59 = vpack.c.bf16 %v3092_v33, %v3088_v47  ;;  %v6872_v47 = vpack.c.bf16 %v3125_v62, %v3121_v13  ;;  %v3108_v33 = vld [vmem:[%s11841_s11 + $0x328] sm:$0xff]  ;;  %v3133_v30 = vld [vmem:[%s11841_s11 + $0x3f0] sm:$0xff]  ;;  %v3115_v13 = vld [vmem:[%s11841_s11 + $0x360] sm:$0xff] }
 0x515   :  { %6863 = vmatprep.subr.bf16.mxu0 %v6862_v23  ;;  %v3100_v23 = vld [vmem:[%s11841_s11 + $0x2e8] sm:$0xff] }
 0x516   :  { %6785 = vmatpush1.bf16.msra.mxu1 %v6784_v18  ;;  %v6792_v18 = vpack.c.bf16 %v3091_v0, %v3087_v50  ;;  %v3103_v0 = vld [vmem:[%s11841_s11 + $0x300] sm:$0xff]  ;;  %v3120_v62 = vld [vmem:[%s11841_s11 + $0x388] sm:$0xff] }
 0x517   :  { %6787 = vmatprep.subr.bf16.mxu1 %v6786_v1  ;;  %v3104_v1 = vld [vmem:[%s11841_s11 + $0x308] sm:$0xff] }
 0x518   :  { %6865 = vmatpush1.bf16.msra.mxu0 %v6864_v48  ;;  %v6794_v48 = vpack.c.bf16 %v3100_v23, %v3096_v35  ;;  %v6798_v50 = vpack.c.bf16 %v3108_v33, %v3104_v1  ;;  %v3112_v35 = vld [vmem:[%s11841_s11 + $0x348] sm:$0xff]  ;;  %v3123_v1 = vld [vmem:[%s11841_s11 + $0x3a0] sm:$0xff] }
 0x519   :  { %6867 = vmatprep.subr.bf16.mxu0 %v6866_v21  ;;  %v6874_v21 = vpack.c.bf16 %v3134_v20, %v3130_v36  ;;  %v6802_v23 = vpack.c.bf16 %v3116_v2, %v3112_v35  ;;  %v3132_v36 = vld [vmem:[%s11841_s11 + $0x3e8] sm:$0xff]  ;;  %v3527_v2 = vld [vmem:[%s11845_s15 + $0x180] sm:$0xff] }
 0x51a   :  { %6789 = vmatpush1.bf16.msra.mxu1 %v6788_v61  ;;  %v6796_v61 = vpack.c.bf16 %v3099_v40, %v3095_v31  ;;  %v3496_v35 = vld [vmem:[%s11845_s15 + $0x88] sm:$0xff] }
 0x51b   :  { %6791 = vmatprep.subr.bf16.mxu1 %v6790_v59  ;;  %v3107_v59 = vld [vmem:[%s11841_s11 + $0x320] sm:$0xff] }
 0x51c   :  { %6869 = vmatpush1.bf16.msra.mxu0 %v6868_v46  ;;  %v6876_v46 = vpack.c.bf16 %v3133_v30, %v3129_v32  ;;  %v6800_v56 = vpack.c.bf16 %v3107_v59, %v3103_v0  ;;  %v3131_v32 = vld [vmem:[%s11841_s11 + $0x3e0] sm:$0xff] }
 0x51d   :  { %6871 = vmatprep.subr.bf16.mxu0 %v6870_v7  ;;  %v3111_v7 = vld [vmem:[%s11841_s11 + $0x340] sm:$0xff] }
 0x51e   :  { %6793 = vmatpush1.bf16.msra.mxu1 %v6792_v18  ;;  %v3124_v18 = vld [vmem:[%s11841_s11 + $0x3a8] sm:$0xff]  ;;  %v6804_v31 = vpack.c.bf16 %v3115_v13, %v3111_v7 }
 0x51f   :  { %6795 = vmatprep.subr.bf16.mxu1 %v6794_v48  ;;  %v6806_v40 = vpack.c.bf16 %v3124_v18, %v3120_v62  ;;  %v3119_v48 = vld [vmem:[%s11841_s11 + $0x380] sm:$0xff] }
 0x520   :  { %6873 = vmatpush1.bf16.msra.mxu0 %v6872_v47  ;;  %v3128_v47 = vld [vmem:[%s11841_s11 + $0x3c8] sm:$0xff]  ;;  %v6808_v20 = vpack.c.bf16 %v3123_v1, %v3119_v48 }
 0x521   :  { %6875 = vmatprep.subr.bf16.mxu0 %v6874_v21  ;;  %v6810_v33 = vpack.c.bf16 %v3132_v36, %v3128_v47  ;;  %v3127_v21 = vld [vmem:[%s11841_s11 + $0x3c0] sm:$0xff] }
 0x522   :  { %6797 = vmatpush1.bf16.msra.mxu1 %v6796_v61  ;;  %v6812_v30 = vpack.c.bf16 %v3131_v32, %v3127_v21 }
 0x523   :  { %6799 = vmatprep.subr.bf16.mxu1 %v6798_v50 }
 0x524   :  { %6877 = vmatpush1.bf16.msra.mxu0 %v6876_v46  ;;  %v3495_v46 = vld [vmem:[%s11845_s15 + $0x80] sm:$0xff] }
 0x526   :  { %6801 = vmatpush1.bf16.msra.mxu1 %v6800_v56  ;;  %v9702_v56 = vpack.c.bf16 %v3496_v35, %v3495_v46 }
 0x527   :  { %6803 = vmatprep.subr.bf16.mxu1 %v6802_v23 }
 0x528   :  { %12034 = vst [vmem:[#allocation44_spill] sm:$0xff] %v9702_v56 }
 0x52a   :  { %6805 = vmatpush1.bf16.msra.mxu1 %v6804_v31 }
 0x52b   :  { %6807 = vmatprep.subr.bf16.mxu1 %v6806_v40 }
 0x52e   :  { %6809 = vmatpush1.bf16.msra.mxu1 %v6808_v20 }
 0x52f   :  { %6811 = vmatprep.subr.bf16.mxu1 %v6810_v33 }
 0x532   :  { %6813 = vmatpush1.bf16.msra.mxu1 %v6812_v30 }
 0x533   :  { %6879 = vmatprep.subr.bf16.mxu1 %v9702_v56 }
 0x559   :  { %v9433_v52 = vpop.f32.mrb[56].mxu0 }
 0x55a   :  { %v9435_v38 = vpop.f32.mrb[57].mxu0  ;;  %v2767_v61 = vrot.slane %v9433_v52, 4 }
 0x55b   :  { %v2788_v50 = vrot.slane %v9435_v38, 4 }
 0x55c   :  { %v2768_v0 = vadd.f32 %v2767_v61, %v9433_v52  ;;  %v3528_v52 = vld [vmem:[%s11845_s15 + $0x188] sm:$0xff] }
 0x55d   :  { %v2789_v59 = vadd.f32 %v2788_v50, %v9435_v38  ;;  %v9707_v23 = vpack.c.bf16 %v3528_v52, %v3527_v2 }
 0x55e   :  { %v2769_v38 = vrot.slane %v2768_v0, 2 }
 0x55f   :  { %12035 = vst [vmem:[#allocation39_spill] sm:$0xff] %v9707_v23  ;;  %v2790_v7 = vrot.slane %v2789_v59, 2  ;;  %6911 = vmatprep.subr.bf16.mxu0 %v9707_v23 }
 0x560   :  { %v2770_v13 = vadd.f32 %v2769_v38, %v2768_v0 }
 0x561   :  { %v2791_v62 = vadd.f32 %v2790_v7, %v2789_v59 }
 0x562   :  { %v2771_v31 = vrot.slane %v2770_v13, 1 }
 0x563   :  { %v2792_v1 = vrot.slane %v2791_v62, 1 }
 0x564   :  { %v2772_v33 = vadd.f32 %v2771_v31, %v2770_v13 }
 0x565   :  { %v2793_v32 = vadd.f32 %v2792_v1, %v2791_v62  ;;  %v2009_v1 = vld [vmem:[#allocation13] sm:$0x3] }
 0x566   :  { %v2795_v46 = vmul.f32 0.001953125, %v2772_v33 }
 0x567   :  { %v2796_v2 = vmul.f32 0.001953125, %v2793_v32  ;;  %v3498_v32 = vld [vmem:[%s11845_s15 + $0x98] sm:$0xff] }
 0x568   :  { %v2841_v38 = vmul.f32 %v2795_v46, %v2795_v46 }
 0x569   :  { %v2842_v60 = vmul.f32 %v2796_v2, %v2796_v2 }
 0x5d5   :  { %v2747_v18 = vpop.f32.mrb[58].mxu0 }
 0x5d6   :  { %v2812_v40 = vrot.slane %v2747_v18, 4  ;;  %v2749_v48 = vpop.f32.mrb[59].mxu0 }
 0x5d7   :  { %v2833_v47 = vrot.slane %v2749_v48, 4 }
 0x5d8   :  { %v2813_v36 = vadd.f32 %v2812_v40, %v2747_v18 }
 0x5d9   :  { %v2834_v20 = vadd.f32 %v2833_v47, %v2749_v48 }
 0x5da   :  { %v2814_v21 = vrot.slane %v2813_v36, 2 }
 0x5db   :  { %v2835_v30 = vrot.slane %v2834_v20, 2 }
 0x5dc   :  { %v2815_v61 = vadd.f32 %v2814_v21, %v2813_v36  ;;  %v3497_v21 = vld [vmem:[%s11845_s15 + $0x90] sm:$0xff] }
 0x5dd   :  { %v2836_v50 = vadd.f32 %v2835_v30, %v2834_v20  ;;  %v3529_v30 = vld [vmem:[%s11845_s15 + $0x190] sm:$0xff]  ;;  %v9788_v27 = vpack.c.bf16 %v3498_v32, %v3497_v21 }
 0x5de   :  { %v2816_v35 = vrot.slane %v2815_v61, 1 }
 0x5df   :  { %v2837_v52 = vrot.slane %v2836_v50, 1  ;;  %12036 = vst [vmem:[#allocation41_spill] sm:$0xff] %v9788_v27 }
 0x5e0   :  { %v2817_v0 = vadd.f32 %v2816_v35, %v2815_v61  ;;  %v3530_v61 = vld [vmem:[%s11845_s15 + $0x198] sm:$0xff] }
 0x5e1   :  { %v2838_v59 = vadd.f32 %v2837_v52, %v2836_v50  ;;  %v3481_v50 = vld [vmem:[%s11845_s15 + $0x10] sm:$0xff]  ;;  %v3482_v35 = vld [vmem:[%s11845_s15 + $0x18] sm:$0xff] }
 0x5e2   :  { %v2839_v7 = vmul.f32 0.001953125, %v2817_v0  ;;  %v3513_v52 = vld [vmem:[%s11845_s15 + $0x110] sm:$0xff]  ;;  %v3514_v0 = vld [vmem:[%s11845_s15 + $0x118] sm:$0xff] }
 0x5e3   :  { %v2840_v23 = vmul.f32 0.001953125, %v2838_v59 }
 0x5e4   :  { %v2843_v56 = vsub.f32 %v2839_v7, %v2841_v38  ;;  %v3499_v7 = vld [vmem:[%s11845_s15 + $0xa0] sm:$0xff] }
 0x5e5   :  { %v2844_v24 = vsub.f32 %v2840_v23, %v2842_v60  ;;  %v3480_v60 = vld [vmem:[%s11845_s15 + $0x8] sm:$0xff] }
 0x5e6   :  { %v2845_v18 = vadd.f32 1e-05, %v2843_v56  ;;  %v3511_v56 = vld [vmem:[%s11845_s15 + $0x100] sm:$0xff]  ;;  %v3512_v23 = vld [vmem:[%s11845_s15 + $0x108] sm:$0xff] }
 0x5e7   :  { %v2846_v40 = vadd.f32 1e-05, %v2844_v24  ;;  %v3479_v24 = vld [vmem:[%s11845_s15] sm:$0xff] }
 0x5e8   :  { %7478 = vrsqrt.f32 %v2845_v18  ;;  %v3500_v18 = vld [vmem:[%s11845_s15 + $0xa8] sm:$0xff] }
 0x5e9   :  { %7480 = vrsqrt.f32 %v2846_v40  ;;  %v3531_v40 = vld [vmem:[%s11845_s15 + $0x1a0] sm:$0xff]  ;;  %v9806_v21 = vpack.c.bf16 %v3500_v18, %v3499_v7 }
 0x5f2   :  { %v7479_v13 = vpop.eup %7478 }
 0x5f3   :  { %v7481_v62 = vpop.eup %7480 }
 0x5f4   :  { %v2851_v31 = vcombine.low %v7479_v13, %v7481_v62  ;;  %v3532_v13 = vld [vmem:[%s11845_s15 + $0x1a8] sm:$0xff] }
 0x5f5   :  { %v9808_v32 = vpack.c.bf16 %v3532_v13, %v3531_v40 }
 0x5f6   :  { %v2858_v48 = vrot.slane %v2851_v31, %v8553_v55  ;;  %v3515_v31 = vld [vmem:[%s11845_s15 + $0x120] sm:$0xff] }
 0x5f8   :  { %v2865_v47 = vrot.slane %v2858_v48, %v8553_v55  ;;  %v3516_v48 = vld [vmem:[%s11845_s15 + $0x128] sm:$0xff] }
 0x5f9   :  { %v9812_v53 = vpack.c.bf16 %v3516_v48, %v3515_v31 }
 0x5fa   :  { %v2867_v36 = vmul.f32 %v2865_v47, %v2009_v1  ;;  %v3501_v1 = vld [vmem:[%s11845_s15 + $0xb0] sm:$0xff]  ;;  %v9784_v47 = vpack.c.bf16 %v3480_v60, %v3479_v24  ;;  %v9800_v24 = vpack.c.bf16 %v3530_v61, %v3529_v30  ;;  %v9802_v60 = vpack.c.bf16 %v3482_v35, %v3481_v50 }
 0x5fc   :  { %v9714_v20 = vrot.slane %v2867_v36, %v8394_v22  ;;  %v9717_v33 = vrot.slane %v2867_v36, %v8402_v25  ;;  %v9786_v36 = vpack.c.bf16 %v3512_v23, %v3511_v56  ;;  %v9804_v56 = vpack.c.bf16 %v3514_v0, %v3513_v52  ;;  %v2010_v23 = vld [vmem:[#allocation14] sm:$0x3] }
 0x5fe   :  { %v2879_v59 = vmul.f32 %v9714_v20, %v2795_v46  ;;  %v2880_v38 = vmul.f32 %v9717_v33, %v2796_v2  ;;  %v3483_v46 = vld [vmem:[%s11845_s15 + $0x20] sm:$0xff]  ;;  %v3484_v2 = vld [vmem:[%s11845_s15 + $0x28] sm:$0xff]  ;;  %v2900_v50 = vmul.f32 %v9714_v20, %v9000_v43  ;;  %v2903_v35 = vmul.f32 %v9717_v33, %v9005_v16 }
 0x5ff   :  { %v9810_v15 = vpack.c.bf16 %v3484_v2, %v3483_v46  ;;  %v2902_v52 = vmul.f32 %v9714_v20, %v9008_v37  ;;  %v2905_v0 = vmul.f32 %v9717_v33, %v9017_v9  ;;  %v2906_v7 = vmul.f32 %v9714_v20, %v9034_v29 }
 0x600   :  { %v2883_v62 = vcombine.low %v2879_v59, %v2880_v38  ;;  %v3502_v59 = vld [vmem:[%s11845_s15 + $0xb8] sm:$0xff]  ;;  %v3533_v38 = vld [vmem:[%s11845_s15 + $0x1b0] sm:$0xff]  ;;  %v2909_v43 = vmul.f32 %v9717_v33, %v9045_v17  ;;  %v2908_v16 = vmul.f32 %v9714_v20, %v9048_v49  ;;  %v2911_v37 = vmul.f32 %v9717_v33, %v9057_v6 }
 0x601   :  { %v9817_v30 = vpack.c.bf16 %v3502_v59, %v3501_v1  ;;  %v9819_v61 = vpack.c.bf16 %v3534_v51, %v3533_v38  ;;  %v2907_v51 = vmul.f32 %v9717_v33, %v9031_v4  ;;  %v2913_v4 = vmul.f32 %v9717_v33, %v9066_v14 }
 0x602   :  { %v2890_v19 = vrot.slane %v2883_v62, %v8553_v55  ;;  %v2901_v62 = vmul.f32 %v9717_v33, %v8997_v63  ;;  %v2904_v63 = vmul.f32 %v9714_v20, %v9020_v58  ;;  %v2912_v29 = vmul.f32 %v9714_v20, %v9069_v12 }
 0x603   :  { %v2915_v17 = vmul.f32 %v9717_v33, %v9074_v41  ;;  %v2914_v49 = vmul.f32 %v9714_v20, %v9077_v42  ;;  %v2917_v6 = vmul.f32 %v9717_v33, %v9083_v44  ;;  %v2919_v2 = vmul.f32 %v9717_v33, %v9091_v10 }
 0x604   :  { %v2897_v27 = vrot.slane %v2890_v19, %v8553_v55  ;;  %v2918_v31 = vmul.f32 %v9714_v20, %v9095_v3  ;;  %v2921_v48 = vmul.f32 %v9717_v33, %v9101_v45  ;;  %v2920_v1 = vmul.f32 %v9714_v20, %v9105_v5 }
 0x605   :  { %v2923_v59 = vmul.f32 %v9717_v33, %v9111_v11  ;;  %v2922_v38 = vmul.f32 %v9714_v20, %v9115_v39 }
 0x606   :  { %v2899_v19 = vsub.f32 %v2010_v23, %v2897_v27  ;;  %v2910_v27 = vmul.f32 %v9714_v20, %v9060_v26  ;;  %v2916_v26 = vmul.f32 %v9714_v20, %v9086_v8 }
 0x608   :  { %v9844_v9 = vrot.slane %v2899_v19, %v8394_v22  ;;  %v9847_v58 = vrot.slane %v2899_v19, %v8402_v25  ;;  %v2927_v19 = vmul.f32 %v9717_v33, %v9131_v28 }
 0x60a   :  { %v2944_v18 = vadd.f32 %v9847_v58, %v2901_v62  ;;  %v2943_v40 = vadd.f32 %v9844_v9, %v2900_v50  ;;  %v2946_v14 = vadd.f32 %v9847_v58, %v2903_v35  ;;  %v2945_v12 = vadd.f32 %v9844_v9, %v2902_v52 }
 0x60b   :  { %v2948_v13 = vadd.f32 %v9847_v58, %v2905_v0  ;;  %v9867_v41 = vadd.f32 %v9844_v9, %v2904_v63  ;;  %v9870_v42 = vadd.f32 %v9847_v58, %v2907_v51  ;;  %v9873_v44 = vadd.f32 %v9844_v9, %v2906_v7 }
 0x60c   :  { %v2976_v8 = vmax.f32 %v2944_v18, 0.0  ;;  %v2975_v46 = vmax.f32 %v2943_v40, 0.0  ;;  %v2978_v23 = vmax.f32 %v2946_v14, 0.0  ;;  %v9888_v10 = vadd.f32 %v9847_v58, %v2909_v43  ;;  %v12037_v43 = vld [vmem:[#allocation41_spill] sm:$0xff]  ;;  %v12041_v40 = vld [vmem:[#allocation40_spill] sm:$0xff] }
 0x60d   :  { %v9891_v3 = vadd.f32 %v9844_v9, %v2908_v16  ;;  %v9894_v45 = vadd.f32 %v9847_v58, %v2911_v37  ;;  %v9897_v5 = vadd.f32 %v9844_v9, %v2910_v27  ;;  %v9900_v11 = vadd.f32 %v9847_v58, %v2913_v4  ;;  %v12038_v27 = vld [vmem:[#allocation45_spill] sm:$0xff] }
 0x60e   :  { %3221 = vmatprep.mubr.f32.mxu1 %v2976_v8  ;;  %3382 = vmatprep.mubr.f32.mxu0 %v2976_v8  ;;  %v9903_v39 = vadd.f32 %v9844_v9, %v2912_v29  ;;  %v9906_v62 = vadd.f32 %v9847_v58, %v2915_v17  ;;  %v2925_v50 = vmul.f32 %v9717_v33, %v9121_v34  ;;  %v2977_v52 = vmax.f32 %v2945_v12, 0.0  ;;  %v12039_v29 = vld [vmem:[#allocation46_spill] sm:$0xff] }
 0x60f   :  { %3222 = vmatmul.mubr.f32.vlgmr.msra.gmra.mrb[56].mxu1 %v2975_v46  ;;  %3383 = vmatmul.mubr.f32.vlgmr.msra.gmra.mrb[60].mxu0 %v2975_v46  ;;  %v2924_v35 = vmul.f32 %v9714_v20, %v9125_v54  ;;  %v9913_v0 = vadd.f32 %v9844_v9, %v2914_v49  ;;  %v2926_v63 = vmul.f32 %v9714_v20, %v9135_v57  ;;  %v2980_v51 = vmax.f32 %v2948_v13, 0.0  ;;  %v3485_v12 = vld [vmem:[%s11845_s15 + $0x30] sm:$0xff]  ;;  %v3486_v13 = vld [vmem:[%s11845_s15 + $0x38] sm:$0xff] }
 0x610   :  { %3227 = vmatprep.mubr.f32.mxu1 %v2978_v23  ;;  %3388 = vmatprep.mubr.f32.mxu0 %v2978_v23  ;;  %v9922_v34 = vadd.f32 %v9847_v58, %v2917_v6  ;;  %v9925_v54 = vadd.f32 %v9844_v9, %v2916_v26  ;;  %v9928_v7 = vadd.f32 %v9847_v58, %v2919_v2  ;;  %v2979_v49 = vmax.f32 %v9867_v41, 0.0  ;;  %v12040_v26 = vld [vmem:[#allocation37_spill] sm:$0xff]  ;;  %v3503_v2 = vld [vmem:[%s11845_s15 + $0xc0] sm:$0xff] }
 0x611   :  { %6881 = vmatpush3.bf16.msra.mxu1 %v9784_v47  ;;  %6913 = vmatpush3.bf16.msra.mxu0 %v9786_v36  ;;  %v9933_v28 = vadd.f32 %v9844_v9, %v2918_v31  ;;  %v9936_v57 = vadd.f32 %v9847_v58, %v2921_v48  ;;  %v9939_v16 = vadd.f32 %v9844_v9, %v2920_v1  ;;  %v2982_v41 = vmax.f32 %v9870_v42, 0.0  ;;  %v3517_v46 = vld [vmem:[%s11845_s15 + $0x130] sm:$0xff]  ;;  %v3518_v42 = vld [vmem:[%s11845_s15 + $0x138] sm:$0xff]  ;;  %v3536_v23 = vld [vmem:[%s11845_s15 + $0x1c8] sm:$0xff] }
 0x612   :  { %6883 = vmatprep.subr.bf16.mxu1 %v12037_v43  ;;  %6915 = vmatprep.subr.bf16.mxu0 %v9800_v24  ;;  %v9942_v37 = vadd.f32 %v9847_v58, %v2923_v59  ;;  %v2929_v4 = vmul.f32 %v9717_v33, %v12038_v27  ;;  %v2928_v17 = vmul.f32 %v9714_v20, %v12039_v29  ;;  %v3504_v59 = vld [vmem:[%s11845_s15 + $0xc8] sm:$0xff] }
 0x613   :  { %3228 = vmatmul.mubr.f32.gmra.mrb[58].mxu1 %v2977_v52  ;;  %3389 = vmatmul.mubr.f32.gmra.mrb[62].mxu0 %v2977_v52  ;;  %v9950_v6 = vadd.f32 %v9844_v9, %v2922_v38  ;;  %v2931_v18 = vmul.f32 %v9717_v33, %v12040_v26  ;;  %v2930_v14 = vmul.f32 %v9714_v20, %v12041_v40  ;;  %v3535_v38 = vld [vmem:[%s11845_s15 + $0x1c0] sm:$0xff]  ;;  %v3520_v29 = vld [vmem:[%s11845_s15 + $0x148] sm:$0xff]  ;;  %v3538_v26 = vld [vmem:[%s11845_s15 + $0x1d8] sm:$0xff] }
 0x614   :  { %3233 = vmatprep.mubr.f32.mxu1 %v2980_v51  ;;  %3394 = vmatprep.mubr.f32.mxu0 %v2980_v51  ;;  %v9966_v8 = vadd.f32 %v9847_v58, %v2925_v50  ;;  %v9969_v33 = vadd.f32 %v9844_v9, %v2924_v35  ;;  %v9972_v20 = vadd.f32 %v9847_v58, %v2927_v19  ;;  %v2981_v35 = vmax.f32 %v9873_v44, 0.0  ;;  %v3487_v51 = vld [vmem:[%s11845_s15 + $0x40] sm:$0xff] }
 0x615   :  { %6885 = vmatpush3.bf16.msra.mxu1 %v9802_v60  ;;  %6917 = vmatpush3.bf16.msra.mxu0 %v9804_v56  ;;  %v9986_v31 = vadd.f32 %v9844_v9, %v2926_v63  ;;  %v9989_v48 = vadd.f32 %v9847_v58, %v2929_v4  ;;  %v9992_v1 = vadd.f32 %v9844_v9, %v2928_v17  ;;  %v2984_v44 = vmax.f32 %v9888_v10, 0.0  ;;  %v3519_v4 = vld [vmem:[%s11845_s15 + $0x140] sm:$0xff]  ;;  %v3505_v10 = vld [vmem:[%s11845_s15 + $0xd0] sm:$0xff]  ;;  %v3506_v17 = vld [vmem:[%s11845_s15 + $0xd8] sm:$0xff] }
 0x616   :  { %6887 = vmatprep.subr.bf16.mxu1 %v9806_v21  ;;  %6919 = vmatprep.subr.bf16.mxu0 %v9808_v32  ;;  %v10004_v50 = vadd.f32 %v9847_v58, %v2931_v18  ;;  %v10008_v52 = vadd.f32 %v9844_v9, %v2930_v14  ;;  %v10012_v19 = vpack.c.bf16 %v3486_v13, %v3485_v12  ;;  %v3488_v58 = vld [vmem:[%s11845_s15 + $0x48] sm:$0xff]  ;;  %v2983_v18 = vmax.f32 %v9891_v3, 0.0  ;;  %v3489_v12 = vld [vmem:[%s11845_s15 + $0x50] sm:$0xff]  ;;  %v3490_v13 = vld [vmem:[%s11845_s15 + $0x58] sm:$0xff] }
 0x617   :  { %3234 = vmatmul.mubr.f32.gmra.mrb[60].mxu1 %v2979_v49  ;;  %3395 = vmatmul.mubr.f32.gmra.mrb[64].mxu0 %v2979_v49  ;;  %v10014_v63 = vpack.c.bf16 %v3518_v42, %v3517_v46  ;;  %v10025_v9 = vpack.c.bf16 %v3504_v59, %v3503_v2  ;;  %v10027_v27 = vpack.c.bf16 %v3536_v23, %v3535_v38  ;;  %v3537_v49 = vld [vmem:[%s11845_s15 + $0x1d0] sm:$0xff]  ;;  %v3522_v2 = vld [vmem:[%s11845_s15 + $0x158] sm:$0xff]  ;;  %v3508_v59 = vld [vmem:[%s11845_s15 + $0xe8] sm:$0xff] }
 0x618   :  { %3239 = vmatprep.mubr.f32.mxu1 %v2982_v41  ;;  %3400 = vmatprep.mubr.f32.mxu0 %v2982_v41  ;;  %v10050_v40 = vpack.c.bf16 %v3488_v58, %v3487_v51  ;;  %v10052_v14 = vpack.c.bf16 %v3520_v29, %v3519_v4  ;;  %v2986_v41 = vmax.f32 %v9894_v45, 0.0  ;;  %v10063_v3 = vpack.c.bf16 %v3506_v17, %v3505_v10  ;;  %v3521_v42 = vld [vmem:[%s11845_s15 + $0x150] sm:$0xff]  ;;  %v3507_v45 = vld [vmem:[%s11845_s15 + $0xe0] sm:$0xff]  ;;  %v3540_v23 = vld [vmem:[%s11845_s15 + $0x1e8] sm:$0xff] }
 0x619   :  { %6889 = vmatpush3.bf16.msra.mxu1 %v9810_v15  ;;  %6921 = vmatpush3.bf16.msra.mxu0 %v9812_v53  ;;  %v10065_v46 = vpack.c.bf16 %v3538_v26, %v3537_v49  ;;  %v3539_v38 = vld [vmem:[%s11845_s15 + $0x1e0] sm:$0xff]  ;;  %v10088_v51 = vpack.c.bf16 %v3490_v13, %v3489_v12  ;;  %v10090_v58 = vpack.c.bf16 %v3522_v2, %v3521_v42  ;;  %v3492_v4 = vld [vmem:[%s11845_s15 + $0x68] sm:$0xff]  ;;  %v2988_v29 = vmax.f32 %v9900_v11, 0.0  ;;  %v3509_v11 = vld [vmem:[%s11845_s15 + $0xf0] sm:$0xff] }
 0x61a   :  { %6891 = vmatprep.subr.bf16.mxu1 %v9817_v30  ;;  %6923 = vmatprep.subr.bf16.mxu0 %v9819_v61  ;;  %v10103_v10 = vpack.c.bf16 %v3540_v23, %v3539_v38  ;;  %v3523_v17 = vld [vmem:[%s11845_s15 + $0x160] sm:$0xff]  ;;  %v3524_v49 = vld [vmem:[%s11845_s15 + $0x168] sm:$0xff]  ;;  %v3510_v26 = vld [vmem:[%s11845_s15 + $0xf8] sm:$0xff]  ;;  %v2987_v13 = vmax.f32 %v9903_v39, 0.0 }
 0x61b   :  { %3240 = vmatmul.mubr.f32.gmra.mrb[62].mxu1 %v2981_v35  ;;  %3401 = vmatmul.mubr.f32.gmra.mrb[66].mxu0 %v2981_v35  ;;  %v2985_v35 = vmax.f32 %v9897_v5, 0.0  ;;  %v10101_v5 = vpack.c.bf16 %v3508_v59, %v3507_v45  ;;  %v3542_v12 = vld [vmem:[%s11845_s15 + $0x1f8] sm:$0xff]  ;;  %v10128_v42 = vpack.c.bf16 %v3524_v49, %v3523_v17  ;;  %v3493_v2 = vld [vmem:[%s11845_s15 + $0x70] sm:$0xff]  ;;  %v2990_v45 = vmax.f32 %v9906_v62, 0.0 }
 0x61c   :  { %3245 = vmatprep.mubr.f32.mxu1 %v2984_v44  ;;  %3406 = vmatprep.mubr.f32.mxu0 %v2984_v44  ;;  %v3491_v44 = vld [vmem:[%s11845_s15 + $0x60] sm:$0xff]  ;;  %v10136_v59 = vpack.c.bf16 %v3510_v26, %v3509_v11  ;;  %v3494_v38 = vld [vmem:[%s11845_s15 + $0x78] sm:$0xff]  ;;  %v3525_v23 = vld [vmem:[%s11845_s15 + $0x170] sm:$0xff]  ;;  %v2994_v17 = vmax.f32 %v9928_v7, 0.0  ;;  %v2996_v49 = vmax.f32 %v9936_v57, 0.0  ;;  %v2998_v11 = vmax.f32 %v9942_v37, 0.0 }
 0x61d   :  { %6893 = vmatpush3.bf16.msra.mxu1 %v10012_v19  ;;  %6925 = vmatpush3.bf16.msra.mxu0 %v10014_v63  ;;  %v3526_v62 = vld [vmem:[%s11845_s15 + $0x178] sm:$0xff]  ;;  %v2997_v7 = vmax.f32 %v9950_v6, 0.0  ;;  %v3000_v26 = vmax.f32 %v9966_v8, 0.0  ;;  %v3002_v57 = vmax.f32 %v9972_v20, 0.0  ;;  %v3004_v37 = vmax.f32 %v9989_v48, 0.0 }
 0x61e   :  { %6895 = vmatprep.subr.bf16.mxu1 %v10025_v9  ;;  %6927 = vmatprep.subr.bf16.mxu0 %v10027_v27  ;;  %v3003_v6 = vmax.f32 %v9992_v1, 0.0  ;;  %v3006_v8 = vmax.f32 %v10004_v50, 0.0  ;;  %v3544_v20 = vld [vmem:[#allocation22 + $0x8] sm:$0xff]  ;;  %v3135_v1 = vld [vmem:[#allocation17] sm:$0xf]  ;;  %v12042_v50 = vld [vmem:[#allocation36_spill] sm:$0xff] }
 0x61f   :  { %3246 = vmatmul.mubr.f32.gmra.mrb[64].mxu1 %v2983_v18  ;;  %3407 = vmatmul.mubr.f32.gmra.mrb[68].mxu0 %v2983_v18  ;;  %v3541_v18 = vld [vmem:[%s11845_s15 + $0x1f0] sm:$0xff] }
 0x620   :  { %3251 = vmatprep.mubr.f32.mxu1 %v2986_v41  ;;  %3412 = vmatprep.mubr.f32.mxu0 %v2986_v41  ;;  %v10126_v41 = vpack.c.bf16 %v3492_v4, %v3491_v44  ;;  %v10138_v39 = vpack.c.bf16 %v3542_v12, %v3541_v18  ;;  %v10152_v44 = vpack.c.bf16 %v3494_v38, %v3493_v2  ;;  %v3546_v18 = vld [vmem:[#allocation22 + $0x18] sm:$0xff]  ;;  %v3547_v38 = vld [vmem:[#allocation22 + $0x20] sm:$0xff] }
 0x621   :  { %6897 = vmatpush3.bf16.msra.mxu1 %v10050_v40  ;;  %6929 = vmatpush3.bf16.msra.mxu0 %v10052_v14  ;;  %v10154_v4 = vpack.c.bf16 %v3526_v62, %v3525_v23  ;;  %v3550_v12 = vld [vmem:[#allocation22 + $0x38] sm:$0xff]  ;;  %v10183_v2 = vrot.slane %v3135_v1, %v12042_v50  ;;  %v12043_v23 = vld [vmem:[#allocation34_spill] sm:$0xff] }
 0x622   :  { %6899 = vmatprep.subr.bf16.mxu1 %v10063_v3  ;;  %6931 = vmatprep.subr.bf16.mxu0 %v10065_v46  ;;  %v10189_v62 = vrot.slane %v3135_v1, %v12043_v23 }
 0x623   :  { %3252 = vmatmul.mubr.f32.gmra.mrb[66].mxu1 %v2985_v35  ;;  %3413 = vmatmul.mubr.f32.gmra.mrb[70].mxu0 %v2985_v35  ;;  %v2989_v35 = vmax.f32 %v9913_v0, 0.0  ;;  %v2991_v0 = vmax.f32 %v9925_v54, 0.0  ;;  %v2995_v54 = vmax.f32 %v9939_v16, 0.0  ;;  %v3001_v16 = vmax.f32 %v9986_v31, 0.0  ;;  %v3548_v31 = vld [vmem:[#allocation22 + $0x28] sm:$0xff] }
 0x624   :  { %3257 = vmatprep.mubr.f32.mxu1 %v2988_v29  ;;  %3418 = vmatprep.mubr.f32.mxu0 %v2988_v29  ;;  %v2992_v29 = vmax.f32 %v9922_v34, 0.0  ;;  %v2993_v34 = vmax.f32 %v9933_v28, 0.0  ;;  %v2999_v28 = vmax.f32 %v9969_v33, 0.0  ;;  %v3005_v33 = vmax.f32 %v10008_v52, 0.0 }
 0x625   :  { %6901 = vmatpush3.bf16.msra.mxu1 %v10088_v51  ;;  %6933 = vmatpush3.bf16.msra.mxu0 %v10090_v58  ;;  %v10176_v48 = vpack.c.bf16 %v3548_v31, %v3544_v20  ;;  %v10186_v52 = vrot.slane %v3135_v1, %v8402_v25 }
 0x626   :  { %6903 = vmatprep.subr.bf16.mxu1 %v10101_v5  ;;  %6935 = vmatprep.subr.bf16.mxu0 %v10103_v10 }
 0x627   :  { %3258 = vmatmul.mubr.f32.gmra.mrb[68].mxu1 %v2987_v13  ;;  %3419 = vmatmul.mubr.f32.gmra.mrb[72].mxu0 %v2987_v13  ;;  %v10178_v13 = vpack.c.bf16 %v3550_v12, %v3546_v18 }
 0x628   :  { %3263 = vmatprep.mubr.f32.mxu1 %v2990_v45  ;;  %3424 = vmatprep.mubr.f32.mxu0 %v2990_v45  ;;  %v3543_v45 = vld [vmem:[#allocation22] sm:$0xff] }
 0x629   :  { %6905 = vmatpush3.bf16.msra.mxu1 %v10126_v41  ;;  %6937 = vmatpush3.bf16.msra.mxu0 %v10128_v42 }
 0x62a   :  { %6907 = vmatprep.subr.bf16.mxu1 %v10136_v59  ;;  %6939 = vmatprep.subr.bf16.mxu0 %v10138_v39 }
 0x62b   :  { %3264 = vmatmul.mubr.f32.gmra.mrb[70].mxu1 %v2989_v35  ;;  %3425 = vmatmul.mubr.f32.gmra.mrb[74].mxu0 %v2989_v35  ;;  %v10192_v35 = vrot.slane %v3135_v1, %v8394_v22  ;;  %v3553_v1 = vld [vmem:[#allocation22 + $0x50] sm:$0xff] }
 0x62c   :  { %3269 = vmatprep.mubr.f32.mxu1 %v2992_v29  ;;  %3430 = vmatprep.mubr.f32.mxu0 %v2992_v29  ;;  %v3545_v29 = vld [vmem:[#allocation22 + $0x10] sm:$0xff] }
 0x62d   :  { %6909 = vmatpush3.bf16.msra.mxu1 %v10152_v44  ;;  %6941 = vmatpush3.bf16.msra.mxu0 %v10154_v4 }
 0x62e   :  { %6943 = vmatprep.subr.bf16.mxu1 %v10176_v48  ;;  %6951 = vmatprep.subr.bf16.mxu0 %v10178_v13 }
 0x62f   :  { %3270 = vmatmul.mubr.f32.gmra.mrb[72].mxu1 %v2991_v0  ;;  %3431 = vmatmul.mubr.f32.gmra.mrb[76].mxu0 %v2991_v0  ;;  %v3549_v0 = vld [vmem:[#allocation22 + $0x30] sm:$0xff] }
 0x630   :  { %3275 = vmatprep.mubr.f32.mxu1 %v2994_v17  ;;  %3436 = vmatprep.mubr.f32.mxu0 %v2994_v17  ;;  %v3552_v17 = vld [vmem:[#allocation22 + $0x48] sm:$0xff] }
 0x633   :  { %3276 = vmatmul.mubr.f32.gmra.mrb[74].mxu1 %v2993_v34  ;;  %3437 = vmatmul.mubr.f32.gmra.mrb[78].mxu0 %v2993_v34 }
 0x634   :  { %3281 = vmatprep.mubr.f32.mxu1 %v2996_v49  ;;  %3442 = vmatprep.mubr.f32.mxu0 %v2996_v49 }
 0x637   :  { %3282 = vmatmul.mubr.f32.gmra.mrb[76].mxu1 %v2995_v54  ;;  %3443 = vmatmul.mubr.f32.gmra.mrb[80].mxu0 %v2995_v54  ;;  %v3556_v54 = vld [vmem:[#allocation22 + $0x68] sm:$0xff] }
 0x638   :  { %3287 = vmatprep.mubr.f32.mxu1 %v2998_v11  ;;  %3448 = vmatprep.mubr.f32.mxu0 %v2998_v11  ;;  %v3554_v11 = vld [vmem:[#allocation22 + $0x58] sm:$0xff]  ;;  %v10210_v18 = vpack.c.bf16 %v3556_v54, %v3552_v17 }
 0x63b   :  { %3288 = vmatmul.mubr.f32.gmra.mrb[78].mxu1 %v2997_v7  ;;  %3449 = vmatmul.mubr.f32.gmra.mrb[82].mxu0 %v2997_v7  ;;  %v3558_v7 = vld [vmem:[#allocation22 + $0x78] sm:$0xff] }
 0x63c   :  { %3293 = vmatprep.mubr.f32.mxu1 %v3000_v26  ;;  %3454 = vmatprep.mubr.f32.mxu0 %v3000_v26  ;;  %v10212_v12 = vpack.c.bf16 %v3558_v7, %v3554_v11 }
 0x63f   :  { %3294 = vmatmul.mubr.f32.gmra.mrb[80].mxu1 %v2999_v28  ;;  %3455 = vmatmul.mubr.f32.gmra.mrb[84].mxu0 %v2999_v28 }
 0x640   :  { %3299 = vmatprep.mubr.f32.mxu1 %v3002_v57  ;;  %3460 = vmatprep.mubr.f32.mxu0 %v3002_v57 }
 0x643   :  { %3300 = vmatmul.mubr.f32.gmra.mrb[82].mxu1 %v3001_v16  ;;  %3461 = vmatmul.mubr.f32.gmra.mrb[86].mxu0 %v3001_v16 }
 0x644   :  { %3305 = vmatprep.mubr.f32.mxu1 %v3004_v37  ;;  %3466 = vmatprep.mubr.f32.mxu0 %v3004_v37  ;;  %v10200_v37 = vpack.c.bf16 %v3547_v38, %v3543_v45 }
 0x647   :  { %3306 = vmatmul.mubr.f32.gmra.mrb[84].mxu1 %v3003_v6  ;;  %3467 = vmatmul.mubr.f32.gmra.mrb[88].mxu0 %v3003_v6  ;;  %v10202_v6 = vpack.c.bf16 %v3549_v0, %v3545_v29 }
 0x648   :  { %3311 = vmatprep.mubr.f32.mxu1 %v3006_v8  ;;  %3472 = vmatprep.mubr.f32.mxu0 %v3006_v8  ;;  %v3551_v8 = vld [vmem:[#allocation22 + $0x40] sm:$0xff] }
 0x64b   :  { %3312 = vmatmul.mubr.f32.gmra.mrb[86].mxu1 %v3005_v33  ;;  %3473 = vmatmul.mubr.f32.gmra.mrb[90].mxu0 %v3005_v33  ;;  %v3555_v33 = vld [vmem:[#allocation22 + $0x60] sm:$0xff] }
 0x64c   :  { %v10218_v29 = vpack.c.bf16 %v3555_v33, %v3551_v8 }
 0x64e   :  { %12046 = vst [vmem:[#allocation41_spill] sm:$0xff] %v10218_v29 }
 0x6e2   :  { %v3223_v34 = vpop.f32.mrb[56].mxu1  ;;  %v3384_v49 = vpop.f32.mrb[60].mxu0 }
 0x6e3   :  { %v3225_v26 = vpop.f32.mrb[57].mxu1  ;;  %v3386_v28 = vpop.f32.mrb[61].mxu0  ;;  %v10205_v20 = vadd.f32 %v3223_v34, %v10192_v35  ;;  %v10208_v31 = vadd.f32 %v3384_v49, %v10189_v62 }
 0x6e4   :  { %v10195_v57 = vadd.f32 %v3225_v26, %v10186_v52  ;;  %v10198_v16 = vadd.f32 %v3386_v28, %v10183_v2  ;;  %v3557_v26 = vld [vmem:[#allocation22 + $0x70] sm:$0xff] }
 0x6e5   :  { %12045 = vst [vmem:[#allocation43_spill] sm:$0xff] %v10208_v31  ;;  %v10228_v34 = vpack.c.bf16 %v3557_v26, %v3553_v1 }
 0x6e6   :  { %12044 = vst [vmem:[#allocation42_spill] sm:$0xff] %v10198_v16  ;;  %v3229_v28 = vpop.f32.mrb[58].mxu1  ;;  %v3390_v50 = vpop.f32.mrb[62].mxu0  ;;  %3625 = vmatprep.mubr.f32.mxu1 %v10195_v57  ;;  %3770 = vmatprep.mubr.f32.mxu0 %v10198_v16 }
 0x6e7   :  { %v3231_v45 = vpop.f32.mrb[59].mxu1  ;;  %v3392_v38 = vpop.f32.mrb[63].mxu0  ;;  %3626 = vmatmul.mubr.f32.vlgmr.msra.gmra.mrb[88].mxu1 %v10205_v20  ;;  %3771 = vmatmul.mubr.f32.vlgmr.msra.gmra.mrb[92].mxu0 %v10208_v31  ;;  %12048 = vst [vmem:[#allocation46_spill] sm:$0xff] %v10228_v34  ;;  %v10231_v49 = vadd.f32 %v3229_v28, %v10192_v35  ;;  %v10234_v54 = vadd.f32 %v3390_v50, %v10189_v62 }
 0x6e8   :  { %v10221_v0 = vadd.f32 %v3231_v45, %v10186_v52  ;;  %v10224_v17 = vadd.f32 %v3392_v38, %v10183_v2  ;;  %6945 = vmatpush1.bf16.msra.mxu1 %v10200_v37  ;;  %6953 = vmatpush1.bf16.msra.mxu0 %v10202_v6  ;;  %v12052_v45 = vld [vmem:[#allocation44_spill] sm:$0xff]  ;;  %v12053_v38 = vld [vmem:[#allocation39_spill] sm:$0xff] }
 0x6e9   :  { %12049 = vst [vmem:[#allocation37_spill] sm:$0xff] %v10234_v54  ;;  %6947 = vmatprep.subr.bf16.mxu1 %v10210_v18  ;;  %6955 = vmatprep.subr.bf16.mxu0 %v10212_v12 }
 0x6ea   :  { %12047 = vst [vmem:[#allocation45_spill] sm:$0xff] %v10224_v17  ;;  %v3235_v11 = vpop.f32.mrb[60].mxu1  ;;  %v3396_v7 = vpop.f32.mrb[64].mxu0  ;;  %3630 = vmatprep.mubr.f32.mxu1 %v10221_v0  ;;  %3775 = vmatprep.mubr.f32.mxu0 %v10224_v17 }
 0x6eb   :  { %v3237_v8 = vpop.f32.mrb[61].mxu1  ;;  %v3398_v33 = vpop.f32.mrb[65].mxu0  ;;  %3631 = vmatmul.mubr.f32.gmra.mrb[90].mxu1 %v10231_v49  ;;  %3776 = vmatmul.mubr.f32.gmra.mrb[94].mxu0 %v10234_v54  ;;  %v10251_v26 = vadd.f32 %v3235_v11, %v10192_v35  ;;  %v10254_v28 = vadd.f32 %v3396_v7, %v10189_v62 }
 0x6ec   :  { %v10243_v1 = vadd.f32 %v3237_v8, %v10186_v52  ;;  %v10246_v50 = vadd.f32 %v3398_v33, %v10183_v2  ;;  %6949 = vmatpush1.bf16.msra.mxu1 %v10218_v29  ;;  %6957 = vmatpush1.bf16.msra.mxu0 %v10228_v34 }
 0x6ed   :  { %12051 = vst [vmem:[#allocation47_spill] sm:$0xff] %v10254_v28  ;;  %6959 = vmatprep.subr.bf16.mxu1 %v12052_v45  ;;  %6991 = vmatprep.subr.bf16.mxu0 %v12053_v38 }
 0x6ee   :  { %12050 = vst [vmem:[#allocation40_spill] sm:$0xff] %v10246_v50  ;;  %v3241_v23 = vpop.f32.mrb[62].mxu1  ;;  %v3402_v8 = vpop.f32.mrb[66].mxu0  ;;  %3635 = vmatprep.mubr.f32.mxu1 %v10243_v1  ;;  %3780 = vmatprep.mubr.f32.mxu0 %v10246_v50 }
 0x6ef   :  { %v3243_v33 = vpop.f32.mrb[63].mxu1  ;;  %v3404_v25 = vpop.f32.mrb[67].mxu0  ;;  %3636 = vmatmul.mubr.f32.gmra.mrb[92].mxu1 %v10251_v26  ;;  %3781 = vmatmul.mubr.f32.gmra.mrb[96].mxu0 %v10254_v28  ;;  %v10269_v45 = vadd.f32 %v3241_v23, %v10192_v35  ;;  %v10272_v38 = vadd.f32 %v3402_v8, %v10189_v62 }
 0x6f0   :  { %v10263_v11 = vadd.f32 %v3243_v33, %v10186_v52  ;;  %v10266_v7 = vadd.f32 %v3404_v25, %v10183_v2 }
 0x6f1   :  { %12056 = vst [vmem:[#allocation48_spill] sm:$0xff] %v10269_v45  ;;  %12057 = vst [vmem:[#allocation49_spill] sm:$0xff] %v10272_v38 }
 0x6f2   :  { %12054 = vst [vmem:[#allocation44_spill] sm:$0xff] %v10263_v11  ;;  %12055 = vst [vmem:[#allocation39_spill] sm:$0xff] %v10266_v7  ;;  %v3247_v22 = vpop.f32.mrb[64].mxu1  ;;  %v3408_v55 = vpop.f32.mrb[68].mxu0  ;;  %3640 = vmatprep.mubr.f32.mxu1 %v10263_v11  ;;  %3785 = vmatprep.mubr.f32.mxu0 %v10266_v7 }
 0x6f3   :  { %v3249_v34 = vpop.f32.mrb[65].mxu1  ;;  %v3410_v29 = vpop.f32.mrb[69].mxu0  ;;  %3641 = vmatmul.mubr.f32.gmra.mrb[94].mxu1 %v10269_v45  ;;  %3786 = vmatmul.mubr.f32.gmra.mrb[98].mxu0 %v10272_v38  ;;  %v10285_v8 = vadd.f32 %v3247_v22, %v10192_v35  ;;  %v10288_v33 = vadd.f32 %v3408_v55, %v10189_v62 }
 0x6f4   :  { %v10279_v25 = vadd.f32 %v3249_v34, %v10186_v52  ;;  %v10282_v23 = vadd.f32 %v3410_v29, %v10183_v2 }
 0x6f5   :  { %12060 = vst [vmem:[#allocation52_spill] sm:$0xff] %v10285_v8  ;;  %12061 = vst [vmem:[#allocation53_spill] sm:$0xff] %v10288_v33 }
 0x6f6   :  { %12058 = vst [vmem:[#allocation50_spill] sm:$0xff] %v10279_v25  ;;  %12059 = vst [vmem:[#allocation51_spill] sm:$0xff] %v10282_v23  ;;  %v3253_v11 = vpop.f32.mrb[66].mxu1  ;;  %v3414_v7 = vpop.f32.mrb[70].mxu0  ;;  %3645 = vmatprep.mubr.f32.mxu1 %v10279_v25  ;;  %3790 = vmatprep.mubr.f32.mxu0 %v10282_v23 }
 0x6f7   :  { %v3255_v45 = vpop.f32.mrb[67].mxu1  ;;  %v3416_v38 = vpop.f32.mrb[71].mxu0  ;;  %3646 = vmatmul.mubr.f32.gmra.mrb[96].mxu1 %v10285_v8  ;;  %3791 = vmatmul.mubr.f32.gmra.mrb[100].mxu0 %v10288_v33  ;;  %v10301_v55 = vadd.f32 %v3253_v11, %v10192_v35  ;;  %v10304_v34 = vadd.f32 %v3414_v7, %v10189_v62 }
 0x6f8   :  { %v10295_v29 = vadd.f32 %v3255_v45, %v10186_v52  ;;  %v10298_v22 = vadd.f32 %v3416_v38, %v10183_v2 }
 0x6f9   :  { %12064 = vst [vmem:[#allocation56_spill] sm:$0xff] %v10301_v55  ;;  %12065 = vst [vmem:[#allocation57_spill] sm:$0xff] %v10304_v34 }
 0x6fa   :  { %12062 = vst [vmem:[#allocation54_spill] sm:$0xff] %v10295_v29  ;;  %12063 = vst [vmem:[#allocation55_spill] sm:$0xff] %v10298_v22  ;;  %v3259_v25 = vpop.f32.mrb[68].mxu1  ;;  %v3420_v23 = vpop.f32.mrb[72].mxu0  ;;  %3650 = vmatprep.mubr.f32.mxu1 %v10295_v29  ;;  %3795 = vmatprep.mubr.f32.mxu0 %v10298_v22 }
 0x6fb   :  { %v3261_v8 = vpop.f32.mrb[69].mxu1  ;;  %v3422_v33 = vpop.f32.mrb[73].mxu0  ;;  %3651 = vmatmul.mubr.f32.gmra.mrb[98].mxu1 %v10301_v55  ;;  %3796 = vmatmul.mubr.f32.gmra.mrb[102].mxu0 %v10304_v34  ;;  %v10317_v7 = vadd.f32 %v3259_v25, %v10192_v35  ;;  %v10320_v38 = vadd.f32 %v3420_v23, %v10189_v62 }
 0x6fc   :  { %v10311_v45 = vadd.f32 %v3261_v8, %v10186_v52  ;;  %v10314_v11 = vadd.f32 %v3422_v33, %v10183_v2 }
 0x6fd   :  { %12068 = vst [vmem:[#allocation60_spill] sm:$0xff] %v10317_v7  ;;  %12069 = vst [vmem:[#allocation61_spill] sm:$0xff] %v10320_v38 }
 0x6fe   :  { %12066 = vst [vmem:[#allocation58_spill] sm:$0xff] %v10311_v45  ;;  %12067 = vst [vmem:[#allocation59_spill] sm:$0xff] %v10314_v11  ;;  %v3265_v29 = vpop.f32.mrb[70].mxu1  ;;  %v3426_v22 = vpop.f32.mrb[74].mxu0  ;;  %3655 = vmatprep.mubr.f32.mxu1 %v10311_v45  ;;  %3800 = vmatprep.mubr.f32.mxu0 %v10314_v11 }
 0x6ff   :  { %v3267_v55 = vpop.f32.mrb[71].mxu1  ;;  %v3428_v34 = vpop.f32.mrb[75].mxu0  ;;  %3656 = vmatmul.mubr.f32.gmra.mrb[100].mxu1 %v10317_v7  ;;  %3801 = vmatmul.mubr.f32.gmra.mrb[104].mxu0 %v10320_v38  ;;  %v10333_v23 = vadd.f32 %v3265_v29, %v10192_v35  ;;  %v10336_v33 = vadd.f32 %v3426_v22, %v10189_v62 }
 0x700   :  { %v10327_v8 = vadd.f32 %v3267_v55, %v10186_v52  ;;  %v10330_v25 = vadd.f32 %v3428_v34, %v10183_v2 }
 0x701   :  { %12072 = vst [vmem:[#allocation64_spill] sm:$0xff] %v10333_v23  ;;  %12073 = vst [vmem:[#allocation65_spill] sm:$0xff] %v10336_v33 }
 0x702   :  { %12070 = vst [vmem:[#allocation62_spill] sm:$0xff] %v10327_v8  ;;  %12071 = vst [vmem:[#allocation63_spill] sm:$0xff] %v10330_v25  ;;  %v3271_v45 = vpop.f32.mrb[72].mxu1  ;;  %v3432_v11 = vpop.f32.mrb[76].mxu0  ;;  %3660 = vmatprep.mubr.f32.mxu1 %v10327_v8  ;;  %3805 = vmatprep.mubr.f32.mxu0 %v10330_v25 }
 0x703   :  { %v3273_v7 = vpop.f32.mrb[73].mxu1  ;;  %v3434_v38 = vpop.f32.mrb[77].mxu0  ;;  %3661 = vmatmul.mubr.f32.gmra.mrb[102].mxu1 %v10333_v23  ;;  %3806 = vmatmul.mubr.f32.gmra.mrb[106].mxu0 %v10336_v33  ;;  %v10349_v22 = vadd.f32 %v3271_v45, %v10192_v35  ;;  %v10352_v34 = vadd.f32 %v3432_v11, %v10189_v62 }
 0x704   :  { %v10343_v55 = vadd.f32 %v3273_v7, %v10186_v52  ;;  %v10346_v29 = vadd.f32 %v3434_v38, %v10183_v2 }
 0x705   :  { %12076 = vst [vmem:[#allocation68_spill] sm:$0xff] %v10349_v22  ;;  %12077 = vst [vmem:[#allocation69_spill] sm:$0xff] %v10352_v34 }
 0x706   :  { %12074 = vst [vmem:[#allocation66_spill] sm:$0xff] %v10343_v55  ;;  %12075 = vst [vmem:[#allocation67_spill] sm:$0xff] %v10346_v29  ;;  %v3277_v8 = vpop.f32.mrb[74].mxu1  ;;  %v3438_v25 = vpop.f32.mrb[78].mxu0  ;;  %3665 = vmatprep.mubr.f32.mxu1 %v10343_v55  ;;  %3810 = vmatprep.mubr.f32.mxu0 %v10346_v29 }
 0x707   :  { %v3279_v23 = vpop.f32.mrb[75].mxu1  ;;  %v3440_v33 = vpop.f32.mrb[79].mxu0  ;;  %3666 = vmatmul.mubr.f32.gmra.mrb[104].mxu1 %v10349_v22  ;;  %3811 = vmatmul.mubr.f32.gmra.mrb[108].mxu0 %v10352_v34  ;;  %v10365_v11 = vadd.f32 %v3277_v8, %v10192_v35  ;;  %v10368_v38 = vadd.f32 %v3438_v25, %v10189_v62 }
 0x708   :  { %v10359_v7 = vadd.f32 %v3279_v23, %v10186_v52  ;;  %v10362_v45 = vadd.f32 %v3440_v33, %v10183_v2 }
 0x709   :  { %12080 = vst [vmem:[#allocation72_spill] sm:$0xff] %v10365_v11  ;;  %12081 = vst [vmem:[#allocation73_spill] sm:$0xff] %v10368_v38 }
 0x70a   :  { %12078 = vst [vmem:[#allocation70_spill] sm:$0xff] %v10359_v7  ;;  %12079 = vst [vmem:[#allocation71_spill] sm:$0xff] %v10362_v45  ;;  %v3283_v55 = vpop.f32.mrb[76].mxu1  ;;  %v3444_v29 = vpop.f32.mrb[80].mxu0  ;;  %3670 = vmatprep.mubr.f32.mxu1 %v10359_v7  ;;  %3815 = vmatprep.mubr.f32.mxu0 %v10362_v45 }
 0x70b   :  { %v3285_v22 = vpop.f32.mrb[77].mxu1  ;;  %v3446_v34 = vpop.f32.mrb[81].mxu0  ;;  %3671 = vmatmul.mubr.f32.gmra.mrb[106].mxu1 %v10365_v11  ;;  %3816 = vmatmul.mubr.f32.gmra.mrb[110].mxu0 %v10368_v38  ;;  %v10381_v25 = vadd.f32 %v3283_v55, %v10192_v35  ;;  %v10384_v33 = vadd.f32 %v3444_v29, %v10189_v62 }
 0x70c   :  { %v10375_v23 = vadd.f32 %v3285_v22, %v10186_v52  ;;  %v10378_v8 = vadd.f32 %v3446_v34, %v10183_v2 }
 0x70d   :  { %12084 = vst [vmem:[#allocation76_spill] sm:$0xff] %v10381_v25  ;;  %12085 = vst [vmem:[#allocation77_spill] sm:$0xff] %v10384_v33 }
 0x70e   :  { %12082 = vst [vmem:[#allocation74_spill] sm:$0xff] %v10375_v23  ;;  %12083 = vst [vmem:[#allocation75_spill] sm:$0xff] %v10378_v8  ;;  %v3289_v7 = vpop.f32.mrb[78].mxu1  ;;  %v3450_v45 = vpop.f32.mrb[82].mxu0  ;;  %3675 = vmatprep.mubr.f32.mxu1 %v10375_v23  ;;  %3820 = vmatprep.mubr.f32.mxu0 %v10378_v8 }
 0x70f   :  { %v3291_v11 = vpop.f32.mrb[79].mxu1  ;;  %v3452_v38 = vpop.f32.mrb[83].mxu0  ;;  %3676 = vmatmul.mubr.f32.gmra.mrb[108].mxu1 %v10381_v25  ;;  %3821 = vmatmul.mubr.f32.gmra.mrb[112].mxu0 %v10384_v33  ;;  %v10397_v29 = vadd.f32 %v3289_v7, %v10192_v35  ;;  %v10400_v34 = vadd.f32 %v3450_v45, %v10189_v62 }
 0x710   :  { %v10391_v22 = vadd.f32 %v3291_v11, %v10186_v52  ;;  %v10394_v55 = vadd.f32 %v3452_v38, %v10183_v2 }
 0x711   :  { %12088 = vst [vmem:[#allocation80_spill] sm:$0xff] %v10397_v29  ;;  %12089 = vst [vmem:[#allocation81_spill] sm:$0xff] %v10400_v34 }
 0x712   :  { %12086 = vst [vmem:[#allocation78_spill] sm:$0xff] %v10391_v22  ;;  %12087 = vst [vmem:[#allocation79_spill] sm:$0xff] %v10394_v55  ;;  %v3295_v23 = vpop.f32.mrb[80].mxu1  ;;  %v3456_v8 = vpop.f32.mrb[84].mxu0  ;;  %3680 = vmatprep.mubr.f32.mxu1 %v10391_v22  ;;  %3825 = vmatprep.mubr.f32.mxu0 %v10394_v55 }
 0x713   :  { %v3297_v25 = vpop.f32.mrb[81].mxu1  ;;  %v3458_v33 = vpop.f32.mrb[85].mxu0  ;;  %3681 = vmatmul.mubr.f32.gmra.mrb[110].mxu1 %v10397_v29  ;;  %3826 = vmatmul.mubr.f32.gmra.mrb[114].mxu0 %v10400_v34  ;;  %v10413_v45 = vadd.f32 %v3295_v23, %v10192_v35  ;;  %v10416_v38 = vadd.f32 %v3456_v8, %v10189_v62 }
 0x714   :  { %v10407_v11 = vadd.f32 %v3297_v25, %v10186_v52  ;;  %v10410_v7 = vadd.f32 %v3458_v33, %v10183_v2 }
 0x715   :  { %12092 = vst [vmem:[#allocation84_spill] sm:$0xff] %v10413_v45  ;;  %12093 = vst [vmem:[#allocation85_spill] sm:$0xff] %v10416_v38 }
 0x716   :  { %12090 = vst [vmem:[#allocation82_spill] sm:$0xff] %v10407_v11  ;;  %12091 = vst [vmem:[#allocation83_spill] sm:$0xff] %v10410_v7  ;;  %v3301_v22 = vpop.f32.mrb[82].mxu1  ;;  %v3462_v55 = vpop.f32.mrb[86].mxu0  ;;  %3685 = vmatprep.mubr.f32.mxu1 %v10407_v11  ;;  %3830 = vmatprep.mubr.f32.mxu0 %v10410_v7 }
 0x717   :  { %v3303_v29 = vpop.f32.mrb[83].mxu1  ;;  %v3464_v34 = vpop.f32.mrb[87].mxu0  ;;  %3686 = vmatmul.mubr.f32.gmra.mrb[112].mxu1 %v10413_v45  ;;  %3831 = vmatmul.mubr.f32.gmra.mrb[116].mxu0 %v10416_v38  ;;  %v10429_v8 = vadd.f32 %v3301_v22, %v10192_v35  ;;  %v10432_v33 = vadd.f32 %v3462_v55, %v10189_v62 }
 0x718   :  { %v10423_v25 = vadd.f32 %v3303_v29, %v10186_v52  ;;  %v10426_v23 = vadd.f32 %v3464_v34, %v10183_v2 }
 0x719   :  { %12096 = vst [vmem:[#allocation88_spill] sm:$0xff] %v10429_v8  ;;  %12097 = vst [vmem:[#allocation89_spill] sm:$0xff] %v10432_v33 }
 0x71a   :  { %12094 = vst [vmem:[#allocation86_spill] sm:$0xff] %v10423_v25  ;;  %12095 = vst [vmem:[#allocation87_spill] sm:$0xff] %v10426_v23  ;;  %v3307_v11 = vpop.f32.mrb[84].mxu1  ;;  %v3468_v7 = vpop.f32.mrb[88].mxu0  ;;  %3690 = vmatprep.mubr.f32.mxu1 %v10423_v25  ;;  %3835 = vmatprep.mubr.f32.mxu0 %v10426_v23 }
 0x71b   :  { %v3309_v45 = vpop.f32.mrb[85].mxu1  ;;  %v3470_v38 = vpop.f32.mrb[89].mxu0  ;;  %3691 = vmatmul.mubr.f32.gmra.mrb[114].mxu1 %v10429_v8  ;;  %3836 = vmatmul.mubr.f32.gmra.mrb[118].mxu0 %v10432_v33  ;;  %v10445_v55 = vadd.f32 %v3307_v11, %v10192_v35  ;;  %v10448_v34 = vadd.f32 %v3468_v7, %v10189_v62 }
 0x71c   :  { %v10439_v29 = vadd.f32 %v3309_v45, %v10186_v52  ;;  %v10442_v22 = vadd.f32 %v3470_v38, %v10183_v2 }
 0x71d   :  { %12100 = vst [vmem:[#allocation92_spill] sm:$0xff] %v10445_v55  ;;  %12101 = vst [vmem:[#allocation93_spill] sm:$0xff] %v10448_v34 }
 0x71e   :  { %12098 = vst [vmem:[#allocation90_spill] sm:$0xff] %v10439_v29  ;;  %12099 = vst [vmem:[#allocation91_spill] sm:$0xff] %v10442_v22  ;;  %v3313_v25 = vpop.f32.mrb[86].mxu1  ;;  %v3474_v23 = vpop.f32.mrb[90].mxu0  ;;  %3695 = vmatprep.mubr.f32.mxu1 %v10439_v29  ;;  %3840 = vmatprep.mubr.f32.mxu0 %v10442_v22 }
 0x71f   :  { %v3315_v8 = vpop.f32.mrb[87].mxu1  ;;  %v3476_v33 = vpop.f32.mrb[91].mxu0  ;;  %3696 = vmatmul.mubr.f32.gmra.mrb[116].mxu1 %v10445_v55  ;;  %3841 = vmatmul.mubr.f32.gmra.mrb[120].mxu0 %v10448_v34  ;;  %v10461_v7 = vadd.f32 %v3313_v25, %v10192_v35  ;;  %v10464_v38 = vadd.f32 %v3474_v23, %v10189_v62  ;;  %v12106_v34 = vmov 0.0  }
 0x720   :  { %v10455_v45 = vadd.f32 %v3315_v8, %v10186_v52  ;;  %v10458_v11 = vadd.f32 %v3476_v33, %v10183_v2 }
 0x721   :  { %12104 = vst [vmem:[#allocation96_spill] sm:$0xff] %v10461_v7  ;;  %12105 = vst [vmem:[#allocation97_spill] sm:$0xff] %v10464_v38 }
 0x722   :  { %12102 = vst [vmem:[#allocation94_spill] sm:$0xff] %v10455_v45  ;;  %12103 = vst [vmem:[#allocation95_spill] sm:$0xff] %v10458_v11  ;;  %3700 = vmatprep.mubr.f32.mxu1 %v10455_v45  ;;  %3845 = vmatprep.mubr.f32.mxu0 %v10458_v11 }
 0x723   :  { %3701 = vmatmul.mubr.f32.gmra.mrb[118].mxu1 %v10461_v7  ;;  %3846 = vmatmul.mubr.f32.gmra.mrb[122].mxu0 %v10464_v38 }
 0x724   :  { %3963 = vmatprep.mubr.f32.mxu1 %v12106_v34  ;;  %4124 = vmatprep.mubr.f32.mxu0 %v12106_v34 }
 0x7ba   :  { %v6270_v2 = vpop.f32.mrb[88].mxu1  ;;  %v6350_v52 = vpop.f32.mrb[92].mxu0 }
 0x7bb   :  { %v6271_v8 = vpop.f32.mrb[89].mxu1  ;;  %v6351_v35 = vpop.f32.mrb[93].mxu0 }
 0x7bc   :  { %v6272_v25 = vadd.f32 %v6271_v8, %v6270_v2  ;;  %v6352_v33 = vadd.f32 %v6351_v35, %v6350_v52 }
 0x7be   :  { %v3773_v62 = vadd.f32 %v6352_v33, %v6272_v25  ;;  %v6273_v23 = vpop.f32.mrb[90].mxu1  ;;  %v6353_v55 = vpop.f32.mrb[94].mxu0 }
 0x7bf   :  { %v6274_v45 = vpop.f32.mrb[91].mxu1  ;;  %v6354_v22 = vpop.f32.mrb[95].mxu0 }
 0x7c0   :  { %v6275_v11 = vadd.f32 %v6274_v45, %v6273_v23  ;;  %v6355_v29 = vadd.f32 %v6354_v22, %v6353_v55  ;;  %6014 = vmatmul.mubr.msk.f32.vlgmr.msra.gmra.mrb[120].mxu1 %vm379_vm0, %v3773_v62  ;;  %6030 = vmatmul.mubr.msk.f32.vlgmr.msra.gmra.mrb[124].mxu0 %vm379_vm0, %v3773_v62 }
 0x7c1   :  { %6961 = vmatpush3.bf16.msra.mxu1 %v9784_v47  ;;  %6993 = vmatpush3.bf16.msra.mxu0 %v9786_v36 }
 0x7c2   :  { %v3778_v38 = vadd.f32 %v6355_v29, %v6275_v11  ;;  %v6276_v7 = vpop.f32.mrb[92].mxu1  ;;  %v6356_v28 = vpop.f32.mrb[96].mxu0  ;;  %3969 = vmatprep.mubr.f32.mxu1 %v12106_v34  ;;  %4130 = vmatprep.mubr.f32.mxu0 %v12106_v34 }
 0x7c3   :  { %v6277_v2 = vpop.f32.mrb[93].mxu1  ;;  %v6357_v52 = vpop.f32.mrb[97].mxu0  ;;  %6963 = vmatprep.subr.bf16.mxu1 %v12037_v43  ;;  %6995 = vmatprep.subr.bf16.mxu0 %v9800_v24 }
 0x7c4   :  { %v6278_v22 = vadd.f32 %v6277_v2, %v6276_v7  ;;  %v6358_v55 = vadd.f32 %v6357_v52, %v6356_v28 }
 0x7c5   :  { %6965 = vmatpush3.bf16.msra.mxu1 %v9802_v60  ;;  %6997 = vmatpush3.bf16.msra.mxu0 %v9804_v56 }
 0x7c6   :  { %v3783_v47 = vadd.f32 %v6358_v55, %v6278_v22  ;;  %v6279_v36 = vpop.f32.mrb[94].mxu1  ;;  %v6359_v29 = vpop.f32.mrb[98].mxu0  ;;  %6967 = vmatprep.subr.bf16.mxu1 %v9806_v21  ;;  %6999 = vmatprep.subr.bf16.mxu0 %v9808_v32 }
 0x7c7   :  { %v6280_v45 = vpop.f32.mrb[95].mxu1  ;;  %v6360_v11 = vpop.f32.mrb[99].mxu0 }
 0x7c8   :  { %v6281_v8 = vadd.f32 %v6280_v45, %v6279_v36  ;;  %v6361_v35 = vadd.f32 %v6360_v11, %v6359_v29  ;;  %6015 = vmatmul.mubr.msk.f32.gmra.mrb[120].mxu1 %vm379_vm0, %v3778_v38  ;;  %6031 = vmatmul.mubr.msk.f32.gmra.mrb[124].mxu0 %vm379_vm0, %v3778_v38 }
 0x7c9   :  { %3975 = vmatprep.mubr.f32.mxu1 %v12106_v34  ;;  %4136 = vmatprep.mubr.f32.mxu0 %v12106_v34 }
 0x7ca   :  { %v3788_v24 = vadd.f32 %v6361_v35, %v6281_v8  ;;  %v6282_v60 = vpop.f32.mrb[96].mxu1  ;;  %v6362_v56 = vpop.f32.mrb[100].mxu0  ;;  %6969 = vmatpush3.bf16.msra.mxu1 %v9810_v15  ;;  %7001 = vmatpush3.bf16.msra.mxu0 %v9812_v53 }
 0x7cb   :  { %v6283_v21 = vpop.f32.mrb[97].mxu1  ;;  %v6363_v32 = vpop.f32.mrb[101].mxu0  ;;  %6971 = vmatprep.subr.bf16.mxu1 %v9817_v30  ;;  %7003 = vmatprep.subr.bf16.mxu0 %v9819_v61 }
 0x7cc   :  { %v6284_v43 = vadd.f32 %v6283_v21, %v6282_v60  ;;  %v6364_v28 = vadd.f32 %v6363_v32, %v6362_v56 }
 0x7ce   :  { %v10492_v7 = vadd.f32 %v6364_v28, %v6284_v43  ;;  %v6285_v38 = vpop.f32.mrb[98].mxu1  ;;  %v6365_v25 = vpop.f32.mrb[102].mxu0  ;;  %6973 = vmatpush3.bf16.msra.mxu1 %v10012_v19  ;;  %7005 = vmatpush3.bf16.msra.mxu0 %v10014_v63 }
 0x7cf   :  { %v6286_v33 = vpop.f32.mrb[99].mxu1  ;;  %v6366_v15 = vpop.f32.mrb[103].mxu0  ;;  %6975 = vmatprep.subr.bf16.mxu1 %v10025_v9  ;;  %7007 = vmatprep.subr.bf16.mxu0 %v10027_v27 }
 0x7d0   :  { %v6287_v53 = vadd.f32 %v6286_v33, %v6285_v38  ;;  %v6367_v30 = vadd.f32 %v6366_v15, %v6365_v25  ;;  %6016 = vmatmul.mubr.msk.f32.gmra.mrb[120].mxu1 %vm379_vm0, %v3783_v47  ;;  %6032 = vmatmul.mubr.msk.f32.gmra.mrb[124].mxu0 %vm379_vm0, %v3783_v47 }
 0x7d1   :  { %3981 = vmatprep.mubr.f32.mxu1 %v12106_v34  ;;  %4142 = vmatprep.mubr.f32.mxu0 %v12106_v34 }
 0x7d2   :  { %v10502_v61 = vadd.f32 %v6367_v30, %v6287_v53  ;;  %v6288_v19 = vpop.f32.mrb[100].mxu1  ;;  %v6368_v63 = vpop.f32.mrb[104].mxu0  ;;  %6977 = vmatpush3.bf16.msra.mxu1 %v10050_v40  ;;  %7009 = vmatpush3.bf16.msra.mxu0 %v10052_v14 }
 0x7d3   :  { %v6289_v9 = vpop.f32.mrb[101].mxu1  ;;  %v6369_v27 = vpop.f32.mrb[105].mxu0  ;;  %6979 = vmatprep.subr.bf16.mxu1 %v10063_v3  ;;  %7011 = vmatprep.subr.bf16.mxu0 %v10065_v46 }
 0x7d4   :  { %v6290_v62 = vadd.f32 %v6289_v9, %v6288_v19  ;;  %v6370_v23 = vadd.f32 %v6369_v27, %v6368_v63 }
 0x7d6   :  { %v10508_v2 = vadd.f32 %v6370_v23, %v6290_v62  ;;  %v6291_v52 = vpop.f32.mrb[102].mxu1  ;;  %v6371_v22 = vpop.f32.mrb[106].mxu0  ;;  %6981 = vmatpush3.bf16.msra.mxu1 %v10088_v51  ;;  %7013 = vmatpush3.bf16.msra.mxu0 %v10090_v58 }
 0x7d7   :  { %v6292_v55 = vpop.f32.mrb[103].mxu1  ;;  %v6372_v40 = vpop.f32.mrb[107].mxu0  ;;  %6983 = vmatprep.subr.bf16.mxu1 %v10101_v5  ;;  %7015 = vmatprep.subr.bf16.mxu0 %v10103_v10 }
 0x7d8   :  { %v6293_v14 = vadd.f32 %v6292_v55, %v6291_v52  ;;  %v6373_v3 = vadd.f32 %v6372_v40, %v6371_v22  ;;  %6017 = vmatmul.mubr.msk.f32.gmra.mrb[120].mxu1 %vm379_vm0, %v3788_v24  ;;  %6033 = vmatmul.mubr.msk.f32.gmra.mrb[124].mxu0 %vm379_vm0, %v3788_v24 }
 0x7d9   :  { %3987 = vmatprep.mubr.f32.mxu1 %v12106_v34  ;;  %4148 = vmatprep.mubr.f32.mxu0 %v12106_v34 }
 0x7da   :  { %v10518_v46 = vadd.f32 %v6373_v3, %v6293_v14  ;;  %v6294_v51 = vpop.f32.mrb[104].mxu1  ;;  %v6374_v58 = vpop.f32.mrb[108].mxu0  ;;  %6985 = vmatpush3.bf16.msra.mxu1 %v10126_v41  ;;  %7017 = vmatpush3.bf16.msra.mxu0 %v10128_v42 }
 0x7db   :  { %v6295_v5 = vpop.f32.mrb[105].mxu1  ;;  %v6375_v10 = vpop.f32.mrb[109].mxu0  ;;  %6987 = vmatprep.subr.bf16.mxu1 %v10136_v59  ;;  %7019 = vmatprep.subr.bf16.mxu0 %v10138_v39 }
 0x7dc   :  { %v6296_v47 = vadd.f32 %v6295_v5, %v6294_v51  ;;  %v6376_v36 = vadd.f32 %v6375_v10, %v6374_v58 }
 0x7de   :  { %v10524_v29 = vadd.f32 %v6376_v36, %v6296_v47  ;;  %v6297_v45 = vpop.f32.mrb[106].mxu1  ;;  %v6377_v11 = vpop.f32.mrb[110].mxu0  ;;  %6989 = vmatpush3.bf16.msra.mxu1 %v10152_v44  ;;  %7021 = vmatpush3.bf16.msra.mxu0 %v10154_v4 }
 0x7df   :  { %v6298_v8 = vpop.f32.mrb[107].mxu1  ;;  %v6378_v41 = vpop.f32.mrb[111].mxu0  ;;  %7023 = vmatprep.subr.bf16.mxu1 %v10176_v48  ;;  %7031 = vmatprep.subr.bf16.mxu0 %v10178_v13 }
 0x7e0   :  { %v6299_v42 = vadd.f32 %v6298_v8, %v6297_v45  ;;  %v6379_v59 = vadd.f32 %v6378_v41, %v6377_v11  ;;  %6018 = vmatmul.mubr.msk.f32.gmra.mrb[120].mxu1 %vm379_vm0, %v10492_v7  ;;  %6034 = vmatmul.mubr.msk.f32.gmra.mrb[124].mxu0 %vm379_vm0, %v10492_v7  ;;  %v4221_v41 = vmul.f32 %v10205_v20, %v10205_v20 }
 0x7e1   :  { %3993 = vmatprep.mubr.f32.mxu1 %v12106_v34  ;;  %4154 = vmatprep.mubr.f32.mxu0 %v12106_v34 }
 0x7e2   :  { %v3818_v39 = vadd.f32 %v6379_v59, %v6299_v42  ;;  %v6300_v44 = vpop.f32.mrb[108].mxu1  ;;  %v6380_v4 = vpop.f32.mrb[112].mxu0  ;;  %v4223_v42 = vmul.f32 %v10208_v31, %v10208_v31  ;;  %v4226_v59 = vmul.f32 %v10221_v0, %v10221_v0 }
 0x7e3   :  { %v6301_v35 = vpop.f32.mrb[109].mxu1  ;;  %v6381_v24 = vpop.f32.mrb[113].mxu0 }
 0x7e4   :  { %v6302_v48 = vadd.f32 %v6301_v35, %v6300_v44  ;;  %v6382_v60 = vadd.f32 %v6381_v24, %v6380_v4  ;;  %v4225_v44 = vmul.f32 %v10231_v49, %v10231_v49  ;;  %v4227_v4 = vmul.f32 %v10234_v54, %v10234_v54 }
 0x7e5   :  { %v4230_v35 = vmul.f32 %v10243_v1, %v10243_v1  ;;  %v4232_v24 = vmul.f32 %v10246_v50, %v10246_v50 }
 0x7e6   :  { %v3823_v13 = vadd.f32 %v6382_v60, %v6302_v48  ;;  %v6303_v56 = vpop.f32.mrb[110].mxu1  ;;  %v6383_v21 = vpop.f32.mrb[114].mxu0  ;;  %v4229_v48 = vmul.f32 %v10251_v26, %v10251_v26  ;;  %v12108_v60 = vld [vmem:[#allocation41_spill] sm:$0xff] }
 0x7e7   :  { %v6304_v32 = vpop.f32.mrb[111].mxu1  ;;  %v6384_v43 = vpop.f32.mrb[115].mxu0 }
 0x7e8   :  { %v6305_v28 = vadd.f32 %v6304_v32, %v6303_v56  ;;  %v6385_v38 = vadd.f32 %v6384_v43, %v6383_v21  ;;  %6019 = vmatmul.mubr.msk.f32.gmra.mrb[120].mxu1 %vm379_vm0, %v10502_v61  ;;  %6035 = vmatmul.mubr.msk.f32.gmra.mrb[124].mxu0 %vm379_vm0, %v10502_v61  ;;  %v12110_v56 = vld [vmem:[#allocation44_spill] sm:$0xff] }
 0x7e9   :  { %3999 = vmatprep.mubr.f32.mxu1 %v12106_v34  ;;  %4160 = vmatprep.mubr.f32.mxu0 %v12106_v34  ;;  %v4234_v21 = vmul.f32 %v12110_v56, %v12110_v56  ;;  %v12112_v32 = vld [vmem:[#allocation48_spill] sm:$0xff] }
 0x7ea   :  { %v3828_v7 = vadd.f32 %v6385_v38, %v6305_v28  ;;  %v6306_v25 = vpop.f32.mrb[112].mxu1  ;;  %v6386_v33 = vpop.f32.mrb[116].mxu0  ;;  %v4233_v43 = vmul.f32 %v12112_v32, %v12112_v32  ;;  %v12113_v28 = vld [vmem:[#allocation49_spill] sm:$0xff] }
 0x7eb   :  { %v6307_v15 = vpop.f32.mrb[113].mxu1  ;;  %v6387_v53 = vpop.f32.mrb[117].mxu0  ;;  %v4235_v38 = vmul.f32 %v12113_v28, %v12113_v28 }
 0x7ec   :  { %v6308_v30 = vadd.f32 %v6307_v15, %v6306_v25  ;;  %v6388_v19 = vadd.f32 %v6387_v53, %v6386_v33  ;;  %v12115_v33 = vld [vmem:[#allocation51_spill] sm:$0xff]  ;;  %v12116_v53 = vld [vmem:[#allocation52_spill] sm:$0xff] }
 0x7ed   :  { %v4240_v15 = vmul.f32 %v12115_v33, %v12115_v33 }
 0x7ee   :  { %v3833_v63 = vadd.f32 %v6388_v19, %v6308_v30  ;;  %v6309_v9 = vpop.f32.mrb[114].mxu1  ;;  %v6389_v27 = vpop.f32.mrb[118].mxu0  ;;  %v4237_v30 = vmul.f32 %v12116_v53, %v12116_v53  ;;  %v12117_v19 = vld [vmem:[#allocation53_spill] sm:$0xff] }
 0x7ef   :  { %v6310_v62 = vpop.f32.mrb[115].mxu1  ;;  %v6390_v23 = vpop.f32.mrb[119].mxu0 }
 0x7f0   :  { %v6311_v52 = vadd.f32 %v6310_v62, %v6309_v9  ;;  %v6391_v22 = vadd.f32 %v6390_v23, %v6389_v27  ;;  %6020 = vmatmul.mubr.msk.f32.gmra.mrb[120].mxu1 %vm379_vm0, %v10508_v2  ;;  %6036 = vmatmul.mubr.msk.f32.gmra.mrb[124].mxu0 %vm379_vm0, %v10508_v2  ;;  %v12118_v9 = vld [vmem:[#allocation54_spill] sm:$0xff]  ;;  %v12119_v62 = vld [vmem:[#allocation55_spill] sm:$0xff] }
 0x7f1   :  { %4005 = vmatprep.mubr.f32.mxu1 %v12106_v34  ;;  %4166 = vmatprep.mubr.f32.mxu0 %v12106_v34  ;;  %v4242_v27 = vmul.f32 %v12118_v9, %v12118_v9  ;;  %v4244_v23 = vmul.f32 %v12119_v62, %v12119_v62 }
 0x7f2   :  { %v3838_v61 = vadd.f32 %v6391_v22, %v6311_v52  ;;  %v6312_v55 = vpop.f32.mrb[116].mxu1  ;;  %v6392_v40 = vpop.f32.mrb[120].mxu0  ;;  %v12120_v52 = vld [vmem:[#allocation56_spill] sm:$0xff] }
 0x7f3   :  { %v6313_v14 = vpop.f32.mrb[117].mxu1  ;;  %v6393_v3 = vpop.f32.mrb[121].mxu0  ;;  %v4241_v22 = vmul.f32 %v12120_v52, %v12120_v52 }
 0x7f4   :  { %v6314_v51 = vadd.f32 %v6313_v14, %v6312_v55  ;;  %v6394_v58 = vadd.f32 %v6393_v3, %v6392_v40  ;;  %v12122_v40 = vld [vmem:[#allocation58_spill] sm:$0xff]  ;;  %v12123_v3 = vld [vmem:[#allocation59_spill] sm:$0xff] }
 0x7f5   :  { %v4246_v14 = vmul.f32 %v12122_v40, %v12122_v40 }
 0x7f6   :  { %v3843_v5 = vadd.f32 %v6394_v58, %v6314_v51  ;;  %v6315_v10 = vpop.f32.mrb[118].mxu1  ;;  %v6395_v47 = vpop.f32.mrb[122].mxu0  ;;  %v4248_v51 = vmul.f32 %v12123_v3, %v12123_v3  ;;  %v12124_v58 = vld [vmem:[#allocation60_spill] sm:$0xff] }
 0x7f7   :  { %v6316_v36 = vpop.f32.mrb[119].mxu1  ;;  %v6396_v45 = vpop.f32.mrb[123].mxu0 }
 0x7f8   :  { %v6317_v11 = vadd.f32 %v6316_v36, %v6315_v10  ;;  %v6397_v8 = vadd.f32 %v6396_v45, %v6395_v47  ;;  %6021 = vmatmul.mubr.msk.f32.gmra.mrb[120].mxu1 %vm379_vm0, %v10518_v46  ;;  %6037 = vmatmul.mubr.msk.f32.gmra.mrb[124].mxu0 %vm379_vm0, %v10518_v46  ;;  %v4222_v46 = vmul.f32 %v10195_v57, %v10195_v57  ;;  %v12125_v10 = vld [vmem:[#allocation61_spill] sm:$0xff]  ;;  %v12126_v36 = vld [vmem:[#allocation62_spill] sm:$0xff] }
 0x7f9   :  { %4011 = vmatprep.mubr.f32.mxu1 %v12106_v34  ;;  %4172 = vmatprep.mubr.f32.mxu0 %v12106_v34  ;;  %v4247_v47 = vmul.f32 %v12125_v10, %v12125_v10  ;;  %v4250_v45 = vmul.f32 %v12126_v36, %v12126_v36 }
 0x7fa   :  { %v3848_v2 = vadd.f32 %v6397_v8, %v6317_v11  ;;  %v12127_v11 = vld [vmem:[#allocation63_spill] sm:$0xff] }
 0x7fb   :  { %v4252_v8 = vmul.f32 %v12127_v11, %v12127_v11 }
 0x800   :  { %6022 = vmatmul.mubr.msk.f32.gmra.mrb[120].mxu1 %vm379_vm0, %v10524_v29  ;;  %6038 = vmatmul.mubr.msk.f32.gmra.mrb[124].mxu0 %vm379_vm0, %v10524_v29  ;;  %v4224_v29 = vmul.f32 %v10198_v16, %v10198_v16 }
 0x801   :  { %4017 = vmatprep.mubr.f32.mxu1 %v12106_v34  ;;  %4178 = vmatprep.mubr.f32.mxu0 %v12106_v34 }
 0x808   :  { %6023 = vmatmul.mubr.msk.f32.gmra.mrb[120].mxu1 %vm379_vm0, %v3818_v39  ;;  %6039 = vmatmul.mubr.msk.f32.gmra.mrb[124].mxu0 %vm379_vm0, %v3818_v39  ;;  %v4228_v39 = vmul.f32 %v10224_v17, %v10224_v17 }
 0x809   :  { %4023 = vmatprep.mubr.f32.mxu1 %v12106_v34  ;;  %4184 = vmatprep.mubr.f32.mxu0 %v12106_v34 }
 0x810   :  { %6024 = vmatmul.mubr.msk.f32.gmra.mrb[120].mxu1 %vm379_vm0, %v3823_v13  ;;  %6040 = vmatmul.mubr.msk.f32.gmra.mrb[124].mxu0 %vm379_vm0, %v3823_v13  ;;  %v12109_v13 = vld [vmem:[#allocation46_spill] sm:$0xff] }
 0x811   :  { %4029 = vmatprep.mubr.f32.mxu1 %v12106_v34  ;;  %4190 = vmatprep.mubr.f32.mxu0 %v12106_v34 }
 0x818   :  { %6025 = vmatmul.mubr.msk.f32.gmra.mrb[120].mxu1 %vm379_vm0, %v3828_v7  ;;  %6041 = vmatmul.mubr.msk.f32.gmra.mrb[124].mxu0 %vm379_vm0, %v3828_v7  ;;  %v12114_v7 = vld [vmem:[#allocation50_spill] sm:$0xff] }
 0x819   :  { %4035 = vmatprep.mubr.f32.mxu1 %v12106_v34  ;;  %4196 = vmatprep.mubr.f32.mxu0 %v12106_v34  ;;  %v4238_v25 = vmul.f32 %v12114_v7, %v12114_v7 }
 0x820   :  { %6026 = vmatmul.mubr.msk.f32.gmra.mrb[120].mxu1 %vm379_vm0, %v3833_v63  ;;  %6042 = vmatmul.mubr.msk.f32.gmra.mrb[124].mxu0 %vm379_vm0, %v3833_v63  ;;  %v4239_v63 = vmul.f32 %v12117_v19, %v12117_v19 }
 0x821   :  { %4041 = vmatprep.mubr.f32.mxu1 %v12106_v34  ;;  %4202 = vmatprep.mubr.f32.mxu0 %v12106_v34 }
 0x828   :  { %6027 = vmatmul.mubr.msk.f32.gmra.mrb[120].mxu1 %vm379_vm0, %v3838_v61  ;;  %6043 = vmatmul.mubr.msk.f32.gmra.mrb[124].mxu0 %vm379_vm0, %v3838_v61  ;;  %v12121_v61 = vld [vmem:[#allocation57_spill] sm:$0xff] }
 0x829   :  { %4047 = vmatprep.mubr.f32.mxu1 %v12106_v34  ;;  %4208 = vmatprep.mubr.f32.mxu0 %v12106_v34  ;;  %v4243_v55 = vmul.f32 %v12121_v61, %v12121_v61 }
 0x830   :  { %6028 = vmatmul.mubr.msk.f32.gmra.mrb[120].mxu1 %vm379_vm0, %v3843_v5  ;;  %6044 = vmatmul.mubr.msk.f32.gmra.mrb[124].mxu0 %vm379_vm0, %v3843_v5  ;;  %v4245_v5 = vmul.f32 %v12124_v58, %v12124_v58 }
 0x831   :  { %4053 = vmatprep.mubr.f32.mxu1 %v12106_v34  ;;  %4214 = vmatprep.mubr.f32.mxu0 %v12106_v34 }
 0x838   :  { %6029 = vmatmul.mubr.msk.f32.gmra.mrb[120].mxu1 %vm379_vm0, %v3848_v2  ;;  %6045 = vmatmul.mubr.msk.f32.gmra.mrb[124].mxu0 %vm379_vm0, %v3848_v2  ;;  %v12128_v2 = vld [vmem:[#allocation64_spill] sm:$0xff] }
 0x839   :  { %4349 = vmatprep.mubr.f32.mxu1 %v4222_v46  ;;  %4494 = vmatprep.mubr.f32.mxu0 %v4224_v29  ;;  %v4249_v46 = vmul.f32 %v12128_v2, %v12128_v2  ;;  %v12129_v29 = vld [vmem:[#allocation65_spill] sm:$0xff] }
 0x83c   :  { %4350 = vmatmul.mubr.f32.vlgmr.msra.gmra.mrb[122].mxu1 %v4221_v41  ;;  %4495 = vmatmul.mubr.f32.vlgmr.msra.gmra.mrb[126].mxu0 %v4223_v42  ;;  %v4251_v41 = vmul.f32 %v12129_v29, %v12129_v29  ;;  %v12130_v42 = vld [vmem:[#allocation66_spill] sm:$0xff]  ;;  %v5441_v29 = vld [vmem:[%s11847_s17 + $0x28] sm:$0xff] }
 0x83d   :  { %4354 = vmatprep.mubr.f32.mxu1 %v4226_v59  ;;  %4499 = vmatprep.mubr.f32.mxu0 %v4228_v39  ;;  %v4254_v59 = vmul.f32 %v12130_v42, %v12130_v42  ;;  %v12131_v39 = vld [vmem:[#allocation67_spill] sm:$0xff] }
 0x83e   :  { %7025 = vmatpush1.bf16.msra.mxu1 %v10200_v37  ;;  %7033 = vmatpush1.bf16.msra.mxu0 %v10202_v6  ;;  %v12107_v37 = vld [vmem:[#allocation47_spill] sm:$0xff] }
 0x83f   :  { %7027 = vmatprep.subr.bf16.mxu1 %v10210_v18  ;;  %7035 = vmatprep.subr.bf16.mxu0 %v10212_v12  ;;  %v4231_v6 = vmul.f32 %v12107_v37, %v12107_v37  ;;  %v12111_v18 = vld [vmem:[#allocation39_spill] sm:$0xff] }
 0x840   :  { %4355 = vmatmul.mubr.f32.gmra.mrb[124].mxu1 %v4225_v44  ;;  %4500 = vmatmul.mubr.f32.gmra.mrb[128].mxu0 %v4227_v4  ;;  %v4236_v12 = vmul.f32 %v12111_v18, %v12111_v18  ;;  %v4256_v44 = vmul.f32 %v12131_v39, %v12131_v39  ;;  %v12132_v4 = vld [vmem:[#allocation68_spill] sm:$0xff] }
 0x841   :  { %4359 = vmatprep.mubr.f32.mxu1 %v4230_v35  ;;  %4504 = vmatprep.mubr.f32.mxu0 %v4232_v24  ;;  %v4253_v35 = vmul.f32 %v12132_v4, %v12132_v4  ;;  %v12133_v24 = vld [vmem:[#allocation69_spill] sm:$0xff] }
 0x842   :  { %7029 = vmatpush1.bf16.msra.mxu1 %v12108_v60  ;;  %7037 = vmatpush1.bf16.msra.mxu0 %v12109_v13  ;;  %v12135_v13 = vld [vmem:[#allocation71_spill] sm:$0xff] }
 0x844   :  { %4360 = vmatmul.mubr.f32.gmra.mrb[126].mxu1 %v4229_v48  ;;  %4505 = vmatmul.mubr.f32.gmra.mrb[130].mxu0 %v4231_v6  ;;  %v4255_v48 = vmul.f32 %v12133_v24, %v12133_v24  ;;  %v12134_v6 = vld [vmem:[#allocation70_spill] sm:$0xff] }
 0x845   :  { %4364 = vmatprep.mubr.f32.mxu1 %v4234_v21  ;;  %4509 = vmatprep.mubr.f32.mxu0 %v4236_v12  ;;  %v4258_v60 = vmul.f32 %v12134_v6, %v12134_v6  ;;  %v4260_v21 = vmul.f32 %v12135_v13, %v12135_v13  ;;  %v12136_v12 = vld [vmem:[#allocation72_spill] sm:$0xff]  ;;  %v5438_v13 = vld [vmem:[%s11847_s17 + $0x10] sm:$0xff] }
 0x848   :  { %4365 = vmatmul.mubr.f32.gmra.mrb[128].mxu1 %v4233_v43  ;;  %4510 = vmatmul.mubr.f32.gmra.mrb[132].mxu0 %v4235_v38  ;;  %v4257_v43 = vmul.f32 %v12136_v12, %v12136_v12  ;;  %v12137_v38 = vld [vmem:[#allocation73_spill] sm:$0xff] }
 0x849   :  { %4369 = vmatprep.mubr.f32.mxu1 %v4238_v25  ;;  %4514 = vmatprep.mubr.f32.mxu0 %v4240_v15  ;;  %v4259_v25 = vmul.f32 %v12137_v38, %v12137_v38  ;;  %v12138_v15 = vld [vmem:[#allocation74_spill] sm:$0xff]  ;;  %v5436_v38 = vld [vmem:[%s11847_s17] sm:$0xff] }
 0x84a   :  { %v7040_v10 = vpack.c.bf16 %v5438_v13, %v5436_v38 }
 0x84c   :  { %4370 = vmatmul.mubr.f32.gmra.mrb[130].mxu1 %v4237_v30  ;;  %4515 = vmatmul.mubr.f32.gmra.mrb[134].mxu0 %v4239_v63  ;;  %v4262_v30 = vmul.f32 %v12138_v15, %v12138_v15  ;;  %v12139_v63 = vld [vmem:[#allocation75_spill] sm:$0xff] }
 0x84d   :  { %4374 = vmatprep.mubr.f32.mxu1 %v4242_v27  ;;  %4519 = vmatprep.mubr.f32.mxu0 %v4244_v23  ;;  %v4264_v27 = vmul.f32 %v12139_v63, %v12139_v63  ;;  %v12140_v23 = vld [vmem:[#allocation76_spill] sm:$0xff] }
 0x850   :  { %4375 = vmatmul.mubr.f32.gmra.mrb[132].mxu1 %v4241_v22  ;;  %4520 = vmatmul.mubr.f32.gmra.mrb[136].mxu0 %v4243_v55  ;;  %v4261_v22 = vmul.f32 %v12140_v23, %v12140_v23  ;;  %v12141_v55 = vld [vmem:[#allocation77_spill] sm:$0xff] }
 0x851   :  { %4379 = vmatprep.mubr.f32.mxu1 %v4246_v14  ;;  %4524 = vmatprep.mubr.f32.mxu0 %v4248_v51  ;;  %v4263_v14 = vmul.f32 %v12141_v55, %v12141_v55  ;;  %v12142_v51 = vld [vmem:[#allocation78_spill] sm:$0xff] }
 0x854   :  { %4380 = vmatmul.mubr.f32.gmra.mrb[134].mxu1 %v4245_v5  ;;  %4525 = vmatmul.mubr.f32.gmra.mrb[138].mxu0 %v4247_v47  ;;  %v4266_v5 = vmul.f32 %v12142_v51, %v12142_v51  ;;  %v12143_v47 = vld [vmem:[#allocation79_spill] sm:$0xff] }
 0x855   :  { %4384 = vmatprep.mubr.f32.mxu1 %v4250_v45  ;;  %4529 = vmatprep.mubr.f32.mxu0 %v4252_v8  ;;  %v4268_v45 = vmul.f32 %v12143_v47, %v12143_v47  ;;  %v12144_v8 = vld [vmem:[#allocation80_spill] sm:$0xff] }
 0x858   :  { %4385 = vmatmul.mubr.f32.gmra.mrb[136].mxu1 %v4249_v46  ;;  %4530 = vmatmul.mubr.f32.gmra.mrb[140].mxu0 %v4251_v41  ;;  %v4265_v46 = vmul.f32 %v12144_v8, %v12144_v8  ;;  %v12145_v41 = vld [vmem:[#allocation81_spill] sm:$0xff] }
 0x859   :  { %4389 = vmatprep.mubr.f32.mxu1 %v4254_v59  ;;  %4534 = vmatprep.mubr.f32.mxu0 %v4256_v44  ;;  %v4267_v59 = vmul.f32 %v12145_v41, %v12145_v41  ;;  %v12146_v44 = vld [vmem:[#allocation82_spill] sm:$0xff] }
 0x85c   :  { %4390 = vmatmul.mubr.f32.gmra.mrb[138].mxu1 %v4253_v35  ;;  %4535 = vmatmul.mubr.f32.gmra.mrb[142].mxu0 %v4255_v48  ;;  %v4270_v35 = vmul.f32 %v12146_v44, %v12146_v44  ;;  %v12147_v48 = vld [vmem:[#allocation83_spill] sm:$0xff] }
 0x85d   :  { %4394 = vmatprep.mubr.f32.mxu1 %v4258_v60  ;;  %4539 = vmatprep.mubr.f32.mxu0 %v4260_v21  ;;  %v4272_v60 = vmul.f32 %v12147_v48, %v12147_v48  ;;  %v12148_v21 = vld [vmem:[#allocation84_spill] sm:$0xff] }
 0x860   :  { %4395 = vmatmul.mubr.f32.gmra.mrb[140].mxu1 %v4257_v43  ;;  %4540 = vmatmul.mubr.f32.gmra.mrb[144].mxu0 %v4259_v25  ;;  %v4269_v43 = vmul.f32 %v12148_v21, %v12148_v21  ;;  %v12149_v25 = vld [vmem:[#allocation85_spill] sm:$0xff] }
 0x861   :  { %4399 = vmatprep.mubr.f32.mxu1 %v4262_v30  ;;  %4544 = vmatprep.mubr.f32.mxu0 %v4264_v27  ;;  %v4271_v30 = vmul.f32 %v12149_v25, %v12149_v25  ;;  %v12150_v27 = vld [vmem:[#allocation86_spill] sm:$0xff]  ;;  %v12155_v25 = vld [vmem:[#allocation91_spill] sm:$0xff] }
 0x862   :  { %v4280_v41 = vmul.f32 %v12155_v25, %v12155_v25 }
 0x864   :  { %4400 = vmatmul.mubr.f32.gmra.mrb[142].mxu1 %v4261_v22  ;;  %4545 = vmatmul.mubr.f32.gmra.mrb[146].mxu0 %v4263_v14  ;;  %v4274_v22 = vmul.f32 %v12150_v27, %v12150_v27  ;;  %v12151_v14 = vld [vmem:[#allocation87_spill] sm:$0xff] }
 0x865   :  { %4404 = vmatprep.mubr.f32.mxu1 %v4266_v5  ;;  %4549 = vmatprep.mubr.f32.mxu0 %v4268_v45  ;;  %v4276_v5 = vmul.f32 %v12151_v14, %v12151_v14  ;;  %v12152_v45 = vld [vmem:[#allocation88_spill] sm:$0xff]  ;;  %v12158_v14 = vld [vmem:[#allocation94_spill] sm:$0xff] }
 0x866   :  { %v4282_v47 = vmul.f32 %v12158_v14, %v12158_v14 }
 0x868   :  { %4405 = vmatmul.mubr.f32.gmra.mrb[144].mxu1 %v4265_v46  ;;  %4550 = vmatmul.mubr.f32.gmra.mrb[148].mxu0 %v4267_v59  ;;  %v4273_v46 = vmul.f32 %v12152_v45, %v12152_v45  ;;  %v12153_v59 = vld [vmem:[#allocation89_spill] sm:$0xff] }
 0x869   :  { %4409 = vmatprep.mubr.f32.mxu1 %v4270_v35  ;;  %4554 = vmatprep.mubr.f32.mxu0 %v4272_v60  ;;  %v4275_v35 = vmul.f32 %v12153_v59, %v12153_v59  ;;  %v12154_v60 = vld [vmem:[#allocation90_spill] sm:$0xff]  ;;  %v12159_v59 = vld [vmem:[#allocation95_spill] sm:$0xff] }
 0x86a   :  { %v4278_v48 = vmul.f32 %v12154_v60, %v12154_v60  ;;  %v4284_v55 = vmul.f32 %v12159_v59, %v12159_v59 }
 0x86c   :  { %4410 = vmatmul.mubr.f32.gmra.mrb[146].mxu1 %v4269_v43  ;;  %4555 = vmatmul.mubr.f32.gmra.mrb[150].mxu0 %v4271_v30  ;;  %v12156_v43 = vld [vmem:[#allocation92_spill] sm:$0xff] }
 0x86d   :  { %4414 = vmatprep.mubr.f32.mxu1 %v4274_v22  ;;  %4559 = vmatprep.mubr.f32.mxu0 %v4276_v5  ;;  %v4277_v30 = vmul.f32 %v12156_v43, %v12156_v43  ;;  %v12157_v22 = vld [vmem:[#allocation93_spill] sm:$0xff] }
 0x86e   :  { %v4279_v5 = vmul.f32 %v12157_v22, %v12157_v22 }
 0x870   :  { %4415 = vmatmul.mubr.f32.gmra.mrb[148].mxu1 %v4273_v46  ;;  %4560 = vmatmul.mubr.f32.gmra.mrb[152].mxu0 %v4275_v35  ;;  %v12160_v46 = vld [vmem:[#allocation96_spill] sm:$0xff] }
 0x871   :  { %4419 = vmatprep.mubr.f32.mxu1 %v4278_v48  ;;  %4564 = vmatprep.mubr.f32.mxu0 %v4280_v41  ;;  %v4281_v48 = vmul.f32 %v12160_v46, %v12160_v46  ;;  %v12161_v41 = vld [vmem:[#allocation97_spill] sm:$0xff] }
 0x872   :  { %v4283_v35 = vmul.f32 %v12161_v41, %v12161_v41 }
 0x874   :  { %4420 = vmatmul.mubr.f32.gmra.mrb[150].mxu1 %v4277_v30  ;;  %4565 = vmatmul.mubr.f32.gmra.mrb[154].mxu0 %v4279_v5  ;;  %v5439_v5 = vld [vmem:[%s11847_s17 + $0x18] sm:$0xff] }
 0x875   :  { %4424 = vmatprep.mubr.f32.mxu1 %v4282_v47  ;;  %4569 = vmatprep.mubr.f32.mxu0 %v4284_v55  ;;  %v5437_v55 = vld [vmem:[%s11847_s17 + $0x8] sm:$0xff] }
 0x878   :  { %4425 = vmatmul.mubr.f32.gmra.mrb[152].mxu1 %v4281_v48  ;;  %4570 = vmatmul.mubr.f32.gmra.mrb[156].mxu0 %v4283_v35  ;;  %v7038_v48 = vpack.c.bf16 %v5439_v5, %v5437_v55  ;;  %v5443_v55 = vld [vmem:[%s11847_s17 + $0x38] sm:$0xff] }
 0x879   :  { %4687 = vmatprep.mubr.f32.mxu1 %v12106_v34  ;;  %4848 = vmatprep.mubr.f32.mxu0 %v12106_v34  ;;  %v7042_v62 = vpack.c.bf16 %v5443_v55, %v5441_v29  ;;  %v5447_v29 = vld [vmem:[%s11847_s17 + $0x58] sm:$0xff] }
 0x87a   :  { %7039 = vmatprep.subr.bf16.mxu1 %v7038_v48 }
 0x90b   :  { %v10722_v22 = vpop.f32.mrb[120].mxu1  ;;  %v10724_v25 = vpop.f32.mrb[124].mxu0 }
 0x90c   :  { %v10726_v30 = vpop.f32.mrb[121].mxu1  ;;  %v10728_v47 = vpop.f32.mrb[125].mxu0 }
 0x90f   :  { %v6430_v35 = vpop.f32.mrb[122].mxu1  ;;  %v6510_v41 = vpop.f32.mrb[126].mxu0 }
 0x910   :  { %v6431_v59 = vpop.f32.mrb[123].mxu1  ;;  %v6511_v63 = vpop.f32.mrb[127].mxu0 }
 0x911   :  { %v6432_v24 = vadd.f32 %v6431_v59, %v6430_v35  ;;  %v6512_v39 = vadd.f32 %v6511_v63, %v6510_v41  ;;  %v5440_v59 = vld [vmem:[%s11847_s17 + $0x20] sm:$0xff]  ;;  %v5442_v63 = vld [vmem:[%s11847_s17 + $0x30] sm:$0xff] }
 0x913   :  { %v4497_v5 = vadd.f32 %v6512_v39, %v6432_v24  ;;  %v6433_v48 = vpop.f32.mrb[124].mxu1  ;;  %v6513_v11 = vpop.f32.mrb[128].mxu0  ;;  %v5445_v39 = vld [vmem:[%s11847_s17 + $0x48] sm:$0xff] }
 0x914   :  { %v6434_v3 = vpop.f32.mrb[125].mxu1  ;;  %v6514_v61 = vpop.f32.mrb[129].mxu0  ;;  %v7046_v55 = vpack.c.bf16 %v5447_v29, %v5445_v39 }
 0x915   :  { %v6435_v41 = vadd.f32 %v6434_v3, %v6433_v48  ;;  %v6515_v35 = vadd.f32 %v6514_v61, %v6513_v11  ;;  %6046 = vmatmul.mubr.msk.f32.vlgmr.msra.gmra.mrb[154].mxu1 %vm379_vm0, %v4497_v5  ;;  %6062 = vmatmul.mubr.msk.f32.vlgmr.msra.gmra.mrb[158].mxu0 %vm379_vm0, %v4497_v5  ;;  %v7044_v61 = vpack.c.bf16 %v5442_v63, %v5440_v59  ;;  %v5444_v5 = vld [vmem:[%s11847_s17 + $0x40] sm:$0xff]  ;;  %v5446_v48 = vld [vmem:[%s11847_s17 + $0x50] sm:$0xff] }
 0x916   :  { %4693 = vmatprep.mubr.f32.mxu1 %v12106_v34  ;;  %4854 = vmatprep.mubr.f32.mxu0 %v12106_v34 }
 0x917   :  { %v4502_v24 = vadd.f32 %v6515_v35, %v6435_v41  ;;  %v6436_v13 = vpop.f32.mrb[126].mxu1  ;;  %v6516_v3 = vpop.f32.mrb[130].mxu0  ;;  %7041 = vmatpush1.bf16.msra.mxu1 %v7040_v10  ;;  %v5449_v41 = vld [vmem:[%s11847_s17 + $0x68] sm:$0xff]  ;;  %v5451_v10 = vld [vmem:[%s11847_s17 + $0x78] sm:$0xff]  ;;  %v7048_v35 = vpack.c.bf16 %v5446_v48, %v5444_v5 }
 0x918   :  { %v6437_v11 = vpop.f32.mrb[127].mxu1  ;;  %v6517_v38 = vpop.f32.mrb[131].mxu0  ;;  %7043 = vmatprep.subr.bf16.mxu1 %v7042_v62  ;;  %v7050_v28 = vpack.c.bf16 %v5451_v10, %v5449_v41 }
 0x919   :  { %v6438_v19 = vadd.f32 %v6437_v11, %v6436_v13  ;;  %v6518_v33 = vadd.f32 %v6517_v38, %v6516_v3  ;;  %v5448_v13 = vld [vmem:[%s11847_s17 + $0x60] sm:$0xff]  ;;  %v5450_v3 = vld [vmem:[%s11847_s17 + $0x70] sm:$0xff] }
 0x91a   :  { %v7052_v48 = vpack.c.bf16 %v5450_v3, %v5448_v13 }
 0x91b   :  { %v4507_v62 = vadd.f32 %v6518_v33, %v6438_v19  ;;  %v6439_v59 = vpop.f32.mrb[128].mxu1  ;;  %v6519_v63 = vpop.f32.mrb[132].mxu0  ;;  %7045 = vmatpush1.bf16.msra.mxu1 %v7044_v61  ;;  %v5453_v33 = vld [vmem:[%s11847_s17 + $0x88] sm:$0xff]  ;;  %v5455_v19 = vld [vmem:[%s11847_s17 + $0x98] sm:$0xff] }
 0x91c   :  { %v6440_v39 = vpop.f32.mrb[129].mxu1  ;;  %v6520_v29 = vpop.f32.mrb[133].mxu0  ;;  %7047 = vmatprep.subr.bf16.mxu1 %v7046_v55  ;;  %v7054_v10 = vpack.c.bf16 %v5455_v19, %v5453_v33 }
 0x91d   :  { %v6441_v11 = vadd.f32 %v6440_v39, %v6439_v59  ;;  %v6521_v38 = vadd.f32 %v6520_v29, %v6519_v63  ;;  %6047 = vmatmul.mubr.msk.f32.gmra.mrb[154].mxu1 %vm379_vm0, %v4502_v24  ;;  %6063 = vmatmul.mubr.msk.f32.gmra.mrb[158].mxu0 %vm379_vm0, %v4502_v24  ;;  %v5452_v59 = vld [vmem:[%s11847_s17 + $0x80] sm:$0xff]  ;;  %v5454_v63 = vld [vmem:[%s11847_s17 + $0x90] sm:$0xff] }
 0x91e   :  { %4699 = vmatprep.mubr.f32.mxu1 %v12106_v34  ;;  %4860 = vmatprep.mubr.f32.mxu0 %v12106_v34 }
 0x91f   :  { %v10792_v61 = vadd.f32 %v6521_v38, %v6441_v11  ;;  %v6442_v55 = vpop.f32.mrb[130].mxu1  ;;  %v6522_v5 = vpop.f32.mrb[134].mxu0  ;;  %7049 = vmatpush1.bf16.msra.mxu1 %v7048_v35  ;;  %v5457_v11 = vld [vmem:[%s11847_s17 + $0xa8] sm:$0xff]  ;;  %v5459_v35 = vld [vmem:[%s11847_s17 + $0xb8] sm:$0xff]  ;;  %v7056_v38 = vpack.c.bf16 %v5454_v63, %v5452_v59 }
 0x920   :  { %v6443_v41 = vpop.f32.mrb[131].mxu1  ;;  %v6523_v24 = vpop.f32.mrb[135].mxu0  ;;  %7051 = vmatprep.subr.bf16.mxu1 %v7050_v28  ;;  %v7058_v18 = vpack.c.bf16 %v5459_v35, %v5457_v11 }
 0x921   :  { %v6444_v39 = vadd.f32 %v6443_v41, %v6442_v55  ;;  %v6524_v29 = vadd.f32 %v6523_v24, %v6522_v5  ;;  %v5456_v55 = vld [vmem:[%s11847_s17 + $0xa0] sm:$0xff]  ;;  %v5458_v5 = vld [vmem:[%s11847_s17 + $0xb0] sm:$0xff] }
 0x923   :  { %v10806_v28 = vadd.f32 %v6524_v29, %v6444_v39  ;;  %v6445_v13 = vpop.f32.mrb[132].mxu1  ;;  %v6525_v3 = vpop.f32.mrb[136].mxu0  ;;  %7053 = vmatpush1.bf16.msra.mxu1 %v7052_v48  ;;  %v5461_v48 = vld [vmem:[%s11847_s17 + $0xc8] sm:$0xff]  ;;  %v7060_v29 = vpack.c.bf16 %v5458_v5, %v5456_v55 }
 0x924   :  { %v6446_v33 = vpop.f32.mrb[133].mxu1  ;;  %v6526_v19 = vpop.f32.mrb[137].mxu0  ;;  %7055 = vmatprep.subr.bf16.mxu1 %v7054_v10  ;;  %v5463_v10 = vld [vmem:[%s11847_s17 + $0xd8] sm:$0xff] }
 0x925   :  { %v6447_v41 = vadd.f32 %v6446_v33, %v6445_v13  ;;  %v6527_v24 = vadd.f32 %v6526_v19, %v6525_v3  ;;  %6048 = vmatmul.mubr.msk.f32.gmra.mrb[154].mxu1 %vm379_vm0, %v4507_v62  ;;  %6064 = vmatmul.mubr.msk.f32.gmra.mrb[158].mxu0 %vm379_vm0, %v4507_v62  ;;  %v7062_v35 = vpack.c.bf16 %v5463_v10, %v5461_v48  ;;  %v5460_v13 = vld [vmem:[%s11847_s17 + $0xc0] sm:$0xff]  ;;  %v5462_v3 = vld [vmem:[%s11847_s17 + $0xd0] sm:$0xff] }
 0x926   :  { %4705 = vmatprep.mubr.f32.mxu1 %v12106_v34  ;;  %4866 = vmatprep.mubr.f32.mxu0 %v12106_v34 }
 0x927   :  { %v10824_v59 = vadd.f32 %v6527_v24, %v6447_v41  ;;  %v6448_v63 = vpop.f32.mrb[134].mxu1  ;;  %v6528_v39 = vpop.f32.mrb[138].mxu0  ;;  %7057 = vmatpush1.bf16.msra.mxu1 %v7056_v38  ;;  %v5465_v41 = vld [vmem:[%s11847_s17 + $0xe8] sm:$0xff]  ;;  %v5467_v38 = vld [vmem:[%s11847_s17 + $0xf8] sm:$0xff]  ;;  %v7064_v24 = vpack.c.bf16 %v5462_v3, %v5460_v13 }
 0x928   :  { %v6449_v11 = vpop.f32.mrb[135].mxu1  ;;  %v6529_v62 = vpop.f32.mrb[139].mxu0  ;;  %7059 = vmatprep.subr.bf16.mxu1 %v7058_v18  ;;  %v7066_v37 = vpack.c.bf16 %v5467_v38, %v5465_v41 }
 0x929   :  { %v6450_v33 = vadd.f32 %v6449_v11, %v6448_v63  ;;  %v6530_v19 = vadd.f32 %v6529_v62, %v6528_v39  ;;  %v5464_v63 = vld [vmem:[%s11847_s17 + $0xe0] sm:$0xff]  ;;  %v5466_v39 = vld [vmem:[%s11847_s17 + $0xf0] sm:$0xff] }
 0x92b   :  { %v10838_v18 = vadd.f32 %v6530_v19, %v6450_v33  ;;  %v6451_v55 = vpop.f32.mrb[136].mxu1  ;;  %v6531_v5 = vpop.f32.mrb[140].mxu0  ;;  %7061 = vmatpush1.bf16.msra.mxu1 %v7060_v29  ;;  %v5469_v29 = vld [vmem:[%s11847_s17 + $0x108] sm:$0xff]  ;;  %v7068_v19 = vpack.c.bf16 %v5466_v39, %v5464_v63 }
 0x92c   :  { %v6452_v48 = vpop.f32.mrb[137].mxu1  ;;  %v6532_v10 = vpop.f32.mrb[141].mxu0  ;;  %7063 = vmatprep.subr.bf16.mxu1 %v7062_v35  ;;  %v5471_v35 = vld [vmem:[%s11847_s17 + $0x118] sm:$0xff] }
 0x92d   :  { %v6453_v11 = vadd.f32 %v6452_v48, %v6451_v55  ;;  %v6533_v62 = vadd.f32 %v6532_v10, %v6531_v5  ;;  %6049 = vmatmul.mubr.msk.f32.gmra.mrb[154].mxu1 %vm379_vm0, %v10792_v61  ;;  %6065 = vmatmul.mubr.msk.f32.gmra.mrb[158].mxu0 %vm379_vm0, %v10792_v61  ;;  %v7070_v38 = vpack.c.bf16 %v5471_v35, %v5469_v29 }
 0x92e   :  { %4711 = vmatprep.mubr.f32.mxu1 %v12106_v34  ;;  %4872 = vmatprep.mubr.f32.mxu0 %v12106_v34 }
 0x92f   :  { %v10858_v13 = vadd.f32 %v6533_v62, %v6453_v11  ;;  %v6454_v3 = vpop.f32.mrb[138].mxu1  ;;  %v6534_v33 = vpop.f32.mrb[142].mxu0  ;;  %7065 = vmatpush1.bf16.msra.mxu1 %v7064_v24 }
 0x930   :  { %v6455_v41 = vpop.f32.mrb[139].mxu1  ;;  %v6535_v61 = vpop.f32.mrb[143].mxu0  ;;  %7067 = vmatprep.subr.bf16.mxu1 %v7066_v37 }
 0x931   :  { %v6456_v55 = vadd.f32 %v6455_v41, %v6454_v3  ;;  %v6536_v5 = vadd.f32 %v6535_v61, %v6534_v33 }
 0x933   :  { %v10860_v48 = vadd.f32 %v6536_v5, %v6456_v55  ;;  %v6457_v10 = vpop.f32.mrb[140].mxu1  ;;  %v6537_v50 = vpop.f32.mrb[144].mxu0  ;;  %7069 = vmatpush1.bf16.msra.mxu1 %v7068_v19 }
 0x934   :  { %v6458_v54 = vpop.f32.mrb[141].mxu1  ;;  %v6538_v17 = vpop.f32.mrb[145].mxu0  ;;  %7071 = vmatprep.subr.bf16.mxu1 %v7070_v38 }
 0x935   :  { %v6459_v11 = vadd.f32 %v6458_v54, %v6457_v10  ;;  %v6539_v62 = vadd.f32 %v6538_v17, %v6537_v50  ;;  %6050 = vmatmul.mubr.msk.f32.gmra.mrb[154].mxu1 %vm379_vm0, %v10806_v28  ;;  %6066 = vmatmul.mubr.msk.f32.gmra.mrb[158].mxu0 %vm379_vm0, %v10806_v28 }
 0x936   :  { %4717 = vmatprep.mubr.f32.mxu1 %v12106_v34  ;;  %4878 = vmatprep.mubr.f32.mxu0 %v12106_v34 }
 0x937   :  { %v4542_v37 = vadd.f32 %v6539_v62, %v6459_v11  ;;  %v6460_v24 = vpop.f32.mrb[142].mxu1  ;;  %v6540_v63 = vpop.f32.mrb[146].mxu0 }
 0x938   :  { %v6461_v39 = vpop.f32.mrb[143].mxu1  ;;  %v6541_v29 = vpop.f32.mrb[147].mxu0 }
 0x939   :  { %v6462_v35 = vadd.f32 %v6461_v39, %v6460_v24  ;;  %v6542_v3 = vadd.f32 %v6541_v29, %v6540_v63 }
 0x93b   :  { %v4547_v33 = vadd.f32 %v6542_v3, %v6462_v35  ;;  %v6463_v54 = vpop.f32.mrb[144].mxu1  ;;  %v6543_v17 = vpop.f32.mrb[148].mxu0 }
 0x93c   :  { %v6464_v50 = vpop.f32.mrb[145].mxu1  ;;  %v6544_v19 = vpop.f32.mrb[149].mxu0 }
 0x93d   :  { %v6465_v41 = vadd.f32 %v6464_v50, %v6463_v54  ;;  %v6545_v61 = vadd.f32 %v6544_v19, %v6543_v17  ;;  %6051 = vmatmul.mubr.msk.f32.gmra.mrb[154].mxu1 %vm379_vm0, %v10824_v59  ;;  %6067 = vmatmul.mubr.msk.f32.gmra.mrb[158].mxu0 %vm379_vm0, %v10824_v59 }
 0x93e   :  { %4723 = vmatprep.mubr.f32.mxu1 %v12106_v34  ;;  %4884 = vmatprep.mubr.f32.mxu0 %v12106_v34 }
 0x93f   :  { %v4552_v28 = vadd.f32 %v6545_v61, %v6465_v41  ;;  %v6466_v38 = vpop.f32.mrb[146].mxu1  ;;  %v6546_v55 = vpop.f32.mrb[150].mxu0 }
 0x940   :  { %v6467_v5 = vpop.f32.mrb[147].mxu1  ;;  %v6547_v10 = vpop.f32.mrb[151].mxu0 }
 0x941   :  { %v6468_v11 = vadd.f32 %v6467_v5, %v6466_v38  ;;  %v6548_v62 = vadd.f32 %v6547_v10, %v6546_v55 }
 0x943   :  { %v4557_v24 = vadd.f32 %v6548_v62, %v6468_v11  ;;  %v6469_v63 = vpop.f32.mrb[148].mxu1  ;;  %v6549_v39 = vpop.f32.mrb[152].mxu0 }
 0x944   :  { %v6470_v29 = vpop.f32.mrb[149].mxu1  ;;  %v6550_v35 = vpop.f32.mrb[153].mxu0 }
 0x945   :  { %v6471_v3 = vadd.f32 %v6470_v29, %v6469_v63  ;;  %v6551_v54 = vadd.f32 %v6550_v35, %v6549_v39  ;;  %6052 = vmatmul.mubr.msk.f32.gmra.mrb[154].mxu1 %vm379_vm0, %v10838_v18  ;;  %6068 = vmatmul.mubr.msk.f32.gmra.mrb[158].mxu0 %vm379_vm0, %v10838_v18  ;;  %v5474_v29 = vld [vmem:[%s11847_s17 + $0x130] sm:$0xff]  ;;  %v5477_v35 = vld [vmem:[%s11847_s17 + $0x148] sm:$0xff] }
 0x946   :  { %4729 = vmatprep.mubr.f32.mxu1 %v12106_v34  ;;  %4890 = vmatprep.mubr.f32.mxu0 %v12106_v34 }
 0x947   :  { %v4562_v59 = vadd.f32 %v6551_v54, %v6471_v3  ;;  %v6472_v17 = vpop.f32.mrb[150].mxu1  ;;  %v6552_v50 = vpop.f32.mrb[154].mxu0  ;;  %v5479_v3 = vld [vmem:[%s11847_s17 + $0x158] sm:$0xff] }
 0x948   :  { %v6473_v19 = vpop.f32.mrb[151].mxu1  ;;  %v6553_v41 = vpop.f32.mrb[155].mxu0 }
 0x949   :  { %v6474_v61 = vadd.f32 %v6473_v19, %v6472_v17  ;;  %v6554_v38 = vadd.f32 %v6553_v41, %v6552_v50  ;;  %v5476_v17 = vld [vmem:[%s11847_s17 + $0x140] sm:$0xff]  ;;  %v5478_v50 = vld [vmem:[%s11847_s17 + $0x150] sm:$0xff]  ;;  %v5481_v19 = vld [vmem:[%s11847_s17 + $0x168] sm:$0xff] }
 0x94a   :  { %v5483_v41 = vld [vmem:[%s11847_s17 + $0x178] sm:$0xff] }
 0x94b   :  { %v4567_v55 = vadd.f32 %v6554_v38, %v6474_v61  ;;  %v6475_v5 = vpop.f32.mrb[152].mxu1  ;;  %v6555_v10 = vpop.f32.mrb[156].mxu0  ;;  %v7080_v61 = vpack.c.bf16 %v5478_v50, %v5476_v17  ;;  %v7082_v38 = vpack.c.bf16 %v5483_v41, %v5481_v19  ;;  %v5497_v17 = vld [vmem:[%s11847_s17 + $0x1e8] sm:$0xff]  ;;  %v5499_v50 = vld [vmem:[%s11847_s17 + $0x1f8] sm:$0xff] }
 0x94c   :  { %v6476_v11 = vpop.f32.mrb[153].mxu1  ;;  %v6556_v62 = vpop.f32.mrb[157].mxu0  ;;  %v7098_v41 = vpack.c.bf16 %v5499_v50, %v5497_v17 }
 0x94d   :  { %v6477_v63 = vadd.f32 %v6476_v11, %v6475_v5  ;;  %v6557_v39 = vadd.f32 %v6556_v62, %v6555_v10  ;;  %6053 = vmatmul.mubr.msk.f32.gmra.mrb[154].mxu1 %vm379_vm0, %v10858_v13  ;;  %6069 = vmatmul.mubr.msk.f32.gmra.mrb[158].mxu0 %vm379_vm0, %v10858_v13  ;;  %v5468_v13 = vld [vmem:[%s11847_s17 + $0x100] sm:$0xff]  ;;  %v5482_v5 = vld [vmem:[%s11847_s17 + $0x170] sm:$0xff]  ;;  %v5485_v10 = vld [vmem:[%s11847_s17 + $0x188] sm:$0xff] }
 0x94e   :  { %4735 = vmatprep.mubr.f32.mxu1 %v12106_v34  ;;  %4896 = vmatprep.mubr.f32.mxu0 %v12106_v34  ;;  %v5487_v11 = vld [vmem:[%s11847_s17 + $0x198] sm:$0xff] }
 0x94f   :  { %v4572_v18 = vadd.f32 %v6557_v39, %v6477_v63  ;;  %v7086_v63 = vpack.c.bf16 %v5487_v11, %v5485_v10  ;;  %v5484_v39 = vld [vmem:[%s11847_s17 + $0x180] sm:$0xff] }
 0x955   :  { %6054 = vmatmul.mubr.msk.f32.gmra.mrb[154].mxu1 %vm379_vm0, %v10860_v48  ;;  %6070 = vmatmul.mubr.msk.f32.gmra.mrb[158].mxu0 %vm379_vm0, %v10860_v48  ;;  %v5470_v48 = vld [vmem:[%s11847_s17 + $0x110] sm:$0xff] }
 0x956   :  { %4741 = vmatprep.mubr.f32.mxu1 %v12106_v34  ;;  %4902 = vmatprep.mubr.f32.mxu0 %v12106_v34 }
 0x95d   :  { %6055 = vmatmul.mubr.msk.f32.gmra.mrb[154].mxu1 %vm379_vm0, %v4542_v37  ;;  %6071 = vmatmul.mubr.msk.f32.gmra.mrb[158].mxu0 %vm379_vm0, %v4542_v37  ;;  %v7072_v37 = vpack.c.bf16 %v5470_v48, %v5468_v13  ;;  %v5489_v13 = vld [vmem:[%s11847_s17 + $0x1a8] sm:$0xff]  ;;  %v5491_v48 = vld [vmem:[%s11847_s17 + $0x1b8] sm:$0xff] }
 0x95e   :  { %4747 = vmatprep.mubr.f32.mxu1 %v12106_v34  ;;  %4908 = vmatprep.mubr.f32.mxu0 %v12106_v34 }
 0x95f   :  { %7073 = vmatpush1.bf16.msra.mxu1 %v7072_v37 }
 0x965   :  { %6056 = vmatmul.mubr.msk.f32.gmra.mrb[154].mxu1 %vm379_vm0, %v4547_v33  ;;  %6072 = vmatmul.mubr.msk.f32.gmra.mrb[158].mxu0 %vm379_vm0, %v4547_v33  ;;  %v5473_v33 = vld [vmem:[%s11847_s17 + $0x128] sm:$0xff] }
 0x966   :  { %4753 = vmatprep.mubr.f32.mxu1 %v12106_v34  ;;  %4914 = vmatprep.mubr.f32.mxu0 %v12106_v34 }
 0x96d   :  { %6057 = vmatmul.mubr.msk.f32.gmra.mrb[154].mxu1 %vm379_vm0, %v4552_v28  ;;  %6073 = vmatmul.mubr.msk.f32.gmra.mrb[158].mxu0 %vm379_vm0, %v4552_v28  ;;  %v5472_v28 = vld [vmem:[%s11847_s17 + $0x120] sm:$0xff] }
 0x96e   :  { %4759 = vmatprep.mubr.f32.mxu1 %v12106_v34  ;;  %4920 = vmatprep.mubr.f32.mxu0 %v12106_v34  ;;  %v7076_v54 = vpack.c.bf16 %v5474_v29, %v5472_v28  ;;  %v5490_v28 = vld [vmem:[%s11847_s17 + $0x1b0] sm:$0xff]  ;;  %v5495_v29 = vld [vmem:[%s11847_s17 + $0x1d8] sm:$0xff] }
 0x975   :  { %6058 = vmatmul.mubr.msk.f32.gmra.mrb[154].mxu1 %vm379_vm0, %v4557_v24  ;;  %6074 = vmatmul.mubr.msk.f32.gmra.mrb[158].mxu0 %vm379_vm0, %v4557_v24 }
 0x976   :  { %4765 = vmatprep.mubr.f32.mxu1 %v12106_v34  ;;  %4926 = vmatprep.mubr.f32.mxu0 %v12106_v34 }
 0x97d   :  { %6059 = vmatmul.mubr.msk.f32.gmra.mrb[154].mxu1 %vm379_vm0, %v4562_v59  ;;  %6075 = vmatmul.mubr.msk.f32.gmra.mrb[158].mxu0 %vm379_vm0, %v4562_v59  ;;  %v7078_v59 = vpack.c.bf16 %v5479_v3, %v5477_v35 }
 0x97e   :  { %4771 = vmatprep.mubr.f32.mxu1 %v12106_v34  ;;  %4932 = vmatprep.mubr.f32.mxu0 %v12106_v34 }
 0x985   :  { %6060 = vmatmul.mubr.msk.f32.gmra.mrb[154].mxu1 %vm379_vm0, %v4567_v55  ;;  %6076 = vmatmul.mubr.msk.f32.gmra.mrb[158].mxu0 %vm379_vm0, %v4567_v55  ;;  %v5480_v55 = vld [vmem:[%s11847_s17 + $0x160] sm:$0xff] }
 0x986   :  { %4777 = vmatprep.mubr.f32.mxu1 %v12106_v34  ;;  %4938 = vmatprep.mubr.f32.mxu0 %v12106_v34  ;;  %v5475_v34 = vld [vmem:[%s11847_s17 + $0x138] sm:$0xff]  ;;  %v7084_v62 = vpack.c.bf16 %v5482_v5, %v5480_v55  ;;  %v5501_v55 = vld [vmem:[%s11847_s17 + $0x208] sm:$0xff] }
 0x987   :  { %v7074_v24 = vpack.c.bf16 %v5475_v34, %v5473_v33  ;;  %v7090_v33 = vpack.c.bf16 %v5491_v48, %v5489_v13  ;;  %v5488_v34 = vld [vmem:[%s11847_s17 + $0x1a0] sm:$0xff]  ;;  %v5503_v5 = vld [vmem:[%s11847_s17 + $0x218] sm:$0xff] }
 0x988   :  { %v7092_v35 = vpack.c.bf16 %v5490_v28, %v5488_v34  ;;  %v7102_v11 = vpack.c.bf16 %v5503_v5, %v5501_v55 }
 0x989   :  { %7075 = vmatprep.subr.bf16.mxu1 %v7074_v24  ;;  %v5493_v24 = vld [vmem:[%s11847_s17 + $0x1c8] sm:$0xff] }
 0x98a   :  { %7077 = vmatpush1.bf16.msra.mxu1 %v7076_v54  ;;  %v7094_v3 = vpack.c.bf16 %v5495_v29, %v5493_v24  ;;  %v5492_v54 = vld [vmem:[%s11847_s17 + $0x1c0] sm:$0xff] }
 0x98b   :  { %7079 = vmatprep.subr.bf16.mxu1 %v7078_v59  ;;  %v5494_v59 = vld [vmem:[%s11847_s17 + $0x1d0] sm:$0xff] }
 0x98c   :  { %v7096_v19 = vpack.c.bf16 %v5494_v59, %v5492_v54 }
 0x98d   :  { %6061 = vmatmul.mubr.msk.f32.gmra.mrb[154].mxu1 %vm379_vm0, %v4572_v18  ;;  %6077 = vmatmul.mubr.msk.f32.gmra.mrb[158].mxu0 %vm379_vm0, %v4572_v18  ;;  %v5486_v18 = vld [vmem:[%s11847_s17 + $0x190] sm:$0xff] }
 0x98e   :  { %7081 = vmatpush1.bf16.msra.mxu1 %v7080_v61  ;;  %v7088_v37 = vpack.c.bf16 %v5486_v18, %v5484_v39  ;;  %v5496_v61 = vld [vmem:[%s11847_s17 + $0x1e0] sm:$0xff]  ;;  %v4981_v39 = vrot.slane %v10726_v30, 4  ;;  %v5023_v18 = vrot.slane %v10728_v47, 4 }
 0x98f   :  { %7083 = vmatprep.subr.bf16.mxu1 %v7082_v38  ;;  %v5498_v38 = vld [vmem:[%s11847_s17 + $0x1f0] sm:$0xff] }
 0x990   :  { %v7100_v10 = vpack.c.bf16 %v5498_v38, %v5496_v61 }
 0x992   :  { %7085 = vmatpush1.bf16.msra.mxu1 %v7084_v62  ;;  %v4960_v62 = vrot.slane %v10722_v22, 4 }
 0x993   :  { %7087 = vmatprep.subr.bf16.mxu1 %v7086_v63  ;;  %v5002_v63 = vrot.slane %v10724_v25, 4 }
 0x994   :  { %v4961_v13 = vadd.f32 %v4960_v62, %v10722_v22 }
 0x995   :  { %v5003_v48 = vadd.f32 %v5002_v63, %v10724_v25 }
 0x996   :  { %7089 = vmatpush1.bf16.msra.mxu1 %v7088_v37  ;;  %v4982_v37 = vadd.f32 %v4981_v39, %v10726_v30  ;;  %v4962_v34 = vrot.slane %v4961_v13, 2 }
 0x997   :  { %7091 = vmatprep.subr.bf16.mxu1 %v7090_v33  ;;  %v5024_v33 = vadd.f32 %v5023_v18, %v10728_v47  ;;  %v5004_v28 = vrot.slane %v5003_v48, 2 }
 0x998   :  { %v4983_v24 = vrot.slane %v4982_v37, 2 }
 0x999   :  { %v5025_v29 = vrot.slane %v5024_v33, 2 }
 0x99a   :  { %7093 = vmatpush1.bf16.msra.mxu1 %v7092_v35  ;;  %v4963_v35 = vadd.f32 %v4962_v34, %v4961_v13  ;;  %v4984_v54 = vadd.f32 %v4983_v24, %v4982_v37 }
 0x99b   :  { %7095 = vmatprep.subr.bf16.mxu1 %v7094_v3  ;;  %v5005_v3 = vadd.f32 %v5004_v28, %v5003_v48  ;;  %v5026_v59 = vadd.f32 %v5025_v29, %v5024_v33 }
 0x99c   :  { %v4985_v55 = vrot.slane %v4984_v54, 1 }
 0x99d   :  { %v5027_v30 = vrot.slane %v5026_v59, 1 }
 0x99e   :  { %7097 = vmatpush1.bf16.msra.mxu1 %v7096_v19  ;;  %v4964_v19 = vrot.slane %v4963_v35, 1  ;;  %v4986_v37 = vadd.f32 %v4985_v55, %v4984_v54 }
 0x99f   :  { %7099 = vmatprep.subr.bf16.mxu1 %v7098_v41  ;;  %v5006_v41 = vrot.slane %v5005_v3, 1  ;;  %v5028_v33 = vadd.f32 %v5027_v30, %v5026_v59 }
 0x9a0   :  { %v4965_v39 = vadd.f32 %v4964_v19, %v4963_v35 }
 0x9a1   :  { %v5007_v18 = vadd.f32 %v5006_v41, %v5005_v3 }
 0x9a2   :  { %7101 = vmatpush1.bf16.msra.mxu1 %v7100_v10  ;;  %v5030_v46 = vmul.f32 0.00048828125, %v4965_v39 }
 0x9a3   :  { %7103 = vmatprep.subr.bf16.mxu1 %v7102_v11  ;;  %v5032_v14 = vmul.f32 0.00048828125, %v5007_v18 }
 0x9a4   :  { %v5122_v54 = vmul.f32 %v5030_v46, %v5030_v46 }
 0x9a5   :  { %v5124_v59 = vmul.f32 %v5032_v14, %v5032_v14 }
 0xa60   :  { %v4779_v17 = vpop.f32.mrb[154].mxu1  ;;  %v4940_v50 = vpop.f32.mrb[158].mxu0 }
 0xa61   :  { %v5049_v61 = vrot.slane %v4779_v17, 4  ;;  %v5091_v22 = vrot.slane %v4940_v50, 4  ;;  %v4781_v38 = vpop.f32.mrb[155].mxu1  ;;  %v4942_v25 = vpop.f32.mrb[159].mxu0 }
 0xa62   :  { %v5070_v5 = vrot.slane %v4781_v38, 4  ;;  %v5112_v47 = vrot.slane %v4942_v25, 4 }
 0xa63   :  { %v5050_v10 = vadd.f32 %v5049_v61, %v4779_v17  ;;  %v5092_v11 = vadd.f32 %v5091_v22, %v4940_v50  ;;  %v5031_v17 = vmul.f32 0.00048828125, %v4986_v37  ;;  %v5033_v50 = vmul.f32 0.00048828125, %v5028_v33 }
 0xa64   :  { %v5071_v62 = vadd.f32 %v5070_v5, %v4781_v38  ;;  %v5113_v63 = vadd.f32 %v5112_v47, %v4942_v25 }
 0xa65   :  { %v5051_v13 = vrot.slane %v5050_v10, 2  ;;  %v5093_v48 = vrot.slane %v5092_v11, 2  ;;  %v5123_v55 = vmul.f32 %v5031_v17, %v5031_v17  ;;  %v5125_v30 = vmul.f32 %v5033_v50, %v5033_v50 }
 0xa66   :  { %v5072_v34 = vrot.slane %v5071_v62, 2  ;;  %v5114_v28 = vrot.slane %v5113_v63, 2 }
 0xa67   :  { %v5052_v24 = vadd.f32 %v5051_v13, %v5050_v10  ;;  %v5094_v29 = vadd.f32 %v5093_v48, %v5092_v11 }
 0xa68   :  { %v5073_v31 = vadd.f32 %v5072_v34, %v5071_v62  ;;  %v5115_v16 = vadd.f32 %v5114_v28, %v5113_v63  ;;  %v12162_v34 = vld [vmem:[#allocation38_spill] sm:$0xff] }
 0xa69   :  { %v5053_v43 = vrot.slane %v5052_v24, 1  ;;  %v5095_v60 = vrot.slane %v5094_v29, 1 }
 0xa6a   :  { %v5074_v61 = vrot.slane %v5073_v31, 1  ;;  %v5116_v22 = vrot.slane %v5115_v16, 1 }
 0xa6b   :  { %v5054_v35 = vadd.f32 %v5053_v43, %v5052_v24  ;;  %v5096_v3 = vadd.f32 %v5095_v60, %v5094_v29 }
 0xa6c   :  { %v5075_v19 = vadd.f32 %v5074_v61, %v5073_v31  ;;  %v5117_v41 = vadd.f32 %v5116_v22, %v5115_v16  ;;  %v3559_v61 = vld [vmem:[#allocation19] sm:$0xf] }
 0xa6d   :  { %v5118_v38 = vmul.f32 0.00048828125, %v5054_v35  ;;  %v5120_v25 = vmul.f32 0.00048828125, %v5096_v3  ;;  %v12163_v3 = vld [vmem:[#allocation33_spill] sm:$0xff] }
 0xa6e   :  { %v5119_v5 = vmul.f32 0.00048828125, %v5075_v19  ;;  %v5121_v47 = vmul.f32 0.00048828125, %v5117_v41  ;;  %v12164_v41 = vld [vmem:[#allocation35_spill] sm:$0xff] }
 0xa6f   :  { %v5126_v10 = vsub.f32 %v5118_v38, %v5122_v54  ;;  %v5128_v11 = vsub.f32 %v5120_v25, %v5124_v59  ;;  %v12165_v59 = vld [vmem:[#allocation34_spill] sm:$0xff]  ;;  %v12166_v25 = vld [vmem:[#allocation36_spill] sm:$0xff] }
 0xa70   :  { %v5127_v62 = vsub.f32 %v5119_v5, %v5123_v55  ;;  %v5129_v63 = vsub.f32 %v5121_v47, %v5125_v30 }
 0xa71   :  { %v5130_v39 = vadd.f32 1e-05, %v5126_v10  ;;  %v5132_v18 = vadd.f32 1e-05, %v5128_v11  ;;  %v11044_v11 = vld [vmem:[%s11847_s17 + $0x200] sm:$0xff] }
 0xa72   :  { %v5131_v13 = vadd.f32 1e-05, %v5127_v62  ;;  %v5133_v48 = vadd.f32 1e-05, %v5129_v63  ;;  %v11049_v62 = vld [vmem:[%s11847_s17 + $0x210] sm:$0xff]  ;;  %v11074_v63 = vld [vmem:[%s11847_s17 + $0x248] sm:$0xff] }
 0xa73   :  { %7482 = vrsqrt.f32 %v5130_v39 }
 0xa74   :  { %7484 = vrsqrt.f32 %v5132_v18 }
 0xa75   :  { %7486 = vrsqrt.f32 %v5131_v13  ;;  %v11079_v13 = vld [vmem:[%s11847_s17 + $0x258] sm:$0xff] }
 0xa76   :  { %7488 = vrsqrt.f32 %v5133_v48  ;;  %v11084_v48 = vld [vmem:[%s11847_s17 + $0x240] sm:$0xff] }
 0xa7d   :  { %v7483_v16 = vpop.eup %7482 }
 0xa7e   :  { %v7485_v31 = vpop.eup %7484 }
 0xa7f   :  { %v7487_v60 = vpop.eup %7486 }
 0xa80   :  { %v7489_v43 = vpop.eup %7488  ;;  %v5142_v37 = vcombine.low %v7483_v16, %v7487_v60  ;;  %v11089_v16 = vld [vmem:[%s11847_s17 + $0x250] sm:$0xff]  ;;  %v11099_v60 = vld [vmem:[%s11847_s17 + $0x278] sm:$0xff] }
 0xa81   :  { %v5143_v33 = vcombine.low %v7485_v31, %v7489_v43  ;;  %v11094_v31 = vld [vmem:[%s11847_s17 + $0x268] sm:$0xff]  ;;  %v11104_v43 = vld [vmem:[%s11847_s17 + $0x260] sm:$0xff] }
 0xa82   :  { %v5150_v28 = vrot.slane %v5142_v37, %v12162_v34 }
 0xa83   :  { %v5157_v24 = vrot.slane %v5143_v33, %v12162_v34 }
 0xa85   :  { %v5158_v29 = vcombine.low %v5150_v28, %v5157_v24  ;;  %v11111_v28 = vld [vmem:[%s11847_s17 + $0x270] sm:$0xff]  ;;  %v11116_v24 = vld [vmem:[%s11847_s17 + $0x288] sm:$0xff] }
 0xa87   :  { %v5165_v22 = vrot.slane %v5158_v29, %v12162_v34  ;;  %v11121_v29 = vld [vmem:[%s11847_s17 + $0x298] sm:$0xff] }
 0xa89   :  { %v5167_v35 = vmul.f32 %v5165_v22, %v3559_v61  ;;  %v7104_v61 = vpack.c.bf16 %v11049_v62, %v11044_v11 }
 0xa8b   :  { %v11026_v19 = vrot.slane %v5167_v35, %v12163_v3  ;;  %v11029_v54 = vrot.slane %v5167_v35, %v12164_v41  ;;  %v11032_v38 = vrot.slane %v5167_v35, %v12165_v59  ;;  %v11035_v55 = vrot.slane %v5167_v35, %v12166_v25 }
 0xa8d   :  { %v5189_v30 = vmul.f32 %v11026_v19, %v5030_v46  ;;  %v5190_v5 = vmul.f32 %v11029_v54, %v5031_v17  ;;  %v5191_v47 = vmul.f32 %v11032_v38, %v5032_v14  ;;  %v5192_v10 = vmul.f32 %v11035_v55, %v5033_v50  ;;  %v11054_v46 = vld [vmem:[%s11847_s17 + $0x228] sm:$0xff]  ;;  %v11059_v14 = vld [vmem:[%s11847_s17 + $0x238] sm:$0xff]  ;;  %v11064_v17 = vld [vmem:[%s11847_s17 + $0x220] sm:$0xff] }
 0xa8e   :  { %v11069_v50 = vld [vmem:[%s11847_s17 + $0x230] sm:$0xff]  ;;  %v5224_v11 = vmul.f32 %v11029_v54, %v10195_v57  ;;  %v5223_v62 = vmul.f32 %v11026_v19, %v10205_v20  ;;  %v5232_v57 = vmul.f32 %v11029_v54, %v10243_v1  ;;  %v5231_v20 = vmul.f32 %v11026_v19, %v10251_v26 }
 0xa8f   :  { %v5197_v39 = vcombine.low %v5189_v30, %v5190_v5  ;;  %v5198_v18 = vcombine.low %v5191_v47, %v5192_v10  ;;  %v5228_v47 = vmul.f32 %v11029_v54, %v10221_v0  ;;  %v5227_v10 = vmul.f32 %v11026_v19, %v10231_v49 }
 0xa90   :  { %v5239_v0 = vmul.f32 %v11026_v19, %v12116_v53  ;;  %v5244_v49 = vmul.f32 %v11029_v54, %v12118_v9  ;;  %v5243_v1 = vmul.f32 %v11026_v19, %v12120_v52  ;;  %v5248_v26 = vmul.f32 %v11029_v54, %v12122_v40 }
 0xa91   :  { %v5205_v37 = vrot.slane %v5197_v39, %v12162_v34  ;;  %v5212_v33 = vrot.slane %v5198_v18, %v12162_v34  ;;  %v3560_v39 = vld [vmem:[#allocation20] sm:$0xf]  ;;  %v5236_v18 = vmul.f32 %v11029_v54, %v12110_v56  ;;  %v5247_v56 = vmul.f32 %v11026_v19, %v12124_v58 }
 0xa92   :  { %v5256_v52 = vmul.f32 %v11029_v54, %v12130_v42  ;;  %v5255_v40 = vmul.f32 %v11026_v19, %v12132_v4  ;;  %v5260_v58 = vmul.f32 %v11029_v54, %v12134_v6 }
 0xa93   :  { %v5213_v30 = vcombine.low %v5205_v37, %v5212_v33  ;;  %v5235_v37 = vmul.f32 %v11026_v19, %v12112_v32  ;;  %v5252_v32 = vmul.f32 %v11029_v54, %v12126_v36  ;;  %v5259_v36 = vmul.f32 %v11026_v19, %v12136_v12 }
 0xa95   :  { %v5220_v33 = vrot.slane %v5213_v30, %v12162_v34  ;;  %v5240_v34 = vmul.f32 %v11029_v54, %v12114_v7  ;;  %v5251_v7 = vmul.f32 %v11026_v19, %v12128_v2  ;;  %v5264_v2 = vmul.f32 %v11029_v54, %v12138_v15 }
 0xa97   :  { %v11158_v30 = vsub.f32 %v3560_v39, %v5220_v33  ;;  %v5263_v39 = vmul.f32 %v11026_v19, %v12140_v23  ;;  %v5268_v23 = vmul.f32 %v11029_v54, %v12142_v51 }
 0xa99   :  { %v11176_v53 = vrot.slane %v11158_v30, %v12164_v41  ;;  %v11180_v9 = vrot.slane %v11158_v30, %v12163_v3 }
 0xa9b   :  { %v5309_v33 = vadd.f32 %v11176_v53, %v5224_v11  ;;  %v5308_v5 = vadd.f32 %v11180_v9, %v5223_v62  ;;  %v5313_v42 = vadd.f32 %v11176_v53, %v5228_v47  ;;  %v5312_v4 = vadd.f32 %v11180_v9, %v5227_v10 }
 0xa9c   :  { %v5317_v35 = vadd.f32 %v11176_v53, %v5232_v57  ;;  %v5316_v6 = vadd.f32 %v11180_v9, %v5231_v20  ;;  %v5321_v12 = vadd.f32 %v11176_v53, %v5236_v18  ;;  %v11202_v22 = vadd.f32 %v11180_v9, %v5235_v37 }
 0xa9d   :  { %v5373_v15 = vmax.f32 %v5309_v33, 0.0  ;;  %v5372_v41 = vmax.f32 %v5308_v5, 0.0  ;;  %v5267_v11 = vmul.f32 %v11026_v19, %v12144_v8  ;;  %v5377_v47 = vmax.f32 %v5313_v42, 0.0 }
 0xa9e   :  { %v5272_v10 = vmul.f32 %v11029_v54, %v12146_v44  ;;  %v5271_v62 = vmul.f32 %v11026_v19, %v12148_v21  ;;  %v5276_v18 = vmul.f32 %v11029_v54, %v12150_v27  ;;  %v11215_v37 = vadd.f32 %v11176_v53, %v5240_v34  ;;  %v12167_v34 = vld [vmem:[#allocation90_spill] sm:$0xff] }
 0xa9f   :  { %5640 = vmatprep.mubr.f32.mxu1 %v5373_v15  ;;  %v11218_v5 = vadd.f32 %v11180_v9, %v5239_v0  ;;  %v11221_v51 = vadd.f32 %v11176_v53, %v5244_v49  ;;  %v11224_v8 = vadd.f32 %v11180_v9, %v5243_v1  ;;  %v11227_v44 = vadd.f32 %v11176_v53, %v5248_v26  ;;  %v12168_v0 = vld [vmem:[#allocation92_spill] sm:$0xff] }
 0xaa0   :  { %5641 = vmatmul.mubr.f32.vlgmr.msra.gmra.mrb[156].mxu1 %v5372_v41  ;;  %v11230_v21 = vadd.f32 %v11180_v9, %v5247_v56  ;;  %v11233_v27 = vadd.f32 %v11176_v53, %v5252_v32  ;;  %v11236_v57 = vadd.f32 %v11180_v9, %v5251_v7  ;;  %v5275_v20 = vmul.f32 %v11026_v19, %v12152_v45  ;;  %v12170_v32 = vld [vmem:[#allocation94_spill] sm:$0xff] }
 0xaa1   :  { %7105 = vmatpush1.bf16.msra.mxu1 %v7104_v61  ;;  %5646 = vmatprep.mubr.f32.mxu1 %v5377_v47  ;;  %v5280_v41 = vmul.f32 %v11029_v54, %v12167_v34  ;;  %v5279_v49 = vmul.f32 %v11026_v19, %v12168_v0  ;;  %v12169_v1 = vpack.c.bf16 %v11059_v14, %v11054_v46  ;;  %v5376_v26 = vmax.f32 %v5312_v4, 0.0  ;;  %v12171_v61 = vld [vmem:[#allocation96_spill] sm:$0xff]  ;;  %v12175_v4 = vld [vmem:[#allocation45_spill] sm:$0xff] }
 0xaa2   :  { %v5381_v56 = vmax.f32 %v5317_v35, 0.0  ;;  %v5284_v7 = vmul.f32 %v11029_v54, %v12170_v32  ;;  %v5283_v33 = vmul.f32 %v11026_v19, %v12171_v61  ;;  %v11252_v45 = vadd.f32 %v11176_v53, %v5256_v52  ;;  %v5520_v32 = vld [vmem:[%s11847_s17 + $0x2a0] sm:$0xff]  ;;  %v5525_v61 = vld [vmem:[%s11847_s17 + $0x2c8] sm:$0xff] }
 0xaa3   :  { %7107 = vmatprep.subr.bf16.mxu1 %v12169_v1  ;;  %v11255_v42 = vadd.f32 %v11180_v9, %v5255_v40  ;;  %v11258_v15 = vadd.f32 %v11176_v53, %v5260_v58  ;;  %v11261_v46 = vadd.f32 %v11180_v9, %v5259_v36  ;;  %v11264_v14 = vadd.f32 %v11176_v53, %v5264_v2  ;;  %v12173_v40 = vld [vmem:[#allocation42_spill] sm:$0xff]  ;;  %v12174_v36 = vld [vmem:[#allocation43_spill] sm:$0xff] }
 0xaa4   :  { %5647 = vmatmul.mubr.f32.gmra.mrb[158].mxu1 %v5376_v26  ;;  %v11267_v54 = vadd.f32 %v11180_v9, %v5263_v39  ;;  %v11270_v19 = vadd.f32 %v11176_v53, %v5268_v23  ;;  %v11273_v35 = vadd.f32 %v11180_v9, %v5267_v11  ;;  %v12172_v52 = vpack.c.bf16 %v11069_v50, %v11064_v17  ;;  %v5521_v26 = vld [vmem:[%s11847_s17 + $0x2a8] sm:$0xff] }
 0xaa5   :  { %5652 = vmatprep.mubr.f32.mxu1 %v5381_v56  ;;  %v5226_v58 = vmul.f32 %v11035_v55, %v12173_v40  ;;  %v5225_v2 = vmul.f32 %v11032_v38, %v12174_v36  ;;  %v5230_v39 = vmul.f32 %v11035_v55, %v12175_v4  ;;  %v12176_v23 = vpack.c.bf16 %v11079_v13, %v11074_v63  ;;  %v5523_v56 = vld [vmem:[%s11847_s17 + $0x2b8] sm:$0xff] }
 0xaa6   :  { %7109 = vmatpush1.bf16.msra.mxu1 %v12172_v52  ;;  %v5380_v11 = vmax.f32 %v5316_v6, 0.0  ;;  %v5385_v47 = vmax.f32 %v5321_v12, 0.0  ;;  %v11289_v17 = vrot.slane %v11158_v30, %v12166_v25  ;;  %v11293_v50 = vrot.slane %v11158_v30, %v12165_v59  ;;  %v5516_v12 = vld [vmem:[%s11847_s17 + $0x280] sm:$0xff] }
 0xaa7   :  { %7111 = vmatprep.subr.bf16.mxu1 %v12176_v23  ;;  %v11296_v34 = vadd.f32 %v11176_v53, %v5272_v10  ;;  %v11299_v0 = vadd.f32 %v11180_v9, %v5271_v62  ;;  %v11302_v1 = vadd.f32 %v11176_v53, %v5276_v18  ;;  %v11305_v63 = vadd.f32 %v11180_v9, %v5275_v20  ;;  %v5518_v10 = vld [vmem:[%s11847_s17 + $0x290] sm:$0xff]  ;;  %v12179_v18 = vld [vmem:[#allocation40_spill] sm:$0xff]  ;;  %v12180_v20 = vld [vmem:[#allocation47_spill] sm:$0xff] }
 0xaa8   :  { %5653 = vmatmul.mubr.f32.gmra.mrb[160].mxu1 %v5380_v11  ;;  %v11308_v25 = vadd.f32 %v11176_v53, %v5280_v41  ;;  %v11311_v13 = vadd.f32 %v11180_v9, %v5279_v49  ;;  %v11314_v59 = vadd.f32 %v11176_v53, %v5284_v7  ;;  %v11317_v30 = vadd.f32 %v11180_v9, %v5283_v33  ;;  %v12178_v62 = vld [vmem:[#allocation37_spill] sm:$0xff]  ;;  %v12182_v7 = vld [vmem:[#allocation39_spill] sm:$0xff] }
 0xaa9   :  { %v12177_v6 = vpack.c.bf16 %v11089_v16, %v11084_v48  ;;  %5658 = vmatprep.mubr.f32.mxu1 %v5385_v47  ;;  %v5229_v53 = vmul.f32 %v11032_v38, %v12178_v62  ;;  %v5234_v9 = vmul.f32 %v11035_v55, %v12179_v18  ;;  %v5233_v41 = vmul.f32 %v11032_v38, %v12180_v20  ;;  %v5527_v33 = vld [vmem:[%s11847_s17 + $0x2d8] sm:$0xff] }
 0xaaa   :  { %v12181_v48 = vpack.c.bf16 %v11099_v60, %v11094_v31  ;;  %v5384_v16 = vmax.f32 %v11202_v22, 0.0  ;;  %v5389_v49 = vmax.f32 %v11215_v37, 0.0  ;;  %v5238_v31 = vmul.f32 %v11035_v55, %v12182_v7  ;;  %v12183_v60 = vld [vmem:[#allocation49_spill] sm:$0xff]  ;;  %v12185_v62 = vld [vmem:[#allocation51_spill] sm:$0xff] }
 0xaab   :  { %7113 = vmatpush1.bf16.msra.mxu1 %v12177_v6  ;;  %v5237_v22 = vmul.f32 %v11032_v38, %v12183_v60  ;;  %v5522_v37 = vld [vmem:[%s11847_s17 + $0x2b0] sm:$0xff]  ;;  %v11362_v52 = vadd.f32 %v11289_v17, %v5226_v58  ;;  %v11365_v40 = vadd.f32 %v11293_v50, %v5225_v2  ;;  %v11368_v36 = vadd.f32 %v11289_v17, %v5230_v39 }
 0xaac   :  { %7115 = vmatprep.subr.bf16.mxu1 %v12181_v48  ;;  %v11371_v4 = vadd.f32 %v11293_v50, %v5229_v53  ;;  %5659 = vmatmul.mubr.f32.gmra.mrb[162].mxu1 %v5384_v16  ;;  %v11374_v23 = vadd.f32 %v11289_v17, %v5234_v9  ;;  %v11377_v11 = vadd.f32 %v11293_v50, %v5233_v41  ;;  %v5388_v9 = vmax.f32 %v11218_v5, 0.0 }
 0xaad   :  { %v11380_v47 = vadd.f32 %v11289_v17, %v5238_v31  ;;  %v11383_v58 = vadd.f32 %v11293_v50, %v5237_v22  ;;  %v12184_v2 = vpack.c.bf16 %v11111_v28, %v11104_v43  ;;  %5664 = vmatprep.mubr.f32.mxu1 %v5389_v49  ;;  %v7120_v39 = vpack.c.bf16 %v5518_v10, %v5516_v12  ;;  %v12187_v43 = vld [vmem:[#allocation53_spill] sm:$0xff]  ;;  %v12188_v12 = vld [vmem:[#allocation55_spill] sm:$0xff] }
 0xaae   :  { %v7122_v6 = vpack.c.bf16 %v5523_v56, %v5521_v26  ;;  %v5242_v53 = vmul.f32 %v11035_v55, %v12185_v62  ;;  %v12186_v18 = vpack.c.bf16 %v11121_v29, %v11116_v24  ;;  %v5393_v20 = vmax.f32 %v11221_v51, 0.0  ;;  %v12189_v49 = vld [vmem:[#allocation57_spill] sm:$0xff]  ;;  %v5524_v24 = vld [vmem:[%s11847_s17 + $0x2c0] sm:$0xff] }
 0xaaf   :  { %7117 = vmatpush1.bf16.msra.mxu1 %v12184_v2  ;;  %v7124_v41 = vpack.c.bf16 %v5522_v37, %v5520_v32  ;;  %v7126_v48 = vpack.c.bf16 %v5527_v33, %v5525_v61  ;;  %v5241_v28 = vmul.f32 %v11032_v38, %v12187_v43  ;;  %v5246_v10 = vmul.f32 %v11035_v55, %v12188_v12  ;;  %v12190_v29 = vld [vmem:[#allocation59_spill] sm:$0xff]  ;;  %v12191_v51 = vld [vmem:[#allocation61_spill] sm:$0xff] }
 0xab0   :  { %7119 = vmatprep.subr.bf16.mxu1 %v12186_v18  ;;  %v11396_v16 = vadd.f32 %v11289_v17, %v5242_v53  ;;  %v5245_v26 = vmul.f32 %v11032_v38, %v12189_v49  ;;  %5665 = vmatmul.mubr.f32.gmra.mrb[164].mxu1 %v5388_v9  ;;  %v5250_v5 = vmul.f32 %v11035_v55, %v12190_v29  ;;  %v12192_v32 = vld [vmem:[#allocation63_spill] sm:$0xff]  ;;  %v12193_v31 = vld [vmem:[#allocation65_spill] sm:$0xff]  ;;  %v5392_v22 = vmax.f32 %v11224_v8, 0.0 }
 0xab1   :  { %v5249_v56 = vmul.f32 %v11032_v38, %v12191_v51  ;;  %v5254_v7 = vmul.f32 %v11035_v55, %v12192_v32  ;;  %v5253_v60 = vmul.f32 %v11032_v38, %v12193_v31  ;;  %5670 = vmatprep.mubr.f32.mxu1 %v5393_v20  ;;  %v5526_v37 = vld [vmem:[%s11847_s17 + $0x2d0] sm:$0xff]  ;;  %v5529_v61 = vld [vmem:[%s11847_s17 + $0x2e8] sm:$0xff]  ;;  %v5531_v33 = vld [vmem:[%s11847_s17 + $0x2f8] sm:$0xff]  ;;  %v11426_v2 = vadd.f32 %v11293_v50, %v5241_v28 }
 0xab2   :  { %v11432_v8 = vadd.f32 %v11293_v50, %v5245_v26  ;;  %v11435_v62 = vadd.f32 %v11289_v17, %v5250_v5  ;;  %v5397_v20 = vmax.f32 %v11227_v44, 0.0  ;;  %v12194_v43 = vld [vmem:[#allocation67_spill] sm:$0xff]  ;;  %v7128_v12 = vpack.c.bf16 %v5526_v37, %v5524_v24  ;;  %v5530_v26 = vld [vmem:[%s11847_s17 + $0x2f0] sm:$0xff] }
 0xab3   :  { %7121 = vmatpush1.bf16.msra.mxu1 %v7120_v39  ;;  %v11429_v39 = vadd.f32 %v11289_v17, %v5246_v10  ;;  %v11438_v53 = vadd.f32 %v11293_v50, %v5249_v56  ;;  %v11441_v18 = vadd.f32 %v11289_v17, %v5254_v7  ;;  %v11444_v9 = vadd.f32 %v11293_v50, %v5253_v60  ;;  %v5528_v49 = vld [vmem:[%s11847_s17 + $0x2e0] sm:$0xff]  ;;  %v12195_v29 = vld [vmem:[#allocation69_spill] sm:$0xff]  ;;  %v5535_v51 = vld [vmem:[%s11847_s17 + $0x318] sm:$0xff] }
 0xab4   :  { %7123 = vmatprep.subr.bf16.mxu1 %v7122_v6  ;;  %v5258_v28 = vmul.f32 %v11035_v55, %v12194_v43  ;;  %5671 = vmatmul.mubr.f32.gmra.mrb[166].mxu1 %v5392_v22  ;;  %v7130_v6 = vpack.c.bf16 %v5531_v33, %v5529_v61  ;;  %v5396_v10 = vmax.f32 %v11230_v21, 0.0  ;;  %v5257_v5 = vmul.f32 %v11032_v38, %v12195_v29  ;;  %v12196_v24 = vld [vmem:[#allocation71_spill] sm:$0xff]  ;;  %v5533_v21 = vld [vmem:[%s11847_s17 + $0x308] sm:$0xff] }
 0xab5   :  { %5676 = vmatprep.mubr.f32.mxu1 %v5397_v20  ;;  %v5532_v56 = vld [vmem:[%s11847_s17 + $0x300] sm:$0xff]  ;;  %v12197_v32 = vld [vmem:[#allocation73_spill] sm:$0xff]  ;;  %v5401_v33 = vmax.f32 %v11233_v27, 0.0 }
 0xab6   :  { %v11457_v44 = vadd.f32 %v11289_v17, %v5258_v28  ;;  %v5261_v7 = vmul.f32 %v11032_v38, %v12197_v32  ;;  %v12198_v31 = vld [vmem:[#allocation75_spill] sm:$0xff]  ;;  %v12199_v22 = vld [vmem:[#allocation77_spill] sm:$0xff]  ;;  %v11491_v29 = vadd.f32 %v11293_v50, %v5257_v5  ;;  %v7132_v5 = vpack.c.bf16 %v5530_v26, %v5528_v49 }
 0xab7   :  { %7125 = vmatpush1.bf16.msra.mxu1 %v7124_v41  ;;  %v5262_v41 = vmul.f32 %v11035_v55, %v12196_v24  ;;  %v5266_v60 = vmul.f32 %v11035_v55, %v12198_v31  ;;  %v12200_v37 = vld [vmem:[#allocation79_spill] sm:$0xff]  ;;  %v5534_v20 = vld [vmem:[%s11847_s17 + $0x310] sm:$0xff]  ;;  %v5537_v43 = vld [vmem:[%s11847_s17 + $0x328] sm:$0xff] }
 0xab8   :  { %7127 = vmatprep.subr.bf16.mxu1 %v7126_v48  ;;  %v5265_v48 = vmul.f32 %v11032_v38, %v12199_v22  ;;  %v5270_v61 = vmul.f32 %v11035_v55, %v12200_v37  ;;  %v5539_v28 = vld [vmem:[%s11847_s17 + $0x338] sm:$0xff]  ;;  %v12201_v32 = vld [vmem:[#allocation81_spill] sm:$0xff]  ;;  %5677 = vmatmul.mubr.f32.gmra.mrb[168].mxu1 %v5396_v10  ;;  %v11499_v31 = vadd.f32 %v11293_v50, %v5261_v7  ;;  %v5400_v7 = vmax.f32 %v11236_v57, 0.0 }
 0xab9   :  { %v11494_v24 = vadd.f32 %v11289_v17, %v5262_v41  ;;  %v5269_v27 = vmul.f32 %v11032_v38, %v12201_v32  ;;  %v11502_v22 = vadd.f32 %v11289_v17, %v5266_v60  ;;  %5682 = vmatprep.mubr.f32.mxu1 %v5401_v33  ;;  %v12204_v32 = vld [vmem:[#allocation83_spill] sm:$0xff]  ;;  %v7134_v60 = vpack.c.bf16 %v5535_v51, %v5533_v21  ;;  %v12209_v21 = vld [vmem:[#allocation93_spill] sm:$0xff] }
 0xaba   :  { %12202 = vst [vmem:[#allocation41_spill] sm:$0xff] %v11499_v31  ;;  %v11505_v37 = vadd.f32 %v11293_v50, %v5265_v48  ;;  %v11508_v3 = vadd.f32 %v11289_v17, %v5270_v61  ;;  %v5274_v10 = vmul.f32 %v11035_v55, %v12204_v32  ;;  %v7138_v31 = vpack.c.bf16 %v5539_v28, %v5537_v43  ;;  %v12206_v26 = vld [vmem:[#allocation87_spill] sm:$0xff] }
 0xabb   :  { %12203 = vst [vmem:[#allocation46_spill] sm:$0xff] %v11502_v22  ;;  %7129 = vmatpush1.bf16.msra.mxu1 %v7128_v12  ;;  %v11511_v41 = vadd.f32 %v11293_v50, %v5269_v27  ;;  %v7136_v22 = vpack.c.bf16 %v5534_v20, %v5532_v56  ;;  %v5405_v48 = vmax.f32 %v11252_v45, 0.0  ;;  %v12205_v12 = vld [vmem:[#allocation85_spill] sm:$0xff]  ;;  %v5278_v33 = vmul.f32 %v11035_v55, %v12206_v26  ;;  %v12208_v32 = vld [vmem:[#allocation91_spill] sm:$0xff] }
 0xabc   :  { %7131 = vmatprep.subr.bf16.mxu1 %v7130_v6  ;;  %v11518_v61 = vadd.f32 %v11289_v17, %v5274_v10  ;;  %v5273_v49 = vmul.f32 %v11032_v38, %v12205_v12  ;;  %5683 = vmatmul.mubr.f32.gmra.mrb[170].mxu1 %v5400_v7  ;;  %v12207_v27 = vld [vmem:[#allocation89_spill] sm:$0xff]  ;;  %v5282_v57 = vmul.f32 %v11035_v55, %v12208_v32  ;;  %v12210_v45 = vld [vmem:[#allocation95_spill] sm:$0xff]  ;;  %v5404_v20 = vmax.f32 %v11255_v42, 0.0 }
 0xabd   :  { %v5277_v6 = vmul.f32 %v11032_v38, %v12207_v27  ;;  %v5281_v51 = vmul.f32 %v11032_v38, %v12209_v21  ;;  %v5286_v56 = vmul.f32 %v11035_v55, %v12210_v45  ;;  %5688 = vmatprep.mubr.f32.mxu1 %v5405_v48  ;;  %v11537_v28 = vadd.f32 %v11289_v17, %v5278_v33  ;;  %v12211_v10 = vld [vmem:[#allocation97_spill] sm:$0xff]  ;;  %v5536_v12 = vld [vmem:[%s11847_s17 + $0x320] sm:$0xff]  ;;  %v5543_v26 = vld [vmem:[%s11847_s17 + $0x358] sm:$0xff] }
 0xabe   :  { %v11534_v43 = vadd.f32 %v11293_v50, %v5273_v49  ;;  %v5285_v7 = vmul.f32 %v11032_v38, %v12211_v10  ;;  %v5538_v55 = vld [vmem:[%s11847_s17 + $0x330] sm:$0xff]  ;;  %v5541_v49 = vld [vmem:[%s11847_s17 + $0x348] sm:$0xff]  ;;  %v5417_v45 = vmax.f32 %v11270_v19, 0.0  ;;  %v5416_v10 = vmax.f32 %v11273_v35, 0.0  ;;  %v5548_v19 = vld [vmem:[%s11847_s17 + $0x380] sm:$0xff] }
 0xabf   :  { %7133 = vmatpush1.bf16.msra.mxu1 %v7132_v5  ;;  %v11548_v42 = vadd.f32 %v11293_v50, %v5277_v6  ;;  %v11551_v5 = vadd.f32 %v11289_v17, %v5282_v57  ;;  %v11554_v48 = vadd.f32 %v11293_v50, %v5281_v51  ;;  %v11557_v38 = vadd.f32 %v11289_v17, %v5286_v56  ;;  %v5542_v32 = vld [vmem:[%s11847_s17 + $0x350] sm:$0xff]  ;;  %v5549_v56 = vld [vmem:[%s11847_s17 + $0x388] sm:$0xff] }
 0xac0   :  { %7135 = vmatprep.subr.bf16.mxu1 %v7134_v60  ;;  %v5409_v60 = vmax.f32 %v11258_v15, 0.0  ;;  %v11567_v33 = vadd.f32 %v11293_v50, %v5285_v7  ;;  %5689 = vmatmul.mubr.f32.gmra.mrb[172].mxu1 %v5404_v20  ;;  %v7140_v27 = vpack.c.bf16 %v5538_v55, %v5536_v12  ;;  %v5408_v17 = vmax.f32 %v11261_v46, 0.0  ;;  %v5540_v15 = vld [vmem:[%s11847_s17 + $0x340] sm:$0xff]  ;;  %v5545_v50 = vld [vmem:[%s11847_s17 + $0x368] sm:$0xff]  ;;  %v5546_v51 = vld [vmem:[%s11847_s17 + $0x370] sm:$0xff] }
 0xac1   :  { %v7142_v6 = vpack.c.bf16 %v5543_v26, %v5541_v49  ;;  %v5413_v57 = vmax.f32 %v11264_v14, 0.0  ;;  %v7144_v46 = vpack.c.bf16 %v5542_v32, %v5540_v15  ;;  %v5544_v14 = vld [vmem:[%s11847_s17 + $0x360] sm:$0xff]  ;;  %v5551_v20 = vld [vmem:[%s11847_s17 + $0x398] sm:$0xff]  ;;  %v5550_v12 = vld [vmem:[%s11847_s17 + $0x390] sm:$0xff]  ;;  %v5421_v55 = vmax.f32 %v11296_v34, 0.0 }
 0xac2   :  { %5694 = vmatprep.mubr.f32.mxu1 %v5409_v60  ;;  %v7150_v7 = vpack.c.bf16 %v5551_v20, %v5549_v56  ;;  %v5553_v60 = vld [vmem:[%s11847_s17 + $0x3a8] sm:$0xff]  ;;  %v5555_v49 = vld [vmem:[%s11847_s17 + $0x3b8] sm:$0xff]  ;;  %v7152_v35 = vpack.c.bf16 %v5550_v12, %v5548_v19  ;;  %v5420_v26 = vmax.f32 %v11299_v0, 0.0  ;;  %v5552_v34 = vld [vmem:[%s11847_s17 + $0x3a0] sm:$0xff]  ;;  %v5433_v56 = vmax.f32 %v11314_v59, 0.0 }
 0xac3   :  { %7137 = vmatpush1.bf16.msra.mxu1 %v7136_v22  ;;  %v5412_v22 = vmax.f32 %v11267_v54, 0.0  ;;  %v7148_v54 = vpack.c.bf16 %v5546_v51, %v5544_v14  ;;  %v5557_v15 = vld [vmem:[%s11847_s17 + $0x3c8] sm:$0xff]  ;;  %v5559_v32 = vld [vmem:[%s11847_s17 + $0x3d8] sm:$0xff]  ;;  %v5428_v14 = vmax.f32 %v11311_v13, 0.0  ;;  %v5375_v13 = vmax.f32 %v11362_v52, 0.0 }
 0xac4   :  { %7139 = vmatprep.subr.bf16.mxu1 %v7138_v31  ;;  %v5547_v31 = vld [vmem:[%s11847_s17 + $0x378] sm:$0xff]  ;;  %5695 = vmatmul.mubr.f32.gmra.mrb[174].mxu1 %v5408_v17  ;;  %v5554_v17 = vld [vmem:[%s11847_s17 + $0x3b0] sm:$0xff]  ;;  %v5378_v59 = vmax.f32 %v11371_v4, 0.0  ;;  %v5383_v19 = vmax.f32 %v11374_v23, 0.0  ;;  %v5382_v12 = vmax.f32 %v11377_v11, 0.0  ;;  %v5386_v52 = vmax.f32 %v11383_v58, 0.0 }
 0xac5   :  { %5700 = vmatprep.mubr.f32.mxu1 %v5413_v57  ;;  %v7146_v21 = vpack.c.bf16 %v5547_v31, %v5545_v50  ;;  %v7156_v0 = vpack.c.bf16 %v5554_v17, %v5552_v34  ;;  %v5424_v57 = vmax.f32 %v11305_v63, 0.0  ;;  %v7158_v50 = vpack.c.bf16 %v5559_v32, %v5557_v15  ;;  %v5558_v31 = vld [vmem:[%s11847_s17 + $0x3d0] sm:$0xff] }
 0xac6   :  { %v5395_v4 = vmax.f32 %v11429_v39, 0.0  ;;  %v5394_v23 = vmax.f32 %v11432_v8, 0.0  ;;  %v5399_v11 = vmax.f32 %v11435_v62, 0.0  ;;  %v5403_v58 = vmax.f32 %v11441_v18, 0.0  ;;  %v12212_v62 = vld [vmem:[#allocation41_spill] sm:$0xff] }
 0xac7   :  { %7141 = vmatpush1.bf16.msra.mxu1 %v7140_v27  ;;  %v7154_v27 = vpack.c.bf16 %v5555_v49, %v5553_v60  ;;  %v5406_v39 = vmax.f32 %v11491_v29, 0.0  ;;  %v5411_v8 = vmax.f32 %v11494_v24, 0.0  ;;  %v12213_v60 = vld [vmem:[#allocation46_spill] sm:$0xff]  ;;  %v5414_v18 = vmax.f32 %v11505_v37, 0.0 }
 0xac8   :  { %7143 = vmatprep.subr.bf16.mxu1 %v7142_v6  ;;  %5701 = vmatmul.mubr.f32.gmra.mrb[176].mxu1 %v5412_v22  ;;  %v5425_v6 = vmax.f32 %v11302_v1, 0.0  ;;  %v5556_v1 = vld [vmem:[%s11847_s17 + $0x3c0] sm:$0xff]  ;;  %v5561_v22 = vld [vmem:[%s11847_s17 + $0x3e8] sm:$0xff]  ;;  %v5423_v29 = vmax.f32 %v11518_v61, 0.0  ;;  %v5422_v24 = vmax.f32 %v11534_v43, 0.0  ;;  %v5427_v49 = vmax.f32 %v11537_v28, 0.0 }
 0xac9   :  { %5706 = vmatprep.mubr.f32.mxu1 %v5417_v45  ;;  %v7160_v63 = vpack.c.bf16 %v5558_v31, %v5556_v1  ;;  %v5562_v45 = vld [vmem:[%s11847_s17 + $0x3f0] sm:$0xff]  ;;  %v5431_v37 = vmax.f32 %v11551_v5, 0.0  ;;  %v5434_v61 = vmax.f32 %v11567_v33, 0.0  ;;  %v5564_v43 = vld [vmem:[#allocation23] sm:$0x3] }
 0xacb   :  { %7145 = vmatpush1.bf16.msra.mxu1 %v7144_v46  ;;  %v5429_v46 = vmax.f32 %v11308_v25, 0.0  ;;  %v5560_v25 = vld [vmem:[%s11847_s17 + $0x3e0] sm:$0xff] }
 0xacc   :  { %7147 = vmatprep.subr.bf16.mxu1 %v7146_v21  ;;  %5707 = vmatmul.mubr.f32.gmra.mrb[178].mxu1 %v5416_v10  ;;  %v5563_v21 = vld [vmem:[%s11847_s17 + $0x3f8] sm:$0xff]  ;;  %v7164_v20 = vpack.c.bf16 %v5562_v45, %v5560_v25  ;;  %v5374_v10 = vmax.f32 %v11365_v40, 0.0  ;;  %v5391_v40 = vmax.f32 %v11396_v16, 0.0  ;;  %v5402_v16 = vmax.f32 %v11444_v9, 0.0 }
 0xacd   :  { %5712 = vmatprep.mubr.f32.mxu1 %v5421_v55  ;;  %v7162_v51 = vpack.c.bf16 %v5563_v21, %v5561_v22  ;;  %v5410_v55 = vmax.f32 %v12212_v62, 0.0  ;;  %v5419_v9 = vmax.f32 %v11508_v3, 0.0  ;;  %v5430_v3 = vmax.f32 %v11554_v48, 0.0 }
 0xacf   :  { %7149 = vmatpush1.bf16.msra.mxu1 %v7148_v54  ;;  %v5432_v54 = vmax.f32 %v11317_v30, 0.0  ;;  %v5387_v30 = vmax.f32 %v11380_v47, 0.0  ;;  %v5398_v47 = vmax.f32 %v11438_v53, 0.0  ;;  %v5415_v53 = vmax.f32 %v12213_v60, 0.0 }
 0xad0   :  { %7151 = vmatprep.subr.bf16.mxu1 %v7150_v7  ;;  %5713 = vmatmul.mubr.f32.gmra.mrb[180].mxu1 %v5420_v26  ;;  %v5379_v7 = vmax.f32 %v11368_v36, 0.0  ;;  %v5390_v36 = vmax.f32 %v11426_v2, 0.0  ;;  %v5407_v2 = vmax.f32 %v11457_v44, 0.0  ;;  %v5418_v44 = vmax.f32 %v11511_v41, 0.0  ;;  %v12214_v26 = vld [vmem:[#allocation33_spill] sm:$0xff] }
 0xad1   :  { %5718 = vmatprep.mubr.f32.mxu1 %v5425_v6  ;;  %v5435_v41 = vmax.f32 %v11557_v38, 0.0  ;;  %v11681_v28 = vrot.slane %v5564_v43, %v12214_v26 }
 0xad3   :  { %7153 = vmatpush1.bf16.msra.mxu1 %v7152_v35  ;;  %v5426_v35 = vmax.f32 %v11548_v42, 0.0 }
 0xad4   :  { %7155 = vmatprep.subr.bf16.mxu1 %v7154_v27  ;;  %5719 = vmatmul.mubr.f32.gmra.mrb[182].mxu1 %v5424_v57  ;;  %v12215_v27 = vld [vmem:[#allocation35_spill] sm:$0xff] }
 0xad5   :  { %5724 = vmatprep.mubr.f32.mxu1 %v5429_v46  ;;  %v11684_v34 = vrot.slane %v5564_v43, %v12215_v27 }
 0xad7   :  { %7157 = vmatpush1.bf16.msra.mxu1 %v7156_v0 }
 0xad8   :  { %7159 = vmatprep.subr.bf16.mxu1 %v7158_v50  ;;  %5725 = vmatmul.mubr.f32.gmra.mrb[184].mxu1 %v5428_v14 }
 0xad9   :  { %5730 = vmatprep.mubr.f32.mxu1 %v5433_v56 }
 0xadb   :  { %7161 = vmatpush1.bf16.msra.mxu1 %v7160_v63 }
 0xadc   :  { %7163 = vmatprep.subr.bf16.mxu1 %v7162_v51  ;;  %5731 = vmatmul.mubr.f32.gmra.mrb[186].mxu1 %v5432_v54 }
 0xadd   :  { %5801 = vmatprep.mubr.f32.mxu1 %v5375_v13 }
 0xadf   :  { %7165 = vmatpush1.bf16.msra.mxu1 %v7164_v20 }
 0xae2   :  { %5802 = vmatmul.mubr.f32.vlgmr.msra.gmra.mrb[156].mxu1 %v5374_v10 }
 0xae3   :  { %5807 = vmatprep.mubr.f32.mxu1 %v5379_v7 }
 0xae6   :  { %5808 = vmatmul.mubr.f32.gmra.mrb[158].mxu1 %v5378_v59 }
 0xae7   :  { %5813 = vmatprep.mubr.f32.mxu1 %v5383_v19 }
 0xaea   :  { %5814 = vmatmul.mubr.f32.gmra.mrb[160].mxu1 %v5382_v12 }
 0xaeb   :  { %5819 = vmatprep.mubr.f32.mxu1 %v5387_v30 }
 0xaee   :  { %5820 = vmatmul.mubr.f32.gmra.mrb[162].mxu1 %v5386_v52 }
 0xaef   :  { %5825 = vmatprep.mubr.f32.mxu1 %v5391_v40 }
 0xaf2   :  { %5826 = vmatmul.mubr.f32.gmra.mrb[164].mxu1 %v5390_v36 }
 0xaf3   :  { %5831 = vmatprep.mubr.f32.mxu1 %v5395_v4 }
 0xaf6   :  { %5832 = vmatmul.mubr.f32.gmra.mrb[166].mxu1 %v5394_v23 }
 0xaf7   :  { %5837 = vmatprep.mubr.f32.mxu1 %v5399_v11 }
 0xafa   :  { %5838 = vmatmul.mubr.f32.gmra.mrb[168].mxu1 %v5398_v47 }
 0xafb   :  { %5843 = vmatprep.mubr.f32.mxu1 %v5403_v58 }
 0xafe   :  { %5844 = vmatmul.mubr.f32.gmra.mrb[170].mxu1 %v5402_v16 }
 0xaff   :  { %5849 = vmatprep.mubr.f32.mxu1 %v5407_v2 }
 0xb02   :  { %5850 = vmatmul.mubr.f32.gmra.mrb[172].mxu1 %v5406_v39 }
 0xb03   :  { %5855 = vmatprep.mubr.f32.mxu1 %v5411_v8 }
 0xb06   :  { %5856 = vmatmul.mubr.f32.gmra.mrb[174].mxu1 %v5410_v55 }
 0xb07   :  { %5861 = vmatprep.mubr.f32.mxu1 %v5415_v53 }
 0xb0a   :  { %5862 = vmatmul.mubr.f32.gmra.mrb[176].mxu1 %v5414_v18 }
 0xb0b   :  { %5867 = vmatprep.mubr.f32.mxu1 %v5419_v9 }
 0xb0e   :  { %5868 = vmatmul.mubr.f32.gmra.mrb[178].mxu1 %v5418_v44 }
 0xb0f   :  { %5873 = vmatprep.mubr.f32.mxu1 %v5423_v29 }
 0xb12   :  { %5874 = vmatmul.mubr.f32.gmra.mrb[180].mxu1 %v5422_v24 }
 0xb13   :  { %5879 = vmatprep.mubr.f32.mxu1 %v5427_v49 }
 0xb16   :  { %5880 = vmatmul.mubr.f32.gmra.mrb[182].mxu1 %v5426_v35 }
 0xb17   :  { %5885 = vmatprep.mubr.f32.mxu1 %v5431_v37 }
 0xb1a   :  { %5886 = vmatmul.mubr.f32.gmra.mrb[184].mxu1 %v5430_v3 }
 0xb1b   :  { %5891 = vmatprep.mubr.f32.mxu1 %v5435_v41 }
 0xb1e   :  { %5892 = vmatmul.mubr.f32.gmra.mrb[186].mxu1 %v5434_v61 }
 0xbb5   :  { %v5803_v42 = vpop.f32.mrb[156].mxu1 }
 0xbb6   :  { %v7182_v5 = vadd.f32 %v5803_v42, %v11681_v28  ;;  %v5805_v17 = vpop.f32.mrb[157].mxu1 }
 0xbb7   :  { %v7183_v48 = vadd.f32 %v5805_v17, %v11684_v34 }
 0xbb8   :  { %7490 = vtanh.f32 %v7182_v5 }
 0xbb9   :  { %7492 = vtanh.f32 %v7183_v48  ;;  %v5809_v38 = vpop.f32.mrb[158].mxu1 }
 0xbba   :  { %v7184_v6 = vadd.f32 %v5809_v38, %v11681_v28  ;;  %v5811_v33 = vpop.f32.mrb[159].mxu1 }
 0xbbb   :  { %v7185_v15 = vadd.f32 %v5811_v33, %v11684_v34 }
 0xbbc   :  { %7494 = vtanh.f32 %v7184_v6 }
 0xbbd   :  { %7496 = vtanh.f32 %v7185_v15  ;;  %v5815_v32 = vpop.f32.mrb[160].mxu1 }
 0xbbe   :  { %v7186_v0 = vadd.f32 %v5815_v32, %v11681_v28  ;;  %v5817_v57 = vpop.f32.mrb[161].mxu1 }
 0xbbf   :  { %v7187_v50 = vadd.f32 %v5817_v57, %v11684_v34 }
 0xbc0   :  { %7498 = vtanh.f32 %v7186_v0 }
 0xbc1   :  { %7500 = vtanh.f32 %v7187_v50  ;;  %v5821_v1 = vpop.f32.mrb[162].mxu1 }
 0xbc2   :  { %v7491_v31 = vpop.eup %7490  ;;  %v7188_v46 = vadd.f32 %v5821_v1, %v11681_v28  ;;  %v5823_v22 = vpop.f32.mrb[163].mxu1 }
 0xbc3   :  { %v7493_v21 = vpop.eup %7492  ;;  %5930 = vst [vmem:[%s11849_s19] sm:$0xff] %v7491_v31  ;;  %v7189_v63 = vadd.f32 %v5823_v22, %v11684_v34 }
 0xbc4   :  { %5931 = vst.msk [vmem:[%s11849_s19 + $0x8] sm:$0xff] %vm2156_vm1, %v7493_v21  ;;  %7502 = vtanh.f32 %v7188_v46 }
 0xbc5   :  { %7504 = vtanh.f32 %v7189_v63  ;;  %v5827_v14 = vpop.f32.mrb[164].mxu1 }
 0xbc6   :  { %v7495_v51 = vpop.eup %7494  ;;  %v7190_v25 = vadd.f32 %v5827_v14, %v11681_v28  ;;  %v5829_v45 = vpop.f32.mrb[165].mxu1 }
 0xbc7   :  { %v7497_v56 = vpop.eup %7496  ;;  %5932 = vst [vmem:[%s11849_s19 + $0x10] sm:$0xff] %v7495_v51  ;;  %v7191_v20 = vadd.f32 %v5829_v45, %v11684_v34 }
 0xbc8   :  { %5933 = vst.msk [vmem:[%s11849_s19 + $0x18] sm:$0xff] %vm2156_vm1, %v7497_v56  ;;  %7506 = vtanh.f32 %v7190_v25 }
 0xbc9   :  { %7508 = vtanh.f32 %v7191_v20  ;;  %v5833_v54 = vpop.f32.mrb[166].mxu1 }
 0xbca   :  { %v7499_v13 = vpop.eup %7498  ;;  %v7192_v10 = vadd.f32 %v5833_v54, %v11681_v28  ;;  %v5835_v7 = vpop.f32.mrb[167].mxu1 }
 0xbcb   :  { %v7501_v59 = vpop.eup %7500  ;;  %5934 = vst [vmem:[%s11849_s19 + $0x20] sm:$0xff] %v7499_v13  ;;  %v7193_v19 = vadd.f32 %v5835_v7, %v11684_v34 }
 0xbcc   :  { %5935 = vst.msk [vmem:[%s11849_s19 + $0x28] sm:$0xff] %vm2156_vm1, %v7501_v59  ;;  %7510 = vtanh.f32 %v7192_v10 }
 0xbcd   :  { %7512 = vtanh.f32 %v7193_v19  ;;  %v5839_v12 = vpop.f32.mrb[168].mxu1 }
 0xbce   :  { %v7503_v30 = vpop.eup %7502  ;;  %v7194_v52 = vadd.f32 %v5839_v12, %v11681_v28  ;;  %v5841_v40 = vpop.f32.mrb[169].mxu1 }
 0xbcf   :  { %v7505_v36 = vpop.eup %7504  ;;  %5936 = vst [vmem:[%s11849_s19 + $0x30] sm:$0xff] %v7503_v30  ;;  %v7195_v4 = vadd.f32 %v5841_v40, %v11684_v34 }
 0xbd0   :  { %5937 = vst.msk [vmem:[%s11849_s19 + $0x38] sm:$0xff] %vm2156_vm1, %v7505_v36  ;;  %7514 = vtanh.f32 %v7194_v52 }
 0xbd1   :  { %7516 = vtanh.f32 %v7195_v4  ;;  %v5845_v23 = vpop.f32.mrb[170].mxu1 }
 0xbd2   :  { %v7507_v11 = vpop.eup %7506  ;;  %v7196_v47 = vadd.f32 %v5845_v23, %v11681_v28  ;;  %v5847_v58 = vpop.f32.mrb[171].mxu1 }
 0xbd3   :  { %v7509_v16 = vpop.eup %7508  ;;  %5938 = vst [vmem:[%s11849_s19 + $0x40] sm:$0xff] %v7507_v11  ;;  %v7197_v2 = vadd.f32 %v5847_v58, %v11684_v34 }
 0xbd4   :  { %5939 = vst.msk [vmem:[%s11849_s19 + $0x48] sm:$0xff] %vm2156_vm1, %v7509_v16  ;;  %7518 = vtanh.f32 %v7196_v47 }
 0xbd5   :  { %7520 = vtanh.f32 %v7197_v2  ;;  %v5851_v39 = vpop.f32.mrb[172].mxu1 }
 0xbd6   :  { %v7511_v8 = vpop.eup %7510  ;;  %v7198_v62 = vadd.f32 %v5851_v39, %v11681_v28  ;;  %v5853_v55 = vpop.f32.mrb[173].mxu1 }
 0xbd7   :  { %v7513_v60 = vpop.eup %7512  ;;  %5940 = vst [vmem:[%s11849_s19 + $0x50] sm:$0xff] %v7511_v8  ;;  %v7199_v53 = vadd.f32 %v5853_v55, %v11684_v34 }
 0xbd8   :  { %5941 = vst.msk [vmem:[%s11849_s19 + $0x58] sm:$0xff] %vm2156_vm1, %v7513_v60  ;;  %7522 = vtanh.f32 %v7198_v62 }
 0xbd9   :  { %7524 = vtanh.f32 %v7199_v53  ;;  %v5857_v18 = vpop.f32.mrb[174].mxu1 }
 0xbda   :  { %v7515_v9 = vpop.eup %7514  ;;  %v7200_v44 = vadd.f32 %v5857_v18, %v11681_v28  ;;  %v5859_v29 = vpop.f32.mrb[175].mxu1 }
 0xbdb   :  { %v7517_v24 = vpop.eup %7516  ;;  %5942 = vst [vmem:[%s11849_s19 + $0x60] sm:$0xff] %v7515_v9  ;;  %v7201_v49 = vadd.f32 %v5859_v29, %v11684_v34 }
 0xbdc   :  { %5943 = vst.msk [vmem:[%s11849_s19 + $0x68] sm:$0xff] %vm2156_vm1, %v7517_v24  ;;  %7526 = vtanh.f32 %v7200_v44 }
 0xbdd   :  { %7528 = vtanh.f32 %v7201_v49  ;;  %v5863_v35 = vpop.f32.mrb[176].mxu1 }
 0xbde   :  { %v7519_v37 = vpop.eup %7518  ;;  %v7202_v3 = vadd.f32 %v5863_v35, %v11681_v28  ;;  %v5865_v41 = vpop.f32.mrb[177].mxu1 }
 0xbdf   :  { %v7521_v61 = vpop.eup %7520  ;;  %5944 = vst [vmem:[%s11849_s19 + $0x70] sm:$0xff] %v7519_v37  ;;  %v7203_v43 = vadd.f32 %v5865_v41, %v11684_v34 }
 0xbe0   :  { %5945 = vst.msk [vmem:[%s11849_s19 + $0x78] sm:$0xff] %vm2156_vm1, %v7521_v61  ;;  %7530 = vtanh.f32 %v7202_v3 }
 0xbe1   :  { %7532 = vtanh.f32 %v7203_v43  ;;  %v5869_v26 = vpop.f32.mrb[178].mxu1 }
 0xbe2   :  { %v7523_v27 = vpop.eup %7522  ;;  %v7204_v42 = vadd.f32 %v5869_v26, %v11681_v28  ;;  %v5871_v5 = vpop.f32.mrb[179].mxu1 }
 0xbe3   :  { %v7525_v17 = vpop.eup %7524  ;;  %5946 = vst [vmem:[%s11849_s19 + $0x80] sm:$0xff] %v7523_v27  ;;  %v7205_v48 = vadd.f32 %v5871_v5, %v11684_v34 }
 0xbe4   :  { %5947 = vst.msk [vmem:[%s11849_s19 + $0x88] sm:$0xff] %vm2156_vm1, %v7525_v17  ;;  %7534 = vtanh.f32 %v7204_v42 }
 0xbe5   :  { %7536 = vtanh.f32 %v7205_v48  ;;  %v5875_v38 = vpop.f32.mrb[180].mxu1 }
 0xbe6   :  { %v7527_v6 = vpop.eup %7526  ;;  %v7206_v33 = vadd.f32 %v5875_v38, %v11681_v28  ;;  %v5877_v15 = vpop.f32.mrb[181].mxu1 }
 0xbe7   :  { %v7529_v32 = vpop.eup %7528  ;;  %5948 = vst [vmem:[%s11849_s19 + $0x90] sm:$0xff] %v7527_v6  ;;  %v7207_v0 = vadd.f32 %v5877_v15, %v11684_v34 }
 0xbe8   :  { %5949 = vst.msk [vmem:[%s11849_s19 + $0x98] sm:$0xff] %vm2156_vm1, %v7529_v32  ;;  %7538 = vtanh.f32 %v7206_v33 }
 0xbe9   :  { %7540 = vtanh.f32 %v7207_v0  ;;  %v5881_v57 = vpop.f32.mrb[182].mxu1 }
 0xbea   :  { %v7531_v50 = vpop.eup %7530  ;;  %v7208_v1 = vadd.f32 %v5881_v57, %v11681_v28  ;;  %v5883_v31 = vpop.f32.mrb[183].mxu1 }
 0xbeb   :  { %v7533_v46 = vpop.eup %7532  ;;  %5950 = vst [vmem:[%s11849_s19 + $0xa0] sm:$0xff] %v7531_v50  ;;  %v7209_v22 = vadd.f32 %v5883_v31, %v11684_v34 }
 0xbec   :  { %5951 = vst.msk [vmem:[%s11849_s19 + $0xa8] sm:$0xff] %vm2156_vm1, %v7533_v46  ;;  %7542 = vtanh.f32 %v7208_v1 }
 0xbed   :  { %7544 = vtanh.f32 %v7209_v22  ;;  %v5887_v21 = vpop.f32.mrb[184].mxu1 }
 0xbee   :  { %v7535_v63 = vpop.eup %7534  ;;  %v7210_v14 = vadd.f32 %v5887_v21, %v11681_v28  ;;  %v5889_v51 = vpop.f32.mrb[185].mxu1 }
 0xbef   :  { %v7537_v25 = vpop.eup %7536  ;;  %5952 = vst [vmem:[%s11849_s19 + $0xb0] sm:$0xff] %v7535_v63  ;;  %v7211_v45 = vadd.f32 %v5889_v51, %v11684_v34 }
 0xbf0   :  { %5953 = vst.msk [vmem:[%s11849_s19 + $0xb8] sm:$0xff] %vm2156_vm1, %v7537_v25  ;;  %7546 = vtanh.f32 %v7210_v14 }
 0xbf1   :  { %7548 = vtanh.f32 %v7211_v45  ;;  %v5893_v56 = vpop.f32.mrb[186].mxu1 }
 0xbf2   :  { %v7539_v20 = vpop.eup %7538  ;;  %v7212_v54 = vadd.f32 %v5893_v56, %v11681_v28  ;;  %v5895_v13 = vpop.f32.mrb[187].mxu1 }
 0xbf3   :  { %v7541_v10 = vpop.eup %7540  ;;  %5954 = vst [vmem:[%s11849_s19 + $0xc0] sm:$0xff] %v7539_v20  ;;  %v7213_v7 = vadd.f32 %v5895_v13, %v11684_v34 }
 0xbf4   :  { %5955 = vst.msk [vmem:[%s11849_s19 + $0xc8] sm:$0xff] %vm2156_vm1, %v7541_v10  ;;  %7550 = vtanh.f32 %v7212_v54 }
 0xbf5   :  { %7552 = vtanh.f32 %v7213_v7 }
 0xbf6   :  { %v7543_v59 = vpop.eup %7542 }
 0xbf7   :  { %v7545_v19 = vpop.eup %7544  ;;  %5956 = vst [vmem:[%s11849_s19 + $0xd0] sm:$0xff] %v7543_v59 }
 0xbf8   :  { %5957 = vst.msk [vmem:[%s11849_s19 + $0xd8] sm:$0xff] %vm2156_vm1, %v7545_v19 }
 0xbfa   :  { %v7547_v28 = vpop.eup %7546 }
 0xbfb   :  { %v7549_v34 = vpop.eup %7548  ;;  %5958 = vst [vmem:[%s11849_s19 + $0xe0] sm:$0xff] %v7547_v28 }
 0xbfc   :  { %5959 = vst.msk [vmem:[%s11849_s19 + $0xe8] sm:$0xff] %vm2156_vm1, %v7549_v34 }
 0xbfe   :  { %v7551_v12 = vpop.eup %7550 }
 0xbff   :  { %v7553_v30 = vpop.eup %7552  ;;  %5960 = vst [vmem:[%s11849_s19 + $0xf0] sm:$0xff] %v7551_v12 }
 0xc00   :  { %5961 = vst.msk [vmem:[%s11849_s19 + $0xf8] sm:$0xff] %vm2156_vm1, %v7553_v30 }
 0xc01   :  { %5966 = vsyncpa [#allocation4], 1 }
 0xc02   :  { %5967 = vsyncpa [#allocation6], 1 }
 0xc03   :  { %5968 = vsyncpa [#allocation9], 1 }
 0xc04   :  { %5969 = vsyncpa [#allocation12], 1 }
 0xc05   :  { %5970 = vsyncpa [#allocation15], 1 }
 0xc06   :  { %5971 = vsyncpa [#allocation18], 1 }
 0xc07   :  { %5972 = vsyncpa [#allocation21], 1 }
 0xc08   :  { %5973 = vsyncpa [#allocation24], 1 }

</bundles_post_ra>
